<compile_context>
chip_gen: v7x
topology: tpu7x:2x2x1
jax: 0.10.0
libtpu: 0.0.40
codegen_flags: <defaults>
</compile_context>

<pallas_src>
import functools

import numpy as np

import jax
import jax.numpy as jnp
from jax import lax
from jax.experimental import pallas as pl
from jax.experimental.pallas import tpu as pltpu

C_PAD = 128    # lane-dense channel padding used everywhere
B_TILE = 8     # images per grid step (sublane axis of the activation layout)


# ---------------------------------------------------------------------------
# Pallas kernel: whole discriminator forward for B_TILE images per grid step.
# ---------------------------------------------------------------------------
def _fused_disc_kernel(x_ref, w1_ref, w2_ref, w3_ref, w4_ref,
                       bias_ref, scale_ref, shift_ref,
                       wh_ref, bh_ref, out_ref, *, n_classes, spatial):
    w_refs = (w1_ref, w2_ref, w3_ref, w4_ref)
    bias_all = bias_ref[...]     # (4, 128) f32
    scale_all = scale_ref[...]   # (4, 128) f32
    shift_all = shift_ref[...]   # (4, 128) f32

    act = x_ref[...]             # (H, W, B, 128) f32, stays resident in VMEM
    b = act.shape[2]

    # ---- 4 x [Conv(3x3,s2,p1) -> LeakyReLU(0.2) -> Dropout -> (BN)] --------
    for l in range(4):
        h, w = spatial[l]
        oh, ow = h // 2, w // 2
        m = oh * ow * b

        # Even/odd row & column phases: reshape + static index on leading dims
        # only (last two dims (B, C) untouched) -> free, no gather matmul.
        x6 = act.reshape(oh, 2, ow, 2, b, C_PAD)
        phase = {(rp, cp): x6[:, rp, :, cp] for rp in (0, 1) for cp in (0, 1)}

        def shift_rows_down(p, _oh=oh):
            # out[r] = p[r-1], out[0] = 0  (zero padding row at the top)
            if _oh == 1:
                return jnp.zeros_like(p)
            return jnp.concatenate([jnp.zeros_like(p[:1]), p[:-1]], axis=0)

        def shift_cols_right(p, _ow=ow):
            # out[:, c] = p[:, c-1], out[:, 0] = 0  (zero padding col on left)
            if _ow == 1:
                return jnp.zeros_like(p)
            return jnp.concatenate([jnp.zeros_like(p[:, :1]), p[:, :-1]],
                                   axis=1)

        # Gather the 9 taps and fuse them along K so the whole conv layer is
        # ONE MXU dot with K = 9*128.
        taps = []
        for kh in range(3):
            for kw in range(3):
                g = phase[(0 if kh == 1 else 1, 0 if kw == 1 else 1)]
                if kh == 0:
                    g = shift_rows_down(g)
                if kw == 0:
                    g = shift_cols_right(g)
                taps.append(g.reshape(m, C_PAD))
        g_all = jnp.concatenate(taps, axis=-1).astype(jnp.bfloat16)  # (m, 1152)

        acc = jnp.dot(g_all, w_refs[l][...],
                      preferred_element_type=jnp.float32)            # (m, 128)

        y = acc + bias_all[l:l + 1, :]
        y = jnp.where(y > 0, y, 0.2 * y)                  # LeakyReLU(0.2)
        # TODO(synk): Dropout2d(0.25) is identity in eval mode; no RNG drop.
        y = y * scale_all[l:l + 1, :] + shift_all[l:l + 1, :]   # folded eval BN
        act = y.reshape(oh, ow, b, C_PAD)                 # f32 between layers

    # ---- fused heads: one dot; sigmoid col 0, softmax cols 1..n_classes -----
    dsh, dsw = spatial[3][0] // 2, spatial[3][1] // 2
    n_pos = dsh * dsw
    act_flat = act.reshape(n_pos, b, C_PAD)
    feats = jnp.concatenate([act_flat[p] for p in range(n_pos)], axis=-1)
    logits = jnp.dot(feats.astype(jnp.bfloat16), wh_ref[...],
                     preferred_element_type=jnp.float32) + bh_ref[...]  # (B,128)

    col = lax.broadcasted_iota(jnp.int32, (b, C_PAD), 1)
    sig = 1.0 / (1.0 + jnp.exp(-logits))                   # exact sigmoid
    cls_mask = (col >= 1) & (col < 1 + n_classes)
    masked = jnp.where(cls_mask, logits, -1e30)
    mx = jnp.max(masked, axis=-1, keepdims=True)
    e = jnp.where(cls_mask, jnp.exp(masked - mx), 0.0)
    probs = e / jnp.sum(e, axis=-1, keepdims=True)         # exact softmax

    out_ref[...] = jnp.where(col == 0, sig, probs)         # (B, 128) lane-dense


# ---------------------------------------------------------------------------
# Host-side parameter construction
# ---------------------------------------------------------------------------
def init_params(key, channels, img_size, n_classes):
    assert channels <= C_PAD and 1 + n_classes <= C_PAD
    assert img_size % 16 == 0
    bn_eps = 0.8
    chans = [channels, 16, 32, 64, 128]
    use_bn = [False, True, True, True]

    w_taps = []
    bias = np.zeros((4, C_PAD), np.float32)
    scale = np.ones((4, C_PAD), np.float32)
    shift = np.zeros((4, C_PAD), np.float32)

    for i in range(4):
        ic, oc = chans[i], chans[i + 1]
        key, kcw, kcb, kg, kbe, km, kv = jax.random.split(key, 7)
        fan_in = ic * 9
        wconv = jax.random.normal(kcw, (oc, ic, 3, 3), jnp.float32) / np.sqrt(fan_in)
        bconv = 0.05 * jax.random.normal(kcb, (oc,), jnp.float32)
        if use_bn[i]:
            gamma = 1.0 + 0.1 * jax.random.normal(kg, (oc,), jnp.float32)
            beta = 0.1 * jax.random.normal(kbe, (oc,), jnp.float32)
            r_mean = 0.1 * jax.random.normal(km, (oc,), jnp.float32)
            r_var = 1.0 + 0.1 * jax.random.uniform(kv, (oc,), jnp.float32)
            sc = gamma / jnp.sqrt(r_var + bn_eps)
            sh = beta - r_mean * sc
        else:
            sc = jnp.ones((oc,), jnp.float32)
            sh = jnp.zeros((oc,), jnp.float32)

        # tap-major conv weight: rows (tap t = kh*3+kw, padded ic) -> (9*128, 128)
        wt = jnp.transpose(wconv, (2, 3, 1, 0)).reshape(9, ic, oc)
        wt = jnp.pad(wt, ((0, 0), (0, C_PAD - ic), (0, C_PAD - oc)))
        w_taps.append(wt.reshape(9 * C_PAD, C_PAD).astype(jnp.bfloat16))

        bias[i, :oc] = np.asarray(bconv)
        scale[i, :oc] = np.asarray(sc)
        shift[i, :oc] = np.asarray(sh)

    # ---- fused + row-permuted head parameters -------------------------------
    ds = img_size // 2 ** 4
    n_pos = ds * ds
    feat_dim = 128 * n_pos
    key, ka, kab, kx, kxb = jax.random.split(key, 5)
    w_adv = jax.random.normal(ka, (feat_dim, 1), jnp.float32) / np.sqrt(feat_dim)
    b_adv = 0.05 * jax.random.normal(kab, (1,), jnp.float32)
    w_aux = jax.random.normal(kx, (feat_dim, n_classes), jnp.float32) / np.sqrt(feat_dim)
    b_aux = 0.05 * jax.random.normal(kxb, (n_classes,), jnp.float32)

    # columns: [0]=adv, [1..n_classes]=aux.  Rows re-ordered from the PyTorch
    # NCHW flatten index (c*P + p) to our (spatial p, channel c) layout.
    w_cat = jnp.concatenate([w_adv, w_aux], axis=1)            # (128*P, 1+nc)
    w_cat = w_cat.reshape(C_PAD, n_pos, 1 + n_classes).transpose(1, 0, 2)
    w_head = jnp.pad(w_cat, ((0, 0), (0, 0), (0, C_PAD - 1 - n_classes)))
    w_head = w_head.reshape(n_pos * C_PAD, C_PAD).astype(jnp.bfloat16)
    b_head = jnp.zeros((1, C_PAD), jnp.float32)
    b_head = b_head.at[0, 0].set(b_adv[0]).at[0, 1:1 + n_classes].set(b_aux)

    return {
        "w_taps": w_taps,                       # 4 x (9*128, 128) bf16
        "bias": jnp.asarray(bias),              # (4, 128) f32
        "scale": jnp.asarray(scale),            # (4, 128) f32
        "shift": jnp.asarray(shift),            # (4, 128) f32
        "w_head": w_head,                       # (P*128, 128) bf16
        "b_head": b_head,                       # (1, 128) f32
    }


# ---------------------------------------------------------------------------
# Forward wrapper (single fused pallas_call, grid over batch tiles of 8)
# ---------------------------------------------------------------------------
def discriminator_forward(img_nchw, params, *, n_classes, b_tile=B_TILE):
    n, c, h, w = img_nchw.shape
    assert h % 16 == 0 and w % 16 == 0
    n_tiles = -(-n // b_tile)
    n_pad = n_tiles * b_tile

    # NCHW -> (H, W, N, C): spatial dims leading, batch on sublanes, channels
    # on lanes (zero-padded to 128).  Same layout is kept for all activations.
    x = jnp.transpose(img_nchw, (2, 3, 0, 1)).astype(jnp.float32)
    x = jnp.pad(x, ((0, 0), (0, 0), (0, n_pad - n), (0, C_PAD - c)))

    spatial = []
    hh, ww = h, w
    for _ in range(4):
        spatial.append((hh, ww))
        hh //= 2
        ww //= 2
    n_pos = hh * ww

    w1, w2, w3, w4 = params["w_taps"]
    shared = (w1, w2, w3, w4, params["bias"], params["scale"], params["shift"],
              params["w_head"], params["b_head"])

    # Constant operands: block == whole array, block index never changes, so
    # Pallas DMAs them once.  (Buffered(1) would halve their buffers, but they
    # total ~1.3 MB here, so default double-buffering is kept for robustness.)
    def full(arr):
        return pl.BlockSpec(arr.shape, lambda i, _nd=arr.ndim: (0,) * _nd)

    in_specs = [pl.BlockSpec((h, w, b_tile, C_PAD), lambda i: (0, 0, i, 0))]
    in_specs += [full(a) for a in shared]
    out_spec = pl.BlockSpec((b_tile, C_PAD), lambda i: (i, 0))

    # Rough cost hint for the XLA scheduler.
    flops = 0
    for hh_, ww_ in spatial:
        flops += 2 * ((hh_ // 2) * (ww_ // 2) * b_tile) * (9 * C_PAD) * C_PAD
    flops += 2 * b_tile * (n_pos * C_PAD) * C_PAD
    flops *= n_tiles
    bytes_accessed = (int(x.size) * 4
                      + sum(int(a.size) * a.dtype.itemsize for a in shared)
                      + n_pad * C_PAD * 4)

    head_out = pl.pallas_call(
        functools.partial(_fused_disc_kernel, n_classes=n_classes,
                          spatial=tuple(spatial)),
        out_shape=jax.ShapeDtypeStruct((n_pad, C_PAD), jnp.float32),
        grid=(n_tiles,),
        in_specs=in_specs,
        out_specs=out_spec,
        compiler_params=pltpu.CompilerParams(
            dimension_semantics=("parallel",)),
        cost_estimate=pl.CostEstimate(flops=flops,
                                      transcendentals=n_pad * C_PAD,
                                      bytes_accessed=bytes_accessed),
    )(x, *shared)

    validity = head_out[:n, 0:1]                  # sigmoid column
    label = head_out[:n, 1:1 + n_classes]         # softmax columns
    return validity, label


# ---------------------------------------------------------------------------
# Pure-JAX reference (same bf16 rounding points as the kernel) for validation
# ---------------------------------------------------------------------------
def reference_forward(img_nchw, params, *, n_classes):
    n, c, h, w = img_nchw.shape
    x = jnp.transpose(img_nchw, (0, 2, 3, 1)).astype(jnp.float32)      # NHWC
    x = jnp.pad(x, ((0, 0), (0, 0), (0, 0), (0, C_PAD - c)))
    for l in range(4):
        wt = params["w_taps"][l].astype(jnp.float32).reshape(9, C_PAD, C_PAD)
        oh, ow = x.shape[1] // 2, x.shape[2] // 2
        xp = jnp.pad(x, ((0, 0), (1, 1), (1, 1), (0, 0)))
        acc = jnp.zeros((n, oh, ow, C_PAD), jnp.float32)
        for kh in range(3):
            for kw in range(3):
                patch = xp[:, kh:kh + 2 * oh:2, kw:kw + 2 * ow:2, :]
                patch = patch.astype(jnp.bfloat16).astype(jnp.float32)
                acc = acc + jnp.einsum("nhwc,cf->nhwf", patch, wt[kh * 3 + kw])
        y = acc + params["bias"][l]
        y = jnp.where(y > 0, y, 0.2 * y)
        y = y * params["scale"][l] + params["shift"][l]
        x = y
    feats = x.reshape(n, -1)                                           # (n, P*128)
    wh = params["w_head"].astype(jnp.float32)
    logits = feats.astype(jnp.bfloat16).astype(jnp.float32) @ wh + params["b_head"][0]
    validity = jax.nn.sigmoid(logits[:, 0:1])
    label = jax.nn.softmax(logits[:, 1:1 + n_classes], axis=-1)
    return validity, label


# ---------------------------------------------------------------------------
if __name__ == "__main__":
    # batch=16 -> 2 grid programs of 8 images each (even count feeds both
    # v7x TensorCores under "parallel" semantics).
    batch, channels, img_size, n_classes = 16, 4, 16, 5

    key = jax.random.PRNGKey(0)
    k_img, k_par = jax.random.split(key)
    img = jax.random.normal(k_img, (batch, channels, img_size, img_size),
                            jnp.float32)
    params = init_params(k_par, channels, img_size, n_classes)

    fwd = jax.jit(functools.partial(discriminator_forward, n_classes=n_classes))
    validity, label = fwd(img, params)
    jax.block_until_ready((validity, label))

    assert validity.shape == (batch, 1)
    assert label.shape == (batch, n_classes)

    v_ref, l_ref = reference_forward(img, params, n_classes=n_classes)
    np.testing.assert_allclose(np.asarray(validity), np.asarray(v_ref),
                               atol=5e-3, rtol=0)
    np.testing.assert_allclose(np.asarray(label), np.asarray(l_ref),
                               atol=5e-3, rtol=0)
    assert np.all(np.isfinite(np.asarray(validity)))
    assert float(np.abs(np.asarray(label).sum(-1) - 1.0).max()) < 1e-3

    print("KERNEL_OK")
</pallas_src>

<mosaic_0001>
module attributes {stable_mosaic.version = 11 : i64} {
  func.func @_fused_disc_kernel(%arg0: i32, %arg1: memref<16x16x8x128xf32, #tpu.memory_space<vmem>>, %arg2: memref<1152x128xbf16, #tpu.memory_space<vmem>>, %arg3: memref<1152x128xbf16, #tpu.memory_space<vmem>>, %arg4: memref<1152x128xbf16, #tpu.memory_space<vmem>>, %arg5: memref<1152x128xbf16, #tpu.memory_space<vmem>>, %arg6: memref<4x128xf32, #tpu.memory_space<vmem>>, %arg7: memref<4x128xf32, #tpu.memory_space<vmem>>, %arg8: memref<4x128xf32, #tpu.memory_space<vmem>>, %arg9: memref<128x128xbf16, #tpu.memory_space<vmem>>, %arg10: memref<1x128xf32, #tpu.memory_space<vmem>>, %arg11: memref<8x128xf32, #tpu.memory_space<vmem>>) attributes {dimension_semantics = [#tpu.dimension_semantics<parallel>], iteration_bounds = array<i64: 2>, scalar_prefetch = 0 : i64, scratch_operands = 0 : i64, tpu.core_type = #tpu.core_type<tc>, window_params = [{transform_indices = @transform_0, window_bounds = array<i64: 16, 16, 8, 128>}, {pipeline_mode = #tpu.pipeline_mode<synchronous>, transform_indices = @transform_1, window_bounds = array<i64: 1152, 128>}, {pipeline_mode = #tpu.pipeline_mode<synchronous>, transform_indices = @transform_2, window_bounds = array<i64: 1152, 128>}, {pipeline_mode = #tpu.pipeline_mode<synchronous>, transform_indices = @transform_3, window_bounds = array<i64: 1152, 128>}, {pipeline_mode = #tpu.pipeline_mode<synchronous>, transform_indices = @transform_4, window_bounds = array<i64: 1152, 128>}, {pipeline_mode = #tpu.pipeline_mode<synchronous>, transform_indices = @transform_5, window_bounds = array<i64: 4, 128>}, {pipeline_mode = #tpu.pipeline_mode<synchronous>, transform_indices = @transform_6, window_bounds = array<i64: 4, 128>}, {pipeline_mode = #tpu.pipeline_mode<synchronous>, transform_indices = @transform_7, window_bounds = array<i64: 4, 128>}, {pipeline_mode = #tpu.pipeline_mode<synchronous>, transform_indices = @transform_8, window_bounds = array<i64: 128, 128>}, {pipeline_mode = #tpu.pipeline_mode<synchronous>, transform_indices = @transform_9, window_bounds = array<i64: 1, 128>}, {transform_indices = @transform_10, window_bounds = array<i64: 8, 128>}]} {
    %c0 = arith.constant 0 : index
    %c0_0 = arith.constant 0 : index
    %0 = vector.load %arg6[%c0, %c0_0] : memref<4x128xf32, #tpu.memory_space<vmem>>, vector<4x128xf32>
    %c0_1 = arith.constant 0 : index
    %c0_2 = arith.constant 0 : index
    %1 = vector.load %arg7[%c0_1, %c0_2] : memref<4x128xf32, #tpu.memory_space<vmem>>, vector<4x128xf32>
    %c0_3 = arith.constant 0 : index
    %c0_4 = arith.constant 0 : index
    %2 = vector.load %arg8[%c0_3, %c0_4] : memref<4x128xf32, #tpu.memory_space<vmem>>, vector<4x128xf32>
    %c0_5 = arith.constant 0 : index
    %c0_6 = arith.constant 0 : index
    %c0_7 = arith.constant 0 : index
    %c0_8 = arith.constant 0 : index
    %3 = vector.load %arg1[%c0_5, %c0_6, %c0_7, %c0_8] : memref<16x16x8x128xf32, #tpu.memory_space<vmem>>, vector<16x16x8x128xf32>
    %4 = vector.shape_cast %3 : vector<16x16x8x128xf32> to vector<8x2x8x2x8x128xf32>
    %5 = vector.extract_strided_slice %4 {offsets = [0, 0, 0, 0, 0, 0], sizes = [8, 1, 8, 1, 8, 128], strides = [1, 1, 1, 1, 1, 1]} : vector<8x2x8x2x8x128xf32> to vector<8x1x8x1x8x128xf32>
    %6 = vector.shape_cast %5 : vector<8x1x8x1x8x128xf32> to vector<8x8x8x128xf32>
    %7 = vector.extract_strided_slice %4 {offsets = [0, 0, 0, 1, 0, 0], sizes = [8, 1, 8, 1, 8, 128], strides = [1, 1, 1, 1, 1, 1]} : vector<8x2x8x2x8x128xf32> to vector<8x1x8x1x8x128xf32>
    %8 = vector.shape_cast %7 : vector<8x1x8x1x8x128xf32> to vector<8x8x8x128xf32>
    %9 = vector.extract_strided_slice %4 {offsets = [0, 1, 0, 0, 0, 0], sizes = [8, 1, 8, 1, 8, 128], strides = [1, 1, 1, 1, 1, 1]} : vector<8x2x8x2x8x128xf32> to vector<8x1x8x1x8x128xf32>
    %10 = vector.shape_cast %9 : vector<8x1x8x1x8x128xf32> to vector<8x8x8x128xf32>
    %11 = vector.extract_strided_slice %4 {offsets = [0, 1, 0, 1, 0, 0], sizes = [8, 1, 8, 1, 8, 128], strides = [1, 1, 1, 1, 1, 1]} : vector<8x2x8x2x8x128xf32> to vector<8x1x8x1x8x128xf32>
    %12 = vector.shape_cast %11 : vector<8x1x8x1x8x128xf32> to vector<8x8x8x128xf32>
    %cst = arith.constant 0.000000e+00 : f32
    %13 = vector.broadcast %cst : f32 to vector<1x8x8x128xf32>
    %14 = vector.extract_strided_slice %12 {offsets = [0, 0, 0, 0], sizes = [7, 8, 8, 128], strides = [1, 1, 1, 1]} : vector<8x8x8x128xf32> to vector<7x8x8x128xf32>
    %15 = tpu.concatenate %13, %14 in 0 : vector<1x8x8x128xf32>, vector<7x8x8x128xf32> -> vector<8x8x8x128xf32>
    %cst_9 = arith.constant 0.000000e+00 : f32
    %16 = vector.broadcast %cst_9 : f32 to vector<8x1x8x128xf32>
    %17 = vector.extract_strided_slice %15 {offsets = [0, 0, 0, 0], sizes = [8, 7, 8, 128], strides = [1, 1, 1, 1]} : vector<8x8x8x128xf32> to vector<8x7x8x128xf32>
    %18 = tpu.concatenate %16, %17 in 1 : vector<8x1x8x128xf32>, vector<8x7x8x128xf32> -> vector<8x8x8x128xf32>
    %19 = vector.shape_cast %18 : vector<8x8x8x128xf32> to vector<512x128xf32>
    %cst_10 = arith.constant 0.000000e+00 : f32
    %20 = vector.broadcast %cst_10 : f32 to vector<1x8x8x128xf32>
    %21 = vector.extract_strided_slice %10 {offsets = [0, 0, 0, 0], sizes = [7, 8, 8, 128], strides = [1, 1, 1, 1]} : vector<8x8x8x128xf32> to vector<7x8x8x128xf32>
    %22 = tpu.concatenate %20, %21 in 0 : vector<1x8x8x128xf32>, vector<7x8x8x128xf32> -> vector<8x8x8x128xf32>
    %23 = vector.shape_cast %22 : vector<8x8x8x128xf32> to vector<512x128xf32>
    %cst_11 = arith.constant 0.000000e+00 : f32
    %24 = vector.broadcast %cst_11 : f32 to vector<1x8x8x128xf32>
    %25 = vector.extract_strided_slice %12 {offsets = [0, 0, 0, 0], sizes = [7, 8, 8, 128], strides = [1, 1, 1, 1]} : vector<8x8x8x128xf32> to vector<7x8x8x128xf32>
    %26 = tpu.concatenate %24, %25 in 0 : vector<1x8x8x128xf32>, vector<7x8x8x128xf32> -> vector<8x8x8x128xf32>
    %27 = vector.shape_cast %26 : vector<8x8x8x128xf32> to vector<512x128xf32>
    %cst_12 = arith.constant 0.000000e+00 : f32
    %28 = vector.broadcast %cst_12 : f32 to vector<8x1x8x128xf32>
    %29 = vector.extract_strided_slice %8 {offsets = [0, 0, 0, 0], sizes = [8, 7, 8, 128], strides = [1, 1, 1, 1]} : vector<8x8x8x128xf32> to vector<8x7x8x128xf32>
    %30 = tpu.concatenate %28, %29 in 1 : vector<8x1x8x128xf32>, vector<8x7x8x128xf32> -> vector<8x8x8x128xf32>
    %31 = vector.shape_cast %30 : vector<8x8x8x128xf32> to vector<512x128xf32>
    %32 = vector.shape_cast %6 : vector<8x8x8x128xf32> to vector<512x128xf32>
    %33 = vector.shape_cast %8 : vector<8x8x8x128xf32> to vector<512x128xf32>
    %cst_13 = arith.constant 0.000000e+00 : f32
    %34 = vector.broadcast %cst_13 : f32 to vector<8x1x8x128xf32>
    %35 = vector.extract_strided_slice %12 {offsets = [0, 0, 0, 0], sizes = [8, 7, 8, 128], strides = [1, 1, 1, 1]} : vector<8x8x8x128xf32> to vector<8x7x8x128xf32>
    %36 = tpu.concatenate %34, %35 in 1 : vector<8x1x8x128xf32>, vector<8x7x8x128xf32> -> vector<8x8x8x128xf32>
    %37 = vector.shape_cast %36 : vector<8x8x8x128xf32> to vector<512x128xf32>
    %38 = vector.shape_cast %10 : vector<8x8x8x128xf32> to vector<512x128xf32>
    %39 = vector.shape_cast %12 : vector<8x8x8x128xf32> to vector<512x128xf32>
    %40 = tpu.concatenate %19, %23, %27, %31, %32, %33, %37, %38, %39 in 1 : vector<512x128xf32>, vector<512x128xf32>, vector<512x128xf32>, vector<512x128xf32>, vector<512x128xf32>, vector<512x128xf32>, vector<512x128xf32>, vector<512x128xf32>, vector<512x128xf32> -> vector<512x1152xf32>
    %41 = arith.truncf %40 : vector<512x1152xf32> to vector<512x1152xbf16>
    %c0_14 = arith.constant 0 : index
    %c0_15 = arith.constant 0 : index
    %42 = vector.load %arg2[%c0_14, %c0_15] : memref<1152x128xbf16, #tpu.memory_space<vmem>>, vector<1152x128xbf16>
    %cst_16 = arith.constant dense<0.000000e+00> : vector<512x128xf32>
    %43 = tpu.matmul %41, %42, %cst_16 {dimension_numbers = #tpu.dot_dimension_numbers<[1], [0], [0], [1], [0, 0, 1, 1], [], []>} : vector<512x1152xbf16>, vector<1152x128xbf16>, vector<512x128xf32> -> vector<512x128xf32>
    %44 = vector.extract_strided_slice %0 {offsets = [0, 0], sizes = [1, 128], strides = [1, 1]} : vector<4x128xf32> to vector<1x128xf32>
    %45 = vector.broadcast %44 : vector<1x128xf32> to vector<512x128xf32>
    %46 = arith.addf %43, %45 : vector<512x128xf32>
    %cst_17 = arith.constant 0.000000e+00 : f32
    %47 = vector.broadcast %cst_17 : f32 to vector<512x128xf32>
    %48 = arith.cmpf ogt, %46, %47 : vector<512x128xf32>
    %cst_18 = arith.constant 2.000000e-01 : f32
    %49 = vector.broadcast %cst_18 : f32 to vector<512x128xf32>
    %50 = arith.mulf %49, %46 : vector<512x128xf32>
    %51 = arith.select %48, %46, %50 : vector<512x128xi1>, vector<512x128xf32>
    %52 = vector.extract_strided_slice %1 {offsets = [0, 0], sizes = [1, 128], strides = [1, 1]} : vector<4x128xf32> to vector<1x128xf32>
    %53 = vector.broadcast %52 : vector<1x128xf32> to vector<512x128xf32>
    %54 = arith.mulf %51, %53 : vector<512x128xf32>
    %55 = vector.extract_strided_slice %2 {offsets = [0, 0], sizes = [1, 128], strides = [1, 1]} : vector<4x128xf32> to vector<1x128xf32>
    %56 = vector.broadcast %55 : vector<1x128xf32> to vector<512x128xf32>
    %57 = arith.addf %54, %56 : vector<512x128xf32>
    %58 = vector.shape_cast %57 : vector<512x128xf32> to vector<8x8x8x128xf32>
    %59 = vector.shape_cast %58 : vector<8x8x8x128xf32> to vector<4x2x4x2x8x128xf32>
    %60 = vector.extract_strided_slice %59 {offsets = [0, 0, 0, 0, 0, 0], sizes = [4, 1, 4, 1, 8, 128], strides = [1, 1, 1, 1, 1, 1]} : vector<4x2x4x2x8x128xf32> to vector<4x1x4x1x8x128xf32>
    %61 = vector.shape_cast %60 : vector<4x1x4x1x8x128xf32> to vector<4x4x8x128xf32>
    %62 = vector.extract_strided_slice %59 {offsets = [0, 0, 0, 1, 0, 0], sizes = [4, 1, 4, 1, 8, 128], strides = [1, 1, 1, 1, 1, 1]} : vector<4x2x4x2x8x128xf32> to vector<4x1x4x1x8x128xf32>
    %63 = vector.shape_cast %62 : vector<4x1x4x1x8x128xf32> to vector<4x4x8x128xf32>
    %64 = vector.extract_strided_slice %59 {offsets = [0, 1, 0, 0, 0, 0], sizes = [4, 1, 4, 1, 8, 128], strides = [1, 1, 1, 1, 1, 1]} : vector<4x2x4x2x8x128xf32> to vector<4x1x4x1x8x128xf32>
    %65 = vector.shape_cast %64 : vector<4x1x4x1x8x128xf32> to vector<4x4x8x128xf32>
    %66 = vector.extract_strided_slice %59 {offsets = [0, 1, 0, 1, 0, 0], sizes = [4, 1, 4, 1, 8, 128], strides = [1, 1, 1, 1, 1, 1]} : vector<4x2x4x2x8x128xf32> to vector<4x1x4x1x8x128xf32>
    %67 = vector.shape_cast %66 : vector<4x1x4x1x8x128xf32> to vector<4x4x8x128xf32>
    %cst_19 = arith.constant 0.000000e+00 : f32
    %68 = vector.broadcast %cst_19 : f32 to vector<1x4x8x128xf32>
    %69 = vector.extract_strided_slice %67 {offsets = [0, 0, 0, 0], sizes = [3, 4, 8, 128], strides = [1, 1, 1, 1]} : vector<4x4x8x128xf32> to vector<3x4x8x128xf32>
    %70 = tpu.concatenate %68, %69 in 0 : vector<1x4x8x128xf32>, vector<3x4x8x128xf32> -> vector<4x4x8x128xf32>
    %cst_20 = arith.constant 0.000000e+00 : f32
    %71 = vector.broadcast %cst_20 : f32 to vector<4x1x8x128xf32>
    %72 = vector.extract_strided_slice %70 {offsets = [0, 0, 0, 0], sizes = [4, 3, 8, 128], strides = [1, 1, 1, 1]} : vector<4x4x8x128xf32> to vector<4x3x8x128xf32>
    %73 = tpu.concatenate %71, %72 in 1 : vector<4x1x8x128xf32>, vector<4x3x8x128xf32> -> vector<4x4x8x128xf32>
    %74 = vector.shape_cast %73 : vector<4x4x8x128xf32> to vector<128x128xf32>
    %cst_21 = arith.constant 0.000000e+00 : f32
    %75 = vector.broadcast %cst_21 : f32 to vector<1x4x8x128xf32>
    %76 = vector.extract_strided_slice %65 {offsets = [0, 0, 0, 0], sizes = [3, 4, 8, 128], strides = [1, 1, 1, 1]} : vector<4x4x8x128xf32> to vector<3x4x8x128xf32>
    %77 = tpu.concatenate %75, %76 in 0 : vector<1x4x8x128xf32>, vector<3x4x8x128xf32> -> vector<4x4x8x128xf32>
    %78 = vector.shape_cast %77 : vector<4x4x8x128xf32> to vector<128x128xf32>
    %cst_22 = arith.constant 0.000000e+00 : f32
    %79 = vector.broadcast %cst_22 : f32 to vector<1x4x8x128xf32>
    %80 = vector.extract_strided_slice %67 {offsets = [0, 0, 0, 0], sizes = [3, 4, 8, 128], strides = [1, 1, 1, 1]} : vector<4x4x8x128xf32> to vector<3x4x8x128xf32>
    %81 = tpu.concatenate %79, %80 in 0 : vector<1x4x8x128xf32>, vector<3x4x8x128xf32> -> vector<4x4x8x128xf32>
    %82 = vector.shape_cast %81 : vector<4x4x8x128xf32> to vector<128x128xf32>
    %cst_23 = arith.constant 0.000000e+00 : f32
    %83 = vector.broadcast %cst_23 : f32 to vector<4x1x8x128xf32>
    %84 = vector.extract_strided_slice %63 {offsets = [0, 0, 0, 0], sizes = [4, 3, 8, 128], strides = [1, 1, 1, 1]} : vector<4x4x8x128xf32> to vector<4x3x8x128xf32>
    %85 = tpu.concatenate %83, %84 in 1 : vector<4x1x8x128xf32>, vector<4x3x8x128xf32> -> vector<4x4x8x128xf32>
    %86 = vector.shape_cast %85 : vector<4x4x8x128xf32> to vector<128x128xf32>
    %87 = vector.shape_cast %61 : vector<4x4x8x128xf32> to vector<128x128xf32>
    %88 = vector.shape_cast %63 : vector<4x4x8x128xf32> to vector<128x128xf32>
    %cst_24 = arith.constant 0.000000e+00 : f32
    %89 = vector.broadcast %cst_24 : f32 to vector<4x1x8x128xf32>
    %90 = vector.extract_strided_slice %67 {offsets = [0, 0, 0, 0], sizes = [4, 3, 8, 128], strides = [1, 1, 1, 1]} : vector<4x4x8x128xf32> to vector<4x3x8x128xf32>
    %91 = tpu.concatenate %89, %90 in 1 : vector<4x1x8x128xf32>, vector<4x3x8x128xf32> -> vector<4x4x8x128xf32>
    %92 = vector.shape_cast %91 : vector<4x4x8x128xf32> to vector<128x128xf32>
    %93 = vector.shape_cast %65 : vector<4x4x8x128xf32> to vector<128x128xf32>
    %94 = vector.shape_cast %67 : vector<4x4x8x128xf32> to vector<128x128xf32>
    %95 = tpu.concatenate %74, %78, %82, %86, %87, %88, %92, %93, %94 in 1 : vector<128x128xf32>, vector<128x128xf32>, vector<128x128xf32>, vector<128x128xf32>, vector<128x128xf32>, vector<128x128xf32>, vector<128x128xf32>, vector<128x128xf32>, vector<128x128xf32> -> vector<128x1152xf32>
    %96 = arith.truncf %95 : vector<128x1152xf32> to vector<128x1152xbf16>
    %c0_25 = arith.constant 0 : index
    %c0_26 = arith.constant 0 : index
    %97 = vector.load %arg3[%c0_25, %c0_26] : memref<1152x128xbf16, #tpu.memory_space<vmem>>, vector<1152x128xbf16>
    %cst_27 = arith.constant dense<0.000000e+00> : vector<128x128xf32>
    %98 = tpu.matmul %96, %97, %cst_27 {dimension_numbers = #tpu.dot_dimension_numbers<[1], [0], [0], [1], [0, 0, 1, 1], [], []>} : vector<128x1152xbf16>, vector<1152x128xbf16>, vector<128x128xf32> -> vector<128x128xf32>
    %99 = vector.extract_strided_slice %0 {offsets = [1, 0], sizes = [1, 128], strides = [1, 1]} : vector<4x128xf32> to vector<1x128xf32>
    %100 = vector.broadcast %99 : vector<1x128xf32> to vector<128x128xf32>
    %101 = arith.addf %98, %100 : vector<128x128xf32>
    %cst_28 = arith.constant 0.000000e+00 : f32
    %102 = vector.broadcast %cst_28 : f32 to vector<128x128xf32>
    %103 = arith.cmpf ogt, %101, %102 : vector<128x128xf32>
    %cst_29 = arith.constant 2.000000e-01 : f32
    %104 = vector.broadcast %cst_29 : f32 to vector<128x128xf32>
    %105 = arith.mulf %104, %101 : vector<128x128xf32>
    %106 = arith.select %103, %101, %105 : vector<128x128xi1>, vector<128x128xf32>
    %107 = vector.extract_strided_slice %1 {offsets = [1, 0], sizes = [1, 128], strides = [1, 1]} : vector<4x128xf32> to vector<1x128xf32>
    %108 = vector.broadcast %107 : vector<1x128xf32> to vector<128x128xf32>
    %109 = arith.mulf %106, %108 : vector<128x128xf32>
    %110 = vector.extract_strided_slice %2 {offsets = [1, 0], sizes = [1, 128], strides = [1, 1]} : vector<4x128xf32> to vector<1x128xf32>
    %111 = vector.broadcast %110 : vector<1x128xf32> to vector<128x128xf32>
    %112 = arith.addf %109, %111 : vector<128x128xf32>
    %113 = vector.shape_cast %112 : vector<128x128xf32> to vector<4x4x8x128xf32>
    %114 = vector.shape_cast %113 : vector<4x4x8x128xf32> to vector<2x2x2x2x8x128xf32>
    %115 = vector.extract_strided_slice %114 {offsets = [0, 0, 0, 0, 0, 0], sizes = [2, 1, 2, 1, 8, 128], strides = [1, 1, 1, 1, 1, 1]} : vector<2x2x2x2x8x128xf32> to vector<2x1x2x1x8x128xf32>
    %116 = vector.shape_cast %115 : vector<2x1x2x1x8x128xf32> to vector<2x2x8x128xf32>
    %117 = vector.extract_strided_slice %114 {offsets = [0, 0, 0, 1, 0, 0], sizes = [2, 1, 2, 1, 8, 128], strides = [1, 1, 1, 1, 1, 1]} : vector<2x2x2x2x8x128xf32> to vector<2x1x2x1x8x128xf32>
    %118 = vector.shape_cast %117 : vector<2x1x2x1x8x128xf32> to vector<2x2x8x128xf32>
    %119 = vector.extract_strided_slice %114 {offsets = [0, 1, 0, 0, 0, 0], sizes = [2, 1, 2, 1, 8, 128], strides = [1, 1, 1, 1, 1, 1]} : vector<2x2x2x2x8x128xf32> to vector<2x1x2x1x8x128xf32>
    %120 = vector.shape_cast %119 : vector<2x1x2x1x8x128xf32> to vector<2x2x8x128xf32>
    %121 = vector.extract_strided_slice %114 {offsets = [0, 1, 0, 1, 0, 0], sizes = [2, 1, 2, 1, 8, 128], strides = [1, 1, 1, 1, 1, 1]} : vector<2x2x2x2x8x128xf32> to vector<2x1x2x1x8x128xf32>
    %122 = vector.shape_cast %121 : vector<2x1x2x1x8x128xf32> to vector<2x2x8x128xf32>
    %cst_30 = arith.constant 0.000000e+00 : f32
    %123 = vector.broadcast %cst_30 : f32 to vector<1x2x8x128xf32>
    %124 = vector.extract_strided_slice %122 {offsets = [0, 0, 0, 0], sizes = [1, 2, 8, 128], strides = [1, 1, 1, 1]} : vector<2x2x8x128xf32> to vector<1x2x8x128xf32>
    %125 = tpu.concatenate %123, %124 in 0 : vector<1x2x8x128xf32>, vector<1x2x8x128xf32> -> vector<2x2x8x128xf32>
    %cst_31 = arith.constant 0.000000e+00 : f32
    %126 = vector.broadcast %cst_31 : f32 to vector<2x1x8x128xf32>
    %127 = vector.extract_strided_slice %125 {offsets = [0, 0, 0, 0], sizes = [2, 1, 8, 128], strides = [1, 1, 1, 1]} : vector<2x2x8x128xf32> to vector<2x1x8x128xf32>
    %128 = tpu.concatenate %126, %127 in 1 : vector<2x1x8x128xf32>, vector<2x1x8x128xf32> -> vector<2x2x8x128xf32>
    %129 = vector.shape_cast %128 : vector<2x2x8x128xf32> to vector<32x128xf32>
    %cst_32 = arith.constant 0.000000e+00 : f32
    %130 = vector.broadcast %cst_32 : f32 to vector<1x2x8x128xf32>
    %131 = vector.extract_strided_slice %120 {offsets = [0, 0, 0, 0], sizes = [1, 2, 8, 128], strides = [1, 1, 1, 1]} : vector<2x2x8x128xf32> to vector<1x2x8x128xf32>
    %132 = tpu.concatenate %130, %131 in 0 : vector<1x2x8x128xf32>, vector<1x2x8x128xf32> -> vector<2x2x8x128xf32>
    %133 = vector.shape_cast %132 : vector<2x2x8x128xf32> to vector<32x128xf32>
    %cst_33 = arith.constant 0.000000e+00 : f32
    %134 = vector.broadcast %cst_33 : f32 to vector<1x2x8x128xf32>
    %135 = vector.extract_strided_slice %122 {offsets = [0, 0, 0, 0], sizes = [1, 2, 8, 128], strides = [1, 1, 1, 1]} : vector<2x2x8x128xf32> to vector<1x2x8x128xf32>
    %136 = tpu.concatenate %134, %135 in 0 : vector<1x2x8x128xf32>, vector<1x2x8x128xf32> -> vector<2x2x8x128xf32>
    %137 = vector.shape_cast %136 : vector<2x2x8x128xf32> to vector<32x128xf32>
    %cst_34 = arith.constant 0.000000e+00 : f32
    %138 = vector.broadcast %cst_34 : f32 to vector<2x1x8x128xf32>
    %139 = vector.extract_strided_slice %118 {offsets = [0, 0, 0, 0], sizes = [2, 1, 8, 128], strides = [1, 1, 1, 1]} : vector<2x2x8x128xf32> to vector<2x1x8x128xf32>
    %140 = tpu.concatenate %138, %139 in 1 : vector<2x1x8x128xf32>, vector<2x1x8x128xf32> -> vector<2x2x8x128xf32>
    %141 = vector.shape_cast %140 : vector<2x2x8x128xf32> to vector<32x128xf32>
    %142 = vector.shape_cast %116 : vector<2x2x8x128xf32> to vector<32x128xf32>
    %143 = vector.shape_cast %118 : vector<2x2x8x128xf32> to vector<32x128xf32>
    %cst_35 = arith.constant 0.000000e+00 : f32
    %144 = vector.broadcast %cst_35 : f32 to vector<2x1x8x128xf32>
    %145 = vector.extract_strided_slice %122 {offsets = [0, 0, 0, 0], sizes = [2, 1, 8, 128], strides = [1, 1, 1, 1]} : vector<2x2x8x128xf32> to vector<2x1x8x128xf32>
    %146 = tpu.concatenate %144, %145 in 1 : vector<2x1x8x128xf32>, vector<2x1x8x128xf32> -> vector<2x2x8x128xf32>
    %147 = vector.shape_cast %146 : vector<2x2x8x128xf32> to vector<32x128xf32>
    %148 = vector.shape_cast %120 : vector<2x2x8x128xf32> to vector<32x128xf32>
    %149 = vector.shape_cast %122 : vector<2x2x8x128xf32> to vector<32x128xf32>
    %150 = tpu.concatenate %129, %133, %137, %141, %142, %143, %147, %148, %149 in 1 : vector<32x128xf32>, vector<32x128xf32>, vector<32x128xf32>, vector<32x128xf32>, vector<32x128xf32>, vector<32x128xf32>, vector<32x128xf32>, vector<32x128xf32>, vector<32x128xf32> -> vector<32x1152xf32>
    %151 = arith.truncf %150 : vector<32x1152xf32> to vector<32x1152xbf16>
    %c0_36 = arith.constant 0 : index
    %c0_37 = arith.constant 0 : index
    %152 = vector.load %arg4[%c0_36, %c0_37] : memref<1152x128xbf16, #tpu.memory_space<vmem>>, vector<1152x128xbf16>
    %cst_38 = arith.constant dense<0.000000e+00> : vector<32x128xf32>
    %153 = tpu.matmul %151, %152, %cst_38 {dimension_numbers = #tpu.dot_dimension_numbers<[1], [0], [0], [1], [0, 0, 1, 1], [], []>} : vector<32x1152xbf16>, vector<1152x128xbf16>, vector<32x128xf32> -> vector<32x128xf32>
    %154 = vector.extract_strided_slice %0 {offsets = [2, 0], sizes = [1, 128], strides = [1, 1]} : vector<4x128xf32> to vector<1x128xf32>
    %155 = vector.broadcast %154 : vector<1x128xf32> to vector<32x128xf32>
    %156 = arith.addf %153, %155 : vector<32x128xf32>
    %cst_39 = arith.constant 0.000000e+00 : f32
    %157 = vector.broadcast %cst_39 : f32 to vector<32x128xf32>
    %158 = arith.cmpf ogt, %156, %157 : vector<32x128xf32>
    %cst_40 = arith.constant 2.000000e-01 : f32
    %159 = vector.broadcast %cst_40 : f32 to vector<32x128xf32>
    %160 = arith.mulf %159, %156 : vector<32x128xf32>
    %161 = arith.select %158, %156, %160 : vector<32x128xi1>, vector<32x128xf32>
    %162 = vector.extract_strided_slice %1 {offsets = [2, 0], sizes = [1, 128], strides = [1, 1]} : vector<4x128xf32> to vector<1x128xf32>
    %163 = vector.broadcast %162 : vector<1x128xf32> to vector<32x128xf32>
    %164 = arith.mulf %161, %163 : vector<32x128xf32>
    %165 = vector.extract_strided_slice %2 {offsets = [2, 0], sizes = [1, 128], strides = [1, 1]} : vector<4x128xf32> to vector<1x128xf32>
    %166 = vector.broadcast %165 : vector<1x128xf32> to vector<32x128xf32>
    %167 = arith.addf %164, %166 : vector<32x128xf32>
    %168 = vector.shape_cast %167 : vector<32x128xf32> to vector<2x2x8x128xf32>
    %169 = vector.shape_cast %168 : vector<2x2x8x128xf32> to vector<1x2x1x2x8x128xf32>
    %170 = vector.extract_strided_slice %169 {offsets = [0, 0, 0, 0, 0, 0], sizes = [1, 1, 1, 1, 8, 128], strides = [1, 1, 1, 1, 1, 1]} : vector<1x2x1x2x8x128xf32> to vector<1x1x1x1x8x128xf32>
    %171 = vector.shape_cast %170 : vector<1x1x1x1x8x128xf32> to vector<1x1x8x128xf32>
    %172 = vector.extract_strided_slice %169 {offsets = [0, 0, 0, 1, 0, 0], sizes = [1, 1, 1, 1, 8, 128], strides = [1, 1, 1, 1, 1, 1]} : vector<1x2x1x2x8x128xf32> to vector<1x1x1x1x8x128xf32>
    %173 = vector.shape_cast %172 : vector<1x1x1x1x8x128xf32> to vector<1x1x8x128xf32>
    %174 = vector.extract_strided_slice %169 {offsets = [0, 1, 0, 0, 0, 0], sizes = [1, 1, 1, 1, 8, 128], strides = [1, 1, 1, 1, 1, 1]} : vector<1x2x1x2x8x128xf32> to vector<1x1x1x1x8x128xf32>
    %175 = vector.shape_cast %174 : vector<1x1x1x1x8x128xf32> to vector<1x1x8x128xf32>
    %176 = vector.extract_strided_slice %169 {offsets = [0, 1, 0, 1, 0, 0], sizes = [1, 1, 1, 1, 8, 128], strides = [1, 1, 1, 1, 1, 1]} : vector<1x2x1x2x8x128xf32> to vector<1x1x1x1x8x128xf32>
    %177 = vector.shape_cast %176 : vector<1x1x1x1x8x128xf32> to vector<1x1x8x128xf32>
    %cst_41 = arith.constant 0.000000e+00 : f32
    %178 = vector.broadcast %cst_41 : f32 to vector<1x1x8x128xf32>
    %179 = vector.shape_cast %178 : vector<1x1x8x128xf32> to vector<8x128xf32>
    %cst_42 = arith.constant 0.000000e+00 : f32
    %180 = vector.broadcast %cst_42 : f32 to vector<1x1x8x128xf32>
    %181 = vector.shape_cast %180 : vector<1x1x8x128xf32> to vector<8x128xf32>
    %cst_43 = arith.constant 0.000000e+00 : f32
    %182 = vector.broadcast %cst_43 : f32 to vector<1x1x8x128xf32>
    %183 = vector.shape_cast %182 : vector<1x1x8x128xf32> to vector<8x128xf32>
    %cst_44 = arith.constant 0.000000e+00 : f32
    %184 = vector.broadcast %cst_44 : f32 to vector<1x1x8x128xf32>
    %185 = vector.shape_cast %184 : vector<1x1x8x128xf32> to vector<8x128xf32>
    %186 = vector.shape_cast %171 : vector<1x1x8x128xf32> to vector<8x128xf32>
    %187 = vector.shape_cast %173 : vector<1x1x8x128xf32> to vector<8x128xf32>
    %cst_45 = arith.constant 0.000000e+00 : f32
    %188 = vector.broadcast %cst_45 : f32 to vector<1x1x8x128xf32>
    %189 = vector.shape_cast %188 : vector<1x1x8x128xf32> to vector<8x128xf32>
    %190 = vector.shape_cast %175 : vector<1x1x8x128xf32> to vector<8x128xf32>
    %191 = vector.shape_cast %177 : vector<1x1x8x128xf32> to vector<8x128xf32>
    %192 = tpu.concatenate %179, %181, %183, %185, %186, %187, %189, %190, %191 in 1 : vector<8x128xf32>, vector<8x128xf32>, vector<8x128xf32>, vector<8x128xf32>, vector<8x128xf32>, vector<8x128xf32>, vector<8x128xf32>, vector<8x128xf32>, vector<8x128xf32> -> vector<8x1152xf32>
    %193 = arith.truncf %192 : vector<8x1152xf32> to vector<8x1152xbf16>
    %c0_46 = arith.constant 0 : index
    %c0_47 = arith.constant 0 : index
    %194 = vector.load %arg5[%c0_46, %c0_47] : memref<1152x128xbf16, #tpu.memory_space<vmem>>, vector<1152x128xbf16>
    %cst_48 = arith.constant dense<0.000000e+00> : vector<8x128xf32>
    %195 = tpu.matmul %193, %194, %cst_48 {dimension_numbers = #tpu.dot_dimension_numbers<[1], [0], [0], [1], [0, 0, 1, 1], [], []>} : vector<8x1152xbf16>, vector<1152x128xbf16>, vector<8x128xf32> -> vector<8x128xf32>
    %196 = vector.extract_strided_slice %0 {offsets = [3, 0], sizes = [1, 128], strides = [1, 1]} : vector<4x128xf32> to vector<1x128xf32>
    %197 = vector.broadcast %196 : vector<1x128xf32> to vector<8x128xf32>
    %198 = arith.addf %195, %197 : vector<8x128xf32>
    %cst_49 = arith.constant 0.000000e+00 : f32
    %199 = vector.broadcast %cst_49 : f32 to vector<8x128xf32>
    %200 = arith.cmpf ogt, %198, %199 : vector<8x128xf32>
    %cst_50 = arith.constant 2.000000e-01 : f32
    %201 = vector.broadcast %cst_50 : f32 to vector<8x128xf32>
    %202 = arith.mulf %201, %198 : vector<8x128xf32>
    %203 = arith.select %200, %198, %202 : vector<8x128xi1>, vector<8x128xf32>
    %204 = vector.extract_strided_slice %1 {offsets = [3, 0], sizes = [1, 128], strides = [1, 1]} : vector<4x128xf32> to vector<1x128xf32>
    %205 = vector.broadcast %204 : vector<1x128xf32> to vector<8x128xf32>
    %206 = arith.mulf %203, %205 : vector<8x128xf32>
    %207 = vector.extract_strided_slice %2 {offsets = [3, 0], sizes = [1, 128], strides = [1, 1]} : vector<4x128xf32> to vector<1x128xf32>
    %208 = vector.broadcast %207 : vector<1x128xf32> to vector<8x128xf32>
    %209 = arith.addf %206, %208 : vector<8x128xf32>
    %210 = vector.shape_cast %209 : vector<8x128xf32> to vector<1x1x8x128xf32>
    %211 = vector.shape_cast %210 : vector<1x1x8x128xf32> to vector<1x8x128xf32>
    %212 = vector.shape_cast %211 : vector<1x8x128xf32> to vector<8x128xf32>
    %213 = arith.truncf %212 : vector<8x128xf32> to vector<8x128xbf16>
    %c0_51 = arith.constant 0 : index
    %c0_52 = arith.constant 0 : index
    %214 = vector.load %arg9[%c0_51, %c0_52] : memref<128x128xbf16, #tpu.memory_space<vmem>>, vector<128x128xbf16>
    %cst_53 = arith.constant dense<0.000000e+00> : vector<8x128xf32>
    %215 = tpu.matmul %213, %214, %cst_53 {dimension_numbers = #tpu.dot_dimension_numbers<[1], [0], [0], [1], [0, 0, 1, 1], [], []>} : vector<8x128xbf16>, vector<128x128xbf16>, vector<8x128xf32> -> vector<8x128xf32>
    %c0_54 = arith.constant 0 : index
    %c0_55 = arith.constant 0 : index
    %216 = vector.load %arg10[%c0_54, %c0_55] : memref<1x128xf32, #tpu.memory_space<vmem>>, vector<1x128xf32>
    %217 = vector.broadcast %216 : vector<1x128xf32> to vector<8x128xf32>
    %218 = arith.addf %215, %217 : vector<8x128xf32>
    %219 = tpu.iota {dimensions = array<i32: 1>} : vector<8x128xi32>
    %cst_56 = arith.constant 0.000000e+00 : f32
    %220 = vector.broadcast %cst_56 : f32 to vector<8x128xf32>
    %221 = arith.subf %220, %218 : vector<8x128xf32>
    %222 = math.exp %221 : vector<8x128xf32>
    %cst_57 = arith.constant 1.000000e+00 : f32
    %223 = vector.broadcast %cst_57 : f32 to vector<8x128xf32>
    %224 = arith.addf %223, %222 : vector<8x128xf32>
    %cst_58 = arith.constant 1.000000e+00 : f32
    %225 = vector.broadcast %cst_58 : f32 to vector<8x128xf32>
    %226 = arith.divf %225, %224 : vector<8x128xf32>
    %c1_i32 = arith.constant 1 : i32
    %227 = vector.broadcast %c1_i32 : i32 to vector<8x128xi32>
    %228 = arith.cmpi sge, %219, %227 : vector<8x128xi32>
    %c6_i32 = arith.constant 6 : i32
    %229 = vector.broadcast %c6_i32 : i32 to vector<8x128xi32>
    %230 = arith.cmpi slt, %219, %229 : vector<8x128xi32>
    %231 = arith.andi %228, %230 : vector<8x128xi1>
    %cst_59 = arith.constant -1.000000e+30 : f32
    %232 = vector.broadcast %cst_59 : f32 to vector<8x128xf32>
    %233 = arith.select %231, %218, %232 : vector<8x128xi1>, vector<8x128xf32>
    %cst_60 = arith.constant dense<0xFF800000> : vector<8xf32>
    %234 = vector.multi_reduction <maximumf>, %233, %cst_60 [1] : vector<8x128xf32> to vector<8xf32>
    %235 = vector.shape_cast %234 : vector<8xf32> to vector<8x1xf32>
    %236 = vector.broadcast %235 : vector<8x1xf32> to vector<8x128xf32>
    %237 = arith.subf %233, %236 : vector<8x128xf32>
    %238 = math.exp %237 : vector<8x128xf32>
    %cst_61 = arith.constant 0.000000e+00 : f32
    %239 = vector.broadcast %cst_61 : f32 to vector<8x128xf32>
    %240 = arith.select %231, %238, %239 : vector<8x128xi1>, vector<8x128xf32>
    %cst_62 = arith.constant dense<0.000000e+00> : vector<8xf32>
    %241 = vector.multi_reduction <add>, %240, %cst_62 [1] : vector<8x128xf32> to vector<8xf32>
    %242 = vector.shape_cast %241 : vector<8xf32> to vector<8x1xf32>
    %243 = vector.broadcast %242 : vector<8x1xf32> to vector<8x128xf32>
    %244 = arith.divf %240, %243 : vector<8x128xf32>
    %c0_i32 = arith.constant 0 : i32
    %245 = vector.broadcast %c0_i32 : i32 to vector<8x128xi32>
    %246 = arith.cmpi eq, %219, %245 : vector<8x128xi32>
    %247 = arith.select %246, %226, %244 : vector<8x128xi1>, vector<8x128xf32>
    %c0_63 = arith.constant 0 : index
    %c0_64 = arith.constant 0 : index
    %248 = vector.load %arg11[%c0_63, %c0_64] : memref<8x128xf32, #tpu.memory_space<vmem>>, vector<8x128xf32>
    tpu.vector_store %arg11[%c0_63, %c0_64], %247 {strides = array<i32>} : memref<8x128xf32, #tpu.memory_space<vmem>>, vector<8x128xf32>,
    return
  }
  func.func @transform_0(%arg0: i32) -> (i32, i32, i32, i32) {
    %c0_i32 = arith.constant 0 : i32
    %c0_i32_0 = arith.constant 0 : i32
    %c0_i32_1 = arith.constant 0 : i32
    %c0_i32_2 = arith.constant 0 : i32
    return %c0_i32, %c0_i32_0, %arg0, %c0_i32_1 : i32, i32, i32, i32
  }
  func.func @transform_1(%arg0: i32) -> (i32, i32) {
    %c0_i32 = arith.constant 0 : i32
    %c0_i32_0 = arith.constant 0 : i32
    %c0_i32_1 = arith.constant 0 : i32
    return %c0_i32, %c0_i32_0 : i32, i32
  }
  func.func @transform_2(%arg0: i32) -> (i32, i32) {
    %c0_i32 = arith.constant 0 : i32
    %c0_i32_0 = arith.constant 0 : i32
    %c0_i32_1 = arith.constant 0 : i32
    return %c0_i32, %c0_i32_0 : i32, i32
  }
  func.func @transform_3(%arg0: i32) -> (i32, i32) {
    %c0_i32 = arith.constant 0 : i32
    %c0_i32_0 = arith.constant 0 : i32
    %c0_i32_1 = arith.constant 0 : i32
    return %c0_i32, %c0_i32_0 : i32, i32
  }
  func.func @transform_4(%arg0: i32) -> (i32, i32) {
    %c0_i32 = arith.constant 0 : i32
    %c0_i32_0 = arith.constant 0 : i32
    %c0_i32_1 = arith.constant 0 : i32
    return %c0_i32, %c0_i32_0 : i32, i32
  }
  func.func @transform_5(%arg0: i32) -> (i32, i32) {
    %c0_i32 = arith.constant 0 : i32
    %c0_i32_0 = arith.constant 0 : i32
    %c0_i32_1 = arith.constant 0 : i32
    return %c0_i32, %c0_i32_0 : i32, i32
  }
  func.func @transform_6(%arg0: i32) -> (i32, i32) {
    %c0_i32 = arith.constant 0 : i32
    %c0_i32_0 = arith.constant 0 : i32
    %c0_i32_1 = arith.constant 0 : i32
    return %c0_i32, %c0_i32_0 : i32, i32
  }
  func.func @transform_7(%arg0: i32) -> (i32, i32) {
    %c0_i32 = arith.constant 0 : i32
    %c0_i32_0 = arith.constant 0 : i32
    %c0_i32_1 = arith.constant 0 : i32
    return %c0_i32, %c0_i32_0 : i32, i32
  }
  func.func @transform_8(%arg0: i32) -> (i32, i32) {
    %c0_i32 = arith.constant 0 : i32
    %c0_i32_0 = arith.constant 0 : i32
    %c0_i32_1 = arith.constant 0 : i32
    return %c0_i32, %c0_i32_0 : i32, i32
  }
  func.func @transform_9(%arg0: i32) -> (i32, i32) {
    %c0_i32 = arith.constant 0 : i32
    %c0_i32_0 = arith.constant 0 : i32
    %c0_i32_1 = arith.constant 0 : i32
    return %c0_i32, %c0_i32_0 : i32, i32
  }
  func.func @transform_10(%arg0: i32) -> (i32, i32) {
    %c0_i32 = arith.constant 0 : i32
    %c0_i32_0 = arith.constant 0 : i32
    return %arg0, %c0_i32 : i32, i32
  }
}

</mosaic_0001>

<bundles_post_ra>
// kernel: discriminator_forward.1
= control target key start
LH: loop header
LB: loop body
LE: loop exit
PB: predicated region body
PF: predicated region fallthrough
CT: control target
= control target key end

     0   :  { %s9164_s13 = smov 0   ;;  %s9166_s14 = smov 0   ;;  %s12967_s0 = inlined_call_operand.vmem [shape: f32[16,16,16,128], index: 0, kind: input, shape index: {}]   ;;  %s12968_s1 = inlined_call_operand.vmem [shape: bf16[1152,128], index: 1, kind: input, shape index: {}]   ;;  %s12969_s2 = inlined_call_operand.vmem [shape: bf16[1152,128], index: 2, kind: input, shape index: {}]   ;;  %s12970_s3 = inlined_call_operand.vmem [shape: bf16[1152,128], index: 3, kind: input, shape index: {}]   ;;  %s12971_s4 = inlined_call_operand.vmem [shape: bf16[1152,128], index: 4, kind: input, shape index: {}]   ;;  %s12972_s5 = inlined_call_operand.vmem [shape: f32[4,128], index: 5, kind: input, shape index: {}]   ;;  %s12973_s6 = inlined_call_operand.vmem [shape: f32[4,128], index: 6, kind: input, shape index: {}]   ;;  %s12974_s7 = inlined_call_operand.vmem [shape: f32[4,128], index: 7, kind: input, shape index: {}]   ;;  %s12975_s8 = inlined_call_operand.vmem [shape: bf16[128,128], index: 8, kind: input, shape index: {}]   ;;  %s12976_s9 = inlined_call_operand.vmem [shape: f32[1,128], index: 9, kind: input, shape index: {}]   ;;  %s12977_s10 = inlined_call_operand.vmem [shape: f32[16,128], index: 10, kind: output, shape index: {}]  }
   0x1   :  { %s9168_s15 = smov 0  }
   0x2 LB: > { %s7277_s16 = sadd.s32 4294967295, %s9103_s15   ;;  %s9181_s17 = sadd.s32 1, %s9103_s15   ;;  %s9103_s15 = sphi %s9168_s15, %s13401_s15   ;;  %s9099_s14 = sphi %s9166_s14, %s13400_s14   ;;  %s9095_s13 = sphi %s9164_s13, %s13399_s13  }
   0x3   : > { %s24_s18 = ssub.s32 %s9103_s15, %s9181_s17  ;;  %s27_s19 = sadd.s32 1, %s9099_s14 }
   0x4   : > { %p25_p0 = scmp.eq.s32.totalorder %s24_s18, 0  ;;  %p34_p1 = scmp.ne.s32.totalorder %s9099_s14, %s9095_s13 }
   0x5   : > { %p35_p2 = scmp.eq.s32.totalorder %s9103_s15, 0  ;;  %p7280_p4 = scmp.ge.s32.totalorder %s9103_s15, 2 }
   0x6   : > { %s9190_s20 = scalar_select %p25_p0, %s9099_s14, %s27_s19  }
   0x7   : > { %p36_p3 = por %p35_p2, %p34_p1  ;;  %302 = sbr.rel (%p7280_p4) target bundleno = 146 (0x92), region = 52 }
   0xe   : > { %305 = sbr.rel (!%p36_p3) target bundleno = 146 (0x92), region = 56  ;;  %s307_s21 = sand.u32 (%p36_p3), 1, %s9099_s14  }
   0xf   : > { %s7282_s22 = sshll.u32 (%p36_p3), %s9103_s15, 3  ;;  %s7281_s23 = sshll.u32 (%p36_p3), %s307_s21, 11 }
  0x10   : > { %s9198_s26 = scalar_lea.vmem (%p36_p3), %s12967_s0, %s7282_s22  ;;  %s9203_s27 = scalar_lea.vmem (%p36_p3), [#allocation2], %s7281_s23 }
  0x11   : > { %v849_v0 = vld [vmem:[%s9198_s26] sm:$0xff] (%p36_p3)  ;;  %v851_v1 = vld [vmem:[%s9198_s26 + $0x10] sm:$0xff] (%p36_p3) }
  0x12   : > { %v853_v2 = vld [vmem:[%s9198_s26 + $0x20] sm:$0xff] (%p36_p3)  ;;  %850 = vst [vmem:[%s9203_s27] sm:$0xff] (%p36_p3), %v849_v0  ;;  %852 = vst [vmem:[%s9203_s27 + $0x8] sm:$0xff] (%p36_p3), %v851_v1  ;;  %v855_v3 = vld [vmem:[%s9198_s26 + $0x30] sm:$0xff] (%p36_p3) }
  0x13   : > { %854 = vst [vmem:[%s9203_s27 + $0x10] sm:$0xff] (%p36_p3), %v853_v2  ;;  %v857_v4 = vld [vmem:[%s9198_s26 + $0x40] sm:$0xff] (%p36_p3)  ;;  %v859_v5 = vld [vmem:[%s9198_s26 + $0x50] sm:$0xff] (%p36_p3)  ;;  %856 = vst [vmem:[%s9203_s27 + $0x18] sm:$0xff] (%p36_p3), %v855_v3 }
  0x14   : > { %858 = vst [vmem:[%s9203_s27 + $0x20] sm:$0xff] (%p36_p3), %v857_v4  ;;  %860 = vst [vmem:[%s9203_s27 + $0x28] sm:$0xff] (%p36_p3), %v859_v5  ;;  %v861_v6 = vld [vmem:[%s9198_s26 + $0x60] sm:$0xff] (%p36_p3)  ;;  %v863_v7 = vld [vmem:[%s9198_s26 + $0x70] sm:$0xff] (%p36_p3) }
  0x15   : > { %v865_v8 = vld [vmem:[%s9198_s26 + $0x80] sm:$0xff]  ;;  %862 = vst [vmem:[%s9203_s27 + $0x30] sm:$0xff] %v861_v6  ;;  %864 = vst [vmem:[%s9203_s27 + $0x38] sm:$0xff] %v863_v7  ;;  %v867_v9 = vld [vmem:[%s9198_s26 + $0x90] sm:$0xff] }
  0x16   : > { %866 = vst [vmem:[%s9203_s27 + $0x40] sm:$0xff] %v865_v8  ;;  %v869_v10 = vld [vmem:[%s9198_s26 + $0xa0] sm:$0xff]  ;;  %v871_v11 = vld [vmem:[%s9198_s26 + $0xb0] sm:$0xff]  ;;  %868 = vst [vmem:[%s9203_s27 + $0x48] sm:$0xff] %v867_v9 }
  0x17   : > { %870 = vst [vmem:[%s9203_s27 + $0x50] sm:$0xff] %v869_v10  ;;  %872 = vst [vmem:[%s9203_s27 + $0x58] sm:$0xff] %v871_v11  ;;  %v873_v12 = vld [vmem:[%s9198_s26 + $0xc0] sm:$0xff]  ;;  %v875_v13 = vld [vmem:[%s9198_s26 + $0xd0] sm:$0xff] }
  0x18   : > { %v877_v14 = vld [vmem:[%s9198_s26 + $0xe0] sm:$0xff]  ;;  %874 = vst [vmem:[%s9203_s27 + $0x60] sm:$0xff] %v873_v12  ;;  %876 = vst [vmem:[%s9203_s27 + $0x68] sm:$0xff] %v875_v13  ;;  %v879_v15 = vld [vmem:[%s9198_s26 + $0xf0] sm:$0xff] }
  0x19   : > { %878 = vst [vmem:[%s9203_s27 + $0x70] sm:$0xff] %v877_v14  ;;  %v881_v16 = vld [vmem:[%s9198_s26 + $0x100] sm:$0xff]  ;;  %v883_v17 = vld [vmem:[%s9198_s26 + $0x110] sm:$0xff]  ;;  %880 = vst [vmem:[%s9203_s27 + $0x78] sm:$0xff] %v879_v15 }
  0x1a   : > { %882 = vst [vmem:[%s9203_s27 + $0x80] sm:$0xff] %v881_v16  ;;  %884 = vst [vmem:[%s9203_s27 + $0x88] sm:$0xff] %v883_v17  ;;  %v885_v18 = vld [vmem:[%s9198_s26 + $0x120] sm:$0xff]  ;;  %v887_v19 = vld [vmem:[%s9198_s26 + $0x130] sm:$0xff] }
  0x1b   : > { %v889_v20 = vld [vmem:[%s9198_s26 + $0x140] sm:$0xff]  ;;  %886 = vst [vmem:[%s9203_s27 + $0x90] sm:$0xff] %v885_v18  ;;  %888 = vst [vmem:[%s9203_s27 + $0x98] sm:$0xff] %v887_v19  ;;  %v891_v21 = vld [vmem:[%s9198_s26 + $0x150] sm:$0xff] }
  0x1c   : > { %890 = vst [vmem:[%s9203_s27 + $0xa0] sm:$0xff] %v889_v20  ;;  %v893_v22 = vld [vmem:[%s9198_s26 + $0x160] sm:$0xff]  ;;  %v895_v23 = vld [vmem:[%s9198_s26 + $0x170] sm:$0xff]  ;;  %892 = vst [vmem:[%s9203_s27 + $0xa8] sm:$0xff] %v891_v21 }
  0x1d   : > { %894 = vst [vmem:[%s9203_s27 + $0xb0] sm:$0xff] %v893_v22  ;;  %896 = vst [vmem:[%s9203_s27 + $0xb8] sm:$0xff] %v895_v23  ;;  %v897_v24 = vld [vmem:[%s9198_s26 + $0x180] sm:$0xff]  ;;  %v899_v25 = vld [vmem:[%s9198_s26 + $0x190] sm:$0xff] }
  0x1e   : > { %v901_v26 = vld [vmem:[%s9198_s26 + $0x1a0] sm:$0xff]  ;;  %898 = vst [vmem:[%s9203_s27 + $0xc0] sm:$0xff] %v897_v24  ;;  %900 = vst [vmem:[%s9203_s27 + $0xc8] sm:$0xff] %v899_v25  ;;  %v903_v27 = vld [vmem:[%s9198_s26 + $0x1b0] sm:$0xff] }
  0x1f   : > { %902 = vst [vmem:[%s9203_s27 + $0xd0] sm:$0xff] %v901_v26  ;;  %v905_v28 = vld [vmem:[%s9198_s26 + $0x1c0] sm:$0xff]  ;;  %v907_v29 = vld [vmem:[%s9198_s26 + $0x1d0] sm:$0xff]  ;;  %904 = vst [vmem:[%s9203_s27 + $0xd8] sm:$0xff] %v903_v27 }
  0x20   : > { %906 = vst [vmem:[%s9203_s27 + $0xe0] sm:$0xff] %v905_v28  ;;  %908 = vst [vmem:[%s9203_s27 + $0xe8] sm:$0xff] %v907_v29  ;;  %v909_v30 = vld [vmem:[%s9198_s26 + $0x1e0] sm:$0xff]  ;;  %v911_v31 = vld [vmem:[%s9198_s26 + $0x1f0] sm:$0xff] }
  0x21   : > { %v913_v32 = vld [vmem:[%s9198_s26 + $0x200] sm:$0xff]  ;;  %910 = vst [vmem:[%s9203_s27 + $0xf0] sm:$0xff] %v909_v30  ;;  %912 = vst [vmem:[%s9203_s27 + $0xf8] sm:$0xff] %v911_v31  ;;  %v915_v33 = vld [vmem:[%s9198_s26 + $0x210] sm:$0xff] }
  0x22   : > { %914 = vst [vmem:[%s9203_s27 + $0x100] sm:$0xff] %v913_v32  ;;  %v917_v34 = vld [vmem:[%s9198_s26 + $0x220] sm:$0xff]  ;;  %v919_v35 = vld [vmem:[%s9198_s26 + $0x230] sm:$0xff]  ;;  %916 = vst [vmem:[%s9203_s27 + $0x108] sm:$0xff] %v915_v33 }
  0x23   : > { %918 = vst [vmem:[%s9203_s27 + $0x110] sm:$0xff] %v917_v34  ;;  %920 = vst [vmem:[%s9203_s27 + $0x118] sm:$0xff] %v919_v35  ;;  %v921_v36 = vld [vmem:[%s9198_s26 + $0x240] sm:$0xff]  ;;  %v923_v37 = vld [vmem:[%s9198_s26 + $0x250] sm:$0xff] }
  0x24   : > { %v925_v38 = vld [vmem:[%s9198_s26 + $0x260] sm:$0xff]  ;;  %922 = vst [vmem:[%s9203_s27 + $0x120] sm:$0xff] %v921_v36  ;;  %924 = vst [vmem:[%s9203_s27 + $0x128] sm:$0xff] %v923_v37  ;;  %v927_v39 = vld [vmem:[%s9198_s26 + $0x270] sm:$0xff] }
  0x25   : > { %926 = vst [vmem:[%s9203_s27 + $0x130] sm:$0xff] %v925_v38  ;;  %v929_v40 = vld [vmem:[%s9198_s26 + $0x280] sm:$0xff]  ;;  %v931_v41 = vld [vmem:[%s9198_s26 + $0x290] sm:$0xff]  ;;  %928 = vst [vmem:[%s9203_s27 + $0x138] sm:$0xff] %v927_v39 }
  0x26   : > { %930 = vst [vmem:[%s9203_s27 + $0x140] sm:$0xff] %v929_v40  ;;  %932 = vst [vmem:[%s9203_s27 + $0x148] sm:$0xff] %v931_v41  ;;  %v933_v42 = vld [vmem:[%s9198_s26 + $0x2a0] sm:$0xff]  ;;  %v935_v43 = vld [vmem:[%s9198_s26 + $0x2b0] sm:$0xff] }
  0x27   : > { %v937_v44 = vld [vmem:[%s9198_s26 + $0x2c0] sm:$0xff]  ;;  %934 = vst [vmem:[%s9203_s27 + $0x150] sm:$0xff] %v933_v42  ;;  %936 = vst [vmem:[%s9203_s27 + $0x158] sm:$0xff] %v935_v43  ;;  %v939_v45 = vld [vmem:[%s9198_s26 + $0x2d0] sm:$0xff] }
  0x28   : > { %938 = vst [vmem:[%s9203_s27 + $0x160] sm:$0xff] %v937_v44  ;;  %v941_v46 = vld [vmem:[%s9198_s26 + $0x2e0] sm:$0xff]  ;;  %v943_v47 = vld [vmem:[%s9198_s26 + $0x2f0] sm:$0xff]  ;;  %940 = vst [vmem:[%s9203_s27 + $0x168] sm:$0xff] %v939_v45 }
  0x29   : > { %942 = vst [vmem:[%s9203_s27 + $0x170] sm:$0xff] %v941_v46  ;;  %944 = vst [vmem:[%s9203_s27 + $0x178] sm:$0xff] %v943_v47  ;;  %v945_v48 = vld [vmem:[%s9198_s26 + $0x300] sm:$0xff]  ;;  %v947_v49 = vld [vmem:[%s9198_s26 + $0x310] sm:$0xff] }
  0x2a   : > { %v949_v50 = vld [vmem:[%s9198_s26 + $0x320] sm:$0xff]  ;;  %946 = vst [vmem:[%s9203_s27 + $0x180] sm:$0xff] %v945_v48  ;;  %948 = vst [vmem:[%s9203_s27 + $0x188] sm:$0xff] %v947_v49  ;;  %v951_v51 = vld [vmem:[%s9198_s26 + $0x330] sm:$0xff] }
  0x2b   : > { %950 = vst [vmem:[%s9203_s27 + $0x190] sm:$0xff] %v949_v50  ;;  %v953_v52 = vld [vmem:[%s9198_s26 + $0x340] sm:$0xff]  ;;  %v955_v53 = vld [vmem:[%s9198_s26 + $0x350] sm:$0xff]  ;;  %952 = vst [vmem:[%s9203_s27 + $0x198] sm:$0xff] %v951_v51 }
  0x2c   : > { %954 = vst [vmem:[%s9203_s27 + $0x1a0] sm:$0xff] %v953_v52  ;;  %956 = vst [vmem:[%s9203_s27 + $0x1a8] sm:$0xff] %v955_v53  ;;  %v957_v54 = vld [vmem:[%s9198_s26 + $0x360] sm:$0xff]  ;;  %v959_v55 = vld [vmem:[%s9198_s26 + $0x370] sm:$0xff] }
  0x2d   : > { %v961_v56 = vld [vmem:[%s9198_s26 + $0x380] sm:$0xff]  ;;  %958 = vst [vmem:[%s9203_s27 + $0x1b0] sm:$0xff] %v957_v54  ;;  %960 = vst [vmem:[%s9203_s27 + $0x1b8] sm:$0xff] %v959_v55  ;;  %v963_v57 = vld [vmem:[%s9198_s26 + $0x390] sm:$0xff] }
  0x2e   : > { %962 = vst [vmem:[%s9203_s27 + $0x1c0] sm:$0xff] %v961_v56  ;;  %v965_v58 = vld [vmem:[%s9198_s26 + $0x3a0] sm:$0xff]  ;;  %v967_v59 = vld [vmem:[%s9198_s26 + $0x3b0] sm:$0xff]  ;;  %964 = vst [vmem:[%s9203_s27 + $0x1c8] sm:$0xff] %v963_v57 }
  0x2f   : > { %966 = vst [vmem:[%s9203_s27 + $0x1d0] sm:$0xff] %v965_v58  ;;  %968 = vst [vmem:[%s9203_s27 + $0x1d8] sm:$0xff] %v967_v59  ;;  %v969_v60 = vld [vmem:[%s9198_s26 + $0x3c0] sm:$0xff]  ;;  %v971_v61 = vld [vmem:[%s9198_s26 + $0x3d0] sm:$0xff] }
  0x30   : > { %v973_v62 = vld [vmem:[%s9198_s26 + $0x3e0] sm:$0xff]  ;;  %970 = vst [vmem:[%s9203_s27 + $0x1e0] sm:$0xff] %v969_v60  ;;  %972 = vst [vmem:[%s9203_s27 + $0x1e8] sm:$0xff] %v971_v61  ;;  %v975_v63 = vld [vmem:[%s9198_s26 + $0x3f0] sm:$0xff] }
  0x31   : > { %974 = vst [vmem:[%s9203_s27 + $0x1f0] sm:$0xff] %v973_v62  ;;  %v977_v0 = vld [vmem:[%s9198_s26 + $0x400] sm:$0xff]  ;;  %v979_v1 = vld [vmem:[%s9198_s26 + $0x410] sm:$0xff]  ;;  %976 = vst [vmem:[%s9203_s27 + $0x1f8] sm:$0xff] %v975_v63 }
  0x32   : > { %978 = vst [vmem:[%s9203_s27 + $0x200] sm:$0xff] %v977_v0  ;;  %980 = vst [vmem:[%s9203_s27 + $0x208] sm:$0xff] %v979_v1  ;;  %v981_v2 = vld [vmem:[%s9198_s26 + $0x420] sm:$0xff]  ;;  %v983_v3 = vld [vmem:[%s9198_s26 + $0x430] sm:$0xff] }
  0x33   : > { %v985_v4 = vld [vmem:[%s9198_s26 + $0x440] sm:$0xff]  ;;  %982 = vst [vmem:[%s9203_s27 + $0x210] sm:$0xff] %v981_v2  ;;  %984 = vst [vmem:[%s9203_s27 + $0x218] sm:$0xff] %v983_v3  ;;  %v987_v5 = vld [vmem:[%s9198_s26 + $0x450] sm:$0xff] }
  0x34   : > { %986 = vst [vmem:[%s9203_s27 + $0x220] sm:$0xff] %v985_v4  ;;  %v989_v6 = vld [vmem:[%s9198_s26 + $0x460] sm:$0xff]  ;;  %v991_v7 = vld [vmem:[%s9198_s26 + $0x470] sm:$0xff]  ;;  %988 = vst [vmem:[%s9203_s27 + $0x228] sm:$0xff] %v987_v5 }
  0x35   : > { %990 = vst [vmem:[%s9203_s27 + $0x230] sm:$0xff] %v989_v6  ;;  %992 = vst [vmem:[%s9203_s27 + $0x238] sm:$0xff] %v991_v7  ;;  %v993_v8 = vld [vmem:[%s9198_s26 + $0x480] sm:$0xff]  ;;  %v995_v9 = vld [vmem:[%s9198_s26 + $0x490] sm:$0xff] }
  0x36   : > { %v997_v10 = vld [vmem:[%s9198_s26 + $0x4a0] sm:$0xff]  ;;  %994 = vst [vmem:[%s9203_s27 + $0x240] sm:$0xff] %v993_v8  ;;  %996 = vst [vmem:[%s9203_s27 + $0x248] sm:$0xff] %v995_v9  ;;  %v999_v11 = vld [vmem:[%s9198_s26 + $0x4b0] sm:$0xff] }
  0x37   : > { %998 = vst [vmem:[%s9203_s27 + $0x250] sm:$0xff] %v997_v10  ;;  %v1001_v12 = vld [vmem:[%s9198_s26 + $0x4c0] sm:$0xff]  ;;  %v1003_v13 = vld [vmem:[%s9198_s26 + $0x4d0] sm:$0xff]  ;;  %1000 = vst [vmem:[%s9203_s27 + $0x258] sm:$0xff] %v999_v11 }
  0x38   : > { %1002 = vst [vmem:[%s9203_s27 + $0x260] sm:$0xff] %v1001_v12  ;;  %1004 = vst [vmem:[%s9203_s27 + $0x268] sm:$0xff] %v1003_v13  ;;  %v1005_v14 = vld [vmem:[%s9198_s26 + $0x4e0] sm:$0xff]  ;;  %v1007_v15 = vld [vmem:[%s9198_s26 + $0x4f0] sm:$0xff] }
  0x39   : > { %v1009_v16 = vld [vmem:[%s9198_s26 + $0x500] sm:$0xff]  ;;  %1006 = vst [vmem:[%s9203_s27 + $0x270] sm:$0xff] %v1005_v14  ;;  %1008 = vst [vmem:[%s9203_s27 + $0x278] sm:$0xff] %v1007_v15  ;;  %v1011_v17 = vld [vmem:[%s9198_s26 + $0x510] sm:$0xff] }
  0x3a   : > { %1010 = vst [vmem:[%s9203_s27 + $0x280] sm:$0xff] %v1009_v16  ;;  %v1013_v18 = vld [vmem:[%s9198_s26 + $0x520] sm:$0xff]  ;;  %v1015_v19 = vld [vmem:[%s9198_s26 + $0x530] sm:$0xff]  ;;  %1012 = vst [vmem:[%s9203_s27 + $0x288] sm:$0xff] %v1011_v17 }
  0x3b   : > { %1014 = vst [vmem:[%s9203_s27 + $0x290] sm:$0xff] %v1013_v18  ;;  %1016 = vst [vmem:[%s9203_s27 + $0x298] sm:$0xff] %v1015_v19  ;;  %v1017_v20 = vld [vmem:[%s9198_s26 + $0x540] sm:$0xff]  ;;  %v1019_v21 = vld [vmem:[%s9198_s26 + $0x550] sm:$0xff] }
  0x3c   : > { %v1021_v22 = vld [vmem:[%s9198_s26 + $0x560] sm:$0xff]  ;;  %1018 = vst [vmem:[%s9203_s27 + $0x2a0] sm:$0xff] %v1017_v20  ;;  %1020 = vst [vmem:[%s9203_s27 + $0x2a8] sm:$0xff] %v1019_v21  ;;  %v1023_v23 = vld [vmem:[%s9198_s26 + $0x570] sm:$0xff] }
  0x3d   : > { %1022 = vst [vmem:[%s9203_s27 + $0x2b0] sm:$0xff] %v1021_v22  ;;  %v1025_v24 = vld [vmem:[%s9198_s26 + $0x580] sm:$0xff]  ;;  %v1027_v25 = vld [vmem:[%s9198_s26 + $0x590] sm:$0xff]  ;;  %1024 = vst [vmem:[%s9203_s27 + $0x2b8] sm:$0xff] %v1023_v23 }
  0x3e   : > { %1026 = vst [vmem:[%s9203_s27 + $0x2c0] sm:$0xff] %v1025_v24  ;;  %1028 = vst [vmem:[%s9203_s27 + $0x2c8] sm:$0xff] %v1027_v25  ;;  %v1029_v26 = vld [vmem:[%s9198_s26 + $0x5a0] sm:$0xff]  ;;  %v1031_v27 = vld [vmem:[%s9198_s26 + $0x5b0] sm:$0xff] }
  0x3f   : > { %v1033_v28 = vld [vmem:[%s9198_s26 + $0x5c0] sm:$0xff]  ;;  %1030 = vst [vmem:[%s9203_s27 + $0x2d0] sm:$0xff] %v1029_v26  ;;  %1032 = vst [vmem:[%s9203_s27 + $0x2d8] sm:$0xff] %v1031_v27  ;;  %v1035_v29 = vld [vmem:[%s9198_s26 + $0x5d0] sm:$0xff] }
  0x40   : > { %1034 = vst [vmem:[%s9203_s27 + $0x2e0] sm:$0xff] %v1033_v28  ;;  %v1037_v30 = vld [vmem:[%s9198_s26 + $0x5e0] sm:$0xff]  ;;  %v1039_v31 = vld [vmem:[%s9198_s26 + $0x5f0] sm:$0xff]  ;;  %1036 = vst [vmem:[%s9203_s27 + $0x2e8] sm:$0xff] %v1035_v29 }
  0x41   : > { %1038 = vst [vmem:[%s9203_s27 + $0x2f0] sm:$0xff] %v1037_v30  ;;  %1040 = vst [vmem:[%s9203_s27 + $0x2f8] sm:$0xff] %v1039_v31  ;;  %v1041_v32 = vld [vmem:[%s9198_s26 + $0x600] sm:$0xff]  ;;  %v1043_v33 = vld [vmem:[%s9198_s26 + $0x610] sm:$0xff] }
  0x42   : > { %v1045_v34 = vld [vmem:[%s9198_s26 + $0x620] sm:$0xff]  ;;  %1042 = vst [vmem:[%s9203_s27 + $0x300] sm:$0xff] %v1041_v32  ;;  %1044 = vst [vmem:[%s9203_s27 + $0x308] sm:$0xff] %v1043_v33  ;;  %v1047_v35 = vld [vmem:[%s9198_s26 + $0x630] sm:$0xff] }
  0x43   : > { %1046 = vst [vmem:[%s9203_s27 + $0x310] sm:$0xff] %v1045_v34  ;;  %v1049_v36 = vld [vmem:[%s9198_s26 + $0x640] sm:$0xff]  ;;  %v1051_v37 = vld [vmem:[%s9198_s26 + $0x650] sm:$0xff]  ;;  %1048 = vst [vmem:[%s9203_s27 + $0x318] sm:$0xff] %v1047_v35 }
  0x44   : > { %1050 = vst [vmem:[%s9203_s27 + $0x320] sm:$0xff] %v1049_v36  ;;  %1052 = vst [vmem:[%s9203_s27 + $0x328] sm:$0xff] %v1051_v37  ;;  %v1053_v38 = vld [vmem:[%s9198_s26 + $0x660] sm:$0xff]  ;;  %v1055_v39 = vld [vmem:[%s9198_s26 + $0x670] sm:$0xff] }
  0x45   : > { %v1057_v40 = vld [vmem:[%s9198_s26 + $0x680] sm:$0xff]  ;;  %1054 = vst [vmem:[%s9203_s27 + $0x330] sm:$0xff] %v1053_v38  ;;  %1056 = vst [vmem:[%s9203_s27 + $0x338] sm:$0xff] %v1055_v39  ;;  %v1059_v41 = vld [vmem:[%s9198_s26 + $0x690] sm:$0xff] }
  0x46   : > { %1058 = vst [vmem:[%s9203_s27 + $0x340] sm:$0xff] %v1057_v40  ;;  %v1061_v42 = vld [vmem:[%s9198_s26 + $0x6a0] sm:$0xff]  ;;  %v1063_v43 = vld [vmem:[%s9198_s26 + $0x6b0] sm:$0xff]  ;;  %1060 = vst [vmem:[%s9203_s27 + $0x348] sm:$0xff] %v1059_v41 }
  0x47   : > { %1062 = vst [vmem:[%s9203_s27 + $0x350] sm:$0xff] %v1061_v42  ;;  %1064 = vst [vmem:[%s9203_s27 + $0x358] sm:$0xff] %v1063_v43  ;;  %v1065_v44 = vld [vmem:[%s9198_s26 + $0x6c0] sm:$0xff]  ;;  %v1067_v45 = vld [vmem:[%s9198_s26 + $0x6d0] sm:$0xff] }
  0x48   : > { %v1069_v46 = vld [vmem:[%s9198_s26 + $0x6e0] sm:$0xff]  ;;  %1066 = vst [vmem:[%s9203_s27 + $0x360] sm:$0xff] %v1065_v44  ;;  %1068 = vst [vmem:[%s9203_s27 + $0x368] sm:$0xff] %v1067_v45  ;;  %v1071_v47 = vld [vmem:[%s9198_s26 + $0x6f0] sm:$0xff] }
  0x49   : > { %1070 = vst [vmem:[%s9203_s27 + $0x370] sm:$0xff] %v1069_v46  ;;  %v1073_v48 = vld [vmem:[%s9198_s26 + $0x700] sm:$0xff]  ;;  %v1075_v49 = vld [vmem:[%s9198_s26 + $0x710] sm:$0xff]  ;;  %1072 = vst [vmem:[%s9203_s27 + $0x378] sm:$0xff] %v1071_v47 }
  0x4a   : > { %1074 = vst [vmem:[%s9203_s27 + $0x380] sm:$0xff] %v1073_v48  ;;  %1076 = vst [vmem:[%s9203_s27 + $0x388] sm:$0xff] %v1075_v49  ;;  %v1077_v50 = vld [vmem:[%s9198_s26 + $0x720] sm:$0xff]  ;;  %v1079_v51 = vld [vmem:[%s9198_s26 + $0x730] sm:$0xff] }
  0x4b   : > { %v1081_v52 = vld [vmem:[%s9198_s26 + $0x740] sm:$0xff]  ;;  %1078 = vst [vmem:[%s9203_s27 + $0x390] sm:$0xff] %v1077_v50  ;;  %1080 = vst [vmem:[%s9203_s27 + $0x398] sm:$0xff] %v1079_v51  ;;  %v1083_v53 = vld [vmem:[%s9198_s26 + $0x750] sm:$0xff] }
  0x4c   : > { %1082 = vst [vmem:[%s9203_s27 + $0x3a0] sm:$0xff] %v1081_v52  ;;  %v1085_v54 = vld [vmem:[%s9198_s26 + $0x760] sm:$0xff]  ;;  %v1087_v55 = vld [vmem:[%s9198_s26 + $0x770] sm:$0xff]  ;;  %1084 = vst [vmem:[%s9203_s27 + $0x3a8] sm:$0xff] %v1083_v53 }
  0x4d   : > { %1086 = vst [vmem:[%s9203_s27 + $0x3b0] sm:$0xff] %v1085_v54  ;;  %1088 = vst [vmem:[%s9203_s27 + $0x3b8] sm:$0xff] %v1087_v55  ;;  %v1089_v56 = vld [vmem:[%s9198_s26 + $0x780] sm:$0xff]  ;;  %v1091_v57 = vld [vmem:[%s9198_s26 + $0x790] sm:$0xff] }
  0x4e   : > { %v1093_v58 = vld [vmem:[%s9198_s26 + $0x7a0] sm:$0xff]  ;;  %1090 = vst [vmem:[%s9203_s27 + $0x3c0] sm:$0xff] %v1089_v56  ;;  %1092 = vst [vmem:[%s9203_s27 + $0x3c8] sm:$0xff] %v1091_v57  ;;  %v1095_v59 = vld [vmem:[%s9198_s26 + $0x7b0] sm:$0xff] }
  0x4f   : > { %1094 = vst [vmem:[%s9203_s27 + $0x3d0] sm:$0xff] %v1093_v58  ;;  %v1097_v60 = vld [vmem:[%s9198_s26 + $0x7c0] sm:$0xff]  ;;  %v1099_v61 = vld [vmem:[%s9198_s26 + $0x7d0] sm:$0xff]  ;;  %1096 = vst [vmem:[%s9203_s27 + $0x3d8] sm:$0xff] %v1095_v59 }
  0x50   : > { %1098 = vst [vmem:[%s9203_s27 + $0x3e0] sm:$0xff] %v1097_v60  ;;  %1100 = vst [vmem:[%s9203_s27 + $0x3e8] sm:$0xff] %v1099_v61  ;;  %v1101_v62 = vld [vmem:[%s9198_s26 + $0x7e0] sm:$0xff]  ;;  %v1103_v63 = vld [vmem:[%s9198_s26 + $0x7f0] sm:$0xff] }
  0x51   : > { %v1105_v0 = vld [vmem:[%s9198_s26 + $0x800] sm:$0xff]  ;;  %1102 = vst [vmem:[%s9203_s27 + $0x3f0] sm:$0xff] %v1101_v62  ;;  %1104 = vst [vmem:[%s9203_s27 + $0x3f8] sm:$0xff] %v1103_v63  ;;  %v1107_v1 = vld [vmem:[%s9198_s26 + $0x810] sm:$0xff] }
  0x52   : > { %1106 = vst [vmem:[%s9203_s27 + $0x400] sm:$0xff] %v1105_v0  ;;  %v1109_v2 = vld [vmem:[%s9198_s26 + $0x820] sm:$0xff]  ;;  %v1111_v3 = vld [vmem:[%s9198_s26 + $0x830] sm:$0xff]  ;;  %1108 = vst [vmem:[%s9203_s27 + $0x408] sm:$0xff] %v1107_v1 }
  0x53   : > { %1110 = vst [vmem:[%s9203_s27 + $0x410] sm:$0xff] %v1109_v2  ;;  %1112 = vst [vmem:[%s9203_s27 + $0x418] sm:$0xff] %v1111_v3  ;;  %v1113_v4 = vld [vmem:[%s9198_s26 + $0x840] sm:$0xff]  ;;  %v1115_v5 = vld [vmem:[%s9198_s26 + $0x850] sm:$0xff] }
  0x54   : > { %v1117_v6 = vld [vmem:[%s9198_s26 + $0x860] sm:$0xff]  ;;  %1114 = vst [vmem:[%s9203_s27 + $0x420] sm:$0xff] %v1113_v4  ;;  %1116 = vst [vmem:[%s9203_s27 + $0x428] sm:$0xff] %v1115_v5  ;;  %v1119_v7 = vld [vmem:[%s9198_s26 + $0x870] sm:$0xff] }
  0x55   : > { %1118 = vst [vmem:[%s9203_s27 + $0x430] sm:$0xff] %v1117_v6  ;;  %v1121_v8 = vld [vmem:[%s9198_s26 + $0x880] sm:$0xff]  ;;  %v1123_v9 = vld [vmem:[%s9198_s26 + $0x890] sm:$0xff]  ;;  %1120 = vst [vmem:[%s9203_s27 + $0x438] sm:$0xff] %v1119_v7 }
  0x56   : > { %1122 = vst [vmem:[%s9203_s27 + $0x440] sm:$0xff] %v1121_v8  ;;  %1124 = vst [vmem:[%s9203_s27 + $0x448] sm:$0xff] %v1123_v9  ;;  %v1125_v10 = vld [vmem:[%s9198_s26 + $0x8a0] sm:$0xff]  ;;  %v1127_v11 = vld [vmem:[%s9198_s26 + $0x8b0] sm:$0xff] }
  0x57   : > { %v1129_v12 = vld [vmem:[%s9198_s26 + $0x8c0] sm:$0xff]  ;;  %1126 = vst [vmem:[%s9203_s27 + $0x450] sm:$0xff] %v1125_v10  ;;  %1128 = vst [vmem:[%s9203_s27 + $0x458] sm:$0xff] %v1127_v11  ;;  %v1131_v13 = vld [vmem:[%s9198_s26 + $0x8d0] sm:$0xff] }
  0x58   : > { %1130 = vst [vmem:[%s9203_s27 + $0x460] sm:$0xff] %v1129_v12  ;;  %v1133_v14 = vld [vmem:[%s9198_s26 + $0x8e0] sm:$0xff]  ;;  %v1135_v15 = vld [vmem:[%s9198_s26 + $0x8f0] sm:$0xff]  ;;  %1132 = vst [vmem:[%s9203_s27 + $0x468] sm:$0xff] %v1131_v13 }
  0x59   : > { %1134 = vst [vmem:[%s9203_s27 + $0x470] sm:$0xff] %v1133_v14  ;;  %1136 = vst [vmem:[%s9203_s27 + $0x478] sm:$0xff] %v1135_v15  ;;  %v1137_v16 = vld [vmem:[%s9198_s26 + $0x900] sm:$0xff]  ;;  %v1139_v17 = vld [vmem:[%s9198_s26 + $0x910] sm:$0xff] }
  0x5a   : > { %v1141_v18 = vld [vmem:[%s9198_s26 + $0x920] sm:$0xff]  ;;  %1138 = vst [vmem:[%s9203_s27 + $0x480] sm:$0xff] %v1137_v16  ;;  %1140 = vst [vmem:[%s9203_s27 + $0x488] sm:$0xff] %v1139_v17  ;;  %v1143_v19 = vld [vmem:[%s9198_s26 + $0x930] sm:$0xff] }
  0x5b   : > { %1142 = vst [vmem:[%s9203_s27 + $0x490] sm:$0xff] %v1141_v18  ;;  %v1145_v20 = vld [vmem:[%s9198_s26 + $0x940] sm:$0xff]  ;;  %v1147_v21 = vld [vmem:[%s9198_s26 + $0x950] sm:$0xff]  ;;  %1144 = vst [vmem:[%s9203_s27 + $0x498] sm:$0xff] %v1143_v19 }
  0x5c   : > { %1146 = vst [vmem:[%s9203_s27 + $0x4a0] sm:$0xff] %v1145_v20  ;;  %1148 = vst [vmem:[%s9203_s27 + $0x4a8] sm:$0xff] %v1147_v21  ;;  %v1149_v22 = vld [vmem:[%s9198_s26 + $0x960] sm:$0xff]  ;;  %v1151_v23 = vld [vmem:[%s9198_s26 + $0x970] sm:$0xff] }
  0x5d   : > { %v1153_v24 = vld [vmem:[%s9198_s26 + $0x980] sm:$0xff]  ;;  %1150 = vst [vmem:[%s9203_s27 + $0x4b0] sm:$0xff] %v1149_v22  ;;  %1152 = vst [vmem:[%s9203_s27 + $0x4b8] sm:$0xff] %v1151_v23  ;;  %v1155_v25 = vld [vmem:[%s9198_s26 + $0x990] sm:$0xff] }
  0x5e   : > { %1154 = vst [vmem:[%s9203_s27 + $0x4c0] sm:$0xff] %v1153_v24  ;;  %v1157_v26 = vld [vmem:[%s9198_s26 + $0x9a0] sm:$0xff]  ;;  %v1159_v27 = vld [vmem:[%s9198_s26 + $0x9b0] sm:$0xff]  ;;  %1156 = vst [vmem:[%s9203_s27 + $0x4c8] sm:$0xff] %v1155_v25 }
  0x5f   : > { %1158 = vst [vmem:[%s9203_s27 + $0x4d0] sm:$0xff] %v1157_v26  ;;  %1160 = vst [vmem:[%s9203_s27 + $0x4d8] sm:$0xff] %v1159_v27  ;;  %v1161_v28 = vld [vmem:[%s9198_s26 + $0x9c0] sm:$0xff]  ;;  %v1163_v29 = vld [vmem:[%s9198_s26 + $0x9d0] sm:$0xff] }
  0x60   : > { %v1165_v30 = vld [vmem:[%s9198_s26 + $0x9e0] sm:$0xff]  ;;  %1162 = vst [vmem:[%s9203_s27 + $0x4e0] sm:$0xff] %v1161_v28  ;;  %1164 = vst [vmem:[%s9203_s27 + $0x4e8] sm:$0xff] %v1163_v29  ;;  %v1167_v31 = vld [vmem:[%s9198_s26 + $0x9f0] sm:$0xff] }
  0x61   : > { %1166 = vst [vmem:[%s9203_s27 + $0x4f0] sm:$0xff] %v1165_v30  ;;  %v1169_v32 = vld [vmem:[%s9198_s26 + $0xa00] sm:$0xff]  ;;  %v1171_v33 = vld [vmem:[%s9198_s26 + $0xa10] sm:$0xff]  ;;  %1168 = vst [vmem:[%s9203_s27 + $0x4f8] sm:$0xff] %v1167_v31 }
  0x62   : > { %1170 = vst [vmem:[%s9203_s27 + $0x500] sm:$0xff] %v1169_v32  ;;  %1172 = vst [vmem:[%s9203_s27 + $0x508] sm:$0xff] %v1171_v33  ;;  %v1173_v34 = vld [vmem:[%s9198_s26 + $0xa20] sm:$0xff]  ;;  %v1175_v35 = vld [vmem:[%s9198_s26 + $0xa30] sm:$0xff] }
  0x63   : > { %v1177_v36 = vld [vmem:[%s9198_s26 + $0xa40] sm:$0xff]  ;;  %1174 = vst [vmem:[%s9203_s27 + $0x510] sm:$0xff] %v1173_v34  ;;  %1176 = vst [vmem:[%s9203_s27 + $0x518] sm:$0xff] %v1175_v35  ;;  %v1179_v37 = vld [vmem:[%s9198_s26 + $0xa50] sm:$0xff] }
  0x64   : > { %1178 = vst [vmem:[%s9203_s27 + $0x520] sm:$0xff] %v1177_v36  ;;  %v1181_v38 = vld [vmem:[%s9198_s26 + $0xa60] sm:$0xff]  ;;  %v1183_v39 = vld [vmem:[%s9198_s26 + $0xa70] sm:$0xff]  ;;  %1180 = vst [vmem:[%s9203_s27 + $0x528] sm:$0xff] %v1179_v37 }
  0x65   : > { %1182 = vst [vmem:[%s9203_s27 + $0x530] sm:$0xff] %v1181_v38  ;;  %1184 = vst [vmem:[%s9203_s27 + $0x538] sm:$0xff] %v1183_v39  ;;  %v1185_v40 = vld [vmem:[%s9198_s26 + $0xa80] sm:$0xff]  ;;  %v1187_v41 = vld [vmem:[%s9198_s26 + $0xa90] sm:$0xff] }
  0x66   : > { %v1189_v42 = vld [vmem:[%s9198_s26 + $0xaa0] sm:$0xff]  ;;  %1186 = vst [vmem:[%s9203_s27 + $0x540] sm:$0xff] %v1185_v40  ;;  %1188 = vst [vmem:[%s9203_s27 + $0x548] sm:$0xff] %v1187_v41  ;;  %v1191_v43 = vld [vmem:[%s9198_s26 + $0xab0] sm:$0xff] }
  0x67   : > { %1190 = vst [vmem:[%s9203_s27 + $0x550] sm:$0xff] %v1189_v42  ;;  %v1193_v44 = vld [vmem:[%s9198_s26 + $0xac0] sm:$0xff]  ;;  %v1195_v45 = vld [vmem:[%s9198_s26 + $0xad0] sm:$0xff]  ;;  %1192 = vst [vmem:[%s9203_s27 + $0x558] sm:$0xff] %v1191_v43 }
  0x68   : > { %1194 = vst [vmem:[%s9203_s27 + $0x560] sm:$0xff] %v1193_v44  ;;  %1196 = vst [vmem:[%s9203_s27 + $0x568] sm:$0xff] %v1195_v45  ;;  %v1197_v46 = vld [vmem:[%s9198_s26 + $0xae0] sm:$0xff]  ;;  %v1199_v47 = vld [vmem:[%s9198_s26 + $0xaf0] sm:$0xff] }
  0x69   : > { %v1201_v48 = vld [vmem:[%s9198_s26 + $0xb00] sm:$0xff]  ;;  %1198 = vst [vmem:[%s9203_s27 + $0x570] sm:$0xff] %v1197_v46  ;;  %1200 = vst [vmem:[%s9203_s27 + $0x578] sm:$0xff] %v1199_v47  ;;  %v1203_v49 = vld [vmem:[%s9198_s26 + $0xb10] sm:$0xff] }
  0x6a   : > { %1202 = vst [vmem:[%s9203_s27 + $0x580] sm:$0xff] %v1201_v48  ;;  %v1205_v50 = vld [vmem:[%s9198_s26 + $0xb20] sm:$0xff]  ;;  %v1207_v51 = vld [vmem:[%s9198_s26 + $0xb30] sm:$0xff]  ;;  %1204 = vst [vmem:[%s9203_s27 + $0x588] sm:$0xff] %v1203_v49 }
  0x6b   : > { %1206 = vst [vmem:[%s9203_s27 + $0x590] sm:$0xff] %v1205_v50  ;;  %1208 = vst [vmem:[%s9203_s27 + $0x598] sm:$0xff] %v1207_v51  ;;  %v1209_v52 = vld [vmem:[%s9198_s26 + $0xb40] sm:$0xff]  ;;  %v1211_v53 = vld [vmem:[%s9198_s26 + $0xb50] sm:$0xff] }
  0x6c   : > { %v1213_v54 = vld [vmem:[%s9198_s26 + $0xb60] sm:$0xff]  ;;  %1210 = vst [vmem:[%s9203_s27 + $0x5a0] sm:$0xff] %v1209_v52  ;;  %1212 = vst [vmem:[%s9203_s27 + $0x5a8] sm:$0xff] %v1211_v53  ;;  %v1215_v55 = vld [vmem:[%s9198_s26 + $0xb70] sm:$0xff] }
  0x6d   : > { %1214 = vst [vmem:[%s9203_s27 + $0x5b0] sm:$0xff] %v1213_v54  ;;  %v1217_v56 = vld [vmem:[%s9198_s26 + $0xb80] sm:$0xff]  ;;  %v1219_v57 = vld [vmem:[%s9198_s26 + $0xb90] sm:$0xff]  ;;  %1216 = vst [vmem:[%s9203_s27 + $0x5b8] sm:$0xff] %v1215_v55 }
  0x6e   : > { %1218 = vst [vmem:[%s9203_s27 + $0x5c0] sm:$0xff] %v1217_v56  ;;  %1220 = vst [vmem:[%s9203_s27 + $0x5c8] sm:$0xff] %v1219_v57  ;;  %v1221_v58 = vld [vmem:[%s9198_s26 + $0xba0] sm:$0xff]  ;;  %v1223_v59 = vld [vmem:[%s9198_s26 + $0xbb0] sm:$0xff] }
  0x6f   : > { %v1225_v60 = vld [vmem:[%s9198_s26 + $0xbc0] sm:$0xff]  ;;  %1222 = vst [vmem:[%s9203_s27 + $0x5d0] sm:$0xff] %v1221_v58  ;;  %1224 = vst [vmem:[%s9203_s27 + $0x5d8] sm:$0xff] %v1223_v59  ;;  %v1227_v61 = vld [vmem:[%s9198_s26 + $0xbd0] sm:$0xff] }
  0x70   : > { %1226 = vst [vmem:[%s9203_s27 + $0x5e0] sm:$0xff] %v1225_v60  ;;  %v1229_v62 = vld [vmem:[%s9198_s26 + $0xbe0] sm:$0xff]  ;;  %v1231_v63 = vld [vmem:[%s9198_s26 + $0xbf0] sm:$0xff]  ;;  %1228 = vst [vmem:[%s9203_s27 + $0x5e8] sm:$0xff] %v1227_v61 }
  0x71   : > { %1230 = vst [vmem:[%s9203_s27 + $0x5f0] sm:$0xff] %v1229_v62  ;;  %1232 = vst [vmem:[%s9203_s27 + $0x5f8] sm:$0xff] %v1231_v63  ;;  %v1233_v0 = vld [vmem:[%s9198_s26 + $0xc00] sm:$0xff]  ;;  %v1235_v1 = vld [vmem:[%s9198_s26 + $0xc10] sm:$0xff] }
  0x72   : > { %v1237_v2 = vld [vmem:[%s9198_s26 + $0xc20] sm:$0xff]  ;;  %1234 = vst [vmem:[%s9203_s27 + $0x600] sm:$0xff] %v1233_v0  ;;  %1236 = vst [vmem:[%s9203_s27 + $0x608] sm:$0xff] %v1235_v1  ;;  %v1239_v3 = vld [vmem:[%s9198_s26 + $0xc30] sm:$0xff] }
  0x73   : > { %1238 = vst [vmem:[%s9203_s27 + $0x610] sm:$0xff] %v1237_v2  ;;  %v1241_v4 = vld [vmem:[%s9198_s26 + $0xc40] sm:$0xff]  ;;  %v1243_v5 = vld [vmem:[%s9198_s26 + $0xc50] sm:$0xff]  ;;  %1240 = vst [vmem:[%s9203_s27 + $0x618] sm:$0xff] %v1239_v3 }
  0x74   : > { %1242 = vst [vmem:[%s9203_s27 + $0x620] sm:$0xff] %v1241_v4  ;;  %1244 = vst [vmem:[%s9203_s27 + $0x628] sm:$0xff] %v1243_v5  ;;  %v1245_v6 = vld [vmem:[%s9198_s26 + $0xc60] sm:$0xff]  ;;  %v1247_v7 = vld [vmem:[%s9198_s26 + $0xc70] sm:$0xff] }
  0x75   : > { %v1249_v8 = vld [vmem:[%s9198_s26 + $0xc80] sm:$0xff]  ;;  %1246 = vst [vmem:[%s9203_s27 + $0x630] sm:$0xff] %v1245_v6  ;;  %1248 = vst [vmem:[%s9203_s27 + $0x638] sm:$0xff] %v1247_v7  ;;  %v1251_v9 = vld [vmem:[%s9198_s26 + $0xc90] sm:$0xff] }
  0x76   : > { %1250 = vst [vmem:[%s9203_s27 + $0x640] sm:$0xff] %v1249_v8  ;;  %v1253_v10 = vld [vmem:[%s9198_s26 + $0xca0] sm:$0xff]  ;;  %v1255_v11 = vld [vmem:[%s9198_s26 + $0xcb0] sm:$0xff]  ;;  %1252 = vst [vmem:[%s9203_s27 + $0x648] sm:$0xff] %v1251_v9 }
  0x77   : > { %1254 = vst [vmem:[%s9203_s27 + $0x650] sm:$0xff] %v1253_v10  ;;  %1256 = vst [vmem:[%s9203_s27 + $0x658] sm:$0xff] %v1255_v11  ;;  %v1257_v12 = vld [vmem:[%s9198_s26 + $0xcc0] sm:$0xff]  ;;  %v1259_v13 = vld [vmem:[%s9198_s26 + $0xcd0] sm:$0xff] }
  0x78   : > { %v1261_v14 = vld [vmem:[%s9198_s26 + $0xce0] sm:$0xff]  ;;  %1258 = vst [vmem:[%s9203_s27 + $0x660] sm:$0xff] %v1257_v12  ;;  %1260 = vst [vmem:[%s9203_s27 + $0x668] sm:$0xff] %v1259_v13  ;;  %v1263_v15 = vld [vmem:[%s9198_s26 + $0xcf0] sm:$0xff] }
  0x79   : > { %1262 = vst [vmem:[%s9203_s27 + $0x670] sm:$0xff] %v1261_v14  ;;  %v1265_v16 = vld [vmem:[%s9198_s26 + $0xd00] sm:$0xff]  ;;  %v1267_v17 = vld [vmem:[%s9198_s26 + $0xd10] sm:$0xff]  ;;  %1264 = vst [vmem:[%s9203_s27 + $0x678] sm:$0xff] %v1263_v15 }
  0x7a   : > { %1266 = vst [vmem:[%s9203_s27 + $0x680] sm:$0xff] %v1265_v16  ;;  %1268 = vst [vmem:[%s9203_s27 + $0x688] sm:$0xff] %v1267_v17  ;;  %v1269_v18 = vld [vmem:[%s9198_s26 + $0xd20] sm:$0xff]  ;;  %v1271_v19 = vld [vmem:[%s9198_s26 + $0xd30] sm:$0xff] }
  0x7b   : > { %v1273_v20 = vld [vmem:[%s9198_s26 + $0xd40] sm:$0xff]  ;;  %1270 = vst [vmem:[%s9203_s27 + $0x690] sm:$0xff] %v1269_v18  ;;  %1272 = vst [vmem:[%s9203_s27 + $0x698] sm:$0xff] %v1271_v19  ;;  %v1275_v21 = vld [vmem:[%s9198_s26 + $0xd50] sm:$0xff] }
  0x7c   : > { %1274 = vst [vmem:[%s9203_s27 + $0x6a0] sm:$0xff] %v1273_v20  ;;  %v1277_v22 = vld [vmem:[%s9198_s26 + $0xd60] sm:$0xff]  ;;  %v1279_v23 = vld [vmem:[%s9198_s26 + $0xd70] sm:$0xff]  ;;  %1276 = vst [vmem:[%s9203_s27 + $0x6a8] sm:$0xff] %v1275_v21 }
  0x7d   : > { %1278 = vst [vmem:[%s9203_s27 + $0x6b0] sm:$0xff] %v1277_v22  ;;  %1280 = vst [vmem:[%s9203_s27 + $0x6b8] sm:$0xff] %v1279_v23  ;;  %v1281_v24 = vld [vmem:[%s9198_s26 + $0xd80] sm:$0xff]  ;;  %v1283_v25 = vld [vmem:[%s9198_s26 + $0xd90] sm:$0xff] }
  0x7e   : > { %v1285_v26 = vld [vmem:[%s9198_s26 + $0xda0] sm:$0xff]  ;;  %1282 = vst [vmem:[%s9203_s27 + $0x6c0] sm:$0xff] %v1281_v24  ;;  %1284 = vst [vmem:[%s9203_s27 + $0x6c8] sm:$0xff] %v1283_v25  ;;  %v1287_v27 = vld [vmem:[%s9198_s26 + $0xdb0] sm:$0xff] }
  0x7f   : > { %1286 = vst [vmem:[%s9203_s27 + $0x6d0] sm:$0xff] %v1285_v26  ;;  %v1289_v28 = vld [vmem:[%s9198_s26 + $0xdc0] sm:$0xff]  ;;  %v1291_v29 = vld [vmem:[%s9198_s26 + $0xdd0] sm:$0xff]  ;;  %1288 = vst [vmem:[%s9203_s27 + $0x6d8] sm:$0xff] %v1287_v27 }
  0x80   : > { %1290 = vst [vmem:[%s9203_s27 + $0x6e0] sm:$0xff] %v1289_v28  ;;  %1292 = vst [vmem:[%s9203_s27 + $0x6e8] sm:$0xff] %v1291_v29  ;;  %v1293_v30 = vld [vmem:[%s9198_s26 + $0xde0] sm:$0xff]  ;;  %v1295_v31 = vld [vmem:[%s9198_s26 + $0xdf0] sm:$0xff] }
  0x81   : > { %v1297_v32 = vld [vmem:[%s9198_s26 + $0xe00] sm:$0xff]  ;;  %1294 = vst [vmem:[%s9203_s27 + $0x6f0] sm:$0xff] %v1293_v30  ;;  %1296 = vst [vmem:[%s9203_s27 + $0x6f8] sm:$0xff] %v1295_v31  ;;  %v1299_v33 = vld [vmem:[%s9198_s26 + $0xe10] sm:$0xff] }
  0x82   : > { %1298 = vst [vmem:[%s9203_s27 + $0x700] sm:$0xff] %v1297_v32  ;;  %v1301_v34 = vld [vmem:[%s9198_s26 + $0xe20] sm:$0xff]  ;;  %v1303_v35 = vld [vmem:[%s9198_s26 + $0xe30] sm:$0xff]  ;;  %1300 = vst [vmem:[%s9203_s27 + $0x708] sm:$0xff] %v1299_v33 }
  0x83   : > { %1302 = vst [vmem:[%s9203_s27 + $0x710] sm:$0xff] %v1301_v34  ;;  %1304 = vst [vmem:[%s9203_s27 + $0x718] sm:$0xff] %v1303_v35  ;;  %v1305_v36 = vld [vmem:[%s9198_s26 + $0xe40] sm:$0xff]  ;;  %v1307_v37 = vld [vmem:[%s9198_s26 + $0xe50] sm:$0xff] }
  0x84   : > { %v1309_v38 = vld [vmem:[%s9198_s26 + $0xe60] sm:$0xff]  ;;  %1306 = vst [vmem:[%s9203_s27 + $0x720] sm:$0xff] %v1305_v36  ;;  %1308 = vst [vmem:[%s9203_s27 + $0x728] sm:$0xff] %v1307_v37  ;;  %v1311_v39 = vld [vmem:[%s9198_s26 + $0xe70] sm:$0xff] }
  0x85   : > { %1310 = vst [vmem:[%s9203_s27 + $0x730] sm:$0xff] %v1309_v38  ;;  %v1313_v40 = vld [vmem:[%s9198_s26 + $0xe80] sm:$0xff]  ;;  %v1315_v41 = vld [vmem:[%s9198_s26 + $0xe90] sm:$0xff]  ;;  %1312 = vst [vmem:[%s9203_s27 + $0x738] sm:$0xff] %v1311_v39 }
  0x86   : > { %1314 = vst [vmem:[%s9203_s27 + $0x740] sm:$0xff] %v1313_v40  ;;  %1316 = vst [vmem:[%s9203_s27 + $0x748] sm:$0xff] %v1315_v41  ;;  %v1317_v42 = vld [vmem:[%s9198_s26 + $0xea0] sm:$0xff]  ;;  %v1319_v43 = vld [vmem:[%s9198_s26 + $0xeb0] sm:$0xff] }
  0x87   : > { %v1321_v44 = vld [vmem:[%s9198_s26 + $0xec0] sm:$0xff]  ;;  %1318 = vst [vmem:[%s9203_s27 + $0x750] sm:$0xff] %v1317_v42  ;;  %1320 = vst [vmem:[%s9203_s27 + $0x758] sm:$0xff] %v1319_v43  ;;  %v1323_v45 = vld [vmem:[%s9198_s26 + $0xed0] sm:$0xff] }
  0x88   : > { %1322 = vst [vmem:[%s9203_s27 + $0x760] sm:$0xff] %v1321_v44  ;;  %v1325_v46 = vld [vmem:[%s9198_s26 + $0xee0] sm:$0xff]  ;;  %v1327_v47 = vld [vmem:[%s9198_s26 + $0xef0] sm:$0xff]  ;;  %1324 = vst [vmem:[%s9203_s27 + $0x768] sm:$0xff] %v1323_v45 }
  0x89   : > { %1326 = vst [vmem:[%s9203_s27 + $0x770] sm:$0xff] %v1325_v46  ;;  %1328 = vst [vmem:[%s9203_s27 + $0x778] sm:$0xff] %v1327_v47  ;;  %v1329_v48 = vld [vmem:[%s9198_s26 + $0xf00] sm:$0xff]  ;;  %v1331_v49 = vld [vmem:[%s9198_s26 + $0xf10] sm:$0xff] }
  0x8a   : > { %v1333_v50 = vld [vmem:[%s9198_s26 + $0xf20] sm:$0xff]  ;;  %1330 = vst [vmem:[%s9203_s27 + $0x780] sm:$0xff] %v1329_v48  ;;  %1332 = vst [vmem:[%s9203_s27 + $0x788] sm:$0xff] %v1331_v49  ;;  %v1335_v51 = vld [vmem:[%s9198_s26 + $0xf30] sm:$0xff] }
  0x8b   : > { %1334 = vst [vmem:[%s9203_s27 + $0x790] sm:$0xff] %v1333_v50  ;;  %v1337_v52 = vld [vmem:[%s9198_s26 + $0xf40] sm:$0xff]  ;;  %v1339_v53 = vld [vmem:[%s9198_s26 + $0xf50] sm:$0xff]  ;;  %1336 = vst [vmem:[%s9203_s27 + $0x798] sm:$0xff] %v1335_v51 }
  0x8c   : > { %1338 = vst [vmem:[%s9203_s27 + $0x7a0] sm:$0xff] %v1337_v52  ;;  %1340 = vst [vmem:[%s9203_s27 + $0x7a8] sm:$0xff] %v1339_v53  ;;  %v1341_v54 = vld [vmem:[%s9198_s26 + $0xf60] sm:$0xff]  ;;  %v1343_v55 = vld [vmem:[%s9198_s26 + $0xf70] sm:$0xff] }
  0x8d   : > { %v1345_v56 = vld [vmem:[%s9198_s26 + $0xf80] sm:$0xff]  ;;  %1342 = vst [vmem:[%s9203_s27 + $0x7b0] sm:$0xff] %v1341_v54  ;;  %1344 = vst [vmem:[%s9203_s27 + $0x7b8] sm:$0xff] %v1343_v55  ;;  %v1347_v57 = vld [vmem:[%s9198_s26 + $0xf90] sm:$0xff] }
  0x8e   : > { %1346 = vst [vmem:[%s9203_s27 + $0x7c0] sm:$0xff] %v1345_v56  ;;  %v1349_v58 = vld [vmem:[%s9198_s26 + $0xfa0] sm:$0xff]  ;;  %v1351_v59 = vld [vmem:[%s9198_s26 + $0xfb0] sm:$0xff]  ;;  %1348 = vst [vmem:[%s9203_s27 + $0x7c8] sm:$0xff] %v1347_v57 }
  0x8f   : > { %1350 = vst [vmem:[%s9203_s27 + $0x7d0] sm:$0xff] %v1349_v58  ;;  %1352 = vst [vmem:[%s9203_s27 + $0x7d8] sm:$0xff] %v1351_v59  ;;  %v1353_v60 = vld [vmem:[%s9198_s26 + $0xfc0] sm:$0xff]  ;;  %v1355_v61 = vld [vmem:[%s9198_s26 + $0xfd0] sm:$0xff] }
  0x90   : > { %v1357_v62 = vld [vmem:[%s9198_s26 + $0xfe0] sm:$0xff]  ;;  %1354 = vst [vmem:[%s9203_s27 + $0x7e0] sm:$0xff] %v1353_v60  ;;  %1356 = vst [vmem:[%s9203_s27 + $0x7e8] sm:$0xff] %v1355_v61  ;;  %v1359_v63 = vld [vmem:[%s9198_s26 + $0xff0] sm:$0xff] }
  0x91   : > { %1358 = vst [vmem:[%s9203_s27 + $0x7f0] sm:$0xff] %v1357_v62  ;;  %1360 = vst [vmem:[%s9203_s27 + $0x7f8] sm:$0xff] %v1359_v63 }
  0x92 PF: > { %p7283_p5 = scmp.ge.s32.totalorder %s9103_s15, 1  ;;  %p1365_p6 = scmp.lt.s32.totalorder %s9103_s15, 3 }
  0x94   : > { %p1366_p7 = pnand %p7283_p5, %p1365_p6 }
  0x96   : > { %1369 = sbr.rel (%p1366_p7) target bundleno = 2846 (0xb1e), region = 94 }
  0x9d   : > { %v8771_v0 = vld [vmem:[%s12968_s1] sm:$0xff]   ;;  %v12985_v1 = vmov 0   ;;  %v8772_v2 = vld [vmem:[%s12968_s1 + $0x8] sm:$0xff]   ;;  %v12978_v3 = vmov 0.0|0.0   ;;  %v8773_v4 = vld [vmem:[%s12968_s1 + $0x10] sm:$0xff]   ;;  %s1372_s12 = sand.u32 1, %s9095_s13  }
  0x9e   : > { %2445 = vmatprep.subr.bf16.mxu0 %v12985_v1  ;;  %8297 = vmatprep.subr.bf16.mxu1 %v12985_v1  ;;  %v8774_v5 = vld [vmem:[%s12968_s1 + $0x18] sm:$0xff]   ;;  %v8775_v6 = vld [vmem:[%s12968_s1 + $0x20] sm:$0xff]   ;;  %v8776_v7 = vld [vmem:[%s12968_s1 + $0x28] sm:$0xff]   ;;  %s7284_s13 = sshll.u32 %s1372_s12, 11  ;;  %v12981_v35 = vmov 0.0   ;;  %p1408_p8 = scmp.lt.s32.totalorder %s7277_s16, 1 }
  0x9f   : > { %2446 = vmatpush1.bf16.msra.mxu0 %v8771_v0  ;;  %2477 = vmatprep.mubr.bf16.mxu0 %v12978_v3  ;;  %v8777_v8 = vld [vmem:[%s12968_s1 + $0x30] sm:$0xff]   ;;  %v8778_v9 = vld [vmem:[%s12968_s1 + $0x38] sm:$0xff]   ;;  %v8779_v10 = vld [vmem:[%s12968_s1 + $0x40] sm:$0xff]   ;;  %s9822_s29 = scalar_lea.vmem [#allocation2], %s7284_s13 }
  0xa0   : > { %2447 = vmatprep.subr.bf16.mxu0 %v12985_v1  ;;  %8313 = vmatpush1.bf16.msra.mxu1 %v8771_v0  ;;  %v8780_v11 = vld [vmem:[%s12968_s1 + $0x48] sm:$0xff]   ;;  %v8781_v12 = vld [vmem:[%s12968_s1 + $0x50] sm:$0xff]   ;;  %v8782_v13 = vld [vmem:[%s12968_s1 + $0x58] sm:$0xff]   ;;  %s13403_s16 = smov (!%p1408_p8, %s7277_s16), 1 }
  0xa1   : > { %8298 = vmatprep.subr.bf16.mxu1 %v12985_v1  ;;  %v8783_v14 = vld [vmem:[%s12968_s1 + $0x60] sm:$0xff]   ;;  %v8784_v15 = vld [vmem:[%s12968_s1 + $0x68] sm:$0xff]   ;;  %v8785_v16 = vld [vmem:[%s12968_s1 + $0x70] sm:$0xff]   ;;  %s7285_s24 = sshll.u32 %s13403_s16, 3 }
  0xa2   : > { %v8786_v17 = vld [vmem:[%s12968_s1 + $0x78] sm:$0xff]   ;;  %v8787_v18 = vld [vmem:[%s12968_s1 + $0x80] sm:$0xff]   ;;  %v8788_v19 = vld [vmem:[%s12968_s1 + $0x88] sm:$0xff]   ;;  %s1411_s27 = scalar_lea.vmem %s12977_s10, %s7285_s24 }
  0xa3   : > { %2448 = vmatpush1.bf16.msra.mxu0 %v8772_v2  ;;  %v8789_v20 = vld [vmem:[%s12968_s1 + $0x90] sm:$0xff]   ;;  %v8790_v21 = vld [vmem:[%s12968_s1 + $0x98] sm:$0xff]   ;;  %v8791_v22 = vld [vmem:[%s12968_s1 + $0xa0] sm:$0xff]  }
  0xa4   : > { %2449 = vmatprep.subr.bf16.mxu0 %v12985_v1  ;;  %8314 = vmatpush1.bf16.msra.mxu1 %v8772_v2  ;;  %v1433_v23 = vld [vmem:[%s9822_s29 + $0x88] sm:$0xff]  ;;  %v1432_v25 = vld [vmem:[%s9822_s29 + $0x80] sm:$0xff]  ;;  %v1434_v26 = vld [vmem:[%s9822_s29 + $0x90] sm:$0xff] }
  0xa5   : > { %8299 = vmatprep.subr.bf16.mxu1 %v12985_v1  ;;  %v8792_v24 = vld [vmem:[%s12968_s1 + $0xa8] sm:$0xff]   ;;  %v1435_v27 = vld [vmem:[%s9822_s29 + $0x98] sm:$0xff]  ;;  %v8793_v29 = vld [vmem:[%s12968_s1 + $0xb0] sm:$0xff]   ;;  %v9839_v30 = vpack.c.bf16 %v1434_v26, %v1432_v25  ;;  %v9854_v36 = vpack.c.bf16 %v1433_v23, %v12981_v35 }
  0xa6   : > { %v9833_v28 = vpack.c.bf16 %v1435_v27, %v1433_v23  ;;  %v1436_v31 = vld [vmem:[%s9822_s29 + $0xa0] sm:$0xff]  ;;  %v1438_v32 = vld [vmem:[%s9822_s29 + $0xb0] sm:$0xff]  ;;  %v8794_v33 = vld [vmem:[%s12968_s1 + $0xb8] sm:$0xff]  }
  0xa7   : > { %2450 = vmatpush1.bf16.msra.mxu0 %v8773_v4  ;;  %13090 = vst [vmem:[#allocation4_spill] sm:$0xff] %v9839_v30  ;;  %v8795_v34 = vld [vmem:[%s12968_s1 + $0xc0] sm:$0xff]   ;;  %13091 = vst [vmem:[#allocation5_spill] sm:$0xff] %v9854_v36  ;;  %v9856_v37 = vpack.c.bf16 %v1438_v32, %v1436_v31  ;;  %v9860_v38 = vld [vmem:[%s9822_s29 + $0xa8] sm:$0xff] }
  0xa8   : > { %2451 = vmatprep.subr.bf16.mxu0 %v12985_v1  ;;  %8315 = vmatpush1.bf16.msra.mxu1 %v8773_v4  ;;  %13089 = vst [vmem:[#allocation3_spill] sm:$0xff] %v9833_v28  ;;  %v1440_v39 = vld [vmem:[%s9822_s29 + $0xc0] sm:$0xff]  ;;  %v1442_v40 = vld [vmem:[%s9822_s29 + $0xd0] sm:$0xff]  ;;  %v8796_v41 = vld [vmem:[%s12968_s1 + $0xc8] sm:$0xff]   ;;  %v9874_v43 = vpack.c.bf16 %v9860_v38, %v1435_v27 }
  0xa9   : > { %8300 = vmatprep.subr.bf16.mxu1 %v12985_v1  ;;  %13092 = vst [vmem:[#allocation6_spill] sm:$0xff] %v9856_v37  ;;  %v8797_v42 = vld [vmem:[%s12968_s1 + $0xd0] sm:$0xff]   ;;  %v9876_v44 = vpack.c.bf16 %v1442_v40, %v1440_v39  ;;  %v9880_v45 = vld [vmem:[%s9822_s29 + $0xb8] sm:$0xff]  ;;  %v9884_v46 = vld [vmem:[%s9822_s29 + $0xc8] sm:$0xff] }
  0xaa   : > { %13093 = vst [vmem:[#allocation7_spill] sm:$0xff] %v9874_v43  ;;  %v1444_v47 = vld [vmem:[%s9822_s29 + $0xe0] sm:$0xff]  ;;  %v1446_v48 = vld [vmem:[%s9822_s29 + $0xf0] sm:$0xff]  ;;  %v8798_v49 = vld [vmem:[%s12968_s1 + $0xd8] sm:$0xff]   ;;  %v9898_v51 = vpack.c.bf16 %v9884_v46, %v9880_v45 }
  0xab   : > { %2452 = vmatpush1.bf16.msra.mxu0 %v8774_v5  ;;  %13094 = vst [vmem:[#allocation8_spill] sm:$0xff] %v9876_v44  ;;  %v8799_v50 = vld [vmem:[%s12968_s1 + $0xe0] sm:$0xff]   ;;  %v9900_v52 = vpack.c.bf16 %v1446_v48, %v1444_v47  ;;  %v9904_v53 = vld [vmem:[%s9822_s29 + $0xd8] sm:$0xff]  ;;  %v9907_v54 = vld [vmem:[%s9822_s29 + $0xe8] sm:$0xff] }
  0xac   : > { %2453 = vmatprep.subr.bf16.mxu0 %v12985_v1  ;;  %8316 = vmatpush1.bf16.msra.mxu1 %v8774_v5  ;;  %13095 = vst [vmem:[#allocation9_spill] sm:$0xff] %v9898_v51  ;;  %v1464_v55 = vld [vmem:[%s9822_s29 + $0x180] sm:$0xff]  ;;  %v1466_v56 = vld [vmem:[%s9822_s29 + $0x190] sm:$0xff]  ;;  %v8800_v57 = vld [vmem:[%s12968_s1 + $0xe8] sm:$0xff]   ;;  %v9922_v59 = vpack.c.bf16 %v9907_v54, %v9904_v53 }
  0xad   : > { %8301 = vmatprep.subr.bf16.mxu1 %v12985_v1  ;;  %13096 = vst [vmem:[#allocation10_spill] sm:$0xff] %v9900_v52  ;;  %v8801_v58 = vld [vmem:[%s12968_s1 + $0xf0] sm:$0xff]   ;;  %v9924_v60 = vpack.c.bf16 %v1466_v56, %v1464_v55  ;;  %v9928_v61 = vld [vmem:[%s9822_s29 + $0x188] sm:$0xff]  ;;  %v1468_v62 = vld [vmem:[%s9822_s29 + $0x1a0] sm:$0xff] }
  0xae   : > { %13097 = vst [vmem:[#allocation11_spill] sm:$0xff] %v9922_v59  ;;  %v1470_v63 = vld [vmem:[%s9822_s29 + $0x1b0] sm:$0xff]  ;;  %v8802_v0 = vld [vmem:[%s12968_s1 + $0xf8] sm:$0xff]   ;;  %v9940_v2 = vpack.c.bf16 %v9928_v61, %v12981_v35  ;;  %v9995_v23 = vld [vmem:[%s9822_s29 + $0x288] sm:$0xff] }
  0xaf   : > { %2454 = vmatpush1.bf16.msra.mxu0 %v8775_v6  ;;  %13098 = vst [vmem:[#allocation12_spill] sm:$0xff] %v9924_v60  ;;  %v9942_v4 = vpack.c.bf16 %v1470_v63, %v1468_v62  ;;  %v9946_v5 = vld [vmem:[%s9822_s29 + $0x198] sm:$0xff]  ;;  %v1502_v25 = vld [vmem:[%s9822_s29 + $0x2b0] sm:$0xff]  ;;  %v10002_v26 = vpack.c.bf16 %v9995_v23, %v12981_v35  ;;  %v10011_v31 = vld [vmem:[%s9822_s29 + $0x2a8] sm:$0xff] }
  0xb0   : > { %2455 = vmatprep.subr.bf16.mxu0 %v12985_v1  ;;  %8317 = vmatpush1.bf16.msra.mxu1 %v8775_v6  ;;  %13099 = vst [vmem:[#allocation13_spill] sm:$0xff] %v9940_v2  ;;  %v9949_v6 = vld [vmem:[%s9822_s29 + $0x1a8] sm:$0xff]  ;;  %v1504_v32 = vld [vmem:[%s9822_s29 + $0x2c0] sm:$0xff]  ;;  %v10024_v40 = vld [vmem:[%s9822_s29 + $0x2b8] sm:$0xff] }
  0xb1   : > { %8302 = vmatprep.subr.bf16.mxu1 %v12985_v1  ;;  %13100 = vst [vmem:[#allocation14_spill] sm:$0xff] %v9942_v4  ;;  %13107 = vst [vmem:[#allocation21_spill] sm:$0xff] %v10002_v26  ;;  %v8803_v55 = vld [vmem:[%s12968_s1 + $0x100] sm:$0xff]   ;;  %v8804_v62 = vld [vmem:[%s12968_s1 + $0x108] sm:$0xff]  }
  0xb2   : > { %v8805_v63 = vld [vmem:[%s12968_s1 + $0x110] sm:$0xff]  }
  0xb3   : > { %2456 = vmatpush1.bf16.msra.mxu0 %v8776_v7 }
  0xb4   : > { %2457 = vmatprep.subr.bf16.mxu0 %v12985_v1  ;;  %8318 = vmatpush1.bf16.msra.mxu1 %v8776_v7  ;;  %v1472_v7 = vld [vmem:[%s9822_s29 + $0x1c0] sm:$0xff] }
  0xb5   : > { %8303 = vmatprep.subr.bf16.mxu1 %v12985_v1 }
  0xb7   : > { %2458 = vmatpush1.bf16.msra.mxu0 %v8777_v8 }
  0xb8   : > { %2459 = vmatprep.subr.bf16.mxu0 %v12985_v1  ;;  %8319 = vmatpush1.bf16.msra.mxu1 %v8777_v8  ;;  %v1474_v8 = vld [vmem:[%s9822_s29 + $0x1d0] sm:$0xff] }
  0xb9   : > { %8304 = vmatprep.subr.bf16.mxu1 %v12985_v1 }
  0xbb   : > { %2460 = vmatpush1.bf16.msra.mxu0 %v8778_v9 }
  0xbc   : > { %2461 = vmatprep.subr.bf16.mxu0 %v12985_v1  ;;  %8320 = vmatpush1.bf16.msra.mxu1 %v8778_v9  ;;  %v9957_v9 = vpack.c.bf16 %v9949_v6, %v9946_v5 }
  0xbd   : > { %8305 = vmatprep.subr.bf16.mxu1 %v12985_v1 }
  0xbe   : > { %13101 = vst [vmem:[#allocation15_spill] sm:$0xff] %v9957_v9 }
  0xbf   : > { %2462 = vmatpush1.bf16.msra.mxu0 %v8779_v10 }
  0xc0   : > { %2463 = vmatprep.subr.bf16.mxu0 %v12985_v1  ;;  %8321 = vmatpush1.bf16.msra.mxu1 %v8779_v10  ;;  %v9959_v10 = vpack.c.bf16 %v1474_v8, %v1472_v7  ;;  %v10070_v7 = vld [vmem:[%s9822_s29 + $0x58] sm:$0xff]  ;;  %v10073_v8 = vld [vmem:[%s9822_s29 + $0x68] sm:$0xff] }
  0xc1   : > { %8306 = vmatprep.subr.bf16.mxu1 %v12985_v1 }
  0xc2   : > { %13102 = vst [vmem:[#allocation16_spill] sm:$0xff] %v9959_v10 }
  0xc3   : > { %2464 = vmatpush1.bf16.msra.mxu0 %v8780_v11 }
  0xc4   : > { %2465 = vmatprep.subr.bf16.mxu0 %v12985_v1  ;;  %8322 = vmatpush1.bf16.msra.mxu1 %v8780_v11  ;;  %v9963_v11 = vld [vmem:[%s9822_s29 + $0x1b8] sm:$0xff] }
  0xc5   : > { %8307 = vmatprep.subr.bf16.mxu1 %v12985_v1 }
  0xc7   : > { %2466 = vmatpush1.bf16.msra.mxu0 %v8781_v12 }
  0xc8   : > { %2467 = vmatprep.subr.bf16.mxu0 %v12985_v1  ;;  %8323 = vmatpush1.bf16.msra.mxu1 %v8781_v12  ;;  %v9966_v12 = vld [vmem:[%s9822_s29 + $0x1c8] sm:$0xff] }
  0xc9   : > { %8308 = vmatprep.subr.bf16.mxu1 %v12985_v1 }
  0xcb   : > { %2468 = vmatpush1.bf16.msra.mxu0 %v8782_v13 }
  0xcc   : > { %2469 = vmatprep.subr.bf16.mxu0 %v12985_v1  ;;  %8324 = vmatpush1.bf16.msra.mxu1 %v8782_v13  ;;  %v1476_v13 = vld [vmem:[%s9822_s29 + $0x1e0] sm:$0xff] }
  0xcd   : > { %8309 = vmatprep.subr.bf16.mxu1 %v12985_v1 }
  0xcf   : > { %2470 = vmatpush1.bf16.msra.mxu0 %v8783_v14 }
  0xd0   : > { %2471 = vmatprep.subr.bf16.mxu0 %v12985_v1  ;;  %8325 = vmatpush1.bf16.msra.mxu1 %v8783_v14  ;;  %v1478_v14 = vld [vmem:[%s9822_s29 + $0x1f0] sm:$0xff] }
  0xd1   : > { %8310 = vmatprep.subr.bf16.mxu1 %v12985_v1 }
  0xd3   : > { %2472 = vmatpush1.bf16.msra.mxu0 %v8784_v15 }
  0xd4   : > { %2473 = vmatprep.subr.bf16.mxu0 %v12985_v1  ;;  %8326 = vmatpush1.bf16.msra.mxu1 %v8784_v15  ;;  %v9973_v15 = vpack.c.bf16 %v9966_v12, %v9963_v11 }
  0xd5   : > { %8311 = vmatprep.subr.bf16.mxu1 %v12985_v1 }
  0xd6   : > { %13103 = vst [vmem:[#allocation17_spill] sm:$0xff] %v9973_v15 }
  0xd7   : > { %2474 = vmatpush1.bf16.msra.mxu0 %v8785_v16 }
  0xd8   : > { %2475 = vmatprep.subr.bf16.mxu0 %v12985_v1  ;;  %8327 = vmatpush1.bf16.msra.mxu1 %v8785_v16  ;;  %v9975_v16 = vpack.c.bf16 %v1478_v14, %v1476_v13  ;;  %v8806_v13 = vld [vmem:[%s12968_s1 + $0x118] sm:$0xff]   ;;  %v8807_v14 = vld [vmem:[%s12968_s1 + $0x120] sm:$0xff]  }
  0xd9   : > { %8312 = vmatprep.subr.bf16.mxu1 %v12985_v1 }
  0xda   : > { %13104 = vst [vmem:[#allocation18_spill] sm:$0xff] %v9975_v16 }
  0xdb   : > { %2476 = vmatpush1.bf16.msra.mxu0 %v8786_v17 }
  0xdc   : > { %2734 = vmatprep.subr.bf16.mxu0 %v12985_v1  ;;  %8328 = vmatpush1.bf16.msra.mxu1 %v8786_v17  ;;  %v9978_v17 = vld [vmem:[%s9822_s29 + $0x1d8] sm:$0xff] }
  0xde   : > { %2478 = vmatmul.mubr.bf16.vlgmr.msra.gmra.mrb[0].mxu0 %v12978_v3 }
  0xdf   : > { %2735 = vmatpush1.bf16.msra.mxu0 %v8787_v18  ;;  %2485 = vmatprep.mubr.bf16.mxu0 %v12978_v3  ;;  %v9981_v18 = vld [vmem:[%s9822_s29 + $0x1e8] sm:$0xff] }
  0xe0   : > { %2736 = vmatprep.subr.bf16.mxu0 %v12985_v1 }
  0xe3   : > { %2737 = vmatpush1.bf16.msra.mxu0 %v8788_v19  ;;  %v1496_v19 = vld [vmem:[%s9822_s29 + $0x280] sm:$0xff] }
  0xe4   : > { %2738 = vmatprep.subr.bf16.mxu0 %v12985_v1 }
  0xe6   : > { %2486 = vmatmul.mubr.bf16.gmra.mrb[4].mxu0 %v12978_v3 }
  0xe7   : > { %2493 = vmatprep.mubr.bf16.mxu0 %v12978_v3  ;;  %2739 = vmatpush1.bf16.msra.mxu0 %v8789_v20  ;;  %v1498_v20 = vld [vmem:[%s9822_s29 + $0x290] sm:$0xff] }
  0xe8   : > { %2740 = vmatprep.subr.bf16.mxu0 %v12985_v1 }
  0xeb   : > { %2741 = vmatpush1.bf16.msra.mxu0 %v8790_v21  ;;  %v9989_v21 = vpack.c.bf16 %v9981_v18, %v9978_v17 }
  0xec   : > { %2742 = vmatprep.subr.bf16.mxu0 %v12985_v1 }
  0xed   : > { %13105 = vst [vmem:[#allocation19_spill] sm:$0xff] %v9989_v21 }
  0xee   : > { %2494 = vmatmul.mubr.bf16.gmra.mrb[8].mxu0 %v12978_v3 }
  0xef   : > { %2501 = vmatprep.mubr.bf16.mxu0 %v12978_v3  ;;  %2743 = vmatpush1.bf16.msra.mxu0 %v8791_v22  ;;  %v9991_v22 = vpack.c.bf16 %v1498_v20, %v1496_v19  ;;  %v1691_v19 = vpack.c.bf16 %v10073_v8, %v10070_v7  ;;  %v10087_v20 = vld [vmem:[%s9822_s29 + $0x108] sm:$0xff] }
  0xf0   : > { %2744 = vmatprep.subr.bf16.mxu0 %v12985_v1 }
  0xf1   : > { %13106 = vst [vmem:[#allocation20_spill] sm:$0xff] %v9991_v22 }
  0xf3   : > { %2745 = vmatpush1.bf16.msra.mxu0 %v8792_v24  ;;  %v1500_v24 = vld [vmem:[%s9822_s29 + $0x2a0] sm:$0xff] }
  0xf4   : > { %2746 = vmatprep.subr.bf16.mxu0 %v12985_v1  ;;  %v10004_v27 = vpack.c.bf16 %v1502_v25, %v1500_v24  ;;  %v8808_v24 = vld [vmem:[%s12968_s1 + $0x128] sm:$0xff]   ;;  %v8809_v25 = vld [vmem:[%s12968_s1 + $0x130] sm:$0xff]  }
  0xf6   : > { %2502 = vmatmul.mubr.bf16.gmra.mrb[12].mxu0 %v12978_v3  ;;  %13108 = vst [vmem:[#allocation22_spill] sm:$0xff] %v10004_v27 }
  0xf7   : > { %2509 = vmatprep.mubr.bf16.mxu0 %v9839_v30  ;;  %2747 = vmatpush1.bf16.msra.mxu0 %v8793_v29  ;;  %v10007_v29 = vld [vmem:[%s9822_s29 + $0x298] sm:$0xff]  ;;  %v10348_v30 = vld [vmem:[%s9822_s29 + $0x508] sm:$0xff] }
  0xf8   : > { %2748 = vmatprep.subr.bf16.mxu0 %v12985_v1  ;;  %13137 = vst [vmem:[#allocation49_spill] sm:$0xff] %v10348_v30 }
  0xfb   : > { %2749 = vmatpush1.bf16.msra.mxu0 %v8794_v33  ;;  %v1506_v33 = vld [vmem:[%s9822_s29 + $0x2d0] sm:$0xff] }
  0xfc   : > { %2750 = vmatprep.subr.bf16.mxu0 %v12985_v1  ;;  %v10020_v39 = vpack.c.bf16 %v1506_v33, %v1504_v32  ;;  %v1697_v32 = vpack.c.bf16 %v10087_v20, %v12981_v35  ;;  %v10101_v33 = vld [vmem:[%s9822_s29 + $0x118] sm:$0xff] }
  0xfe   : > { %2510 = vmatmul.mubr.bf16.gmra.mrb[16].mxu0 %v9854_v36  ;;  %13110 = vst [vmem:[#allocation24_spill] sm:$0xff] %v10020_v39  ;;  %v1543_v36 = vld [vmem:[%s9822_s29 + $0x3f8] sm:$0xff] }
  0xff   : > { %2517 = vmatprep.mubr.bf16.mxu0 %v9856_v37  ;;  %2751 = vmatpush1.bf16.msra.mxu0 %v8795_v34  ;;  %v10018_v34 = vpack.c.bf16 %v10011_v31, %v10007_v29 }
 0x100   : > { %2752 = vmatprep.subr.bf16.mxu0 %v12985_v1 }
 0x101   : > { %13109 = vst [vmem:[#allocation23_spill] sm:$0xff] %v10018_v34 }
 0x103   : > { %2753 = vmatpush1.bf16.msra.mxu0 %v8796_v41  ;;  %v10028_v41 = vld [vmem:[%s9822_s29 + $0x2c8] sm:$0xff] }
 0x104   : > { %2754 = vmatprep.subr.bf16.mxu0 %v12985_v1  ;;  %v10035_v47 = vpack.c.bf16 %v10028_v41, %v10024_v40 }
 0x106   : > { %2518 = vmatmul.mubr.bf16.gmra.mrb[20].mxu0 %v9874_v43  ;;  %13111 = vst [vmem:[#allocation25_spill] sm:$0xff] %v10035_v47 }
 0x107   : > { %2525 = vmatprep.mubr.bf16.mxu0 %v9876_v44  ;;  %2755 = vmatpush1.bf16.msra.mxu0 %v8797_v42  ;;  %v10031_v42 = vld [vmem:[%s9822_s29 + $0x8] sm:$0xff] }
 0x108   : > { %2756 = vmatprep.subr.bf16.mxu0 %v12985_v1  ;;  %v1673_v48 = vpack.c.bf16 %v10031_v42, %v12981_v35  ;;  %v10334_v44 = vld [vmem:[%s9822_s29 + $0x468] sm:$0xff] }
 0x109   : > { %13135 = vst [vmem:[#allocation47_spill] sm:$0xff] %v10334_v44 }
 0x10b   : > { %2757 = vmatpush1.bf16.msra.mxu0 %v8798_v49  ;;  %v10041_v49 = vld [vmem:[%s9822_s29 + $0x18] sm:$0xff] }
 0x10c   : > { %2758 = vmatprep.subr.bf16.mxu0 %v12985_v1 }
 0x10e   : > { %2526 = vmatmul.mubr.bf16.gmra.mrb[24].mxu0 %v9898_v51  ;;  %v10331_v51 = vld [vmem:[%s9822_s29 + $0x458] sm:$0xff] }
 0x10f   : > { %2533 = vmatprep.mubr.bf16.mxu0 %v9900_v52  ;;  %2759 = vmatpush1.bf16.msra.mxu0 %v8799_v50  ;;  %v10044_v50 = vld [vmem:[%s9822_s29 + $0x28] sm:$0xff]  ;;  %v10328_v52 = vld [vmem:[%s9822_s29 + $0x3d8] sm:$0xff]  ;;  %13134 = vst [vmem:[#allocation46_spill] sm:$0xff] %v10331_v51  ;;  %v1787_v37 = vpack.c.bf16 %v10334_v44, %v10331_v51 }
 0x110   : > { %2760 = vmatprep.subr.bf16.mxu0 %v12985_v1  ;;  %v1679_v56 = vpack.c.bf16 %v10044_v50, %v10041_v49  ;;  %v10455_v51 = vld [vmem:[%s9822_s29 + $0x648] sm:$0xff] }
 0x111   : > { %13154 = vst [vmem:[#allocation66_spill] sm:$0xff] %v10455_v51 }
 0x113   : > { %2761 = vmatpush1.bf16.msra.mxu0 %v8800_v57  ;;  %v10053_v57 = vld [vmem:[%s9822_s29 + $0x38] sm:$0xff] }
 0x114   : > { %2762 = vmatprep.subr.bf16.mxu0 %v12985_v1 }
 0x116   : > { %2534 = vmatmul.mubr.bf16.gmra.mrb[28].mxu0 %v9922_v59 }
 0x117   : > { %2541 = vmatprep.mubr.bf16.mxu0 %v9924_v60  ;;  %2763 = vmatpush1.bf16.msra.mxu0 %v8801_v58  ;;  %v10056_v58 = vld [vmem:[%s9822_s29 + $0x48] sm:$0xff] }
 0x118   : > { %2764 = vmatprep.subr.bf16.mxu0 %v12985_v1 }
 0x11b   : > { %2765 = vmatpush1.bf16.msra.mxu0 %v8802_v0  ;;  %v1685_v0 = vpack.c.bf16 %v10056_v58, %v10053_v57 }
 0x11c   : > { %3023 = vmatprep.subr.bf16.mxu0 %v12985_v1 }
 0x11e   : > { %2542 = vmatmul.mubr.bf16.gmra.mrb[32].mxu0 %v9940_v2  ;;  %v10315_v2 = vld [vmem:[%s9822_s29 + $0x448] sm:$0xff] }
 0x11f   : > { %2549 = vmatprep.mubr.bf16.mxu0 %v9942_v4  ;;  %v10312_v4 = vld [vmem:[%s9822_s29 + $0x438] sm:$0xff]  ;;  %13132 = vst [vmem:[#allocation44_spill] sm:$0xff] %v10315_v2 }
 0x120   : > { %13131 = vst [vmem:[#allocation43_spill] sm:$0xff] %v10312_v4  ;;  %v1781_v59 = vpack.c.bf16 %v10315_v2, %v10312_v4 }
 0x126   : > { %2550 = vmatmul.mubr.bf16.gmra.mrb[36].mxu0 %v9957_v9  ;;  %v10309_v9 = vld [vmem:[%s9822_s29 + $0x3b8] sm:$0xff] }
 0x127   : > { %2557 = vmatprep.mubr.bf16.mxu0 %v9959_v10 }
 0x12e   : > { %2558 = vmatmul.mubr.bf16.gmra.mrb[40].mxu0 %v9973_v15  ;;  %v10296_v15 = vld [vmem:[%s9822_s29 + $0x428] sm:$0xff] }
 0x12f   : > { %2565 = vmatprep.mubr.bf16.mxu0 %v9975_v16  ;;  %v10290_v16 = vld [vmem:[%s9822_s29 + $0x398] sm:$0xff]  ;;  %13129 = vst [vmem:[#allocation41_spill] sm:$0xff] %v10296_v15 }
 0x136   : > { %2566 = vmatmul.mubr.bf16.gmra.mrb[44].mxu0 %v9989_v21 }
 0x137   : > { %2573 = vmatprep.mubr.bf16.mxu0 %v9991_v22  ;;  %v13127_v22 = vmov 0.0  }
 0x13e   : > { %2574 = vmatmul.mubr.bf16.gmra.mrb[48].mxu0 %v10002_v26 }
 0x13f   : > { %2581 = vmatprep.mubr.bf16.mxu0 %v10004_v27  ;;  %v10277_v27 = vld [vmem:[%s9822_s29 + $0x408] sm:$0xff] }
 0x140   : > { %13124 = vst [vmem:[#allocation38_spill] sm:$0xff] %v10277_v27  ;;  %v1769_v21 = vpack.c.bf16 %v10277_v27, %v13127_v22 }
 0x146   : > { %2582 = vmatmul.mubr.bf16.gmra.mrb[52].mxu0 %v10018_v34  ;;  %v10260_v34 = vld [vmem:[%s9822_s29 + $0x368] sm:$0xff] }
 0x147   : > { %2589 = vmatprep.mubr.bf16.mxu0 %v10020_v39  ;;  %v10257_v39 = vld [vmem:[%s9822_s29 + $0x358] sm:$0xff]  ;;  %13122 = vst [vmem:[#allocation36_spill] sm:$0xff] %v10260_v34 }
 0x148   : > { %13121 = vst [vmem:[#allocation35_spill] sm:$0xff] %v10257_v39 }
 0x14e   : > { %2590 = vmatmul.mubr.bf16.gmra.mrb[56].mxu0 %v10035_v47  ;;  %v10224_v47 = vld [vmem:[%s9822_s29 + $0x318] sm:$0xff] }
 0x14f   : > { %2766 = vmatprep.mubr.bf16.mxu0 %v1673_v48  ;;  %v10104_v48 = vld [vmem:[%s9822_s29 + $0x128] sm:$0xff] }
 0x156   : > { %2767 = vmatmul.mubr.bf16.vlgmr.msra.gmra.mrb[0].mxu0 %v12978_v3 }
 0x157   : > { %3024 = vmatpush1.bf16.msra.mxu0 %v8803_v55  ;;  %2774 = vmatprep.mubr.bf16.mxu0 %v1679_v56  ;;  %v8810_v55 = vld [vmem:[%s12968_s1 + $0x138] sm:$0xff]   ;;  %v8811_v56 = vld [vmem:[%s12968_s1 + $0x140] sm:$0xff]  }
 0x158   : > { %3025 = vmatprep.subr.bf16.mxu0 %v12985_v1 }
 0x15b   : > { %3026 = vmatpush1.bf16.msra.mxu0 %v8804_v62  ;;  %v1703_v62 = vpack.c.bf16 %v10104_v48, %v10101_v33 }
 0x15c   : > { %3027 = vmatprep.subr.bf16.mxu0 %v12985_v1 }
 0x15e   : > { %2775 = vmatmul.mubr.bf16.gmra.mrb[4].mxu0 %v12978_v3 }
 0x15f   : > { %2782 = vmatprep.mubr.bf16.mxu0 %v1685_v0  ;;  %3028 = vmatpush1.bf16.msra.mxu0 %v8805_v63  ;;  %v10118_v63 = vld [vmem:[%s9822_s29 + $0x138] sm:$0xff]  ;;  %v10121_v0 = vld [vmem:[%s9822_s29 + $0x148] sm:$0xff] }
 0x160   : > { %3029 = vmatprep.subr.bf16.mxu0 %v12985_v1 }
 0x163   : > { %3030 = vmatpush1.bf16.msra.mxu0 %v8806_v13  ;;  %v8812_v13 = vld [vmem:[%s12968_s1 + $0x148] sm:$0xff]  }
 0x164   : > { %3031 = vmatprep.subr.bf16.mxu0 %v12985_v1 }
 0x166   : > { %2783 = vmatmul.mubr.bf16.gmra.mrb[8].mxu0 %v12978_v3 }
 0x167   : > { %2790 = vmatprep.mubr.bf16.mxu0 %v1691_v19  ;;  %3032 = vmatpush1.bf16.msra.mxu0 %v8807_v14  ;;  %v8813_v14 = vld [vmem:[%s12968_s1 + $0x150] sm:$0xff]   ;;  %v10132_v19 = vpack.c.bf16 %v9880_v45, %v9860_v38  ;;  %v10147_v38 = vpack.c.bf16 %v9904_v53, %v9884_v46 }
 0x168   : > { %3033 = vmatprep.subr.bf16.mxu0 %v12985_v1 }
 0x169   : > { %13112 = vst [vmem:[#allocation26_spill] sm:$0xff] %v10132_v19  ;;  %13113 = vst [vmem:[#allocation27_spill] sm:$0xff] %v10147_v38 }
 0x16b   : > { %3034 = vmatpush1.bf16.msra.mxu0 %v8808_v24  ;;  %v1709_v24 = vpack.c.bf16 %v10121_v0, %v10118_v63 }
 0x16c   : > { %3035 = vmatprep.subr.bf16.mxu0 %v12985_v1 }
 0x16e   : > { %2791 = vmatmul.mubr.bf16.gmra.mrb[12].mxu0 %v12978_v3  ;;  %v10214_v3 = vld [vmem:[%s9822_s29 + $0x308] sm:$0xff] }
 0x16f   : > { %2798 = vmatprep.mubr.bf16.mxu0 %v1697_v32  ;;  %3036 = vmatpush1.bf16.msra.mxu0 %v8809_v25  ;;  %v10139_v25 = vld [vmem:[%s9822_s29 + $0x158] sm:$0xff]  ;;  %v10142_v32 = vld [vmem:[%s9822_s29 + $0x168] sm:$0xff] }
 0x170   : > { %3037 = vmatprep.subr.bf16.mxu0 %v12985_v1  ;;  %v1715_v45 = vpack.c.bf16 %v10142_v32, %v10139_v25 }
 0x173   : > { %3038 = vmatpush1.bf16.msra.mxu0 %v8810_v55  ;;  %v8814_v55 = vld [vmem:[%s12968_s1 + $0x158] sm:$0xff]  }
 0x174   : > { %3039 = vmatprep.subr.bf16.mxu0 %v12985_v1 }
 0x176   : > { %2799 = vmatmul.mubr.bf16.gmra.mrb[16].mxu0 %v9833_v28  ;;  %v10522_v28 = vld [vmem:[%s9822_s29 + $0x738] sm:$0xff] }
 0x177   : > { %2806 = vmatprep.mubr.bf16.mxu0 %v1703_v62  ;;  %3040 = vmatpush1.bf16.msra.mxu0 %v8811_v56  ;;  %v1447_v56 = vld [vmem:[%s9822_s29 + $0xf8] sm:$0xff]  ;;  %v10157_v62 = vld [vmem:[%s9822_s29 + $0x208] sm:$0xff]  ;;  %13167 = vst [vmem:[#allocation79_spill] sm:$0xff] %v10522_v28 }
 0x178   : > { %3041 = vmatprep.subr.bf16.mxu0 %v12985_v1  ;;  %v10161_v46 = vpack.c.bf16 %v1447_v56, %v9907_v54  ;;  %v1721_v53 = vpack.c.bf16 %v10157_v62, %v12981_v35  ;;  %v10186_v56 = vld [vmem:[%s9822_s29 + $0x248] sm:$0xff] }
 0x17a   : > { %13114 = vst [vmem:[#allocation28_spill] sm:$0xff] %v10161_v46 }
 0x17b   : > { %3042 = vmatpush1.bf16.msra.mxu0 %v8812_v13  ;;  %v10167_v13 = vld [vmem:[%s9822_s29 + $0x218] sm:$0xff] }
 0x17c   : > { %3043 = vmatprep.subr.bf16.mxu0 %v12985_v1 }
 0x17e   : > { %2807 = vmatmul.mubr.bf16.gmra.mrb[20].mxu0 %v10132_v19 }
 0x17f   : > { %2814 = vmatprep.mubr.bf16.mxu0 %v1709_v24  ;;  %3044 = vmatpush1.bf16.msra.mxu0 %v8813_v14  ;;  %v10170_v14 = vld [vmem:[%s9822_s29 + $0x228] sm:$0xff]  ;;  %v10174_v24 = vpack.c.bf16 %v9946_v5, %v9928_v61  ;;  %v10191_v61 = vpack.c.bf16 %v9963_v11, %v9949_v6 }
 0x180   : > { %3045 = vmatprep.subr.bf16.mxu0 %v12985_v1  ;;  %v1727_v54 = vpack.c.bf16 %v10170_v14, %v10167_v13  ;;  %v8816_v11 = vld [vmem:[%s12968_s1 + $0x168] sm:$0xff]  }
 0x181   : > { %13115 = vst [vmem:[#allocation29_spill] sm:$0xff] %v10174_v24  ;;  %13116 = vst [vmem:[#allocation30_spill] sm:$0xff] %v10191_v61 }
 0x183   : > { %3046 = vmatpush1.bf16.msra.mxu0 %v8814_v55  ;;  %v10183_v55 = vld [vmem:[%s9822_s29 + $0x238] sm:$0xff] }
 0x184   : > { %3047 = vmatprep.subr.bf16.mxu0 %v12985_v1  ;;  %v1733_v5 = vpack.c.bf16 %v10186_v56, %v10183_v55 }
 0x186   : > { %2815 = vmatmul.mubr.bf16.gmra.mrb[24].mxu0 %v10147_v38  ;;  %v10474_v38 = vld [vmem:[%s9822_s29 + $0x668] sm:$0xff] }
 0x187   : > { %2822 = vmatprep.mubr.bf16.mxu0 %v1715_v45  ;;  %v8815_v45 = vld [vmem:[%s12968_s1 + $0x160] sm:$0xff]   ;;  %13157 = vst [vmem:[#allocation69_spill] sm:$0xff] %v10474_v38 }
 0x188   : > { %3048 = vmatpush1.bf16.msra.mxu0 %v8815_v45  ;;  %v10204_v45 = vpack.c.bf16 %v9978_v17, %v9966_v12  ;;  %v1745_v17 = vpack.c.bf16 %v10214_v3, %v12981_v35  ;;  %v10243_v35 = vld [vmem:[%s9822_s29 + $0x348] sm:$0xff] }
 0x189   : > { %3049 = vmatprep.subr.bf16.mxu0 %v12985_v1 }
 0x18a   : > { %13117 = vst [vmem:[#allocation31_spill] sm:$0xff] %v10204_v45 }
 0x18c   : > { %3050 = vmatpush1.bf16.msra.mxu0 %v8816_v11  ;;  %v10231_v11 = vpack.c.bf16 %v10007_v29, %v9995_v23  ;;  %v10248_v23 = vpack.c.bf16 %v10024_v40, %v10011_v31  ;;  %v1763_v31 = vpack.c.bf16 %v10260_v34, %v10257_v39  ;;  %v8818_v40 = vld [vmem:[%s12968_s1 + $0x178] sm:$0xff]   ;;  %v10544_v34 = vld [vmem:[%s9822_s29 + $0x768] sm:$0xff] }
 0x18d   : > { %3051 = vmatprep.subr.bf16.mxu0 %v12985_v1  ;;  %13171 = vst [vmem:[#allocation83_spill] sm:$0xff] %v10544_v34 }
 0x18e   : > { %2823 = vmatmul.mubr.bf16.gmra.mrb[28].mxu0 %v10161_v46  ;;  %13119 = vst [vmem:[#allocation33_spill] sm:$0xff] %v10231_v11  ;;  %13120 = vst [vmem:[#allocation34_spill] sm:$0xff] %v10248_v23  ;;  %v10452_v46 = vld [vmem:[%s9822_s29 + $0x638] sm:$0xff] }
 0x18f   : > { %2830 = vmatprep.mubr.bf16.mxu0 %v1721_v53  ;;  %v10197_v53 = vld [vmem:[%s9822_s29 + $0x258] sm:$0xff]  ;;  %13153 = vst [vmem:[#allocation65_spill] sm:$0xff] %v10452_v46 }
 0x196   : > { %2831 = vmatmul.mubr.bf16.gmra.mrb[32].mxu0 %v10174_v24 }
 0x197   : > { %2838 = vmatprep.mubr.bf16.mxu0 %v1727_v54  ;;  %v10200_v54 = vld [vmem:[%s9822_s29 + $0x268] sm:$0xff] }
 0x198   : > { %v1739_v6 = vpack.c.bf16 %v10200_v54, %v10197_v53 }
 0x19e   : > { %2839 = vmatmul.mubr.bf16.gmra.mrb[36].mxu0 %v10191_v61 }
 0x19f   : > { %2846 = vmatprep.mubr.bf16.mxu0 %v1733_v5  ;;  %v1479_v5 = vld [vmem:[%s9822_s29 + $0x1f8] sm:$0xff] }
 0x1a0   : > { %v10218_v12 = vpack.c.bf16 %v1479_v5, %v9981_v18  ;;  %v8817_v5 = vld [vmem:[%s12968_s1 + $0x170] sm:$0xff]  }
 0x1a1   : > { %3052 = vmatpush1.bf16.msra.mxu0 %v8817_v5 }
 0x1a2   : > { %13118 = vst [vmem:[#allocation32_spill] sm:$0xff] %v10218_v12  ;;  %3053 = vmatprep.subr.bf16.mxu0 %v12985_v1  ;;  %v1511_v1 = vld [vmem:[%s9822_s29 + $0x2f8] sm:$0xff] }
 0x1a5   : > { %3054 = vmatpush1.bf16.msra.mxu0 %v8818_v40  ;;  %v10293_v40 = vld [vmem:[%s9822_s29 + $0x418] sm:$0xff] }
 0x1a6   : > { %2847 = vmatmul.mubr.bf16.gmra.mrb[40].mxu0 %v10204_v45  ;;  %13128 = vst [vmem:[#allocation40_spill] sm:$0xff] %v10293_v40  ;;  %v1775_v10 = vpack.c.bf16 %v10296_v15, %v10293_v40  ;;  %v10404_v45 = vld [vmem:[%s9822_s29 + $0x568] sm:$0xff] }
 0x1a7   : > { %2854 = vmatprep.mubr.bf16.mxu0 %v1739_v6  ;;  %v10227_v6 = vld [vmem:[%s9822_s29 + $0x328] sm:$0xff]  ;;  %13146 = vst [vmem:[#allocation58_spill] sm:$0xff] %v10404_v45 }
 0x1a8   : > { %v1751_v18 = vpack.c.bf16 %v10227_v6, %v10224_v47  ;;  %v10525_v40 = vld [vmem:[%s9822_s29 + $0x748] sm:$0xff] }
 0x1a9   : > { %13168 = vst [vmem:[#allocation80_spill] sm:$0xff] %v10525_v40 }
 0x1ae   : > { %2855 = vmatmul.mubr.bf16.gmra.mrb[44].mxu0 %v10218_v12  ;;  %v10385_v12 = vld [vmem:[%s9822_s29 + $0x548] sm:$0xff] }
 0x1af   : > { %2862 = vmatprep.mubr.bf16.mxu0 %v1745_v17  ;;  %v10240_v17 = vld [vmem:[%s9822_s29 + $0x338] sm:$0xff]  ;;  %13143 = vst [vmem:[#allocation55_spill] sm:$0xff] %v10385_v12 }
 0x1b0   : > { %v1757_v29 = vpack.c.bf16 %v10243_v35, %v10240_v17 }
 0x1b6   : > { %2863 = vmatmul.mubr.bf16.gmra.mrb[48].mxu0 %v10231_v11  ;;  %v10382_v11 = vld [vmem:[%s9822_s29 + $0x538] sm:$0xff] }
 0x1b7   : > { %2870 = vmatprep.mubr.bf16.mxu0 %v1751_v18  ;;  %v10254_v18 = vld [vmem:[%s9822_s29 + $0x2d8] sm:$0xff]  ;;  %13142 = vst [vmem:[#allocation54_spill] sm:$0xff] %v10382_v11 }
 0x1b8   : > { %v10264_v5 = vpack.c.bf16 %v10254_v18, %v10028_v41  ;;  %v13125_v41 = vmov 0  }
 0x1b9   : > { %3312 = vmatprep.subr.bf16.mxu0 %v13125_v41 }
 0x1ba   : > { %13123 = vst [vmem:[#allocation37_spill] sm:$0xff] %v10264_v5 }
 0x1be   : > { %2871 = vmatmul.mubr.bf16.gmra.mrb[52].mxu0 %v10248_v23  ;;  %v10379_v23 = vld [vmem:[%s9822_s29 + $0x4b8] sm:$0xff] }
 0x1bf   : > { %2878 = vmatprep.mubr.bf16.mxu0 %v1757_v29  ;;  %v10273_v29 = vld [vmem:[%s9822_s29 + $0x2e8] sm:$0xff] }
 0x1c0   : > { %v10281_v26 = vpack.c.bf16 %v1511_v1, %v10273_v29 }
 0x1c2   : > { %13126 = vst [vmem:[#allocation39_spill] sm:$0xff] %v10281_v26 }
 0x1c6   : > { %2879 = vmatmul.mubr.bf16.gmra.mrb[56].mxu0 %v10264_v5  ;;  %v10366_v5 = vld [vmem:[%s9822_s29 + $0x528] sm:$0xff] }
 0x1c7   : > { %2886 = vmatprep.mubr.bf16.mxu0 %v1763_v31  ;;  %v10287_v31 = vld [vmem:[%s9822_s29 + $0x388] sm:$0xff]  ;;  %13140 = vst [vmem:[#allocation52_spill] sm:$0xff] %v10366_v5 }
 0x1c8   : > { %v10300_v1 = vpack.c.bf16 %v10290_v16, %v10287_v31 }
 0x1ca   : > { %13130 = vst [vmem:[#allocation42_spill] sm:$0xff] %v10300_v1 }
 0x1ce   : > { %2887 = vmatmul.mubr.bf16.gmra.mrb[60].mxu0 %v10281_v26  ;;  %v10363_v26 = vld [vmem:[%s9822_s29 + $0x518] sm:$0xff] }
 0x1cf   : > { %2894 = vmatprep.mubr.bf16.mxu0 %v1769_v21  ;;  %v10306_v21 = vld [vmem:[%s9822_s29 + $0x3a8] sm:$0xff]  ;;  %13139 = vst [vmem:[#allocation51_spill] sm:$0xff] %v10363_v26 }
 0x1d0   : > { %v10319_v60 = vpack.c.bf16 %v10309_v9, %v10306_v21 }
 0x1d2   : > { %13133 = vst [vmem:[#allocation45_spill] sm:$0xff] %v10319_v60 }
 0x1d6   : > { %2895 = vmatmul.mubr.bf16.gmra.mrb[64].mxu0 %v10300_v1  ;;  %v1793_v1 = vpack.c.bf16 %v10348_v30, %v13127_v22 }
 0x1d7   : > { %2902 = vmatprep.mubr.bf16.mxu0 %v1775_v10  ;;  %v10325_v10 = vld [vmem:[%s9822_s29 + $0x3c8] sm:$0xff] }
 0x1d8   : > { %v10338_v43 = vpack.c.bf16 %v10328_v52, %v10325_v10 }
 0x1da   : > { %13136 = vst [vmem:[#allocation48_spill] sm:$0xff] %v10338_v43 }
 0x1de   : > { %2903 = vmatmul.mubr.bf16.gmra.mrb[68].mxu0 %v10319_v60 }
 0x1df   : > { %2910 = vmatprep.mubr.bf16.mxu0 %v1781_v59  ;;  %v10344_v59 = vld [vmem:[%s9822_s29 + $0x3e8] sm:$0xff] }
 0x1e0   : > { %v10351_v60 = vpack.c.bf16 %v1543_v36, %v10344_v59 }
 0x1e2   : > { %13138 = vst [vmem:[#allocation50_spill] sm:$0xff] %v10351_v60 }
 0x1e6   : > { %2911 = vmatmul.mubr.bf16.gmra.mrb[72].mxu0 %v10338_v43  ;;  %v10357_v43 = vld [vmem:[%s9822_s29 + $0x488] sm:$0xff] }
 0x1e7   : > { %2918 = vmatprep.mubr.bf16.mxu0 %v1787_v37  ;;  %v10360_v37 = vld [vmem:[%s9822_s29 + $0x498] sm:$0xff] }
 0x1e8   : > { %v10370_v36 = vpack.c.bf16 %v10360_v37, %v10357_v43 }
 0x1ea   : > { %13141 = vst [vmem:[#allocation53_spill] sm:$0xff] %v10370_v36 }
 0x1ee   : > { %2919 = vmatmul.mubr.bf16.gmra.mrb[76].mxu0 %v10351_v60  ;;  %v1799_v60 = vpack.c.bf16 %v10366_v5, %v10363_v26  ;;  %v1805_v5 = vpack.c.bf16 %v10385_v12, %v10382_v11  ;;  %v10401_v26 = vld [vmem:[%s9822_s29 + $0x558] sm:$0xff]  ;;  %v10418_v11 = vld [vmem:[%s9822_s29 + $0x608] sm:$0xff] }
 0x1ef   : > { %2926 = vmatprep.mubr.bf16.mxu0 %v1793_v1  ;;  %v10376_v1 = vld [vmem:[%s9822_s29 + $0x4a8] sm:$0xff]  ;;  %13145 = vst [vmem:[#allocation57_spill] sm:$0xff] %v10401_v26  ;;  %v1575_v12 = vld [vmem:[%s9822_s29 + $0x4f8] sm:$0xff]  ;;  %13148 = vst [vmem:[#allocation60_spill] sm:$0xff] %v10418_v11  ;;  %v1817_v24 = vpack.c.bf16 %v10418_v11, %v13127_v22 }
 0x1f0   : > { %v10389_v30 = vpack.c.bf16 %v10379_v23, %v10376_v1  ;;  %v10449_v11 = vld [vmem:[%s9822_s29 + $0x5b8] sm:$0xff] }
 0x1f2   : > { %13144 = vst [vmem:[#allocation56_spill] sm:$0xff] %v10389_v30 }
 0x1f6   : > { %2927 = vmatmul.mubr.bf16.gmra.mrb[80].mxu0 %v10370_v36  ;;  %v10398_v36 = vld [vmem:[%s9822_s29 + $0x4d8] sm:$0xff] }
 0x1f7   : > { %2934 = vmatprep.mubr.bf16.mxu0 %v1799_v60  ;;  %v10395_v60 = vld [vmem:[%s9822_s29 + $0x4c8] sm:$0xff] }
 0x1f8   : > { %v10408_v61 = vpack.c.bf16 %v10398_v36, %v10395_v60 }
 0x1fa   : > { %13147 = vst [vmem:[#allocation59_spill] sm:$0xff] %v10408_v61 }
 0x1fe   : > { %2935 = vmatmul.mubr.bf16.gmra.mrb[84].mxu0 %v10389_v30  ;;  %v1811_v30 = vpack.c.bf16 %v10404_v45, %v10401_v26  ;;  %v10433_v45 = vld [vmem:[%s9822_s29 + $0x618] sm:$0xff]  ;;  %v10436_v26 = vld [vmem:[%s9822_s29 + $0x628] sm:$0xff] }
 0x1ff   : > { %2942 = vmatprep.mubr.bf16.mxu0 %v1805_v5  ;;  %v10414_v5 = vld [vmem:[%s9822_s29 + $0x4e8] sm:$0xff]  ;;  %13150 = vst [vmem:[#allocation62_spill] sm:$0xff] %v10433_v45  ;;  %13151 = vst [vmem:[#allocation63_spill] sm:$0xff] %v10436_v26 }
 0x200   : > { %v10421_v44 = vpack.c.bf16 %v1575_v12, %v10414_v5 }
 0x202   : > { %13149 = vst [vmem:[#allocation61_spill] sm:$0xff] %v10421_v44 }
 0x206   : > { %2943 = vmatmul.mubr.bf16.gmra.mrb[88].mxu0 %v10408_v61  ;;  %v10427_v61 = vld [vmem:[%s9822_s29 + $0x588] sm:$0xff] }
 0x207   : > { %2950 = vmatprep.mubr.bf16.mxu0 %v1811_v30  ;;  %v10430_v30 = vld [vmem:[%s9822_s29 + $0x598] sm:$0xff] }
 0x208   : > { %v10440_v12 = vpack.c.bf16 %v10430_v30, %v10427_v61 }
 0x20a   : > { %13152 = vst [vmem:[#allocation64_spill] sm:$0xff] %v10440_v12 }
 0x20e   : > { %2951 = vmatmul.mubr.bf16.gmra.mrb[92].mxu0 %v10421_v44  ;;  %v1823_v44 = vpack.c.bf16 %v10436_v26, %v10433_v45  ;;  %v1829_v26 = vpack.c.bf16 %v10455_v51, %v10452_v46  ;;  %v10471_v45 = vld [vmem:[%s9822_s29 + $0x658] sm:$0xff]  ;;  %v10488_v46 = vld [vmem:[%s9822_s29 + $0x708] sm:$0xff] }
 0x20f   : > { %2958 = vmatprep.mubr.bf16.mxu0 %v1817_v24  ;;  %v10446_v24 = vld [vmem:[%s9822_s29 + $0x5a8] sm:$0xff]  ;;  %13156 = vst [vmem:[#allocation68_spill] sm:$0xff] %v10471_v45  ;;  %v1607_v51 = vld [vmem:[%s9822_s29 + $0x5f8] sm:$0xff]  ;;  %13159 = vst [vmem:[#allocation71_spill] sm:$0xff] %v10488_v46  ;;  %v1841_v15 = vpack.c.bf16 %v10488_v46, %v13127_v22 }
 0x210   : > { %v10459_v2 = vpack.c.bf16 %v10449_v11, %v10446_v24  ;;  %v10519_v46 = vld [vmem:[%s9822_s29 + $0x6b8] sm:$0xff] }
 0x211   : > { %13166 = vst [vmem:[#allocation78_spill] sm:$0xff] %v10519_v46 }
 0x212   : > { %13155 = vst [vmem:[#allocation67_spill] sm:$0xff] %v10459_v2 }
 0x216   : > { %2959 = vmatmul.mubr.bf16.gmra.mrb[96].mxu0 %v10440_v12  ;;  %v10468_v12 = vld [vmem:[%s9822_s29 + $0x5d8] sm:$0xff] }
 0x217   : > { %2966 = vmatprep.mubr.bf16.mxu0 %v1823_v44  ;;  %v10465_v44 = vld [vmem:[%s9822_s29 + $0x5c8] sm:$0xff] }
 0x218   : > { %v10478_v19 = vpack.c.bf16 %v10468_v12, %v10465_v44 }
 0x21a   : > { %13158 = vst [vmem:[#allocation70_spill] sm:$0xff] %v10478_v19 }
 0x21e   : > { %2967 = vmatmul.mubr.bf16.gmra.mrb[100].mxu0 %v10459_v2  ;;  %v1835_v2 = vpack.c.bf16 %v10474_v38, %v10471_v45  ;;  %v10503_v38 = vld [vmem:[%s9822_s29 + $0x718] sm:$0xff]  ;;  %v10506_v45 = vld [vmem:[%s9822_s29 + $0x728] sm:$0xff] }
 0x21f   : > { %2974 = vmatprep.mubr.bf16.mxu0 %v1829_v26  ;;  %v10484_v26 = vld [vmem:[%s9822_s29 + $0x5e8] sm:$0xff]  ;;  %13162 = vst [vmem:[#allocation74_spill] sm:$0xff] %v10503_v38  ;;  %13163 = vst [vmem:[#allocation75_spill] sm:$0xff] %v10506_v45 }
 0x220   : > { %v10491_v4 = vpack.c.bf16 %v1607_v51, %v10484_v26 }
 0x222   : > { %13160 = vst [vmem:[#allocation72_spill] sm:$0xff] %v10491_v4 }
 0x226   : > { %2975 = vmatmul.mubr.bf16.gmra.mrb[104].mxu0 %v10478_v19  ;;  %v10497_v19 = vld [vmem:[%s9822_s29 + $0x688] sm:$0xff] }
 0x227   : > { %2982 = vmatprep.mubr.bf16.mxu0 %v1835_v2  ;;  %v10500_v2 = vld [vmem:[%s9822_s29 + $0x698] sm:$0xff] }
 0x228   : > { %13161 = vst [vmem:[#allocation73_spill] sm:$0xff] %v10500_v2  ;;  %v10510_v51 = vpack.c.bf16 %v10500_v2, %v10497_v19 }
 0x22a   : > { %13164 = vst [vmem:[#allocation76_spill] sm:$0xff] %v10510_v51 }
 0x22e   : > { %2983 = vmatmul.mubr.bf16.gmra.mrb[108].mxu0 %v10491_v4  ;;  %v1847_v4 = vpack.c.bf16 %v10506_v45, %v10503_v38  ;;  %v1853_v45 = vpack.c.bf16 %v10525_v40, %v10522_v28  ;;  %v10541_v38 = vld [vmem:[%s9822_s29 + $0x758] sm:$0xff]  ;;  %v1508_v28 = vld [vmem:[%s9822_s29 + $0x2e0] sm:$0xff] }
 0x22f   : > { %2990 = vmatprep.mubr.bf16.mxu0 %v1841_v15  ;;  %v10516_v15 = vld [vmem:[%s9822_s29 + $0x6a8] sm:$0xff]  ;;  %13170 = vst [vmem:[#allocation82_spill] sm:$0xff] %v10541_v38  ;;  %v1859_v40 = vpack.c.bf16 %v10544_v34, %v10541_v38  ;;  %v1675_v34 = vpack.c.bf16 %v10041_v49, %v10031_v42  ;;  %v10569_v38 = vpack.c.bf16 %v10273_v29, %v10254_v18  ;;  %v8819_v49 = vld [vmem:[%s12968_s1 + $0x180] sm:$0xff]  }
 0x230   : > { %13165 = vst [vmem:[#allocation77_spill] sm:$0xff] %v10516_v15  ;;  %v10529_v27 = vpack.c.bf16 %v10519_v46, %v10516_v15  ;;  %v1510_v46 = vld [vmem:[%s9822_s29 + $0x2f0] sm:$0xff]  ;;  %v1681_v18 = vpack.c.bf16 %v10053_v57, %v10044_v50  ;;  %v1420_v29 = vld [vmem:[%s9822_s29 + $0x20] sm:$0xff] }
 0x231   : > { %v10559_v15 = vpack.c.bf16 %v1510_v46, %v1508_v28  ;;  %13173 = vst [vmem:[#allocation85_spill] sm:$0xff] %v10569_v38  ;;  %v1418_v28 = vld [vmem:[%s9822_s29 + $0x10] sm:$0xff] }
 0x232   : > { %13169 = vst [vmem:[#allocation81_spill] sm:$0xff] %v10529_v27  ;;  %v1530_v46 = vld [vmem:[%s9822_s29 + $0x390] sm:$0xff] }
 0x233   : > { %13172 = vst [vmem:[#allocation84_spill] sm:$0xff] %v10559_v15  ;;  %2597 = vmatprep.mubr.bf16.mxu1 %v10559_v15 }
 0x234   : > { %2598 = vmatmul.mubr.bf16.vlgmr.msra.gmra.mrb[0].mxu1 %v10569_v38  ;;  %v1422_v38 = vld [vmem:[%s9822_s29 + $0x30] sm:$0xff] }
 0x235   : > { %v1680_v57 = vpack.c.bf16 %v1422_v38, %v1420_v29  ;;  %v1538_v38 = vld [vmem:[%s9822_s29 + $0x3d0] sm:$0xff]  ;;  %v1431_v29 = vld [vmem:[%s9822_s29 + $0x78] sm:$0xff] }
 0x236   : > { %2991 = vmatmul.mubr.bf16.gmra.mrb[112].mxu0 %v10510_v51  ;;  %v10538_v51 = vld [vmem:[%s9822_s29 + $0x6d8] sm:$0xff] }
 0x237   : > { %2998 = vmatprep.mubr.bf16.mxu0 %v1847_v4  ;;  %v10535_v4 = vld [vmem:[%s9822_s29 + $0x6c8] sm:$0xff] }
 0x238   : > { %v10548_v2 = vpack.c.bf16 %v10538_v51, %v10535_v4 }
 0x23e   : > { %2999 = vmatmul.mubr.bf16.gmra.mrb[116].mxu0 %v10529_v27  ;;  %v1639_v27 = vld [vmem:[%s9822_s29 + $0x6f8] sm:$0xff] }
 0x23f   : > { %3006 = vmatprep.mubr.bf16.mxu0 %v1853_v45  ;;  %v10554_v45 = vld [vmem:[%s9822_s29 + $0x6e8] sm:$0xff] }
 0x240   : > { %v10562_v39 = vpack.c.bf16 %v1639_v27, %v10554_v45  ;;  %v1528_v27 = vld [vmem:[%s9822_s29 + $0x380] sm:$0xff] }
 0x241   : > { %v10577_v15 = vpack.c.bf16 %v1530_v46, %v1528_v27  ;;  %v1534_v27 = vld [vmem:[%s9822_s29 + $0x3b0] sm:$0xff] }
 0x242   : > { %v8821_v46 = vld [vmem:[%s12968_s1 + $0x190] sm:$0xff]  }
 0x243   : > { %2605 = vmatprep.mubr.bf16.mxu1 %v10577_v15 }
 0x246   : > { %3007 = vmatmul.mubr.bf16.gmra.mrb[120].mxu0 %v10548_v2 }
 0x247   : > { %3014 = vmatprep.mubr.bf16.mxu0 %v1859_v40  ;;  %v1416_v40 = vld [vmem:[%s9822_s29] sm:$0xff] }
 0x248   : > { %v1674_v42 = vpack.c.bf16 %v1418_v28, %v1416_v40  ;;  %v8820_v40 = vld [vmem:[%s12968_s1 + $0x188] sm:$0xff]   ;;  %v1532_v28 = vld [vmem:[%s9822_s29 + $0x3a0] sm:$0xff] }
 0x249   : > { %v10598_v50 = vpack.c.bf16 %v1534_v27, %v1532_v28  ;;  %v8823_v28 = vld [vmem:[%s12968_s1 + $0x1a0] sm:$0xff]   ;;  %v10631_v27 = vpack.c.bf16 %v10325_v10, %v10309_v9 }
 0x24e   : > { %3015 = vmatmul.mubr.bf16.gmra.mrb[124].mxu0 %v10562_v39 }
 0x24f   : > { %3055 = vmatprep.mubr.bf16.mxu0 %v1675_v34  ;;  %v10587_v34 = vpack.c.bf16 %v10287_v31, %v13127_v22  ;;  %v1687_v31 = vpack.c.bf16 %v10070_v7, %v10056_v58  ;;  %v8822_v58 = vld [vmem:[%s12968_s1 + $0x198] sm:$0xff]   ;;  %v1536_v7 = vld [vmem:[%s9822_s29 + $0x3c0] sm:$0xff] }
 0x251   : > { %2606 = vmatmul.mubr.bf16.gmra.mrb[4].mxu1 %v10587_v34 }
 0x252   : > { %2613 = vmatprep.mubr.bf16.mxu1 %v10598_v50 }
 0x256   : > { %3056 = vmatmul.mubr.bf16.vlgmr.msra.gmra.mrb[0].mxu0 %v1674_v42  ;;  %v10609_v42 = vpack.c.bf16 %v10306_v21, %v10290_v16  ;;  %v10621_v16 = vpack.c.bf16 %v1538_v38, %v1536_v7  ;;  %v10653_v7 = vpack.c.bf16 %v10344_v59, %v10328_v52  ;;  %v1448_v38 = vld [vmem:[%s9822_s29 + $0x100] sm:$0xff] }
 0x257   : > { %3313 = vmatpush1.bf16.msra.mxu0 %v8819_v49  ;;  %3063 = vmatprep.mubr.bf16.mxu0 %v1681_v18  ;;  %v1424_v49 = vld [vmem:[%s9822_s29 + $0x40] sm:$0xff]  ;;  %v1426_v18 = vld [vmem:[%s9822_s29 + $0x50] sm:$0xff] }
 0x258   : > { %3314 = vmatprep.subr.bf16.mxu0 %v13125_v41  ;;  %v1686_v21 = vpack.c.bf16 %v1426_v18, %v1424_v49  ;;  %v1542_v49 = vld [vmem:[%s9822_s29 + $0x3f0] sm:$0xff]  ;;  %v1699_v18 = vpack.c.bf16 %v10101_v33, %v10087_v20  ;;  %v8826_v20 = vld [vmem:[%s12968_s1 + $0x1b8] sm:$0xff]   ;;  %v1560_v33 = vld [vmem:[%s9822_s29 + $0x480] sm:$0xff] }
 0x259   : > { %2614 = vmatmul.mubr.bf16.gmra.mrb[8].mxu1 %v10609_v42 }
 0x25a   : > { %2621 = vmatprep.mubr.bf16.mxu1 %v10621_v16 }
 0x25b   : > { %3315 = vmatpush1.bf16.msra.mxu0 %v8820_v40  ;;  %v1693_v40 = vpack.c.bf16 %v1431_v29, %v10073_v8  ;;  %v8824_v8 = vld [vmem:[%s12968_s1 + $0x1a8] sm:$0xff]   ;;  %v1450_v29 = vld [vmem:[%s9822_s29 + $0x110] sm:$0xff] }
 0x25c   : > { %3316 = vmatprep.subr.bf16.mxu0 %v13125_v41  ;;  %v1698_v59 = vpack.c.bf16 %v1450_v29, %v1448_v38  ;;  %v1456_v38 = vld [vmem:[%s9822_s29 + $0x140] sm:$0xff]  ;;  %v1458_v29 = vld [vmem:[%s9822_s29 + $0x150] sm:$0xff] }
 0x25e   : > { %3064 = vmatmul.mubr.bf16.gmra.mrb[4].mxu0 %v1680_v57  ;;  %v1428_v57 = vld [vmem:[%s9822_s29 + $0x60] sm:$0xff] }
 0x25f   : > { %3071 = vmatprep.mubr.bf16.mxu0 %v1687_v31  ;;  %3317 = vmatpush1.bf16.msra.mxu0 %v8821_v46  ;;  %v1430_v31 = vld [vmem:[%s9822_s29 + $0x70] sm:$0xff]  ;;  %v1540_v46 = vld [vmem:[%s9822_s29 + $0x3e0] sm:$0xff] }
 0x260   : > { %3318 = vmatprep.subr.bf16.mxu0 %v13125_v41  ;;  %v10642_v9 = vpack.c.bf16 %v1542_v49, %v1540_v46  ;;  %v1692_v10 = vpack.c.bf16 %v1430_v31, %v1428_v57  ;;  %v10675_v57 = vpack.c.bf16 %v10357_v43, %v13127_v22  ;;  %v1452_v31 = vld [vmem:[%s9822_s29 + $0x120] sm:$0xff]  ;;  %v1566_v46 = vld [vmem:[%s9822_s29 + $0x4b0] sm:$0xff] }
 0x261   : > { %2622 = vmatmul.mubr.bf16.gmra.mrb[12].mxu1 %v10631_v27 }
 0x262   : > { %2629 = vmatprep.mubr.bf16.mxu1 %v10642_v9 }
 0x263   : > { %3319 = vmatpush1.bf16.msra.mxu0 %v8822_v58  ;;  %v8825_v58 = vld [vmem:[%s12968_s1 + $0x1b0] sm:$0xff]  }
 0x264   : > { %3320 = vmatprep.subr.bf16.mxu0 %v13125_v41 }
 0x266   : > { %3072 = vmatmul.mubr.bf16.gmra.mrb[8].mxu0 %v1686_v21  ;;  %v1562_v21 = vld [vmem:[%s9822_s29 + $0x490] sm:$0xff] }
 0x267   : > { %3079 = vmatprep.mubr.bf16.mxu0 %v1693_v40  ;;  %3321 = vmatpush1.bf16.msra.mxu0 %v8823_v28  ;;  %v10664_v52 = vpack.c.bf16 %v1562_v21, %v1560_v33  ;;  %v1705_v40 = vpack.c.bf16 %v10118_v63, %v10104_v48  ;;  %v8827_v28 = vld [vmem:[%s12968_s1 + $0x1c0] sm:$0xff]   ;;  %v8828_v48 = vld [vmem:[%s12968_s1 + $0x1c8] sm:$0xff]   ;;  %v10712_v21 = vpack.c.bf16 %v10395_v60, %v10379_v23 }
 0x268   : > { %3322 = vmatprep.subr.bf16.mxu0 %v13125_v41  ;;  %v1564_v63 = vld [vmem:[%s9822_s29 + $0x4a0] sm:$0xff]  ;;  %v1723_v60 = vpack.c.bf16 %v10167_v13, %v10157_v62  ;;  %v1729_v62 = vpack.c.bf16 %v10183_v55, %v10170_v14  ;;  %v10744_v13 = vpack.c.bf16 %v10427_v61, %v13127_v22  ;;  %v1735_v61 = vpack.c.bf16 %v10197_v53, %v10186_v56 }
 0x269   : > { %2630 = vmatmul.mubr.bf16.gmra.mrb[16].mxu1 %v10653_v7  ;;  %v10686_v43 = vpack.c.bf16 %v1566_v46, %v1564_v63  ;;  %v1480_v63 = vld [vmem:[%s9822_s29 + $0x200] sm:$0xff]  ;;  %v1482_v46 = vld [vmem:[%s9822_s29 + $0x210] sm:$0xff] }
 0x26a   : > { %2637 = vmatprep.mubr.bf16.mxu1 %v10664_v52 }
 0x26b   : > { %3323 = vmatpush1.bf16.msra.mxu0 %v8824_v8  ;;  %v1454_v8 = vld [vmem:[%s9822_s29 + $0x130] sm:$0xff] }
 0x26c   : > { %3324 = vmatprep.subr.bf16.mxu0 %v13125_v41  ;;  %v1704_v49 = vpack.c.bf16 %v1454_v8, %v1452_v31  ;;  %v1572_v31 = vld [vmem:[%s9822_s29 + $0x4e0] sm:$0xff]  ;;  %v1574_v8 = vld [vmem:[%s9822_s29 + $0x4f0] sm:$0xff] }
 0x26e   : > { %3080 = vmatmul.mubr.bf16.gmra.mrb[12].mxu0 %v1692_v10  ;;  %v1711_v10 = vpack.c.bf16 %v10139_v25, %v10121_v0  ;;  %v1568_v0 = vld [vmem:[%s9822_s29 + $0x4c0] sm:$0xff]  ;;  %v1570_v25 = vld [vmem:[%s9822_s29 + $0x4d0] sm:$0xff] }
 0x26f   : > { %3087 = vmatprep.mubr.bf16.mxu0 %v1699_v18  ;;  %3325 = vmatpush1.bf16.msra.mxu0 %v8825_v58  ;;  %v8829_v18 = vld [vmem:[%s12968_s1 + $0x1d0] sm:$0xff]   ;;  %v10697_v58 = vpack.c.bf16 %v10376_v1, %v10360_v37  ;;  %v10705_v33 = vpack.c.bf16 %v1570_v25, %v1568_v0  ;;  %v1710_v37 = vpack.c.bf16 %v1458_v29, %v1456_v38  ;;  %v1596_v0 = vld [vmem:[%s9822_s29 + $0x5a0] sm:$0xff] }
 0x270   : > { %3326 = vmatprep.subr.bf16.mxu0 %v13125_v41  ;;  %v1722_v38 = vpack.c.bf16 %v1482_v46, %v1480_v63  ;;  %v1486_v29 = vld [vmem:[%s9822_s29 + $0x230] sm:$0xff]  ;;  %v10794_v46 = vpack.c.bf16 %v10484_v26, %v10468_v12  ;;  %v1753_v12 = vpack.c.bf16 %v10240_v17, %v10227_v6  ;;  %v10811_v26 = vpack.c.bf16 %v10497_v19, %v13127_v22  ;;  %v13174_v17 = vld [vmem:[#allocation35_spill] sm:$0xff] }
 0x271   : > { %2638 = vmatmul.mubr.bf16.gmra.mrb[20].mxu1 %v10675_v57  ;;  %v1598_v25 = vld [vmem:[%s9822_s29 + $0x5b0] sm:$0xff] }
 0x272   : > { %2645 = vmatprep.mubr.bf16.mxu1 %v10686_v43  ;;  %v10754_v14 = vpack.c.bf16 %v1598_v25, %v1596_v0  ;;  %v1606_v63 = vld [vmem:[%s9822_s29 + $0x5f0] sm:$0xff]  ;;  %v8835_v0 = vld [vmem:[%s12968_s1 + $0x208] sm:$0xff]  }
 0x273   : > { %3327 = vmatpush1.bf16.msra.mxu0 %v8826_v20  ;;  %v1463_v20 = vld [vmem:[%s9822_s29 + $0x178] sm:$0xff]  ;;  %v1518_v25 = vld [vmem:[%s9822_s29 + $0x330] sm:$0xff] }
 0x274   : > { %3328 = vmatprep.subr.bf16.mxu0 %v13125_v41  ;;  %v1717_v1 = vpack.c.bf16 %v1463_v20, %v10142_v32  ;;  %v10722_v32 = vpack.c.bf16 %v1574_v8, %v1572_v31  ;;  %v10762_v20 = vpack.c.bf16 %v10446_v24, %v10430_v30  ;;  %v10776_v30 = vpack.c.bf16 %v10465_v44, %v10449_v11  ;;  %v1492_v24 = vld [vmem:[%s9822_s29 + $0x260] sm:$0xff]  ;;  %v8832_v8 = vld [vmem:[%s12968_s1 + $0x1e8] sm:$0xff]  }
 0x275   : > { %v1747_v44 = vpack.c.bf16 %v10224_v47, %v10214_v3 }
 0x276   : > { %3088 = vmatmul.mubr.bf16.gmra.mrb[16].mxu0 %v1698_v59  ;;  %v1460_v59 = vld [vmem:[%s9822_s29 + $0x160] sm:$0xff] }
 0x277   : > { %3095 = vmatprep.mubr.bf16.mxu0 %v1705_v40  ;;  %3329 = vmatpush1.bf16.msra.mxu0 %v8827_v28  ;;  %v8830_v40 = vld [vmem:[%s12968_s1 + $0x1d8] sm:$0xff]   ;;  %v1462_v28 = vld [vmem:[%s9822_s29 + $0x170] sm:$0xff] }
 0x278   : > { %3330 = vmatprep.subr.bf16.mxu0 %v13125_v41  ;;  %v1716_v23 = vpack.c.bf16 %v1462_v28, %v1460_v59  ;;  %v1600_v59 = vld [vmem:[%s9822_s29 + $0x5c0] sm:$0xff]  ;;  %v1495_v28 = vld [vmem:[%s9822_s29 + $0x278] sm:$0xff] }
 0x279   : > { %2646 = vmatmul.mubr.bf16.gmra.mrb[24].mxu1 %v10697_v58  ;;  %v1741_v53 = vpack.c.bf16 %v1495_v28, %v10200_v54  ;;  %v8836_v28 = vld [vmem:[%s12968_s1 + $0x210] sm:$0xff]  }
 0x27a   : > { %2653 = vmatprep.mubr.bf16.mxu1 %v10705_v33 }
 0x27b   : > { %3331 = vmatpush1.bf16.msra.mxu0 %v8828_v48  ;;  %v10730_v48 = vpack.c.bf16 %v10414_v5, %v10398_v36  ;;  %v1484_v36 = vld [vmem:[%s9822_s29 + $0x220] sm:$0xff] }
 0x27c   : > { %3332 = vmatprep.subr.bf16.mxu0 %v13125_v41  ;;  %v8831_v5 = vld [vmem:[%s12968_s1 + $0x1e0] sm:$0xff]   ;;  %v1728_v55 = vpack.c.bf16 %v1486_v29, %v1484_v36  ;;  %v1626_v36 = vld [vmem:[%s9822_s29 + $0x690] sm:$0xff] }
 0x27d   : > { %v8834_v29 = vld [vmem:[%s12968_s1 + $0x1f0] sm:$0xff]  }
 0x27e   : > { %3096 = vmatmul.mubr.bf16.gmra.mrb[20].mxu0 %v1704_v49  ;;  %v1592_v49 = vld [vmem:[%s9822_s29 + $0x580] sm:$0xff] }
 0x27f   : > { %3103 = vmatprep.mubr.bf16.mxu0 %v1711_v10  ;;  %3333 = vmatpush1.bf16.msra.mxu0 %v8829_v18  ;;  %v1594_v10 = vld [vmem:[%s9822_s29 + $0x590] sm:$0xff] }
 0x280   : > { %3334 = vmatprep.subr.bf16.mxu0 %v13125_v41  ;;  %v10737_v18 = vpack.c.bf16 %v1594_v10, %v1592_v49  ;;  %v1512_v49 = vld [vmem:[%s9822_s29 + $0x300] sm:$0xff] }
 0x281   : > { %2654 = vmatmul.mubr.bf16.gmra.mrb[28].mxu1 %v10712_v21  ;;  %v8833_v10 = vld [vmem:[%s12968_s1 + $0x200] sm:$0xff]  }
 0x282   : > { %2661 = vmatprep.mubr.bf16.mxu1 %v10722_v32  ;;  %8125 = vmatprep.subr.bf16.mxu1 %v8833_v10 }
 0x283   : > { %3335 = vmatpush1.bf16.msra.mxu0 %v8830_v40  ;;  %v1602_v40 = vld [vmem:[%s9822_s29 + $0x5d0] sm:$0xff]  ;;  %8126 = vmatpush3.bf16.msra.mxu1 %v8833_v10  ;;  %v8839_v10 = vld [vmem:[%s12968_s1 + $0x220] sm:$0xff]  }
 0x284   : > { %3336 = vmatprep.subr.bf16.mxu0 %v13125_v41  ;;  %v10770_v31 = vpack.c.bf16 %v1602_v40, %v1600_v59  ;;  %8127 = vmatprep.subr.bf16.mxu1 %v8835_v0  ;;  %v13176_v59 = vld [vmem:[#allocation77_spill] sm:$0xff] }
 0x286   : > { %3104 = vmatmul.mubr.bf16.gmra.mrb[24].mxu0 %v1710_v37  ;;  %v1488_v37 = vld [vmem:[%s9822_s29 + $0x240] sm:$0xff] }
 0x287   : > { %3111 = vmatprep.mubr.bf16.mxu0 %v1717_v1  ;;  %3337 = vmatpush1.bf16.msra.mxu0 %v8831_v5  ;;  %v1490_v1 = vld [vmem:[%s9822_s29 + $0x250] sm:$0xff]  ;;  %v1516_v5 = vld [vmem:[%s9822_s29 + $0x320] sm:$0xff] }
 0x288   : > { %3338 = vmatprep.subr.bf16.mxu0 %v13125_v41  ;;  %v1734_v56 = vpack.c.bf16 %v1490_v1, %v1488_v37  ;;  %v1752_v6 = vpack.c.bf16 %v1518_v25, %v1516_v5  ;;  %8128 = vmatpush3.bf16.msra.mxu1 %v8835_v0  ;;  %v1759_v37 = vpack.c.bf16 %v13174_v17, %v10243_v35  ;;  %v13175_v1 = vld [vmem:[#allocation73_spill] sm:$0xff]  ;;  %v13179_v0 = vld [vmem:[#allocation38_spill] sm:$0xff]  ;;  %v13180_v25 = vld [vmem:[#allocation40_spill] sm:$0xff] }
 0x289   : > { %2662 = vmatmul.mubr.bf16.gmra.mrb[32].mxu1 %v10730_v48  ;;  %v10832_v40 = vpack.c.bf16 %v13176_v59, %v13175_v1  ;;  %8129 = vmatprep.subr.bf16.mxu1 %v8836_v28  ;;  %v1634_v35 = vld [vmem:[%s9822_s29 + $0x6d0] sm:$0xff]  ;;  %v8842_v17 = vld [vmem:[%s12968_s1 + $0x238] sm:$0xff]  }
 0x28a   : > { %2669 = vmatprep.mubr.bf16.mxu1 %v10737_v18  ;;  %v1546_v1 = vld [vmem:[%s9822_s29 + $0x410] sm:$0xff] }
 0x28b   : > { %3339 = vmatpush1.bf16.msra.mxu0 %v8832_v8  ;;  %v1527_v8 = vld [vmem:[%s9822_s29 + $0x378] sm:$0xff]  ;;  %v13182_v59 = vld [vmem:[#allocation41_spill] sm:$0xff] }
 0x28c   : > { %3340 = vmatprep.subr.bf16.mxu0 %v13125_v41  ;;  %8130 = vmatpush3.bf16.msra.mxu1 %v8836_v28  ;;  %v13183_v28 = vld [vmem:[#allocation43_spill] sm:$0xff] }
 0x28e   : > { %3112 = vmatmul.mubr.bf16.gmra.mrb[28].mxu0 %v1716_v23  ;;  %v1494_v23 = vld [vmem:[%s9822_s29 + $0x270] sm:$0xff] }
 0x28f   : > { %3119 = vmatprep.mubr.bf16.mxu0 %v1723_v60  ;;  %v1604_v60 = vld [vmem:[%s9822_s29 + $0x5e0] sm:$0xff]  ;;  %v1740_v11 = vpack.c.bf16 %v1494_v23, %v1492_v24  ;;  %3341 = vmatpush1.bf16.msra.mxu0 %v8834_v29 }
 0x290   : > { %v10786_v54 = vpack.c.bf16 %v1606_v63, %v1604_v60  ;;  %3342 = vmatprep.subr.bf16.mxu0 %v13125_v41  ;;  %v8837_v41 = vld [vmem:[%s12968_s1 + $0x218] sm:$0xff]   ;;  %v1632_v24 = vld [vmem:[%s9822_s29 + $0x6c0] sm:$0xff]  ;;  %v13177_v63 = vld [vmem:[#allocation36_spill] sm:$0xff] }
 0x291   : > { %2670 = vmatmul.mubr.bf16.gmra.mrb[36].mxu1 %v10744_v13  ;;  %v10846_v23 = vpack.c.bf16 %v1634_v35, %v1632_v24  ;;  %8131 = vmatprep.subr.bf16.mxu1 %v8837_v41  ;;  %v13184_v24 = vld [vmem:[#allocation26_spill] sm:$0xff]  ;;  %v13185_v35 = vld [vmem:[#allocation27_spill] sm:$0xff] }
 0x292   : > { %2677 = vmatprep.mubr.bf16.mxu1 %v10754_v14  ;;  %8132 = vmatpush3.bf16.msra.mxu1 %v8837_v41  ;;  %v1548_v41 = vld [vmem:[%s9822_s29 + $0x420] sm:$0xff] }
 0x293   : > { %8133 = vmatprep.subr.bf16.mxu1 %v8839_v10 }
 0x296   : > { %3120 = vmatmul.mubr.bf16.gmra.mrb[32].mxu0 %v1722_v38  ;;  %v1514_v38 = vld [vmem:[%s9822_s29 + $0x310] sm:$0xff]  ;;  %8134 = vmatpush3.bf16.msra.mxu1 %v8839_v10 }
 0x297   : > { %3127 = vmatprep.mubr.bf16.mxu0 %v1729_v62  ;;  %v1624_v62 = vld [vmem:[%s9822_s29 + $0x680] sm:$0xff]  ;;  %v1746_v47 = vpack.c.bf16 %v1514_v38, %v1512_v49  ;;  %v1554_v10 = vld [vmem:[%s9822_s29 + $0x450] sm:$0xff] }
 0x298   : > { %v10804_v3 = vpack.c.bf16 %v1626_v36, %v1624_v62  ;;  %v1524_v38 = vld [vmem:[%s9822_s29 + $0x360] sm:$0xff]  ;;  %v8838_v62 = vld [vmem:[%s12968_s1 + $0x1f8] sm:$0xff]   ;;  %v8840_v36 = vld [vmem:[%s12968_s1 + $0x228] sm:$0xff]  }
 0x299   : > { %2678 = vmatmul.mubr.bf16.gmra.mrb[40].mxu1 %v10762_v20  ;;  %3343 = vmatpush1.bf16.msra.mxu0 %v8838_v62  ;;  %v13188_v62 = vld [vmem:[#allocation28_spill] sm:$0xff] }
 0x29a   : > { %2685 = vmatprep.mubr.bf16.mxu1 %v10770_v31  ;;  %8135 = vmatprep.subr.bf16.mxu1 %v8840_v36 }
 0x29b   : > { %8136 = vmatpush3.bf16.msra.mxu1 %v8840_v36  ;;  %v13189_v36 = vld [vmem:[#allocation29_spill] sm:$0xff] }
 0x29e   : > { %3128 = vmatmul.mubr.bf16.gmra.mrb[36].mxu0 %v1728_v55  ;;  %v1628_v55 = vld [vmem:[%s9822_s29 + $0x6a0] sm:$0xff] }
 0x29f   : > { %3135 = vmatprep.mubr.bf16.mxu0 %v1735_v61  ;;  %v1630_v61 = vld [vmem:[%s9822_s29 + $0x6b0] sm:$0xff] }
 0x2a0   : > { %v10824_v19 = vpack.c.bf16 %v1630_v61, %v1628_v55  ;;  %v1771_v55 = vpack.c.bf16 %v13180_v25, %v13179_v0  ;;  %v10875_v61 = vpack.c.bf16 %v10554_v45, %v10538_v51  ;;  %v13181_v51 = vld [vmem:[#allocation3_spill] sm:$0xff]  ;;  %v1558_v0 = vld [vmem:[%s9822_s29 + $0x470] sm:$0xff]  ;;  %v13191_v25 = vld [vmem:[#allocation30_spill] sm:$0xff] }
 0x2a1   : > { %2686 = vmatmul.mubr.bf16.gmra.mrb[44].mxu1 %v10776_v30 }
 0x2a2   : > { %2693 = vmatprep.mubr.bf16.mxu1 %v10786_v54 }
 0x2a6   : > { %3136 = vmatmul.mubr.bf16.gmra.mrb[40].mxu0 %v1734_v56  ;;  %v1520_v56 = vld [vmem:[%s9822_s29 + $0x340] sm:$0xff] }
 0x2a7   : > { %3143 = vmatprep.mubr.bf16.mxu0 %v1741_v53  ;;  %v1522_v53 = vld [vmem:[%s9822_s29 + $0x350] sm:$0xff] }
 0x2a8   : > { %v1758_v60 = vpack.c.bf16 %v1522_v53, %v1520_v56  ;;  %v1777_v56 = vpack.c.bf16 %v13183_v28, %v13182_v59  ;;  %v1550_v53 = vld [vmem:[%s9822_s29 + $0x430] sm:$0xff]  ;;  %v13195_v59 = vld [vmem:[#allocation32_spill] sm:$0xff] }
 0x2a9   : > { %2694 = vmatmul.mubr.bf16.gmra.mrb[48].mxu1 %v10794_v46  ;;  %v13196_v28 = vld [vmem:[#allocation33_spill] sm:$0xff] }
 0x2aa   : > { %2701 = vmatprep.mubr.bf16.mxu1 %v10804_v3 }
 0x2ae   : > { %3144 = vmatmul.mubr.bf16.gmra.mrb[44].mxu0 %v1740_v11  ;;  %v1765_v11 = vpack.c.bf16 %v1527_v8, %v13177_v63  ;;  %v1776_v8 = vpack.c.bf16 %v1550_v53, %v1548_v41  ;;  %v13187_v63 = vld [vmem:[#allocation46_spill] sm:$0xff]  ;;  %v13197_v41 = vld [vmem:[#allocation52_spill] sm:$0xff] }
 0x2af   : > { %3151 = vmatprep.mubr.bf16.mxu0 %v1747_v44  ;;  %v13178_v44 = vld [vmem:[#allocation78_spill] sm:$0xff] }
 0x2b0   : > { %v10852_v49 = vpack.c.bf16 %v10535_v4, %v13178_v44  ;;  %v1638_v4 = vld [vmem:[%s9822_s29 + $0x6f0] sm:$0xff]  ;;  %v1552_v44 = vld [vmem:[%s9822_s29 + $0x440] sm:$0xff]  ;;  %v13198_v53 = vld [vmem:[#allocation54_spill] sm:$0xff] }
 0x2b1   : > { %2702 = vmatmul.mubr.bf16.gmra.mrb[52].mxu1 %v10811_v26 }
 0x2b2   : > { %2709 = vmatprep.mubr.bf16.mxu1 %v10824_v19 }
 0x2b6   : > { %3152 = vmatmul.mubr.bf16.gmra.mrb[48].mxu0 %v1746_v47  ;;  %v1526_v47 = vld [vmem:[%s9822_s29 + $0x370] sm:$0xff] }
 0x2b7   : > { %3159 = vmatprep.mubr.bf16.mxu0 %v1753_v12  ;;  %v1636_v12 = vld [vmem:[%s9822_s29 + $0x6e0] sm:$0xff]  ;;  %v1764_v29 = vpack.c.bf16 %v1526_v47, %v1524_v38  ;;  %v1559_v38 = vld [vmem:[%s9822_s29 + $0x478] sm:$0xff]  ;;  %v1782_v47 = vpack.c.bf16 %v1554_v10, %v1552_v44  ;;  %v13202_v10 = vld [vmem:[#allocation57_spill] sm:$0xff] }
 0x2b8   : > { %v10868_v5 = vpack.c.bf16 %v1638_v4, %v1636_v12  ;;  %v13190_v12 = vld [vmem:[#allocation47_spill] sm:$0xff] }
 0x2b9   : > { %2710 = vmatmul.mubr.bf16.gmra.mrb[56].mxu1 %v10832_v40  ;;  %v1789_v4 = vpack.c.bf16 %v1559_v38, %v13190_v12  ;;  %v13201_v44 = vld [vmem:[#allocation55_spill] sm:$0xff] }
 0x2ba   : > { %2717 = vmatprep.mubr.bf16.mxu1 %v10846_v23  ;;  %v1807_v38 = vpack.c.bf16 %v13202_v10, %v13201_v44  ;;  %v13203_v12 = vld [vmem:[#allocation39_spill] sm:$0xff]  ;;  %v13214_v44 = vld [vmem:[#allocation56_spill] sm:$0xff] }
 0x2bb   : > { %v13215_v10 = vld [vmem:[#allocation59_spill] sm:$0xff] }
 0x2be   : > { %3160 = vmatmul.mubr.bf16.gmra.mrb[52].mxu0 %v1752_v6  ;;  %v8841_v6 = vld [vmem:[%s12968_s1 + $0x230] sm:$0xff]  }
 0x2bf   : > { %3167 = vmatprep.mubr.bf16.mxu0 %v1759_v37  ;;  %v1544_v37 = vld [vmem:[%s9822_s29 + $0x400] sm:$0xff]  ;;  %8137 = vmatprep.subr.bf16.mxu1 %v8841_v6 }
 0x2c0   : > { %8138 = vmatpush3.bf16.msra.mxu1 %v8841_v6  ;;  %v1770_v45 = vpack.c.bf16 %v1546_v1, %v1544_v37  ;;  %v13194_v37 = vld [vmem:[#allocation51_spill] sm:$0xff] }
 0x2c1   : > { %2718 = vmatmul.mubr.bf16.gmra.mrb[60].mxu1 %v10852_v49  ;;  %8139 = vmatprep.subr.bf16.mxu1 %v8842_v17 }
 0x2c2   : > { %2725 = vmatprep.mubr.bf16.mxu1 %v10868_v5 }
 0x2c4   : > { %8140 = vmatpush3.bf16.msra.mxu1 %v8842_v17  ;;  %v13193_v17 = vld [vmem:[#allocation49_spill] sm:$0xff] }
 0x2c5   : > { %v1795_v1 = vpack.c.bf16 %v13194_v37, %v13193_v17  ;;  %v13206_v17 = vld [vmem:[#allocation45_spill] sm:$0xff]  ;;  %v13207_v37 = vld [vmem:[#allocation48_spill] sm:$0xff] }
 0x2c6   : > { %3168 = vmatmul.mubr.bf16.gmra.mrb[56].mxu0 %v1758_v60  ;;  %v13186_v60 = vld [vmem:[#allocation44_spill] sm:$0xff] }
 0x2c7   : > { %3175 = vmatprep.mubr.bf16.mxu0 %v1765_v11  ;;  %v1783_v11 = vpack.c.bf16 %v13187_v63, %v13186_v60  ;;  %v13199_v60 = vld [vmem:[#allocation34_spill] sm:$0xff]  ;;  %v13200_v63 = vld [vmem:[#allocation37_spill] sm:$0xff] }
 0x2c9   : > { %2726 = vmatmul.mubr.bf16.gmra.mrb[64].mxu1 %v10875_v61 }
 0x2ca   : > { %8141 = vmatprep.mubr.bf16.mxu1 %v13181_v51  ;;  %v1576_v51 = vld [vmem:[%s9822_s29 + $0x500] sm:$0xff] }
 0x2ce   : > { %3176 = vmatmul.mubr.bf16.gmra.mrb[60].mxu0 %v1764_v29  ;;  %v1556_v29 = vld [vmem:[%s9822_s29 + $0x460] sm:$0xff] }
 0x2cf   : > { %3183 = vmatprep.mubr.bf16.mxu0 %v1771_v55  ;;  %v13192_v55 = vld [vmem:[#allocation31_spill] sm:$0xff]  ;;  %v1788_v6 = vpack.c.bf16 %v1558_v0, %v1556_v29  ;;  %v13205_v0 = vld [vmem:[#allocation58_spill] sm:$0xff] }
 0x2d1   : > { %8142 = vmatmul.mubr.bf16.vlgmr.msra.gmra.mrb[68].mxu1 %v13184_v24  ;;  %v1801_v24 = vpack.c.bf16 %v13198_v53, %v13197_v41  ;;  %v13210_v41 = vld [vmem:[#allocation50_spill] sm:$0xff]  ;;  %v13211_v53 = vld [vmem:[#allocation53_spill] sm:$0xff] }
 0x2d2   : > { %8145 = vmatprep.mubr.bf16.mxu1 %v13185_v35  ;;  %v1580_v35 = vld [vmem:[%s9822_s29 + $0x520] sm:$0xff] }
 0x2d6   : > { %3184 = vmatmul.mubr.bf16.gmra.mrb[64].mxu0 %v1770_v45  ;;  %v1578_v45 = vld [vmem:[%s9822_s29 + $0x510] sm:$0xff] }
 0x2d7   : > { %3191 = vmatprep.mubr.bf16.mxu0 %v1777_v56  ;;  %v1794_v56 = vpack.c.bf16 %v1578_v45, %v1576_v51  ;;  %v13208_v51 = vld [vmem:[#allocation60_spill] sm:$0xff]  ;;  %v13209_v45 = vld [vmem:[#allocation62_spill] sm:$0xff] }
 0x2d9   : > { %8146 = vmatmul.mubr.bf16.gmra.mrb[72].mxu1 %v13188_v62  ;;  %v1584_v62 = vld [vmem:[%s9822_s29 + $0x540] sm:$0xff] }
 0x2da   : > { %8149 = vmatprep.mubr.bf16.mxu1 %v13189_v36  ;;  %v1586_v36 = vld [vmem:[%s9822_s29 + $0x550] sm:$0xff] }
 0x2db   : > { %v1806_v29 = vpack.c.bf16 %v1586_v36, %v1584_v62  ;;  %v13216_v62 = vld [vmem:[#allocation66_spill] sm:$0xff]  ;;  %v13217_v36 = vld [vmem:[#allocation68_spill] sm:$0xff] }
 0x2de   : > { %3192 = vmatmul.mubr.bf16.gmra.mrb[68].mxu0 %v1776_v8  ;;  %v1582_v8 = vld [vmem:[%s9822_s29 + $0x530] sm:$0xff] }
 0x2df   : > { %3199 = vmatprep.mubr.bf16.mxu0 %v1783_v11  ;;  %v1800_v11 = vpack.c.bf16 %v1582_v8, %v1580_v35  ;;  %v13212_v35 = vld [vmem:[#allocation63_spill] sm:$0xff]  ;;  %v13213_v8 = vld [vmem:[#allocation65_spill] sm:$0xff] }
 0x2e1   : > { %8150 = vmatmul.mubr.bf16.gmra.mrb[76].mxu1 %v13191_v25 }
 0x2e2   : > { %8153 = vmatprep.mubr.bf16.mxu1 %v13192_v55  ;;  %v1588_v55 = vld [vmem:[%s9822_s29 + $0x560] sm:$0xff] }
 0x2e6   : > { %3200 = vmatmul.mubr.bf16.gmra.mrb[72].mxu0 %v1782_v47  ;;  %v1591_v47 = vld [vmem:[%s9822_s29 + $0x578] sm:$0xff] }
 0x2e7   : > { %3207 = vmatprep.mubr.bf16.mxu0 %v1789_v4  ;;  %v13204_v4 = vld [vmem:[#allocation42_spill] sm:$0xff]  ;;  %v1813_v25 = vpack.c.bf16 %v1591_v47, %v13205_v0  ;;  %v1831_v47 = vpack.c.bf16 %v13217_v36, %v13216_v62  ;;  %v13218_v0 = vld [vmem:[#allocation61_spill] sm:$0xff] }
 0x2e8   : > { %v13229_v62 = vld [vmem:[#allocation81_spill] sm:$0xff] }
 0x2e9   : > { %8154 = vmatmul.mubr.bf16.gmra.mrb[80].mxu1 %v13195_v59  ;;  %v1819_v59 = vpack.c.bf16 %v13209_v45, %v13208_v51  ;;  %v13221_v51 = vld [vmem:[#allocation67_spill] sm:$0xff]  ;;  %v13222_v45 = vld [vmem:[#allocation70_spill] sm:$0xff] }
 0x2ea   : > { %8157 = vmatprep.mubr.bf16.mxu1 %v13196_v28  ;;  %v1608_v28 = vld [vmem:[%s9822_s29 + $0x600] sm:$0xff] }
 0x2ee   : > { %3208 = vmatmul.mubr.bf16.gmra.mrb[76].mxu0 %v1788_v6  ;;  %v1590_v6 = vld [vmem:[%s9822_s29 + $0x570] sm:$0xff] }
 0x2ef   : > { %3215 = vmatprep.mubr.bf16.mxu0 %v1795_v1  ;;  %v1812_v1 = vpack.c.bf16 %v1590_v6, %v1588_v55  ;;  %v13220_v6 = vld [vmem:[#allocation69_spill] sm:$0xff] }
 0x2f1   : > { %8158 = vmatmul.mubr.bf16.gmra.mrb[84].mxu1 %v13199_v60  ;;  %v1825_v60 = vpack.c.bf16 %v13213_v8, %v13212_v35  ;;  %v13225_v35 = vld [vmem:[#allocation72_spill] sm:$0xff] }
 0x2f2   : > { %8161 = vmatprep.mubr.bf16.mxu1 %v13200_v63  ;;  %v1612_v63 = vld [vmem:[%s9822_s29 + $0x620] sm:$0xff]  ;;  %v13226_v8 = vld [vmem:[#allocation76_spill] sm:$0xff] }
 0x2f6   : > { %3216 = vmatmul.mubr.bf16.gmra.mrb[80].mxu0 %v1794_v56  ;;  %v1610_v56 = vld [vmem:[%s9822_s29 + $0x610] sm:$0xff] }
 0x2f7   : > { %3223 = vmatprep.mubr.bf16.mxu0 %v1801_v24  ;;  %v1818_v24 = vpack.c.bf16 %v1610_v56, %v1608_v28  ;;  %v13223_v28 = vld [vmem:[#allocation71_spill] sm:$0xff]  ;;  %v13224_v56 = vld [vmem:[#allocation74_spill] sm:$0xff] }
 0x2f9   : > { %8162 = vmatmul.mubr.bf16.gmra.mrb[88].mxu1 %v13203_v12  ;;  %v1616_v12 = vld [vmem:[%s9822_s29 + $0x640] sm:$0xff] }
 0x2fa   : > { %8165 = vmatprep.mubr.bf16.mxu1 %v13204_v4  ;;  %v1618_v4 = vld [vmem:[%s9822_s29 + $0x650] sm:$0xff] }
 0x2fb   : > { %v1830_v55 = vpack.c.bf16 %v1618_v4, %v1616_v12  ;;  %v13231_v12 = vld [vmem:[#allocation82_spill] sm:$0xff] }
 0x2fe   : > { %3224 = vmatmul.mubr.bf16.gmra.mrb[84].mxu0 %v1800_v11  ;;  %v1614_v11 = vld [vmem:[%s9822_s29 + $0x630] sm:$0xff] }
 0x2ff   : > { %3231 = vmatprep.mubr.bf16.mxu0 %v1807_v38  ;;  %v1824_v38 = vpack.c.bf16 %v1614_v11, %v1612_v63  ;;  %v13227_v63 = vld [vmem:[#allocation75_spill] sm:$0xff] }
 0x300   : > { %v13228_v11 = vld [vmem:[#allocation79_spill] sm:$0xff] }
 0x301   : > { %8166 = vmatmul.mubr.bf16.gmra.mrb[92].mxu1 %v13206_v17 }
 0x302   : > { %8169 = vmatprep.mubr.bf16.mxu1 %v13207_v37  ;;  %v1620_v37 = vld [vmem:[%s9822_s29 + $0x660] sm:$0xff] }
 0x306   : > { %3232 = vmatmul.mubr.bf16.gmra.mrb[88].mxu0 %v1806_v29  ;;  %v1623_v29 = vld [vmem:[%s9822_s29 + $0x678] sm:$0xff] }
 0x307   : > { %3239 = vmatprep.mubr.bf16.mxu0 %v1813_v25  ;;  %v13219_v25 = vld [vmem:[#allocation64_spill] sm:$0xff]  ;;  %v1837_v17 = vpack.c.bf16 %v1623_v29, %v13220_v6  ;;  %v1648_v29 = vld [vmem:[%s9822_s29 + $0x740] sm:$0xff] }
 0x308   : > { %v13232_v6 = vld [vmem:[#allocation83_spill] sm:$0xff] }
 0x309   : > { %8170 = vmatmul.mubr.bf16.gmra.mrb[96].mxu1 %v13210_v41  ;;  %v1843_v41 = vpack.c.bf16 %v13224_v56, %v13223_v28  ;;  %v13236_v28 = vld [vmem:[#allocation7_spill] sm:$0xff]  ;;  %v13237_v56 = vld [vmem:[#allocation8_spill] sm:$0xff] }
 0x30a   : > { %8173 = vmatprep.mubr.bf16.mxu1 %v13211_v53  ;;  %v1640_v53 = vld [vmem:[%s9822_s29 + $0x700] sm:$0xff] }
 0x30e   : > { %3240 = vmatmul.mubr.bf16.gmra.mrb[92].mxu0 %v1812_v1  ;;  %v1622_v1 = vld [vmem:[%s9822_s29 + $0x670] sm:$0xff] }
 0x30f   : > { %3247 = vmatprep.mubr.bf16.mxu0 %v1819_v59  ;;  %v1836_v59 = vpack.c.bf16 %v1622_v1, %v1620_v37  ;;  %v1652_v37 = vld [vmem:[%s9822_s29 + $0x760] sm:$0xff]  ;;  %v1654_v1 = vld [vmem:[%s9822_s29 + $0x770] sm:$0xff] }
 0x311   : > { %8174 = vmatmul.mubr.bf16.gmra.mrb[100].mxu1 %v13214_v44  ;;  %v1849_v44 = vpack.c.bf16 %v13228_v11, %v13227_v63 }
 0x312   : > { %8177 = vmatprep.mubr.bf16.mxu1 %v13215_v10  ;;  %v1644_v10 = vld [vmem:[%s9822_s29 + $0x720] sm:$0xff] }
 0x316   : > { %3248 = vmatmul.mubr.bf16.gmra.mrb[96].mxu0 %v1818_v24  ;;  %v1642_v24 = vld [vmem:[%s9822_s29 + $0x710] sm:$0xff] }
 0x317   : > { %3255 = vmatprep.mubr.bf16.mxu0 %v1825_v60  ;;  %v1842_v60 = vpack.c.bf16 %v1642_v24, %v1640_v53  ;;  %v13238_v53 = vld [vmem:[#allocation9_spill] sm:$0xff] }
 0x319   : > { %8178 = vmatmul.mubr.bf16.gmra.mrb[104].mxu1 %v13218_v0  ;;  %v1650_v0 = vld [vmem:[%s9822_s29 + $0x750] sm:$0xff] }
 0x31a   : > { %8181 = vmatprep.mubr.bf16.mxu1 %v13219_v25  ;;  %v1655_v25 = vld [vmem:[%s9822_s29 + $0x778] sm:$0xff] }
 0x31e   : > { %3256 = vmatmul.mubr.bf16.gmra.mrb[100].mxu0 %v1824_v38  ;;  %v1646_v38 = vld [vmem:[%s9822_s29 + $0x730] sm:$0xff] }
 0x31f   : > { %3263 = vmatprep.mubr.bf16.mxu0 %v1831_v47  ;;  %v1848_v36 = vpack.c.bf16 %v1646_v38, %v1644_v10  ;;  %v13230_v47 = vld [vmem:[#allocation80_spill] sm:$0xff] }
 0x320   : > { %v1855_v4 = vpack.c.bf16 %v13231_v12, %v13230_v47  ;;  %v13243_v47 = vld [vmem:[#allocation12_spill] sm:$0xff] }
 0x321   : > { %8182 = vmatmul.mubr.bf16.gmra.mrb[108].mxu1 %v13221_v51  ;;  %v1860_v51 = vpack.c.bf16 %v1654_v1, %v1652_v37  ;;  %v13249_v1 = vld [vmem:[#allocation14_spill] sm:$0xff] }
 0x322   : > { %8185 = vmatprep.mubr.bf16.mxu1 %v13222_v45  ;;  %v13234_v45 = vld [vmem:[#allocation5_spill] sm:$0xff] }
 0x326   : > { %3264 = vmatmul.mubr.bf16.gmra.mrb[104].mxu0 %v1830_v55  ;;  %v1854_v55 = vpack.c.bf16 %v1650_v0, %v1648_v29 }
 0x327   : > { %3271 = vmatprep.mubr.bf16.mxu0 %v1837_v17  ;;  %v1861_v17 = vpack.c.bf16 %v1655_v25, %v13232_v6 }
 0x329   : > { %8186 = vmatmul.mubr.bf16.gmra.mrb[112].mxu1 %v13225_v35  ;;  %v13239_v35 = vld [vmem:[#allocation10_spill] sm:$0xff] }
 0x32a   : > { %8189 = vmatprep.mubr.bf16.mxu1 %v13226_v8 }
 0x32e   : > { %3272 = vmatmul.mubr.bf16.gmra.mrb[108].mxu0 %v1836_v59  ;;  %v13235_v59 = vld [vmem:[#allocation6_spill] sm:$0xff] }
 0x32f   : > { %3279 = vmatprep.mubr.bf16.mxu0 %v1843_v41 }
 0x331   : > { %8190 = vmatmul.mubr.bf16.gmra.mrb[116].mxu1 %v13229_v62  ;;  %v13241_v62 = vld [vmem:[#allocation11_spill] sm:$0xff] }
 0x332   : > { %8193 = vmatprep.mubr.bf16.mxu1 %v10548_v2  ;;  %v13233_v2 = vld [vmem:[#allocation4_spill] sm:$0xff] }
 0x336   : > { %3280 = vmatmul.mubr.bf16.gmra.mrb[112].mxu0 %v1842_v60 }
 0x337   : > { %3287 = vmatprep.mubr.bf16.mxu0 %v1849_v44 }
 0x339   : > { %8194 = vmatmul.mubr.bf16.gmra.mrb[120].mxu1 %v10562_v39  ;;  %v10979_v39 = vpop.f32.mrb[0].mxu1 }
 0x33a   : > { %v2601_v41 = vpop.f32.mrb[1].mxu1 }
 0x33b   : > { %v10982_v24 = vpop.f32.mrb[2].mxu1 }
 0x33c   : > { %v2604_v8 = vpop.f32.mrb[3].mxu1 }
 0x33d   : > { %v10985_v60 = vpop.f32.mrb[4].mxu1  ;;  %v13255_v8 = vld [vmem:[#allocation16_spill] sm:$0xff] }
 0x33e   : > { %3288 = vmatmul.mubr.bf16.gmra.mrb[116].mxu0 %v1848_v36  ;;  %v2609_v63 = vpop.f32.mrb[5].mxu1 }
 0x33f   : > { %3295 = vmatprep.mubr.bf16.mxu0 %v1855_v4  ;;  %v10987_v11 = vpop.f32.mrb[6].mxu1 }
 0x340   : > { %v2612_v44 = vpop.f32.mrb[7].mxu1 }
 0x341   : > { %v10989_v10 = vpop.f32.mrb[8].mxu1 }
 0x342   : > { %13240 = vst [vmem:[#allocation35_spill] sm:$0xff] %v10989_v10  ;;  %v2617_v38 = vpop.f32.mrb[9].mxu1 }
 0x343   : > { %v10992_v36 = vpop.f32.mrb[10].mxu1 }
 0x344   : > { %13242 = vst [vmem:[#allocation73_spill] sm:$0xff] %v10992_v36  ;;  %v2620_v12 = vpop.f32.mrb[11].mxu1 }
 0x345   : > { %v10995_v4 = vpop.f32.mrb[12].mxu1 }
 0x346   : > { %3296 = vmatmul.mubr.bf16.gmra.mrb[120].mxu0 %v1854_v55  ;;  %13244 = vst [vmem:[#allocation77_spill] sm:$0xff] %v10995_v4  ;;  %v2625_v29 = vpop.f32.mrb[13].mxu1  ;;  %v1662_v4 = vld [vmem:[%s9822_s29 + $0x7b0] sm:$0xff] }
 0x347   : > { %3303 = vmatprep.mubr.bf16.mxu0 %v1861_v17  ;;  %v10997_v0 = vpop.f32.mrb[14].mxu1  ;;  %v13247_v17 = vld [vmem:[#allocation13_spill] sm:$0xff] }
 0x348   : > { %13245 = vst [vmem:[#allocation36_spill] sm:$0xff] %v10997_v0  ;;  %v2628_v25 = vpop.f32.mrb[15].mxu1 }
 0x349   : > { %v10999_v55 = vpop.f32.mrb[16].mxu1  ;;  %v13259_v25 = vld [vmem:[#allocation17_spill] sm:$0xff] }
 0x34a   : > { %13246 = vst [vmem:[#allocation78_spill] sm:$0xff] %v10999_v55  ;;  %v2633_v6 = vpop.f32.mrb[17].mxu1 }
 0x34b   : > { %v11002_v37 = vpop.f32.mrb[18].mxu1 }
 0x34c   : > { %13248 = vst [vmem:[#allocation38_spill] sm:$0xff] %v11002_v37 }
 0x34e   : > { %3304 = vmatmul.mubr.bf16.gmra.mrb[124].mxu0 %v1860_v51  ;;  %v2636_v51 = vpop.f32.mrb[19].mxu1 }
 0x34f   : > { %3344 = vmatprep.mubr.bf16.mxu0 %v13233_v2  ;;  %v11005_v2 = vpop.f32.mrb[20].mxu1 }
 0x350   : > { %13250 = vst [vmem:[#allocation40_spill] sm:$0xff] %v11005_v2 }
 0x356   : > { %3345 = vmatmul.mubr.bf16.vlgmr.msra.gmra.mrb[0].mxu0 %v13234_v45  ;;  %v2641_v45 = vpop.f32.mrb[21].mxu1 }
 0x357   : > { %3352 = vmatprep.mubr.bf16.mxu0 %v13235_v59  ;;  %v11007_v59 = vpop.f32.mrb[22].mxu1 }
 0x358   : > { %13251 = vst [vmem:[#allocation3_spill] sm:$0xff] %v11007_v59 }
 0x35e   : > { %3353 = vmatmul.mubr.bf16.gmra.mrb[4].mxu0 %v13236_v28  ;;  %v2644_v28 = vpop.f32.mrb[23].mxu1 }
 0x35f   : > { %3360 = vmatprep.mubr.bf16.mxu0 %v13237_v56  ;;  %v11009_v56 = vpop.f32.mrb[24].mxu1 }
 0x360   : > { %13252 = vst [vmem:[#allocation41_spill] sm:$0xff] %v11009_v56  ;;  %v2649_v41 = vpop.f32.mrb[25].mxu1  ;;  %v1658_v56 = vld [vmem:[%s9822_s29 + $0x790] sm:$0xff] }
 0x366   : > { %3361 = vmatmul.mubr.bf16.gmra.mrb[8].mxu0 %v13238_v53  ;;  %v13253_v53 = vld [vmem:[#allocation15_spill] sm:$0xff] }
 0x367   : > { %3368 = vmatprep.mubr.bf16.mxu0 %v13239_v35  ;;  %v11012_v35 = vpop.f32.mrb[26].mxu1 }
 0x368   : > { %13254 = vst [vmem:[#allocation43_spill] sm:$0xff] %v11012_v35  ;;  %v2652_v63 = vpop.f32.mrb[27].mxu1  ;;  %v1656_v35 = vld [vmem:[%s9822_s29 + $0x780] sm:$0xff] }
 0x369   : > { %v11015_v44 = vpop.f32.mrb[28].mxu1  ;;  %v13265_v63 = vld [vmem:[#allocation19_spill] sm:$0xff]  ;;  %v1845_v2 = vpack.c.bf16 %v1658_v56, %v1656_v35 }
 0x36a   : > { %13256 = vst [vmem:[#allocation26_spill] sm:$0xff] %v11015_v44  ;;  %v2657_v38 = vpop.f32.mrb[29].mxu1  ;;  %v8855_v44 = vld [vmem:[%s12969_s2 + $0x70] sm:$0xff]   ;;  %v1414_v56 = vld [vmem:[%s12973_s6] sm:$0xf] }
 0x36e   : > { %3369 = vmatmul.mubr.bf16.gmra.mrb[12].mxu0 %v13241_v62  ;;  %v11017_v62 = vpop.f32.mrb[30].mxu1 }
 0x36f   : > { %3376 = vmatprep.mubr.bf16.mxu0 %v13243_v47  ;;  %13257 = vst [vmem:[#allocation27_spill] sm:$0xff] %v11017_v62  ;;  %v2660_v47 = vpop.f32.mrb[31].mxu1 }
 0x370   : > { %v11019_v12 = vpop.f32.mrb[32].mxu1  ;;  %v13267_v47 = vld [vmem:[#allocation20_spill] sm:$0xff] }
 0x371   : > { %13258 = vst [vmem:[#allocation44_spill] sm:$0xff] %v11019_v12  ;;  %v2665_v29 = vpop.f32.mrb[33].mxu1  ;;  %v1671_v12 = vld [vmem:[%s9822_s29 + $0x7f8] sm:$0xff] }
 0x372   : > { %v11022_v6 = vpop.f32.mrb[34].mxu1 }
 0x373   : > { %13260 = vst [vmem:[#allocation46_spill] sm:$0xff] %v11022_v6  ;;  %v11145_v6 = vld [vmem:[%s9822_s29 + $0x7d8] sm:$0xff] }
 0x376   : > { %3377 = vmatmul.mubr.bf16.gmra.mrb[16].mxu0 %v13247_v17  ;;  %v13261_v17 = vld [vmem:[#allocation18_spill] sm:$0xff] }
 0x377   : > { %3384 = vmatprep.mubr.bf16.mxu0 %v13249_v1  ;;  %v2668_v1 = vpop.f32.mrb[35].mxu1 }
 0x378   : > { %v11025_v51 = vpop.f32.mrb[36].mxu1 }
 0x379   : > { %13262 = vst [vmem:[#allocation28_spill] sm:$0xff] %v11025_v51  ;;  %v2673_v45 = vpop.f32.mrb[37].mxu1 }
 0x37a   : > { %v11027_v28 = vpop.f32.mrb[38].mxu1 }
 0x37b   : > { %13263 = vst [vmem:[#allocation29_spill] sm:$0xff] %v11027_v28  ;;  %v2676_v41 = vpop.f32.mrb[39].mxu1 }
 0x37c   : > { %v13271_v41 = vld [vmem:[#allocation21_spill] sm:$0xff] }
 0x37e   : > { %3385 = vmatmul.mubr.bf16.gmra.mrb[20].mxu0 %v13253_v53  ;;  %v11029_v53 = vpop.f32.mrb[40].mxu1 }
 0x37f   : > { %3392 = vmatprep.mubr.bf16.mxu0 %v13255_v8  ;;  %13264 = vst [vmem:[#allocation47_spill] sm:$0xff] %v11029_v53  ;;  %v2681_v8 = vpop.f32.mrb[41].mxu1 }
 0x380   : > { %v11032_v38 = vpop.f32.mrb[42].mxu1  ;;  %v13273_v8 = vld [vmem:[#allocation22_spill] sm:$0xff] }
 0x381   : > { %13266 = vst [vmem:[#allocation30_spill] sm:$0xff] %v11032_v38  ;;  %v2684_v29 = vpop.f32.mrb[43].mxu1 }
 0x386   : > { %3393 = vmatmul.mubr.bf16.gmra.mrb[24].mxu0 %v13259_v25  ;;  %v11035_v25 = vpop.f32.mrb[44].mxu1 }
 0x387   : > { %3400 = vmatprep.mubr.bf16.mxu0 %v13261_v17  ;;  %13268 = vst [vmem:[#allocation31_spill] sm:$0xff] %v11035_v25  ;;  %v2689_v17 = vpop.f32.mrb[45].mxu1 }
 0x388   : > { %v11037_v1 = vpop.f32.mrb[46].mxu1 }
 0x389   : > { %13269 = vst [vmem:[#allocation49_spill] sm:$0xff] %v11037_v1  ;;  %v2692_v51 = vpop.f32.mrb[47].mxu1 }
 0x38a   : > { %v11039_v45 = vpop.f32.mrb[48].mxu1  ;;  %v13277_v51 = vld [vmem:[#allocation23_spill] sm:$0xff] }
 0x38b   : > { %13270 = vst [vmem:[#allocation51_spill] sm:$0xff] %v11039_v45  ;;  %v2697_v28 = vpop.f32.mrb[49].mxu1 }
 0x38c   : > { %v11042_v53 = vpop.f32.mrb[50].mxu1  ;;  %v13279_v28 = vld [vmem:[#allocation24_spill] sm:$0xff] }
 0x38d   : > { %13272 = vst [vmem:[#allocation32_spill] sm:$0xff] %v11042_v53 }
 0x38e   : > { %3401 = vmatmul.mubr.bf16.gmra.mrb[28].mxu0 %v13265_v63  ;;  %v2700_v63 = vpop.f32.mrb[51].mxu1 }
 0x38f   : > { %3408 = vmatprep.mubr.bf16.mxu0 %v13267_v47  ;;  %v11045_v38 = vpop.f32.mrb[52].mxu1 }
 0x390   : > { %13274 = vst [vmem:[#allocation33_spill] sm:$0xff] %v11045_v38  ;;  %v2705_v47 = vpop.f32.mrb[53].mxu1 }
 0x391   : > { %v11047_v29 = vpop.f32.mrb[54].mxu1 }
 0x392   : > { %13275 = vst [vmem:[#allocation52_spill] sm:$0xff] %v11047_v29  ;;  %v2708_v25 = vpop.f32.mrb[55].mxu1 }
 0x393   : > { %v11049_v17 = vpop.f32.mrb[56].mxu1  ;;  %v13283_v25 = vld [vmem:[#allocation25_spill] sm:$0xff] }
 0x394   : > { %13276 = vst [vmem:[#allocation54_spill] sm:$0xff] %v11049_v17  ;;  %v2713_v1 = vpop.f32.mrb[57].mxu1  ;;  %v8851_v17 = vld [vmem:[%s12969_s2 + $0x60] sm:$0xff]  }
 0x395   : > { %v11052_v45 = vpop.f32.mrb[58].mxu1 }
 0x396   : > { %3409 = vmatmul.mubr.bf16.gmra.mrb[32].mxu0 %v13271_v41  ;;  %13278 = vst [vmem:[#allocation34_spill] sm:$0xff] %v11052_v45  ;;  %v2716_v41 = vpop.f32.mrb[59].mxu1 }
 0x397   : > { %3416 = vmatprep.mubr.bf16.mxu0 %v13273_v8  ;;  %v11055_v53 = vpop.f32.mrb[60].mxu1 }
 0x398   : > { %13280 = vst [vmem:[#allocation37_spill] sm:$0xff] %v11055_v53  ;;  %v2721_v8 = vpop.f32.mrb[61].mxu1  ;;  %v8847_v53 = vld [vmem:[%s12969_s2 + $0x50] sm:$0xff]  }
 0x399   : > { %v11057_v63 = vpop.f32.mrb[62].mxu1 }
 0x39a   : > { %13281 = vst [vmem:[#allocation55_spill] sm:$0xff] %v11057_v63  ;;  %v2724_v38 = vpop.f32.mrb[63].mxu1  ;;  %v11096_v63 = vld [vmem:[%s9822_s29 + $0x7a8] sm:$0xff] }
 0x39b   : > { %v13286_v38 = vld [vmem:[#allocation85_spill] sm:$0xff] }
 0x39c   : > { %v11059_v47 = vpop.f32.mrb[64].mxu1 }
 0x39d   : > { %13282 = vst [vmem:[#allocation57_spill] sm:$0xff] %v11059_v47  ;;  %v2729_v29 = vpop.f32.mrb[65].mxu1  ;;  %v11091_v47 = vld [vmem:[%s9822_s29 + $0x798] sm:$0xff] }
 0x39e   : > { %3417 = vmatmul.mubr.bf16.gmra.mrb[36].mxu0 %v13277_v51  ;;  %v11062_v1 = vpop.f32.mrb[66].mxu1  ;;  %v13285_v51 = vld [vmem:[#allocation84_spill] sm:$0xff] }
 0x39f   : > { %3424 = vmatprep.mubr.bf16.mxu0 %v13279_v28  ;;  %13284 = vst [vmem:[#allocation39_spill] sm:$0xff] %v11062_v1  ;;  %v2732_v45 = vpop.f32.mrb[67].mxu1  ;;  %v11088_v1 = vld [vmem:[%s9822_s29 + $0x788] sm:$0xff] }
 0x3a0   : > { %v8844_v45 = vld [vmem:[%s12969_s2] sm:$0xff]  }
 0x3a4   : > { %v11065_v28 = vpop.f32.mrb[68].mxu1 }
 0x3a5   : > { %v11067_v41 = vpop.f32.mrb[69].mxu1 }
 0x3a6   : > { %3425 = vmatmul.mubr.bf16.gmra.mrb[40].mxu0 %v13283_v25  ;;  %v11069_v8 = vpop.f32.mrb[70].mxu1  ;;  %v8843_v25 = vld [vmem:[%s12969_s2 + $0x40] sm:$0xff]  }
 0x3a7   : > { %3432 = vmatprep.mubr.bf16.mxu0 %v13285_v51  ;;  %v11072_v29 = vpop.f32.mrb[71].mxu1  ;;  %7625 = vmatprep.subr.bf16.mxu1 %v8843_v25  ;;  %v8845_v51 = vld [vmem:[%s12969_s2 + $0x48] sm:$0xff]   ;;  %v11099_v25 = vld [vmem:[%s9822_s29 + $0x7b8] sm:$0xff] }
 0x3a8   : > { %7626 = vmatpush3.bf16.msra.mxu1 %v8844_v45  ;;  %v1852_v45 = vpack.c.bf16 %v11099_v25, %v11096_v63 }
 0x3a9   : > { %7627 = vmatprep.subr.bf16.mxu1 %v8845_v51  ;;  %v8848_v51 = vld [vmem:[%s12969_s2 + $0x10] sm:$0xff]  }
 0x3ae   : > { %3433 = vmatmul.mubr.bf16.gmra.mrb[44].mxu0 %v13286_v38  ;;  %v8846_v38 = vld [vmem:[%s12969_s2 + $0x8] sm:$0xff]  }
 0x3af   : > { %3440 = vmatprep.mubr.bf16.mxu0 %v10577_v15  ;;  %v1846_v15 = vpack.c.bf16 %v11091_v47, %v11088_v1  ;;  %7628 = vmatpush3.bf16.msra.mxu1 %v8846_v38  ;;  %v11111_v38 = vpop.f32.mrb[72].mxu1 }
 0x3b0   : > { %7629 = vmatprep.subr.bf16.mxu1 %v8847_v53  ;;  %v8853_v53 = vld [vmem:[%s12969_s2 + $0x68] sm:$0xff]  }
 0x3b1   : > { %8197 = vmatprep.mubr.bf16.mxu1 %v1846_v15  ;;  %v11116_v15 = vpop.f32.mrb[73].mxu1 }
 0x3b2   : > { %8198 = vmatmul.mubr.bf16.gmra.mrb[124].mxu1 %v1852_v45  ;;  %v11121_v45 = vpop.f32.mrb[74].mxu1 }
 0x3b3   : > { %7630 = vmatpush3.bf16.msra.mxu1 %v8848_v51  ;;  %v11125_v51 = vpop.f32.mrb[75].mxu1 }
 0x3b6   : > { %3441 = vmatmul.mubr.bf16.gmra.mrb[48].mxu0 %v10587_v34  ;;  %v8849_v34 = vld [vmem:[%s12969_s2 + $0x58] sm:$0xff]  }
 0x3b7   : > { %3448 = vmatprep.mubr.bf16.mxu0 %v10598_v50  ;;  %v8850_v50 = vld [vmem:[%s12969_s2 + $0x18] sm:$0xff]   ;;  %7631 = vmatprep.subr.bf16.mxu1 %v8849_v34  ;;  %v8852_v34 = vld [vmem:[%s12969_s2 + $0x20] sm:$0xff]  }
 0x3b8   : > { %7632 = vmatpush3.bf16.msra.mxu1 %v8850_v50  ;;  %v11142_v50 = vld [vmem:[%s9822_s29 + $0x7c8] sm:$0xff] }
 0x3b9   : > { %7633 = vmatprep.subr.bf16.mxu1 %v8851_v17  ;;  %v1858_v17 = vpack.c.bf16 %v11145_v6, %v11142_v50 }
 0x3bb   : > { %8201 = vmatprep.mubr.bf16.mxu1 %v1858_v17 }
 0x3bc   : > { %7634 = vmatpush3.bf16.msra.mxu1 %v8852_v34  ;;  %v11152_v34 = vld [vmem:[%s9822_s29 + $0x7e8] sm:$0xff] }
 0x3bd   : > { %7635 = vmatprep.subr.bf16.mxu1 %v8853_v53  ;;  %v1864_v62 = vpack.c.bf16 %v1671_v12, %v11152_v34  ;;  %v8856_v53 = vld [vmem:[%s12969_s2 + $0x30] sm:$0xff]  }
 0x3be   : > { %3449 = vmatmul.mubr.bf16.gmra.mrb[52].mxu0 %v10609_v42  ;;  %v8854_v42 = vld [vmem:[%s12969_s2 + $0x28] sm:$0xff]  }
 0x3bf   : > { %3456 = vmatprep.mubr.bf16.mxu0 %v10621_v16  ;;  %8202 = vmatmul.mubr.bf16.gmra.mrb[128].mxu1 %v1864_v62  ;;  %v13287_v16 = vmov 0.0|0.0  }
 0x3c0   : > { %7636 = vmatpush3.bf16.msra.mxu1 %v8854_v42  ;;  %4878 = vmatprep.mubr.bf16.mxu1 %v13287_v16  ;;  %v11165_v42 = vpop.f32.mrb[76].mxu1 }
 0x3c1   : > { %7637 = vmatprep.subr.bf16.mxu1 %v8855_v44  ;;  %v11170_v12 = vpop.f32.mrb[77].mxu1 }
 0x3c2   : > { %v11175_v62 = vpop.f32.mrb[78].mxu1 }
 0x3c3   : > { %v11179_v17 = vpop.f32.mrb[79].mxu1 }
 0x3c4   : > { %7638 = vmatpush3.bf16.msra.mxu1 %v8856_v53  ;;  %v11188_v53 = vpop.f32.mrb[80].mxu1 }
 0x3c6   : > { %3457 = vmatmul.mubr.bf16.gmra.mrb[56].mxu0 %v10631_v27  ;;  %v8857_v27 = vld [vmem:[%s12969_s2 + $0x78] sm:$0xff]  }
 0x3c7   : > { %3464 = vmatprep.mubr.bf16.mxu0 %v10642_v9  ;;  %v8858_v9 = vld [vmem:[%s12969_s2 + $0x38] sm:$0xff]   ;;  %7639 = vmatprep.subr.bf16.mxu1 %v8857_v27  ;;  %v11190_v27 = vpop.f32.mrb[81].mxu1 }
 0x3c8   : > { %7640 = vmatpush3.bf16.msra.mxu1 %v8858_v9  ;;  %v11192_v44 = vpop.f32.mrb[82].mxu1 }
 0x3c9   : > { %v11194_v9 = vpop.f32.mrb[83].mxu1 }
 0x3cb   : > { %4879 = vmatmul.mubr.bf16.vlgmr.msra.gmra.mrb[132].mxu1 %v13287_v16 }
 0x3cc   : > { %4886 = vmatprep.mubr.bf16.mxu1 %v13287_v16 }
 0x3ce   : > { %3465 = vmatmul.mubr.bf16.gmra.mrb[60].mxu0 %v10653_v7  ;;  %v11200_v7 = vpop.f32.mrb[84].mxu1 }
 0x3cf   : > { %3472 = vmatprep.mubr.bf16.mxu0 %v10664_v52  ;;  %v11202_v52 = vpop.f32.mrb[85].mxu1 }
 0x3d3   : > { %4887 = vmatmul.mubr.bf16.gmra.mrb[136].mxu1 %v13287_v16 }
 0x3d6   : > { %3473 = vmatmul.mubr.bf16.gmra.mrb[64].mxu0 %v10675_v57  ;;  %v11204_v57 = vpop.f32.mrb[86].mxu1 }
 0x3d7   : > { %3480 = vmatprep.mubr.bf16.mxu0 %v10686_v43  ;;  %v11206_v43 = vpop.f32.mrb[87].mxu1 }
 0x3de   : > { %3481 = vmatmul.mubr.bf16.gmra.mrb[68].mxu0 %v10697_v58  ;;  %v11212_v58 = vpop.f32.mrb[88].mxu1 }
 0x3df   : > { %3488 = vmatprep.mubr.bf16.mxu0 %v10705_v33  ;;  %v11214_v33 = vpop.f32.mrb[89].mxu1 }
 0x3e6   : > { %3489 = vmatmul.mubr.bf16.gmra.mrb[72].mxu0 %v10712_v21  ;;  %v11216_v21 = vpop.f32.mrb[90].mxu1 }
 0x3e7   : > { %3496 = vmatprep.mubr.bf16.mxu0 %v10722_v32  ;;  %v11218_v32 = vpop.f32.mrb[91].mxu1 }
 0x3ee   : > { %3497 = vmatmul.mubr.bf16.gmra.mrb[76].mxu0 %v10730_v48  ;;  %v11224_v48 = vpop.f32.mrb[92].mxu1 }
 0x3ef   : > { %3504 = vmatprep.mubr.bf16.mxu0 %v10737_v18  ;;  %v11226_v18 = vpop.f32.mrb[93].mxu1 }
 0x3f6   : > { %3505 = vmatmul.mubr.bf16.gmra.mrb[80].mxu0 %v10744_v13  ;;  %v11228_v13 = vpop.f32.mrb[94].mxu1 }
 0x3f7   : > { %3512 = vmatprep.mubr.bf16.mxu0 %v10754_v14  ;;  %v11230_v14 = vpop.f32.mrb[95].mxu1 }
 0x3fe   : > { %3513 = vmatmul.mubr.bf16.gmra.mrb[84].mxu0 %v10762_v20  ;;  %v11236_v20 = vpop.f32.mrb[96].mxu1 }
 0x3ff   : > { %3520 = vmatprep.mubr.bf16.mxu0 %v10770_v31  ;;  %v11238_v31 = vpop.f32.mrb[97].mxu1 }
 0x406   : > { %3521 = vmatmul.mubr.bf16.gmra.mrb[88].mxu0 %v10776_v30  ;;  %v13068_v30 = vlaneseq }
 0x407   : > { %3528 = vmatprep.mubr.bf16.mxu0 %v10786_v54  ;;  %v11240_v54 = vpop.f32.mrb[98].mxu1 }
 0x408   : > { %v11242_v16 = vpop.f32.mrb[99].mxu1 }
 0x409   : > { %v11260_v59 = vpop.f32.mrb[100].mxu1 }
 0x40a   : > { %13289 = vst [vmem:[#allocation58_spill] sm:$0xff] %v11260_v59  ;;  %v11262_v37 = vpop.f32.mrb[101].mxu1 }
 0x40b   : > { %13290 = vst [vmem:[#allocation45_spill] sm:$0xff] %v11262_v37  ;;  %v11266_v55 = vpop.f32.mrb[102].mxu1  ;;  %v1666_v37 = vld [vmem:[%s9822_s29 + $0x7d0] sm:$0xff] }
 0x40c   : > { %13291 = vst [vmem:[#allocation48_spill] sm:$0xff] %v11266_v55  ;;  %v11268_v0 = vpop.f32.mrb[103].mxu1  ;;  %v1844_v55 = vpack.c.bf16 %v11088_v1, %v13127_v22 }
 0x40d   : > { %13292 = vst [vmem:[#allocation60_spill] sm:$0xff] %v11268_v0 }
 0x40e   : > { %3529 = vmatmul.mubr.bf16.gmra.mrb[92].mxu0 %v10794_v46  ;;  %v11247_v46 = vshrl.u32 %v13068_v30, 7 }
 0x40f   : > { %3536 = vmatprep.mubr.bf16.mxu0 %v10804_v3 }
 0x410   : > { %13288 = vst [vmem:[#allocation42_spill] sm:$0xff] %v11247_v46  ;;  %v2011_v3 = vsub.s32 0, %v11247_v46 }
 0x416   : > { %3537 = vmatmul.mubr.bf16.gmra.mrb[96].mxu0 %v10811_v26  ;;  %v1413_v26 = vld [vmem:[%s12972_s5] sm:$0xf] }
 0x417   : > { %3544 = vmatprep.mubr.bf16.mxu0 %v10824_v19  ;;  %v11255_v19 = vrot.slane %v1413_v26, %v2011_v3 }
 0x41e   : > { %3545 = vmatmul.mubr.bf16.gmra.mrb[100].mxu0 %v10832_v40 }
 0x41f   : > { %3552 = vmatprep.mubr.bf16.mxu0 %v10846_v23 }
 0x426   : > { %3553 = vmatmul.mubr.bf16.gmra.mrb[104].mxu0 %v10852_v49 }
 0x427   : > { %3560 = vmatprep.mubr.bf16.mxu0 %v10868_v5 }
 0x429   : > { %v3346_v40 = vpop.f32.mrb[0].mxu0 }
 0x42a   : > { %v8329_v23 = vadd.f32 %v3346_v40, %v11255_v19  ;;  %v3348_v30 = vpop.f32.mrb[1].mxu0 }
 0x42b   : > { %v3349_v46 = vpop.f32.mrb[2].mxu0  ;;  %v1660_v30 = vld [vmem:[%s9822_s29 + $0x7a0] sm:$0xff] }
 0x42c   : > { %v8330_v49 = vadd.f32 %v3349_v46, %v11255_v19  ;;  %v3636_v5 = vadd.f32 %v8329_v23, %v11067_v41  ;;  %v3351_v26 = vpop.f32.mrb[3].mxu0 }
 0x42e   : > { %v3639_v40 = vadd.f32 %v8330_v49, %v11072_v29  ;;  %3561 = vmatmul.mubr.bf16.gmra.mrb[108].mxu0 %v10875_v61  ;;  %v3954_v35 = vmul.f32 0.2, %v3636_v5  ;;  %vm3890_vm0 = vcmp.gt.f32.partialorder %v3636_v5, 0.0  ;;  %v11280_v29 = vrot.slane %v1414_v56, %v2011_v3  ;;  %v1415_v49 = vld [vmem:[%s12974_s7] sm:$0xf] }
 0x42f   : > { %3568 = vmatprep.mubr.bf16.mxu0 %v1845_v2  ;;  %v1851_v2 = vpack.c.bf16 %v1662_v4, %v1660_v30  ;;  %v11289_v30 = vrot.slane %v1415_v49, %v2011_v3 }
 0x430   : > { %v3955_v41 = vmul.f32 0.2, %v3639_v40  ;;  %vm3891_vm1 = vcmp.gt.f32.partialorder %v3639_v40, 0.0  ;;  %v4018_v59 = vsel %vm3890_vm0, %v3636_v5, %v3954_v35  ;;  %v1664_v35 = vld [vmem:[%s9822_s29 + $0x7c0] sm:$0xff] }
 0x431   : > { %v3354_v46 = vpop.f32.mrb[4].mxu0  ;;  %v4086_v4 = vmul.f32 %v11280_v29, %v4018_v59  ;;  %v11302_v59 = vpop.f32.mrb[104].mxu1 }
 0x432   : > { %v8331_v23 = vadd.f32 %v3354_v46, %v11255_v19  ;;  %v3356_v26 = vpop.f32.mrb[5].mxu0  ;;  %v4019_v10 = vsel %vm3891_vm1, %v3639_v40, %v3955_v41  ;;  %v11310_v49 = vpop.f32.mrb[105].mxu1 }
 0x433   : > { %v3357_v61 = vpop.f32.mrb[6].mxu0  ;;  %v4087_v40 = vmul.f32 %v11280_v29, %v4019_v10  ;;  %v11305_v3 = vadd.f32 %v11289_v30, %v4086_v4 }
 0x434   : > { %v3644_v36 = vadd.f32 %v8331_v23, %v11065_v28  ;;  %v8332_v46 = vadd.f32 %v3357_v61, %v11255_v19  ;;  %v3359_v26 = vpop.f32.mrb[7].mxu0 }
 0x435   : > { %13293 = vst [vmem:[#allocation62_spill] sm:$0xff] %v11305_v3 }
 0x436   : > { %vm3892_vm2 = vcmp.gt.f32.partialorder %v3644_v36, 0.0  ;;  %v3956_v1 = vmul.f32 0.2, %v3644_v36  ;;  %v3647_v56 = vadd.f32 %v8332_v46, %v11069_v8  ;;  %3569 = vmatmul.mubr.bf16.gmra.mrb[112].mxu0 %v1844_v55  ;;  %v8859_v55 = vld [vmem:[%s12969_s2 + $0xc0] sm:$0xff]  }
 0x437   : > { %3576 = vmatprep.mubr.bf16.mxu0 %v1851_v2  ;;  %v1857_v2 = vpack.c.bf16 %v1666_v37, %v1664_v35  ;;  %7689 = vmatprep.subr.bf16.mxu1 %v8859_v55  ;;  %v1670_v55 = vld [vmem:[%s9822_s29 + $0x7f0] sm:$0xff] }
 0x438   : > { %v4020_v0 = vsel %vm3892_vm2, %v3644_v36, %v3956_v1  ;;  %vm3893_vm3 = vcmp.gt.f32.partialorder %v3647_v56, 0.0  ;;  %v3957_v5 = vmul.f32 0.2, %v3647_v56  ;;  %v8860_v36 = vld [vmem:[%s12969_s2 + $0x80] sm:$0xff]  }
 0x439   : > { %v4088_v28 = vmul.f32 %v11280_v29, %v4020_v0  ;;  %v3362_v23 = vpop.f32.mrb[8].mxu0  ;;  %7690 = vmatpush3.bf16.msra.mxu1 %v8860_v36 }
 0x43a   : > { %v4021_v41 = vsel %vm3893_vm3, %v3647_v56, %v3957_v5  ;;  %v8333_v61 = vadd.f32 %v3362_v23, %v11255_v19  ;;  %v3364_v8 = vpop.f32.mrb[9].mxu0  ;;  %v11315_v5 = vpop.f32.mrb[106].mxu1 }
 0x43b   : > { %v11308_v0 = vadd.f32 %v11289_v30, %v4088_v28  ;;  %v3365_v10 = vpop.f32.mrb[10].mxu0  ;;  %v4089_v46 = vmul.f32 %v11280_v29, %v4021_v41  ;;  %v11317_v4 = vpop.f32.mrb[107].mxu1  ;;  %v11320_v28 = vadd.f32 %v11289_v30, %v4087_v40  ;;  %v1668_v41 = vld [vmem:[%s9822_s29 + $0x7e0] sm:$0xff] }
 0x43c   : > { %v8334_v26 = vadd.f32 %v3365_v10, %v11255_v19  ;;  %v3652_v1 = vadd.f32 %v8333_v61, %v11116_v15  ;;  %v3367_v56 = vpop.f32.mrb[11].mxu0  ;;  %v13295_v15 = vpack.c.bf16 %v11096_v63, %v11091_v47  ;;  %v8861_v63 = vld [vmem:[%s12969_s2 + $0xc8] sm:$0xff]  }
 0x43d   : > { %13294 = vst [vmem:[#allocation50_spill] sm:$0xff] %v11308_v0  ;;  %v11323_v37 = vadd.f32 %v11289_v30, %v4089_v46  ;;  %7691 = vmatprep.subr.bf16.mxu1 %v8861_v63 }
 0x43e   : > { %v3655_v23 = vadd.f32 %v8334_v26, %v11125_v51  ;;  %3577 = vmatmul.mubr.bf16.gmra.mrb[116].mxu0 %v13295_v15  ;;  %v3958_v8 = vmul.f32 0.2, %v3652_v1  ;;  %vm3894_vm5 = vcmp.gt.f32.partialorder %v3652_v1, 0.0  ;;  %v1863_v26 = vpack.c.bf16 %v1670_v55, %v1668_v41 }
 0x43f   : > { %3584 = vmatprep.mubr.bf16.mxu0 %v1857_v2  ;;  %v13296_v55 = vpack.c.bf16 %v11142_v50, %v11099_v25 }
 0x440   : > { %vm3895_vm4 = vcmp.gt.f32.partialorder %v3655_v23, 0.0  ;;  %v3959_v40 = vmul.f32 0.2, %v3655_v23  ;;  %v4022_v2 = vsel %vm3894_vm5, %v3652_v1, %v3958_v8 }
 0x441   : > { %v3370_v36 = vpop.f32.mrb[12].mxu0 }
 0x442   : > { %v4023_v10 = vsel %vm3895_vm4, %v3655_v23, %v3959_v40  ;;  %v8335_v46 = vadd.f32 %v3370_v36, %v11255_v19  ;;  %v3372_v56 = vpop.f32.mrb[13].mxu0  ;;  %v8862_v36 = vld [vmem:[%s12969_s2 + $0x88] sm:$0xff]  }
 0x443   : > { %v3373_v51 = vpop.f32.mrb[14].mxu0  ;;  %v4091_v47 = vmul.f32 %v11280_v29, %v4023_v10  ;;  %7692 = vmatpush3.bf16.msra.mxu1 %v8862_v36  ;;  %v8864_v56 = vld [vmem:[%s12969_s2 + $0x90] sm:$0xff]  }
 0x444   : > { %v3660_v15 = vadd.f32 %v8335_v46, %v11111_v38  ;;  %v8336_v35 = vadd.f32 %v3373_v51, %v11255_v19  ;;  %v3375_v61 = vpop.f32.mrb[15].mxu0  ;;  %v4090_v38 = vmul.f32 %v11280_v29, %v4022_v2  ;;  %v8863_v46 = vld [vmem:[%s12969_s2 + $0xd0] sm:$0xff]   ;;  %v11363_v51 = vpop.f32.mrb[108].mxu1 }
 0x445   : > { %v11343_v23 = vadd.f32 %v11289_v30, %v4091_v47  ;;  %v11365_v63 = vpop.f32.mrb[109].mxu1  ;;  %7693 = vmatprep.subr.bf16.mxu1 %v8863_v46 }
 0x446   : > { %vm3896_vm6 = vcmp.gt.f32.partialorder %v3660_v15, 0.0  ;;  %v3960_v40 = vmul.f32 0.2, %v3660_v15  ;;  %v3663_v41 = vadd.f32 %v8336_v35, %v11121_v45  ;;  %3585 = vmatmul.mubr.bf16.gmra.mrb[120].mxu0 %v13296_v55  ;;  %v11369_v2 = vadd.f32 %v11289_v30, %v4090_v38 }
 0x447   : > { %3592 = vmatprep.mubr.bf16.mxu0 %v1863_v26  ;;  %7694 = vmatpush3.bf16.msra.mxu1 %v8864_v56 }
 0x448   : > { %v4024_v8 = vsel %vm3896_vm6, %v3660_v15, %v3960_v40  ;;  %vm3897_vm7 = vcmp.gt.f32.partialorder %v3663_v41, 0.0  ;;  %v3961_v61 = vmul.f32 0.2, %v3663_v41  ;;  %13297 = vst [vmem:[#allocation53_spill] sm:$0xff] %v11369_v2 }
 0x449   : > { %v3378_v10 = vpop.f32.mrb[16].mxu0  ;;  %v4092_v45 = vmul.f32 %v11280_v29, %v4024_v8  ;;  %v11376_v8 = vpop.f32.mrb[110].mxu1 }
 0x44a   : > { %v4025_v35 = vsel %vm3897_vm7, %v3663_v41, %v3961_v61  ;;  %v8337_v25 = vadd.f32 %v3378_v10, %v11255_v19  ;;  %v3380_v50 = vpop.f32.mrb[17].mxu0  ;;  %v11378_v61 = vpop.f32.mrb[111].mxu1 }
 0x44b   : > { %v3381_v26 = vpop.f32.mrb[18].mxu0  ;;  %v4093_v47 = vmul.f32 %v11280_v29, %v4025_v35  ;;  %v11372_v15 = vadd.f32 %v11289_v30, %v4092_v45  ;;  %v13300_v45 = vpack.c.bf16 %v11152_v34, %v11145_v6 }
 0x44c   : > { %v8338_v40 = vadd.f32 %v3381_v26, %v11255_v19  ;;  %v3668_v41 = vadd.f32 %v8337_v25, %v11170_v12  ;;  %v3383_v55 = vpop.f32.mrb[19].mxu0 }
 0x44d   : > { %13298 = vst [vmem:[#allocation63_spill] sm:$0xff] %v11372_v15  ;;  %v11381_v36 = vadd.f32 %v11289_v30, %v4093_v47 }
 0x44e   : > { %v3671_v10 = vadd.f32 %v8338_v40, %v11179_v17  ;;  %3593 = vmatmul.mubr.bf16.gmra.mrb[124].mxu0 %v13300_v45  ;;  %v3962_v35 = vmul.f32 0.2, %v3668_v41  ;;  %vm3898_vm9 = vcmp.gt.f32.partialorder %v3668_v41, 0.0  ;;  %v8865_v17 = vld [vmem:[%s12969_s2 + $0xd8] sm:$0xff]  }
 0x44f   : > { %13299 = vst [vmem:[#allocation65_spill] sm:$0xff] %v11381_v36  ;;  %7695 = vmatprep.subr.bf16.mxu1 %v8865_v17 }
 0x450   : > { %vm3899_vm8 = vcmp.gt.f32.partialorder %v3671_v10, 0.0  ;;  %v3963_v25 = vmul.f32 0.2, %v3671_v10  ;;  %v4026_v6 = vsel %vm3898_vm9, %v3668_v41, %v3962_v35  ;;  %v8866_v41 = vld [vmem:[%s12969_s2 + $0x98] sm:$0xff]  }
 0x451   : > { %v3386_v50 = vpop.f32.mrb[20].mxu0  ;;  %7696 = vmatpush3.bf16.msra.mxu1 %v8866_v41 }
 0x452   : > { %v8339_v46 = vadd.f32 %v3386_v50, %v11255_v19  ;;  %v3388_v26 = vpop.f32.mrb[21].mxu0  ;;  %v4027_v47 = vsel %vm3899_vm8, %v3671_v10, %v3963_v25  ;;  %v4094_v10 = vmul.f32 %v11280_v29, %v4026_v6  ;;  %v8868_v6 = vld [vmem:[%s12969_s2 + $0xa0] sm:$0xff]  }
 0x453   : > { %v3389_v55 = vpop.f32.mrb[22].mxu0  ;;  %v4095_v50 = vmul.f32 %v11280_v29, %v4027_v47  ;;  %v8867_v47 = vld [vmem:[%s12969_s2 + $0xe0] sm:$0xff]  }
 0x454   : > { %v3676_v34 = vadd.f32 %v8339_v46, %v11165_v42  ;;  %v8340_v56 = vadd.f32 %v3389_v55, %v11255_v19  ;;  %v3391_v40 = vpop.f32.mrb[23].mxu0  ;;  %7697 = vmatprep.subr.bf16.mxu1 %v8867_v47 }
 0x455   : > { %v4162_v40 = vadd.f32 %v11289_v30, %v4094_v10  ;;  %7698 = vmatpush3.bf16.msra.mxu1 %v8868_v6  ;;  %v8869_v6 = vld [vmem:[%s12969_s2 + $0xe8] sm:$0xff]  }
 0x456   : > { %vm3900_vm10 = vcmp.gt.f32.partialorder %v3676_v34, 0.0  ;;  %v3964_v45 = vmul.f32 0.2, %v3676_v34  ;;  %v3679_v38 = vadd.f32 %v8340_v56, %v11175_v62  ;;  %v4163_v62 = vadd.f32 %v11289_v30, %v4095_v50  ;;  %7699 = vmatprep.subr.bf16.mxu1 %v8869_v6 }
 0x458   : > { %v4028_v25 = vsel %vm3900_vm10, %v3676_v34, %v3964_v45  ;;  %vm3901_vm11 = vcmp.gt.f32.partialorder %v3679_v38, 0.0  ;;  %v3965_v26 = vmul.f32 0.2, %v3679_v38  ;;  %v11412_v34 = vpop.f32.mrb[112].mxu1 }
 0x459   : > { %v3394_v42 = vpop.f32.mrb[24].mxu0  ;;  %v4096_v35 = vmul.f32 %v11280_v29, %v4028_v25  ;;  %v11417_v25 = vpop.f32.mrb[113].mxu1 }
 0x45a   : > { %v4029_v46 = vsel %vm3901_vm11, %v3679_v38, %v3965_v26  ;;  %v8341_v55 = vadd.f32 %v3394_v42, %v11255_v19  ;;  %v3396_v17 = vpop.f32.mrb[25].mxu0  ;;  %v11421_v42 = vpop.f32.mrb[114].mxu1 }
 0x45b   : > { %v3397_v56 = vpop.f32.mrb[26].mxu0  ;;  %v4164_v38 = vadd.f32 %v11289_v30, %v4096_v35  ;;  %v4097_v45 = vmul.f32 %v11280_v29, %v4029_v46  ;;  %v11426_v1 = vpop.f32.mrb[115].mxu1  ;;  %v11430_v35 = vpack.c.bf16 %v4163_v62, %v13127_v22 }
 0x45c   : > { %v8342_v50 = vadd.f32 %v3397_v56, %v11255_v19  ;;  %v3684_v26 = vadd.f32 %v8341_v55, %v11190_v27  ;;  %v3399_v41 = vpop.f32.mrb[27].mxu0 }
 0x45d   : > { %v11423_v17 = vpack.c.bf16 %v4164_v38, %v4162_v40  ;;  %v4165_v12 = vadd.f32 %v11289_v30, %v4097_v45  ;;  %13302 = vst [vmem:[#allocation59_spill] sm:$0xff] %v11430_v35 }
 0x45e   : > { %v3687_v10 = vadd.f32 %v8342_v50, %v11194_v9  ;;  %v3966_v27 = vmul.f32 0.2, %v3684_v26  ;;  %vm3902_vm13 = vcmp.gt.f32.partialorder %v3684_v26, 0.0 }
 0x45f   : > { %13301 = vst [vmem:[#allocation56_spill] sm:$0xff] %v11423_v17  ;;  %4894 = vmatprep.mubr.bf16.mxu1 %v11423_v17  ;;  %v11433_v46 = vpack.c.bf16 %v4165_v12, %v4163_v62 }
 0x460   : > { %vm3903_vm12 = vcmp.gt.f32.partialorder %v3687_v10, 0.0  ;;  %v3967_v55 = vmul.f32 0.2, %v3687_v10  ;;  %4895 = vmatmul.mubr.bf16.gmra.mrb[140].mxu1 %v11430_v35  ;;  %v4030_v62 = vsel %vm3902_vm13, %v3684_v26, %v3966_v27 }
 0x461   : > { %v3402_v47 = vpop.f32.mrb[28].mxu0 }
 0x462   : > { %v4031_v56 = vsel %vm3903_vm12, %v3687_v10, %v3967_v55  ;;  %v8343_v40 = vadd.f32 %v3402_v47, %v11255_v19  ;;  %v3404_v38 = vpop.f32.mrb[29].mxu0  ;;  %v4098_v47 = vmul.f32 %v11280_v29, %v4030_v62 }
 0x463   : > { %v4099_v9 = vmul.f32 %v11280_v29, %v4031_v56  ;;  %v3405_v45 = vpop.f32.mrb[30].mxu0 }
 0x464   : > { %v3692_v50 = vadd.f32 %v8343_v40, %v11188_v53  ;;  %v8344_v41 = vadd.f32 %v3405_v45, %v11255_v19  ;;  %v3407_v17 = vpop.f32.mrb[31].mxu0  ;;  %v8870_v53 = vld [vmem:[%s12969_s2 + $0xa8] sm:$0xff]   ;;  %v11459_v45 = vpop.f32.mrb[116].mxu1  ;;  %v4166_v62 = vadd.f32 %v11289_v30, %v4098_v47 }
 0x465   : > { %v4167_v35 = vadd.f32 %v11289_v30, %v4099_v9  ;;  %7700 = vmatpush3.bf16.msra.mxu1 %v8870_v53 }
 0x466   : > { %vm3904_vm14 = vcmp.gt.f32.partialorder %v3692_v50, 0.0  ;;  %v3968_v10 = vmul.f32 0.2, %v3692_v50  ;;  %v3695_v55 = vadd.f32 %v8344_v41, %v11192_v44  ;;  %v8871_v44 = vld [vmem:[%s12969_s2 + $0xf0] sm:$0xff]  }
 0x467   : > { %v11446_v56 = vpack.c.bf16 %v4167_v35, %v4165_v12  ;;  %v8872_v12 = vld [vmem:[%s12969_s2 + $0xb0] sm:$0xff]   ;;  %7701 = vmatprep.subr.bf16.mxu1 %v8871_v44 }
 0x468   : > { %v4032_v38 = vsel %vm3904_vm14, %v3692_v50, %v3968_v10  ;;  %vm3905_vm15 = vcmp.gt.f32.partialorder %v3695_v55, 0.0  ;;  %v3969_v2 = vmul.f32 0.2, %v3695_v55 }
 0x469   : > { %13303 = vst [vmem:[#allocation66_spill] sm:$0xff] %v11446_v56  ;;  %v3410_v26 = vpop.f32.mrb[32].mxu0  ;;  %v4100_v17 = vmul.f32 %v11280_v29, %v4032_v38  ;;  %7702 = vmatpush3.bf16.msra.mxu1 %v8872_v12 }
 0x46a   : > { %v4033_v27 = vsel %vm3905_vm15, %v3695_v55, %v3969_v2  ;;  %v8345_v40 = vadd.f32 %v3410_v26, %v11255_v19  ;;  %v3412_v9 = vpop.f32.mrb[33].mxu0  ;;  %v11463_v2 = vpop.f32.mrb[117].mxu1 }
 0x46b   : > { %v3413_v6 = vpop.f32.mrb[34].mxu0  ;;  %v4168_v50 = vadd.f32 %v11289_v30, %v4100_v17  ;;  %v4101_v41 = vmul.f32 %v11280_v29, %v4033_v27  ;;  %v11468_v53 = vpop.f32.mrb[118].mxu1 }
 0x46c   : > { %v8346_v10 = vadd.f32 %v3413_v6, %v11255_v19  ;;  %v3700_v55 = vadd.f32 %v8345_v40, %v11202_v52  ;;  %v3415_v38 = vpop.f32.mrb[35].mxu0  ;;  %v11472_v9 = vpop.f32.mrb[119].mxu1 }
 0x46d   : > { %v11470_v26 = vpack.c.bf16 %v4168_v50, %v4166_v62  ;;  %v4169_v47 = vadd.f32 %v11289_v30, %v4101_v41  ;;  %v8873_v50 = vld [vmem:[%s12969_s2 + $0xf8] sm:$0xff]  }
 0x46e   : > { %v3703_v17 = vadd.f32 %v8346_v10, %v11206_v43  ;;  %v3970_v6 = vmul.f32 0.2, %v3700_v55  ;;  %vm3906_vm0 = vcmp.gt.f32.partialorder %v3700_v55, 0.0  ;;  %7703 = vmatprep.subr.bf16.mxu1 %v8873_v50 }
 0x46f   : > { %13304 = vst [vmem:[#allocation68_spill] sm:$0xff] %v11470_v26  ;;  %4902 = vmatprep.mubr.bf16.mxu1 %v11470_v26  ;;  %v11477_v27 = vpack.c.bf16 %v4169_v47, %v4167_v35  ;;  %v8874_v35 = vld [vmem:[%s12969_s2 + $0xb8] sm:$0xff]  }
 0x470   : > { %4903 = vmatmul.mubr.bf16.gmra.mrb[144].mxu1 %v11446_v56  ;;  %v3971_v40 = vmul.f32 0.2, %v3703_v17  ;;  %vm3907_vm1 = vcmp.gt.f32.partialorder %v3703_v17, 0.0  ;;  %v4034_v12 = vsel %vm3906_vm0, %v3700_v55, %v3970_v6 }
 0x471   : > { %v3418_v52 = vpop.f32.mrb[36].mxu0  ;;  %7704 = vmatpush3.bf16.msra.mxu1 %v8874_v35  ;;  %v4102_v56 = vmul.f32 %v11280_v29, %v4034_v12 }
 0x472   : > { %v8347_v44 = vadd.f32 %v3418_v52, %v11255_v19  ;;  %v3420_v62 = vpop.f32.mrb[37].mxu0  ;;  %v4035_v47 = vsel %vm3907_vm1, %v3703_v17, %v3971_v40  ;;  %v8875_v17 = vld [vmem:[%s12969_s2 + $0x140] sm:$0xff]   ;;  %v11497_v40 = vpop.f32.mrb[120].mxu1 }
 0x473   : > { %v3421_v43 = vpop.f32.mrb[38].mxu0  ;;  %v4103_v36 = vmul.f32 %v11280_v29, %v4035_v47  ;;  %v11503_v12 = vadd.f32 %v11289_v30, %v4102_v56  ;;  %7753 = vmatprep.subr.bf16.mxu1 %v8875_v17 }
 0x474   : > { %v3708_v41 = vadd.f32 %v8347_v44, %v11200_v7  ;;  %v8348_v10 = vadd.f32 %v3421_v43, %v11255_v19  ;;  %v3423_v38 = vpop.f32.mrb[39].mxu0  ;;  %v11499_v43 = vpop.f32.mrb[121].mxu1 }
 0x475   : > { %13305 = vst [vmem:[#allocation61_spill] sm:$0xff] %v11503_v12  ;;  %v11510_v38 = vpop.f32.mrb[122].mxu1 }
 0x476   : > { %vm3908_vm2 = vcmp.gt.f32.partialorder %v3708_v41, 0.0  ;;  %v3972_v52 = vmul.f32 0.2, %v3708_v41  ;;  %v3711_v62 = vadd.f32 %v8348_v10, %v11204_v57  ;;  %v11512_v47 = vpop.f32.mrb[123].mxu1 }
 0x478   : > { %v4036_v26 = vsel %vm3908_vm2, %v3708_v41, %v3972_v52  ;;  %vm3909_vm3 = vcmp.gt.f32.partialorder %v3711_v62, 0.0  ;;  %v3973_v15 = vmul.f32 0.2, %v3711_v62  ;;  %v11515_v52 = vadd.f32 %v11289_v30, %v4103_v36 }
 0x479   : > { %v3426_v55 = vpop.f32.mrb[40].mxu0  ;;  %v4104_v7 = vmul.f32 %v11280_v29, %v4036_v26 }
 0x47a   : > { %v4037_v6 = vsel %vm3909_vm3, %v3711_v62, %v3973_v15  ;;  %v8349_v44 = vadd.f32 %v3426_v55, %v11255_v19  ;;  %v3428_v50 = vpop.f32.mrb[41].mxu0 }
 0x47b   : > { %v3429_v57 = vpop.f32.mrb[42].mxu0  ;;  %v4105_v35 = vmul.f32 %v11280_v29, %v4037_v6  ;;  %v11506_v26 = vadd.f32 %v11289_v30, %v4104_v7 }
 0x47c   : > { %v8350_v15 = vadd.f32 %v3429_v57, %v11255_v19  ;;  %v3716_v41 = vadd.f32 %v8349_v44, %v11214_v33  ;;  %v3431_v10 = vpop.f32.mrb[43].mxu0 }
 0x47d   : > { %13306 = vst [vmem:[#allocation64_spill] sm:$0xff] %v11506_v26  ;;  %v11518_v62 = vadd.f32 %v11289_v30, %v4105_v35 }
 0x47e   : > { %v3719_v55 = vadd.f32 %v8350_v15, %v11218_v32  ;;  %v3974_v7 = vmul.f32 0.2, %v3716_v41  ;;  %vm3910_vm5 = vcmp.gt.f32.partialorder %v3716_v41, 0.0 }
 0x480   : > { %vm3911_vm4 = vcmp.gt.f32.partialorder %v3719_v55, 0.0  ;;  %v3975_v6 = vmul.f32 0.2, %v3719_v55  ;;  %v4038_v10 = vsel %vm3910_vm5, %v3716_v41, %v3974_v7 }
 0x481   : > { %v3434_v44 = vpop.f32.mrb[44].mxu0 }
 0x482   : > { %v4039_v50 = vsel %vm3911_vm4, %v3719_v55, %v3975_v6  ;;  %v8351_v36 = vadd.f32 %v3434_v44, %v11255_v19  ;;  %v3436_v17 = vpop.f32.mrb[45].mxu0  ;;  %v4106_v55 = vmul.f32 %v11280_v29, %v4038_v10 }
 0x483   : > { %v4107_v57 = vmul.f32 %v11280_v29, %v4039_v50  ;;  %v3437_v35 = vpop.f32.mrb[46].mxu0 }
 0x484   : > { %v3724_v56 = vadd.f32 %v8351_v36, %v11212_v58  ;;  %v8352_v32 = vadd.f32 %v3437_v35, %v11255_v19  ;;  %v3439_v15 = vpop.f32.mrb[47].mxu0  ;;  %v11544_v10 = vadd.f32 %v11289_v30, %v4106_v55 }
 0x485   : > { %v11530_v33 = vadd.f32 %v11289_v30, %v4107_v57  ;;  %v11538_v57 = vpop.f32.mrb[124].mxu1 }
 0x486   : > { %vm3912_vm6 = vcmp.gt.f32.partialorder %v3724_v56, 0.0  ;;  %v3976_v12 = vmul.f32 0.2, %v3724_v56  ;;  %v3727_v26 = vadd.f32 %v8352_v32, %v11216_v21  ;;  %v11540_v15 = vpop.f32.mrb[125].mxu1  ;;  %13307 = vst [vmem:[#allocation69_spill] sm:$0xff] %v11544_v10 }
 0x488   : > { %v4040_v44 = vsel %vm3912_vm6, %v3724_v56, %v3976_v12  ;;  %vm3913_vm7 = vcmp.gt.f32.partialorder %v3727_v26, 0.0  ;;  %v3977_v41 = vmul.f32 0.2, %v3727_v26 }
 0x489   : > { %v3442_v7 = vpop.f32.mrb[48].mxu0  ;;  %v4108_v58 = vmul.f32 %v11280_v29, %v4040_v44  ;;  %v11551_v44 = vpop.f32.mrb[126].mxu1 }
 0x48a   : > { %v4041_v50 = vsel %vm3913_vm7, %v3727_v26, %v3977_v41  ;;  %v8353_v36 = vadd.f32 %v3442_v7, %v11255_v19  ;;  %v3444_v17 = vpop.f32.mrb[49].mxu0  ;;  %v11553_v41 = vpop.f32.mrb[127].mxu1 }
 0x48b   : > { %v3445_v35 = vpop.f32.mrb[50].mxu0  ;;  %v4109_v21 = vmul.f32 %v11280_v29, %v4041_v50  ;;  %v11547_v12 = vadd.f32 %v11289_v30, %v4108_v58 }
 0x48c   : > { %v8354_v56 = vadd.f32 %v3445_v35, %v11255_v19  ;;  %v3732_v26 = vadd.f32 %v8353_v36, %v11226_v18  ;;  %v3447_v32 = vpop.f32.mrb[51].mxu0 }
 0x48d   : > { %13308 = vst [vmem:[#allocation67_spill] sm:$0xff] %v11547_v12  ;;  %v11556_v7 = vadd.f32 %v11289_v30, %v4109_v21 }
 0x48e   : > { %v3735_v55 = vadd.f32 %v8354_v56, %v11230_v14  ;;  %v3978_v17 = vmul.f32 0.2, %v3732_v26  ;;  %vm3914_vm9 = vcmp.gt.f32.partialorder %v3732_v26, 0.0 }
 0x48f   : > { %13309 = vst [vmem:[#allocation70_spill] sm:$0xff] %v11556_v7 }
 0x490   : > { %vm3915_vm8 = vcmp.gt.f32.partialorder %v3735_v55, 0.0  ;;  %v3979_v35 = vmul.f32 0.2, %v3735_v55  ;;  %v4042_v21 = vsel %vm3914_vm9, %v3732_v26, %v3978_v17 }
 0x491   : > { %v3450_v18 = vpop.f32.mrb[52].mxu0  ;;  %v4110_v12 = vmul.f32 %v11280_v29, %v4042_v21 }
 0x492   : > { %v8355_v36 = vadd.f32 %v3450_v18, %v11255_v19  ;;  %v3452_v32 = vpop.f32.mrb[53].mxu0  ;;  %v4043_v6 = vsel %vm3915_vm8, %v3735_v55, %v3979_v35 }
 0x493   : > { %v3453_v3 = vpop.f32.mrb[54].mxu0  ;;  %v4111_v14 = vmul.f32 %v11280_v29, %v4043_v6  ;;  %v4178_v35 = vadd.f32 %v11289_v30, %v4110_v12 }
 0x494   : > { %v3740_v0 = vadd.f32 %v8355_v36, %v11224_v48  ;;  %v8356_v50 = vadd.f32 %v3453_v3, %v11255_v19  ;;  %v3455_v10 = vpop.f32.mrb[55].mxu0 }
 0x495   : > { %v4179_v3 = vadd.f32 %v11289_v30, %v4111_v14  ;;  %v11572_v10 = vpop.f32.mrb[128].mxu1 }
 0x496   : > { %vm3916_vm10 = vcmp.gt.f32.partialorder %v3740_v0, 0.0  ;;  %v3980_v56 = vmul.f32 0.2, %v3740_v0  ;;  %v3743_v58 = vadd.f32 %v8356_v50, %v11228_v13  ;;  %13310 = vst [vmem:[#allocation71_spill] sm:$0xff] %v11572_v10  ;;  %v11577_v50 = vpop.f32.mrb[129].mxu1 }
 0x497   : > { %v11581_v21 = vpop.f32.mrb[130].mxu1 }
 0x498   : > { %v4044_v7 = vsel %vm3916_vm10, %v3740_v0, %v3980_v56  ;;  %vm3917_vm11 = vcmp.gt.f32.partialorder %v3743_v58, 0.0  ;;  %v3981_v18 = vmul.f32 0.2, %v3743_v58  ;;  %13311 = vst [vmem:[#allocation74_spill] sm:$0xff] %v11581_v21 }
 0x499   : > { %v3458_v32 = vpop.f32.mrb[56].mxu0  ;;  %v4112_v55 = vmul.f32 %v11280_v29, %v4044_v7 }
 0x49a   : > { %v4045_v26 = vsel %vm3917_vm11, %v3743_v58, %v3981_v18  ;;  %v8357_v48 = vadd.f32 %v3458_v32, %v11255_v19  ;;  %v3460_v17 = vpop.f32.mrb[57].mxu0  ;;  %v11586_v18 = vpop.f32.mrb[131].mxu1  ;;  %v11590_v32 = vpack.c.bf16 %v4179_v3, %v13127_v22 }
 0x49b   : > { %v3461_v6 = vpop.f32.mrb[58].mxu0  ;;  %v4180_v13 = vadd.f32 %v11289_v30, %v4112_v55  ;;  %v4113_v0 = vmul.f32 %v11280_v29, %v4045_v26 }
 0x49c   : > { %v8358_v36 = vadd.f32 %v3461_v6, %v11255_v19  ;;  %v3748_v7 = vadd.f32 %v8357_v48, %v11238_v31  ;;  %v3463_v58 = vpop.f32.mrb[59].mxu0  ;;  %13313 = vst [vmem:[#allocation76_spill] sm:$0xff] %v11590_v32  ;;  %v2600_v48 = vadd.f32 %v10979_v39, %v11255_v19 }
 0x49d   : > { %v11583_v56 = vpack.c.bf16 %v4180_v13, %v4178_v35  ;;  %v4181_v14 = vadd.f32 %v11289_v30, %v4113_v0  ;;  %v2603_v13 = vadd.f32 %v10982_v24, %v11255_v19 }
 0x49e   : > { %v3751_v12 = vadd.f32 %v8358_v36, %v11242_v16  ;;  %v3982_v26 = vmul.f32 0.2, %v3748_v7  ;;  %vm3918_vm13 = vcmp.gt.f32.partialorder %v3748_v7, 0.0 }
 0x49f   : > { %13312 = vst [vmem:[#allocation72_spill] sm:$0xff] %v11583_v56  ;;  %4910 = vmatprep.mubr.bf16.mxu1 %v11583_v56  ;;  %v11593_v55 = vpack.c.bf16 %v4181_v14, %v4179_v3 }
 0x4a0   : > { %vm3919_vm12 = vcmp.gt.f32.partialorder %v3751_v12, 0.0  ;;  %v3983_v31 = vmul.f32 0.2, %v3751_v12  ;;  %4911 = vmatmul.mubr.bf16.gmra.mrb[148].mxu1 %v11590_v32  ;;  %v4046_v36 = vsel %vm3918_vm13, %v3748_v7, %v3982_v26  ;;  %v2608_v7 = vadd.f32 %v10985_v60, %v11255_v19 }
 0x4a1   : > { %v3466_v17 = vpop.f32.mrb[60].mxu0 }
 0x4a2   : > { %v4047_v6 = vsel %vm3919_vm12, %v3751_v12, %v3983_v31  ;;  %v8360_v35 = vadd.f32 %v3466_v17, %v2600_v48  ;;  %v3468_v16 = vpop.f32.mrb[61].mxu0  ;;  %v4114_v12 = vmul.f32 %v11280_v29, %v4046_v36 }
 0x4a3   : > { %v4115_v0 = vmul.f32 %v11280_v29, %v4047_v6  ;;  %v3469_v3 = vpop.f32.mrb[62].mxu0 }
 0x4a4   : > { %v3756_v58 = vadd.f32 %v8360_v35, %v11236_v20  ;;  %v8362_v56 = vadd.f32 %v3469_v3, %v2603_v13  ;;  %v3471_v21 = vpop.f32.mrb[63].mxu0  ;;  %v2611_v35 = vadd.f32 %v10987_v11, %v11255_v19  ;;  %v7641_v13 = vpop.f32.mrb[132].mxu1  ;;  %v13315_v3 = vld [vmem:[#allocation45_spill] sm:$0xff] }
 0x4a5   : > { %v4183_v32 = vadd.f32 %v11289_v30, %v4115_v0 }
 0x4a6   : > { %vm3920_vm14 = vcmp.gt.f32.partialorder %v3756_v58, 0.0  ;;  %v3984_v39 = vmul.f32 0.2, %v3756_v58  ;;  %v3759_v10 = vadd.f32 %v8362_v56, %v11240_v54  ;;  %v4182_v56 = vadd.f32 %v11289_v30, %v4114_v12 }
 0x4a7   : > { %v11605_v31 = vpack.c.bf16 %v4183_v32, %v4181_v14 }
 0x4a8   : > { %v4048_v48 = vsel %vm3920_vm14, %v3756_v58, %v3984_v39  ;;  %vm3921_vm15 = vcmp.gt.f32.partialorder %v3759_v10, 0.0  ;;  %v3985_v24 = vmul.f32 0.2, %v3759_v10  ;;  %v7642_v58 = vpop.f32.mrb[133].mxu1 }
 0x4a9   : > { %13314 = vst [vmem:[#allocation75_spill] sm:$0xff] %v11605_v31  ;;  %v3474_v26 = vpop.f32.mrb[64].mxu0  ;;  %v4116_v20 = vmul.f32 %v11280_v29, %v4048_v48  ;;  %v7644_v48 = vpop.f32.mrb[134].mxu1 }
 0x4aa   : > { %v4049_v21 = vsel %vm3921_vm15, %v3759_v10, %v3985_v24  ;;  %v8364_v17 = vadd.f32 %v3474_v26, %v2608_v7  ;;  %v3476_v6 = vpop.f32.mrb[65].mxu0  ;;  %v13317_v24 = vld [vmem:[#allocation60_spill] sm:$0xff]  ;;  %v7645_v7 = vpop.f32.mrb[135].mxu1  ;;  %v11623_v26 = vadd.f32 %v7642_v58, %v7641_v13  ;;  %v13322_v13 = vld [vmem:[#allocation73_spill] sm:$0xff] }
 0x4ab   : > { %v3477_v54 = vpop.f32.mrb[66].mxu0  ;;  %v4184_v14 = vadd.f32 %v11289_v30, %v4116_v20  ;;  %v4117_v16 = vmul.f32 %v11280_v29, %v4049_v21  ;;  %v11625_v20 = vadd.f32 %v7645_v7, %v7644_v48  ;;  %v7647_v21 = vpop.f32.mrb[136].mxu1  ;;  %v13320_v6 = vld [vmem:[#allocation35_spill] sm:$0xff] }
 0x4ac   : > { %v8366_v0 = vadd.f32 %v3477_v54, %v2611_v35  ;;  %v3764_v60 = vadd.f32 %v8364_v17, %v13315_v3  ;;  %v3479_v36 = vpop.f32.mrb[67].mxu0  ;;  %13318 = vst [vmem:[#allocation81_spill] sm:$0xff] %v11623_v26  ;;  %v2616_v35 = vadd.f32 %v13320_v6, %v11255_v19  ;;  %v7648_v54 = vpop.f32.mrb[137].mxu1 }
 0x4ad   : > { %v11616_v39 = vpack.c.bf16 %v4184_v14, %v4182_v56  ;;  %v4185_v10 = vadd.f32 %v11289_v30, %v4117_v16  ;;  %13319 = vst [vmem:[#allocation80_spill] sm:$0xff] %v11625_v20  ;;  %v11630_v14 = vadd.f32 %v7648_v54, %v7647_v21  ;;  %v7650_v16 = vpop.f32.mrb[138].mxu1  ;;  %v2619_v36 = vadd.f32 %v13322_v13, %v11255_v19  ;;  %v13324_v54 = vld [vmem:[#allocation48_spill] sm:$0xff]  ;;  %v13325_v13 = vld [vmem:[#allocation77_spill] sm:$0xff] }
 0x4ae   : > { %v3767_v11 = vadd.f32 %v8366_v0, %v13317_v24  ;;  %v3986_v17 = vmul.f32 0.2, %v3764_v60  ;;  %vm3922_vm0 = vcmp.gt.f32.partialorder %v3764_v60, 0.0  ;;  %v7651_v58 = vpop.f32.mrb[139].mxu1  ;;  %v13323_v24 = vld [vmem:[#allocation58_spill] sm:$0xff] }
 0x4af   : > { %13316 = vst [vmem:[#allocation79_spill] sm:$0xff] %v11616_v39  ;;  %4918 = vmatprep.mubr.bf16.mxu1 %v11616_v39  ;;  %v11621_v12 = vpack.c.bf16 %v4185_v10, %v4183_v32  ;;  %13321 = vst [vmem:[#allocation82_spill] sm:$0xff] %v11630_v14  ;;  %v11635_v26 = vadd.f32 %v7651_v58, %v7650_v16  ;;  %v2624_v39 = vadd.f32 %v13325_v13, %v11255_v19 }
 0x4b0   : > { %4919 = vmatmul.mubr.bf16.gmra.mrb[152].mxu1 %v11605_v31  ;;  %v3987_v0 = vmul.f32 0.2, %v3767_v11  ;;  %vm3923_vm1 = vcmp.gt.f32.partialorder %v3767_v11, 0.0  ;;  %v4050_v48 = vsel %vm3922_vm0, %v3764_v60, %v3986_v17 }
 0x4b1   : > { %v3482_v56 = vpop.f32.mrb[68].mxu0 }
 0x4b2   : > { %v8368_v32 = vadd.f32 %v3482_v56, %v2616_v35  ;;  %v3484_v3 = vpop.f32.mrb[69].mxu0  ;;  %v4051_v31 = vsel %vm3923_vm1, %v3767_v11, %v3987_v0  ;;  %v4118_v35 = vmul.f32 %v11280_v29, %v4050_v48  ;;  %v13326_v0 = vld [vmem:[#allocation36_spill] sm:$0xff] }
 0x4b3   : > { %v3485_v10 = vpop.f32.mrb[70].mxu0  ;;  %v4119_v60 = vmul.f32 %v11280_v29, %v4051_v31  ;;  %v2627_v58 = vadd.f32 %v13326_v0, %v11255_v19 }
 0x4b4   : > { %v3772_v7 = vadd.f32 %v8368_v32, %v13323_v24  ;;  %v8370_v20 = vadd.f32 %v3485_v10, %v2619_v36  ;;  %v3487_v6 = vpop.f32.mrb[71].mxu0  ;;  %v11647_v48 = vadd.f32 %v11289_v30, %v4118_v35 }
 0x4b6   : > { %vm3924_vm2 = vcmp.gt.f32.partialorder %v3772_v7, 0.0  ;;  %v3988_v21 = vmul.f32 0.2, %v3772_v7  ;;  %v3775_v14 = vadd.f32 %v8370_v20, %v13324_v54 }
 0x4b8   : > { %v4052_v56 = vsel %vm3924_vm2, %v3772_v7, %v3988_v21  ;;  %vm3925_vm3 = vcmp.gt.f32.partialorder %v3775_v14, 0.0  ;;  %v3989_v3 = vmul.f32 0.2, %v3775_v14 }
 0x4b9   : > { %v3490_v17 = vpop.f32.mrb[72].mxu0  ;;  %v4120_v32 = vmul.f32 %v11280_v29, %v4052_v56 }
 0x4ba   : > { %v4053_v16 = vsel %vm3925_vm3, %v3775_v14, %v3989_v3  ;;  %v8372_v36 = vadd.f32 %v3490_v17, %v2624_v39  ;;  %v3492_v11 = vpop.f32.mrb[73].mxu0  ;;  %v11654_v14 = vadd.f32 %v11289_v30, %v4119_v60 }
 0x4bb   : > { %v3493_v20 = vpop.f32.mrb[74].mxu0  ;;  %v4121_v10 = vmul.f32 %v11280_v29, %v4053_v16  ;;  %v11650_v24 = vadd.f32 %v11289_v30, %v4120_v32 }
 0x4bc   : > { %v8374_v7 = vadd.f32 %v3493_v20, %v2627_v58  ;;  %v3780_v31 = vadd.f32 %v8372_v36, %v11310_v49  ;;  %v3495_v6 = vpop.f32.mrb[75].mxu0  ;;  %v13327_v49 = vld [vmem:[#allocation78_spill] sm:$0xff] }
 0x4bd   : > { %v11657_v39 = vadd.f32 %v11289_v30, %v4121_v10  ;;  %v2632_v13 = vadd.f32 %v13327_v49, %v11255_v19  ;;  %v13328_v36 = vld [vmem:[#allocation38_spill] sm:$0xff] }
 0x4be   : > { %v3783_v54 = vadd.f32 %v8374_v7, %v11317_v4  ;;  %v3990_v56 = vmul.f32 0.2, %v3780_v31  ;;  %vm3926_vm5 = vcmp.gt.f32.partialorder %v3780_v31, 0.0  ;;  %v2635_v11 = vadd.f32 %v13328_v36, %v11255_v19 }
 0x4c0   : > { %vm3927_vm4 = vcmp.gt.f32.partialorder %v3783_v54, 0.0  ;;  %v3991_v3 = vmul.f32 0.2, %v3783_v54  ;;  %v4054_v58 = vsel %vm3926_vm5, %v3780_v31, %v3990_v56  ;;  %v13329_v31 = vld [vmem:[#allocation40_spill] sm:$0xff] }
 0x4c1   : > { %v3498_v60 = vpop.f32.mrb[76].mxu0 }
 0x4c2   : > { %v4055_v17 = vsel %vm3927_vm4, %v3783_v54, %v3991_v3  ;;  %v8376_v32 = vadd.f32 %v3498_v60, %v2632_v13  ;;  %v3500_v16 = vpop.f32.mrb[77].mxu0  ;;  %v4122_v3 = vmul.f32 %v11280_v29, %v4054_v58 }
 0x4c3   : > { %v4123_v0 = vmul.f32 %v11280_v29, %v4055_v17  ;;  %v3501_v4 = vpop.f32.mrb[78].mxu0 }
 0x4c4   : > { %v3788_v20 = vadd.f32 %v8376_v32, %v11302_v59  ;;  %v8378_v10 = vadd.f32 %v3501_v4, %v2635_v11  ;;  %v3503_v7 = vpop.f32.mrb[79].mxu0  ;;  %v2640_v59 = vadd.f32 %v13329_v31, %v11255_v19 }
 0x4c5   : > { %v11671_v6 = vadd.f32 %v11289_v30, %v4123_v0  ;;  %v13330_v0 = vld [vmem:[#allocation3_spill] sm:$0xff] }
 0x4c6   : > { %vm3928_vm6 = vcmp.gt.f32.partialorder %v3788_v20, 0.0  ;;  %v3992_v49 = vmul.f32 0.2, %v3788_v20  ;;  %v3791_v54 = vadd.f32 %v8378_v10, %v11315_v5  ;;  %v2643_v5 = vadd.f32 %v13330_v0, %v11255_v19  ;;  %v13332_v0 = vld [vmem:[#allocation43_spill] sm:$0xff] }
 0x4c7   : > { %v4248_v13 = vpack.c.bf16 %v11671_v6, %v11657_v39  ;;  %v11684_v10 = vadd.f32 %v11289_v30, %v4122_v3 }
 0x4c8   : > { %v4056_v60 = vsel %vm3928_vm6, %v3788_v20, %v3992_v49  ;;  %vm3929_vm7 = vcmp.gt.f32.partialorder %v3791_v54, 0.0  ;;  %v3993_v17 = vmul.f32 0.2, %v3791_v54 }
 0x4c9   : > { %v3506_v56 = vpop.f32.mrb[80].mxu0  ;;  %v4124_v32 = vmul.f32 %v11280_v29, %v4056_v60 }
 0x4ca   : > { %v4057_v16 = vsel %vm3929_vm7, %v3791_v54, %v3993_v17  ;;  %v8380_v36 = vadd.f32 %v3506_v56, %v2640_v59  ;;  %v3508_v11 = vpop.f32.mrb[81].mxu0 }
 0x4cb   : > { %v3509_v4 = vpop.f32.mrb[82].mxu0  ;;  %v4125_v58 = vmul.f32 %v11280_v29, %v4057_v16  ;;  %v11687_v20 = vadd.f32 %v11289_v30, %v4124_v32  ;;  %v13331_v32 = vld [vmem:[#allocation41_spill] sm:$0xff] }
 0x4cc   : > { %v8382_v7 = vadd.f32 %v3509_v4, %v2643_v5  ;;  %v3796_v49 = vadd.f32 %v8380_v36, %v11365_v63  ;;  %v3511_v31 = vpop.f32.mrb[83].mxu0  ;;  %v2648_v16 = vadd.f32 %v13331_v32, %v11255_v19  ;;  %v2651_v5 = vadd.f32 %v13332_v0, %v11255_v19 }
 0x4cd   : > { %v11691_v54 = vadd.f32 %v11289_v30, %v4125_v58 }
 0x4ce   : > { %v3799_v17 = vadd.f32 %v8382_v7, %v11378_v61  ;;  %v3994_v3 = vmul.f32 0.2, %v3796_v49  ;;  %vm3930_vm9 = vcmp.gt.f32.partialorder %v3796_v49, 0.0 }
 0x4d0   : > { %vm3931_vm8 = vcmp.gt.f32.partialorder %v3799_v17, 0.0  ;;  %v3995_v56 = vmul.f32 0.2, %v3799_v17  ;;  %v4058_v31 = vsel %vm3930_vm9, %v3796_v49, %v3994_v3 }
 0x4d1   : > { %v3514_v63 = vpop.f32.mrb[84].mxu0  ;;  %v4126_v35 = vmul.f32 %v11280_v29, %v4058_v31 }
 0x4d2   : > { %v8384_v36 = vadd.f32 %v3514_v63, %v2648_v16  ;;  %v3516_v11 = vpop.f32.mrb[85].mxu0  ;;  %v4059_v4 = vsel %vm3931_vm8, %v3799_v17, %v3995_v56 }
 0x4d3   : > { %v3517_v58 = vpop.f32.mrb[86].mxu0  ;;  %v4127_v59 = vmul.f32 %v11280_v29, %v4059_v4  ;;  %v13333_v11 = vld [vmem:[#allocation26_spill] sm:$0xff]  ;;  %v4194_v4 = vadd.f32 %v11289_v30, %v4126_v35 }
 0x4d4   : > { %v3804_v61 = vadd.f32 %v8384_v36, %v11363_v51  ;;  %v8386_v7 = vadd.f32 %v3517_v58, %v2651_v5  ;;  %v3519_v60 = vpop.f32.mrb[87].mxu0  ;;  %v2656_v17 = vadd.f32 %v13333_v11, %v11255_v19  ;;  %v13334_v36 = vld [vmem:[#allocation27_spill] sm:$0xff] }
 0x4d5   : > { %v2659_v0 = vadd.f32 %v13334_v36, %v11255_v19  ;;  %v4195_v5 = vadd.f32 %v11289_v30, %v4127_v59 }
 0x4d6   : > { %vm3932_vm10 = vcmp.gt.f32.partialorder %v3804_v61, 0.0  ;;  %v3996_v21 = vmul.f32 0.2, %v3804_v61  ;;  %v3807_v32 = vadd.f32 %v8386_v7, %v11376_v8 }
 0x4d7   : > { %v11721_v11 = vpack.c.bf16 %v4195_v5, %v13127_v22 }
 0x4d8   : > { %v4060_v16 = vsel %vm3932_vm10, %v3804_v61, %v3996_v21  ;;  %vm3933_vm11 = vcmp.gt.f32.partialorder %v3807_v32, 0.0  ;;  %v3997_v63 = vmul.f32 0.2, %v3807_v32 }
 0x4d9   : > { %v3522_v56 = vpop.f32.mrb[88].mxu0  ;;  %v4128_v49 = vmul.f32 %v11280_v29, %v4060_v16 }
 0x4da   : > { %v4061_v51 = vsel %vm3933_vm11, %v3807_v32, %v3997_v63  ;;  %v8388_v3 = vadd.f32 %v3522_v56, %v2656_v17  ;;  %v3524_v60 = vpop.f32.mrb[89].mxu0 }
 0x4db   : > { %v3525_v8 = vpop.f32.mrb[90].mxu0  ;;  %v4196_v21 = vadd.f32 %v11289_v30, %v4128_v49  ;;  %v4129_v58 = vmul.f32 %v11280_v29, %v4061_v51  ;;  %v13336_v60 = vld [vmem:[#allocation46_spill] sm:$0xff] }
 0x4dc   : > { %v8390_v31 = vadd.f32 %v3525_v8, %v2659_v0  ;;  %v3812_v61 = vadd.f32 %v8388_v3, %v11417_v25  ;;  %v3527_v7 = vpop.f32.mrb[91].mxu0  ;;  %v13335_v25 = vld [vmem:[#allocation44_spill] sm:$0xff]  ;;  %v2667_v36 = vadd.f32 %v13336_v60, %v11255_v19 }
 0x4dd   : > { %v11716_v16 = vpack.c.bf16 %v4196_v21, %v4194_v4  ;;  %v4197_v32 = vadd.f32 %v11289_v30, %v4129_v58  ;;  %v2664_v56 = vadd.f32 %v13335_v25, %v11255_v19 }
 0x4de   : > { %v3815_v63 = vadd.f32 %v8390_v31, %v11426_v1  ;;  %v3998_v59 = vmul.f32 0.2, %v3812_v61  ;;  %vm3934_vm13 = vcmp.gt.f32.partialorder %v3812_v61, 0.0 }
 0x4df   : > { %4926 = vmatprep.mubr.bf16.mxu1 %v11716_v16  ;;  %v11724_v35 = vpack.c.bf16 %v4197_v32, %v4195_v5 }
 0x4e0   : > { %vm3935_vm12 = vcmp.gt.f32.partialorder %v3815_v63, 0.0  ;;  %v3999_v17 = vmul.f32 0.2, %v3815_v63  ;;  %4927 = vmatmul.mubr.bf16.gmra.mrb[156].mxu1 %v11721_v11  ;;  %v4062_v8 = vsel %vm3934_vm13, %v3812_v61, %v3998_v59 }
 0x4e1   : > { %v3530_v49 = vpop.f32.mrb[92].mxu0 }
 0x4e2   : > { %v4063_v51 = vsel %vm3935_vm12, %v3815_v63, %v3999_v17  ;;  %v8392_v3 = vadd.f32 %v3530_v49, %v2664_v56  ;;  %v3532_v1 = vpop.f32.mrb[93].mxu0  ;;  %v4130_v63 = vmul.f32 %v11280_v29, %v4062_v8 }
 0x4e3   : > { %v4131_v0 = vmul.f32 %v11280_v29, %v4063_v51  ;;  %v3533_v5 = vpop.f32.mrb[94].mxu0  ;;  %v13337_v51 = vld [vmem:[#allocation28_spill] sm:$0xff] }
 0x4e4   : > { %v3820_v4 = vadd.f32 %v8392_v3, %v11412_v34  ;;  %v8394_v21 = vadd.f32 %v3533_v5, %v2667_v36  ;;  %v3535_v58 = vpop.f32.mrb[95].mxu0  ;;  %v2672_v61 = vadd.f32 %v13337_v51, %v11255_v19  ;;  %v13338_v36 = vld [vmem:[#allocation29_spill] sm:$0xff]  ;;  %v4198_v5 = vadd.f32 %v11289_v30, %v4130_v63 }
 0x4e5   : > { %v4199_v31 = vadd.f32 %v11289_v30, %v4131_v0  ;;  %v2675_v0 = vadd.f32 %v13338_v36, %v11255_v19 }
 0x4e6   : > { %vm3936_vm14 = vcmp.gt.f32.partialorder %v3820_v4, 0.0  ;;  %v4000_v7 = vmul.f32 0.2, %v3820_v4  ;;  %v3823_v25 = vadd.f32 %v8394_v21, %v11421_v42 }
 0x4e7   : > { %v11736_v17 = vpack.c.bf16 %v4199_v31, %v4197_v32 }
 0x4e8   : > { %v4064_v56 = vsel %vm3936_vm14, %v3820_v4, %v4000_v7  ;;  %vm3937_vm15 = vcmp.gt.f32.partialorder %v3823_v25, 0.0  ;;  %v4001_v49 = vmul.f32 0.2, %v3823_v25 }
 0x4e9   : > { %v3538_v59 = vpop.f32.mrb[96].mxu0  ;;  %v4132_v34 = vmul.f32 %v11280_v29, %v4064_v56 }
 0x4ea   : > { %v4065_v3 = vsel %vm3937_vm15, %v3823_v25, %v4001_v49  ;;  %v8396_v1 = vadd.f32 %v3538_v59, %v2672_v61  ;;  %v3540_v60 = vpop.f32.mrb[97].mxu0  ;;  %v4218_v49 = vpack.c.bf16 %v11320_v28, %v13127_v22  ;;  %v13339_v61 = vld [vmem:[#allocation47_spill] sm:$0xff] }
 0x4eb   : > { %v3541_v42 = vpop.f32.mrb[98].mxu0  ;;  %v4200_v32 = vadd.f32 %v11289_v30, %v4132_v34  ;;  %v4133_v8 = vmul.f32 %v11280_v29, %v4065_v3 }
 0x4ec   : > { %v8398_v4 = vadd.f32 %v3541_v42, %v2675_v0  ;;  %v3828_v21 = vadd.f32 %v8396_v1, %v11463_v2  ;;  %v3543_v58 = vpop.f32.mrb[99].mxu0  ;;  %v2680_v2 = vadd.f32 %v13339_v61, %v11255_v19  ;;  %v13342_v61 = vld [vmem:[#allocation31_spill] sm:$0xff] }
 0x4ed   : > { %v11747_v7 = vpack.c.bf16 %v4200_v32, %v4198_v5  ;;  %v4201_v25 = vadd.f32 %v11289_v30, %v4133_v8  ;;  %v8876_v32 = vld [vmem:[%s12969_s2 + $0x100] sm:$0xff]  }
 0x4ee   : > { %v3831_v56 = vadd.f32 %v8398_v4, %v11472_v9  ;;  %v4002_v51 = vmul.f32 0.2, %v3828_v21  ;;  %vm3938_vm0 = vcmp.gt.f32.partialorder %v3828_v21, 0.0  ;;  %v13340_v9 = vld [vmem:[#allocation30_spill] sm:$0xff] }
 0x4ef   : > { %4934 = vmatprep.mubr.bf16.mxu1 %v11747_v7  ;;  %v11754_v63 = vpack.c.bf16 %v4201_v25, %v4199_v31  ;;  %v2683_v60 = vadd.f32 %v13340_v9, %v11255_v19  ;;  %v8877_v25 = vld [vmem:[%s12969_s2 + $0x148] sm:$0xff]  }
 0x4f0   : > { %4935 = vmatmul.mubr.bf16.gmra.mrb[160].mxu1 %v11736_v17  ;;  %v4003_v34 = vmul.f32 0.2, %v3831_v56  ;;  %vm3939_vm1 = vcmp.gt.f32.partialorder %v3831_v56, 0.0  ;;  %v4066_v0 = vsel %vm3938_vm0, %v3828_v21, %v4002_v51  ;;  %v13341_v51 = vmov 0.0|0.0  }
 0x4f1   : > { %v3546_v59 = vpop.f32.mrb[100].mxu0  ;;  %4975 = vmatprep.mubr.bf16.mxu1 %v4218_v49  ;;  %v4134_v49 = vmul.f32 %v11280_v29, %v4066_v0 }
 0x4f2   : > { %v8400_v3 = vadd.f32 %v3546_v59, %v2680_v2  ;;  %v3548_v1 = vpop.f32.mrb[101].mxu0  ;;  %v4067_v8 = vsel %vm3939_vm1, %v3831_v56, %v4003_v34  ;;  %v2688_v2 = vadd.f32 %v13342_v61, %v11255_v19  ;;  %v8878_v34 = vld [vmem:[%s12969_s2 + $0x108] sm:$0xff]  }
 0x4f3   : > { %v3549_v36 = vpop.f32.mrb[102].mxu0  ;;  %v4135_v56 = vmul.f32 %v11280_v29, %v4067_v8 }
 0x4f4   : > { %v3836_v31 = vadd.f32 %v8400_v3, %v11459_v45  ;;  %v8402_v42 = vadd.f32 %v3549_v36, %v2683_v60  ;;  %v3551_v5 = vpop.f32.mrb[103].mxu0  ;;  %v13344_v36 = vld [vmem:[#allocation49_spill] sm:$0xff] }
 0x4f5   : > { %v2691_v0 = vadd.f32 %v13344_v36, %v11255_v19 }
 0x4f6   : > { %vm3940_vm2 = vcmp.gt.f32.partialorder %v3836_v31, 0.0  ;;  %v4004_v4 = vmul.f32 0.2, %v3836_v31  ;;  %v3839_v58 = vadd.f32 %v8402_v42, %v11468_v53  ;;  %v13343_v53 = vpack.c.bf16 %v11343_v23, %v11323_v37 }
 0x4f8   : > { %v4068_v21 = vsel %vm3940_vm2, %v3836_v31, %v4004_v4  ;;  %vm3941_vm3 = vcmp.gt.f32.partialorder %v3839_v58, 0.0  ;;  %v4005_v45 = vmul.f32 0.2, %v3839_v58  ;;  %4976 = vmatmul.mubr.bf16.vlgmr.msra.gmra.mrb[164].mxu1 %v13341_v51  ;;  %v8879_v31 = vld [vmem:[%s12969_s2 + $0x150] sm:$0xff]  }
 0x4f9   : > { %v3554_v59 = vpop.f32.mrb[104].mxu0  ;;  %4983 = vmatprep.mubr.bf16.mxu1 %v13343_v53  ;;  %7754 = vmatpush3.bf16.msra.mxu1 %v8876_v32  ;;  %v4136_v3 = vmul.f32 %v11280_v29, %v4068_v21  ;;  %v11788_v32 = vadd.f32 %v11289_v30, %v4134_v49 }
 0x4fa   : > { %v4069_v1 = vsel %vm3941_vm3, %v3839_v58, %v4005_v45  ;;  %v8404_v9 = vadd.f32 %v3554_v59, %v2688_v2  ;;  %v3556_v60 = vpop.f32.mrb[105].mxu0  ;;  %7755 = vmatprep.subr.bf16.mxu1 %v8877_v25  ;;  %v8880_v25 = vld [vmem:[%s12969_s2 + $0x110] sm:$0xff]   ;;  %v11798_v45 = vadd.f32 %v11289_v30, %v4135_v56  ;;  %v4230_v59 = vpack.c.bf16 %v11515_v52, %v13127_v22 }
 0x4fb   : > { %v3557_v42 = vpop.f32.mrb[106].mxu0  ;;  %v4137_v5 = vmul.f32 %v11280_v29, %v4069_v1  ;;  %v11791_v8 = vadd.f32 %v11289_v30, %v4136_v3  ;;  %v13345_v3 = vld [vmem:[#allocation51_spill] sm:$0xff] }
 0x4fc   : > { %v8406_v4 = vadd.f32 %v3557_v42, %v2691_v0  ;;  %v3844_v58 = vadd.f32 %v8404_v9, %v11499_v43  ;;  %v3559_v21 = vpop.f32.mrb[107].mxu0  ;;  %v8881_v43 = vld [vmem:[%s12969_s2 + $0x158] sm:$0xff]   ;;  %v2696_v1 = vadd.f32 %v13345_v3, %v11255_v19 }
 0x4fd   : > { %7756 = vmatpush3.bf16.msra.mxu1 %v8878_v34  ;;  %v11801_v61 = vadd.f32 %v11289_v30, %v4137_v5  ;;  %v8882_v9 = vld [vmem:[%s12969_s2 + $0x118] sm:$0xff]   ;;  %v8883_v5 = vld [vmem:[%s12969_s2 + $0x160] sm:$0xff]  }
 0x4fe   : > { %v3847_v2 = vadd.f32 %v8406_v4, %v11512_v47  ;;  %7757 = vmatprep.subr.bf16.mxu1 %v8879_v31  ;;  %v4006_v53 = vmul.f32 0.2, %v3844_v58  ;;  %vm3942_vm5 = vcmp.gt.f32.partialorder %v3844_v58, 0.0  ;;  %v13346_v31 = vld [vmem:[#allocation32_spill] sm:$0xff] }
 0x4ff   : > { %v2699_v42 = vadd.f32 %v13346_v31, %v11255_v19 }
 0x500   : > { %vm3943_vm4 = vcmp.gt.f32.partialorder %v3847_v2, 0.0  ;;  %v4007_v34 = vmul.f32 0.2, %v3847_v2  ;;  %4984 = vmatmul.mubr.bf16.gmra.mrb[168].mxu1 %v13341_v51 }
 0x501   : > { %v3562_v47 = vpop.f32.mrb[108].mxu0  ;;  %4991 = vmatprep.mubr.bf16.mxu1 %v4230_v59  ;;  %7758 = vmatpush3.bf16.msra.mxu1 %v8880_v25  ;;  %v4070_v59 = vsel %vm3942_vm5, %v3844_v58, %v4006_v53  ;;  %v8885_v58 = vld [vmem:[%s12969_s2 + $0x168] sm:$0xff]  }
 0x502   : > { %v4071_v60 = vsel %vm3943_vm4, %v3847_v2, %v4007_v34  ;;  %v8408_v36 = vadd.f32 %v3562_v47, %v2696_v1  ;;  %v3564_v0 = vpop.f32.mrb[109].mxu0  ;;  %7759 = vmatprep.subr.bf16.mxu1 %v8881_v43  ;;  %v8884_v2 = vld [vmem:[%s12969_s2 + $0x120] sm:$0xff]  }
 0x503   : > { %v4139_v4 = vmul.f32 %v11280_v29, %v4071_v60  ;;  %v3565_v21 = vpop.f32.mrb[110].mxu0  ;;  %v8886_v0 = vld [vmem:[%s12969_s2 + $0x128] sm:$0xff]  }
 0x504   : > { %v3852_v25 = vadd.f32 %v8408_v36, %v11497_v40  ;;  %v8410_v3 = vadd.f32 %v3565_v21, %v2699_v42  ;;  %v3567_v49 = vpop.f32.mrb[111].mxu0  ;;  %v4138_v40 = vmul.f32 %v11280_v29, %v4070_v59  ;;  %v13349_v21 = vld [vmem:[#allocation52_spill] sm:$0xff] }
 0x505   : > { %7760 = vmatpush3.bf16.msra.mxu1 %v8882_v9  ;;  %v11830_v34 = vadd.f32 %v11289_v30, %v4139_v4  ;;  %v13347_v9 = vld [vmem:[#allocation33_spill] sm:$0xff]  ;;  %v2707_v59 = vadd.f32 %v13349_v21, %v11255_v19 }
 0x506   : > { %vm3944_vm6 = vcmp.gt.f32.partialorder %v3852_v25, 0.0  ;;  %v4008_v43 = vmul.f32 0.2, %v3852_v25  ;;  %v3855_v1 = vadd.f32 %v8410_v3, %v11510_v38  ;;  %7761 = vmatprep.subr.bf16.mxu1 %v8883_v5  ;;  %v2704_v60 = vadd.f32 %v13347_v9, %v11255_v19 }
 0x507   : > { %v4260_v49 = vpack.c.bf16 %v11830_v34, %v11801_v61  ;;  %v13348_v38 = vpack.c.bf16 %v11530_v33, %v11518_v62 }
 0x508   : > { %v4072_v53 = vsel %vm3944_vm6, %v3852_v25, %v4008_v43  ;;  %vm3945_vm7 = vcmp.gt.f32.partialorder %v3855_v1, 0.0  ;;  %v4009_v47 = vmul.f32 0.2, %v3855_v1  ;;  %4992 = vmatmul.mubr.bf16.gmra.mrb[172].mxu1 %v11433_v46  ;;  %v8887_v25 = vld [vmem:[%s12969_s2 + $0x170] sm:$0xff]   ;;  %v11856_v43 = vadd.f32 %v11289_v30, %v4138_v40 }
 0x509   : > { %v3570_v36 = vpop.f32.mrb[112].mxu0  ;;  %4999 = vmatprep.mubr.bf16.mxu1 %v13348_v38  ;;  %7762 = vmatpush3.bf16.msra.mxu1 %v8884_v2  ;;  %v4140_v31 = vmul.f32 %v11280_v29, %v4072_v53  ;;  %v8889_v38 = vld [vmem:[%s12969_s2 + $0x178] sm:$0xff]  }
 0x50a   : > { %v4073_v42 = vsel %vm3945_vm7, %v3855_v1, %v4009_v47  ;;  %v8412_v5 = vadd.f32 %v3570_v36, %v2704_v60  ;;  %v3572_v4 = vpop.f32.mrb[113].mxu0  ;;  %7763 = vmatprep.subr.bf16.mxu1 %v8885_v58  ;;  %v8888_v58 = vld [vmem:[%s12969_s2 + $0x130] sm:$0xff]  }
 0x50b   : > { %v3573_v3 = vpop.f32.mrb[114].mxu0  ;;  %v4141_v2 = vmul.f32 %v11280_v29, %v4073_v42  ;;  %v11859_v9 = vadd.f32 %v11289_v30, %v4140_v31  ;;  %v13350_v42 = vld [vmem:[#allocation54_spill] sm:$0xff] }
 0x50c   : > { %v8414_v1 = vadd.f32 %v3573_v3, %v2707_v59  ;;  %v3860_v53 = vadd.f32 %v8412_v5, %v11540_v15  ;;  %v3575_v47 = vpop.f32.mrb[115].mxu0  ;;  %v4242_v15 = vpack.c.bf16 %v11654_v14, %v13127_v22  ;;  %v2712_v5 = vadd.f32 %v13350_v42, %v11255_v19  ;;  %v13351_v3 = vld [vmem:[#allocation34_spill] sm:$0xff] }
 0x50d   : > { %7764 = vmatpush3.bf16.msra.mxu1 %v8886_v0  ;;  %v11866_v60 = vadd.f32 %v11289_v30, %v4141_v2  ;;  %v2715_v2 = vadd.f32 %v13351_v3, %v11255_v19 }
 0x50e   : > { %v3863_v40 = vadd.f32 %v8414_v1, %v11553_v41  ;;  %7765 = vmatprep.subr.bf16.mxu1 %v8887_v25  ;;  %v4010_v31 = vmul.f32 0.2, %v3860_v53  ;;  %vm3946_vm8 = vcmp.gt.f32.partialorder %v3860_v53, 0.0  ;;  %v8890_v41 = vld [vmem:[%s12969_s2 + $0x138] sm:$0xff]   ;;  %v8891_v1 = vld [vmem:[%s12969_s2 + $0x1c0] sm:$0xff]  }
 0x510   : > { %5000 = vmatmul.mubr.bf16.gmra.mrb[176].mxu1 %v11477_v27  ;;  %v4011_v21 = vmul.f32 0.2, %v3863_v40  ;;  %vm3947_vm9 = vcmp.gt.f32.partialorder %v3863_v40, 0.0  ;;  %v4074_v42 = vsel %vm3946_vm8, %v3860_v53, %v4010_v31  ;;  %v13352_v53 = vld [vmem:[#allocation37_spill] sm:$0xff] }
 0x511   : > { %v3578_v4 = vpop.f32.mrb[116].mxu0  ;;  %5007 = vmatprep.mubr.bf16.mxu1 %v4242_v15  ;;  %7766 = vmatpush3.bf16.msra.mxu1 %v8888_v58  ;;  %v2720_v31 = vadd.f32 %v13352_v53, %v11255_v19 }
 0x512   : > { %v8416_v59 = vadd.f32 %v3578_v4, %v2712_v5  ;;  %v3580_v25 = vpop.f32.mrb[117].mxu0  ;;  %7767 = vmatprep.subr.bf16.mxu1 %v8889_v38  ;;  %v4075_v0 = vsel %vm3947_vm9, %v3863_v40, %v4011_v21  ;;  %v4142_v38 = vmul.f32 %v11280_v29, %v4074_v42 }
 0x513   : > { %v3581_v47 = vpop.f32.mrb[118].mxu0 }
 0x514   : > { %v3868_v58 = vadd.f32 %v8416_v59, %v11538_v57  ;;  %v8418_v15 = vadd.f32 %v3581_v47, %v2715_v2  ;;  %v3583_v36 = vpop.f32.mrb[119].mxu0  ;;  %v4143_v57 = vmul.f32 %v11280_v29, %v4075_v0  ;;  %v13353_v59 = vld [vmem:[#allocation55_spill] sm:$0xff]  ;;  %v11904_v42 = vadd.f32 %v11289_v30, %v4142_v38 }
 0x515   : > { %7768 = vmatpush3.bf16.msra.mxu1 %v8890_v41  ;;  %v2723_v2 = vadd.f32 %v13353_v59, %v11255_v19  ;;  %v4254_v38 = vpack.c.bf16 %v11798_v45, %v13127_v22 }
 0x516   : > { %vm3948_vm10 = vcmp.gt.f32.partialorder %v3868_v58, 0.0  ;;  %v4012_v5 = vmul.f32 0.2, %v3868_v58  ;;  %v3871_v4 = vadd.f32 %v8418_v15, %v11551_v44  ;;  %7817 = vmatprep.subr.bf16.mxu1 %v8891_v1 }
 0x518   : > { %v4076_v25 = vsel %vm3948_vm10, %v3868_v58, %v4012_v5  ;;  %vm3949_vm11 = vcmp.gt.f32.partialorder %v3871_v4, 0.0  ;;  %v4013_v3 = vmul.f32 0.2, %v3871_v4  ;;  %5008 = vmatmul.mubr.bf16.gmra.mrb[180].mxu1 %v11593_v55 }
 0x519   : > { %v3586_v36 = vpop.f32.mrb[120].mxu0  ;;  %5015 = vmatprep.mubr.bf16.mxu1 %v4248_v13  ;;  %v4144_v44 = vmul.f32 %v11280_v29, %v4076_v25  ;;  %v11916_v25 = vadd.f32 %v11289_v30, %v4143_v57 }
 0x51a   : > { %v4077_v40 = vsel %vm3949_vm11, %v3871_v4, %v4013_v3  ;;  %v8420_v41 = vadd.f32 %v3586_v36, %v2720_v31  ;;  %v3588_v21 = vpop.f32.mrb[121].mxu0  ;;  %v13354_v36 = vld [vmem:[#allocation57_spill] sm:$0xff] }
 0x51b   : > { %v4145_v1 = vmul.f32 %v11280_v29, %v4077_v40  ;;  %v3589_v47 = vpop.f32.mrb[122].mxu0  ;;  %v11907_v0 = vadd.f32 %v11289_v30, %v4144_v44  ;;  %v2728_v44 = vadd.f32 %v13354_v36, %v11255_v19  ;;  %v13355_v21 = vld [vmem:[#allocation39_spill] sm:$0xff] }
 0x51c   : > { %v8422_v58 = vadd.f32 %v3589_v47, %v2723_v2  ;;  %v3876_v13 = vadd.f32 %v8420_v41, %v11577_v50  ;;  %v3591_v15 = vpop.f32.mrb[123].mxu0  ;;  %v2731_v59 = vadd.f32 %v13355_v21, %v11255_v19 }
 0x51d   : > { %v11911_v5 = vadd.f32 %v11289_v30, %v4145_v1 }
 0x51e   : > { %v3879_v3 = vadd.f32 %v8422_v58, %v11586_v18  ;;  %v4014_v31 = vmul.f32 0.2, %v3876_v13  ;;  %vm3950_vm13 = vcmp.gt.f32.partialorder %v3876_v13, 0.0  ;;  %v13356_v58 = vld [vmem:[#allocation71_spill] sm:$0xff] }
 0x520   : > { %vm3951_vm12 = vcmp.gt.f32.partialorder %v3879_v3, 0.0  ;;  %v4015_v50 = vmul.f32 0.2, %v3879_v3  ;;  %5016 = vmatmul.mubr.bf16.gmra.mrb[184].mxu1 %v11621_v12  ;;  %v4078_v47 = vsel %vm3950_vm13, %v3876_v13, %v4014_v31 }
 0x521   : > { %v3594_v40 = vpop.f32.mrb[124].mxu0  ;;  %5023 = vmatprep.mubr.bf16.mxu1 %v4254_v38  ;;  %v13357_v38 = vld [vmem:[#allocation74_spill] sm:$0xff] }
 0x522   : > { %v4079_v57 = vsel %vm3951_vm12, %v3879_v3, %v4015_v50  ;;  %v8424_v41 = vadd.f32 %v3594_v40, %v2728_v44  ;;  %v3596_v18 = vpop.f32.mrb[125].mxu0  ;;  %v4146_v50 = vmul.f32 %v11280_v29, %v4078_v47 }
 0x523   : > { %v4147_v2 = vmul.f32 %v11280_v29, %v4079_v57  ;;  %v3597_v1 = vpop.f32.mrb[126].mxu0 }
 0x524   : > { %v3884_v15 = vadd.f32 %v8424_v41, %v13356_v58  ;;  %v8426_v53 = vadd.f32 %v3597_v1, %v2731_v59  ;;  %v3599_v4 = vpop.f32.mrb[127].mxu0  ;;  %v8893_v58 = vld [vmem:[%s12969_s2 + $0x1c8] sm:$0xff]  }
 0x525   : > { %v11931_v56 = vadd.f32 %v11289_v30, %v4147_v2 }
 0x526   : > { %vm3952_vm14 = vcmp.gt.f32.partialorder %v3884_v15, 0.0  ;;  %v4016_v36 = vmul.f32 0.2, %v3884_v15  ;;  %v3887_v3 = vadd.f32 %v8426_v53, %v13357_v38  ;;  %v11944_v53 = vadd.f32 %v11289_v30, %v4146_v50  ;;  %v13360_v38 = vld [vmem:[#allocation62_spill] sm:$0xff]  ;;  %v8894_v50 = vld [vmem:[%s12969_s2 + $0x188] sm:$0xff]  }
 0x527   : > { %v4263_v19 = vpack.c.bf16 %v11931_v56, %v11911_v5 }
 0x528   : > { %v4080_v44 = vsel %vm3952_vm14, %v3884_v15, %v4016_v36  ;;  %vm3953_vm15 = vcmp.gt.f32.partialorder %v3887_v3, 0.0  ;;  %v4017_v40 = vmul.f32 0.2, %v3887_v3  ;;  %5024 = vmatmul.mubr.bf16.gmra.mrb[188].mxu1 %v11724_v35  ;;  %v13359_v36 = vld [vmem:[#allocation50_spill] sm:$0xff] }
 0x529   : > { %5031 = vmatprep.mubr.bf16.mxu1 %v4260_v49  ;;  %v4148_v13 = vmul.f32 %v11280_v29, %v4080_v44  ;;  %v8895_v44 = vld [vmem:[%s12969_s2 + $0x1d0] sm:$0xff]  }
 0x52a   : > { %v4081_v4 = vsel %vm3953_vm15, %v3887_v3, %v4017_v40  ;;  %v8896_v40 = vld [vmem:[%s12969_s2 + $0x190] sm:$0xff]  }
 0x52b   : > { %v4149_v31 = vmul.f32 %v11280_v29, %v4081_v4  ;;  %v11947_v57 = vadd.f32 %v11289_v30, %v4148_v13  ;;  %v13358_v29 = vpack.c.bf16 %v11323_v37, %v11320_v28  ;;  %v13361_v28 = vpack.c.bf16 %v13359_v36, %v13360_v38  ;;  %v13362_v37 = vld [vmem:[#allocation65_spill] sm:$0xff]  ;;  %v13364_v13 = vld [vmem:[#allocation63_spill] sm:$0xff]  ;;  %v8901_v36 = vld [vmem:[%s12969_s2 + $0x1e8] sm:$0xff]  }
 0x52c   : > { %v13363_v3 = vpack.c.bf16 %v13362_v37, %v11343_v23  ;;  %v8897_v23 = vld [vmem:[%s12969_s2 + $0x1d8] sm:$0xff]   ;;  %v13365_v4 = vld [vmem:[#allocation53_spill] sm:$0xff] }
 0x52d   : > { %v11950_v41 = vadd.f32 %v11289_v30, %v4149_v31  ;;  %v4264_v18 = vpack.c.bf16 %v11947_v57, %v11944_v53  ;;  %v8892_v30 = vld [vmem:[%s12969_s2 + $0x180] sm:$0xff]   ;;  %v13366_v31 = vpack.c.bf16 %v13364_v13, %v13365_v4  ;;  %v13369_v37 = vld [vmem:[#allocation61_spill] sm:$0xff] }
 0x52e   : > { %v8904_v13 = vld [vmem:[%s12969_s2 + $0x1b0] sm:$0xff]   ;;  %v13373_v4 = vld [vmem:[#allocation67_spill] sm:$0xff] }
 0x52f   : > { %v4265_v49 = vpack.c.bf16 %v11950_v41, %v11931_v56 }
 0x530   : > { %5032 = vmatmul.mubr.bf16.gmra.mrb[192].mxu1 %v11754_v63 }
 0x531   : > { %5072 = vmatprep.mubr.bf16.mxu1 %v13358_v29  ;;  %v13367_v29 = vpack.c.bf16 %v11518_v62, %v11515_v52  ;;  %v8900_v52 = vld [vmem:[%s12969_s2 + $0x1a0] sm:$0xff]  }
 0x533   : > { %v7653_v21 = vpop.f32.mrb[140].mxu1 }
 0x534   : > { %v7654_v59 = vpop.f32.mrb[141].mxu1 }
 0x535   : > { %v11960_v2 = vadd.f32 %v7654_v59, %v7653_v21  ;;  %v7656_v1 = vpop.f32.mrb[142].mxu1  ;;  %v8898_v21 = vld [vmem:[%s12969_s2 + $0x198] sm:$0xff]   ;;  %v8899_v59 = vld [vmem:[%s12969_s2 + $0x1e0] sm:$0xff]  }
 0x536   : > { %v7657_v47 = vpop.f32.mrb[143].mxu1 }
 0x537   : > { %v11968_v15 = vadd.f32 %v7657_v47, %v7656_v1 }
 0x538   : > { %5073 = vmatmul.mubr.bf16.vlgmr.msra.gmra.mrb[196].mxu1 %v13361_v28  ;;  %v13368_v28 = vld [vmem:[#allocation64_spill] sm:$0xff] }
 0x539   : > { %5080 = vmatprep.mubr.bf16.mxu1 %v13363_v3  ;;  %7818 = vmatpush3.bf16.msra.mxu1 %v8892_v30  ;;  %v13370_v3 = vpack.c.bf16 %v13368_v28, %v13369_v37  ;;  %v8911_v28 = vld [vmem:[%s12969_s2 + $0x220] sm:$0xff]  }
 0x53a   : > { %7819 = vmatprep.subr.bf16.mxu1 %v8893_v58 }
 0x53d   : > { %7820 = vmatpush3.bf16.msra.mxu1 %v8894_v50  ;;  %v13371_v50 = vld [vmem:[#allocation70_spill] sm:$0xff] }
 0x53e   : > { %7821 = vmatprep.subr.bf16.mxu1 %v8895_v44  ;;  %v13372_v44 = vpack.c.bf16 %v13371_v50, %v11530_v33  ;;  %v8905_v33 = vld [vmem:[%s12969_s2 + $0x1f8] sm:$0xff]  }
 0x540   : > { %5081 = vmatmul.mubr.bf16.gmra.mrb[200].mxu1 %v13366_v31  ;;  %v13374_v31 = vld [vmem:[#allocation69_spill] sm:$0xff] }
 0x541   : > { %5088 = vmatprep.mubr.bf16.mxu1 %v13367_v29  ;;  %7822 = vmatpush3.bf16.msra.mxu1 %v8896_v40  ;;  %v8902_v40 = vld [vmem:[%s12969_s2 + $0x1a8] sm:$0xff]   ;;  %v13375_v29 = vpack.c.bf16 %v13373_v4, %v13374_v31  ;;  %v13390_v4 = vld [vmem:[#allocation79_spill] sm:$0xff]  ;;  %v8913_v31 = vld [vmem:[%s12969_s2 + $0x230] sm:$0xff]  }
 0x542   : > { %7823 = vmatprep.subr.bf16.mxu1 %v8897_v23  ;;  %v8903_v23 = vld [vmem:[%s12969_s2 + $0x1f0] sm:$0xff]  }
 0x543   : > { %v7659_v1 = vpop.f32.mrb[144].mxu1 }
 0x544   : > { %v7660_v30 = vpop.f32.mrb[145].mxu1 }
 0x545   : > { %v12000_v47 = vadd.f32 %v7660_v30, %v7659_v1  ;;  %v7662_v58 = vpop.f32.mrb[146].mxu1  ;;  %7824 = vmatpush3.bf16.msra.mxu1 %v8898_v21  ;;  %v13376_v21 = vpack.c.bf16 %v11657_v39, %v11654_v14  ;;  %v8907_v1 = vld [vmem:[%s12969_s2 + $0x200] sm:$0xff]   ;;  %v13377_v30 = vpack.c.bf16 %v11650_v24, %v11647_v48  ;;  %v13378_v14 = vpack.c.bf16 %v11691_v54, %v11671_v6  ;;  %v13384_v6 = vld [vmem:[#allocation56_spill] sm:$0xff] }
 0x546   : > { %v7663_v62 = vpop.f32.mrb[147].mxu1  ;;  %7825 = vmatprep.subr.bf16.mxu1 %v8899_v59  ;;  %v8906_v59 = vld [vmem:[%s12969_s2 + $0x1b8] sm:$0xff]   ;;  %v13379_v39 = vpack.c.bf16 %v11687_v20, %v11684_v10  ;;  %v13382_v48 = vpack.c.bf16 %v11866_v60, %v11830_v34  ;;  %v13383_v24 = vpack.c.bf16 %v11859_v9, %v11856_v43  ;;  %v13385_v34 = vld [vmem:[#allocation59_spill] sm:$0xff]  ;;  %v13386_v60 = vld [vmem:[#allocation68_spill] sm:$0xff] }
 0x547   : > { %v12008_v38 = vadd.f32 %v7663_v62, %v7662_v58  ;;  %v13380_v58 = vpack.c.bf16 %v11801_v61, %v11798_v45  ;;  %v8909_v43 = vld [vmem:[%s12969_s2 + $0x210] sm:$0xff]   ;;  %v8910_v9 = vld [vmem:[%s12969_s2 + $0x218] sm:$0xff]  }
 0x548   : > { %5089 = vmatmul.mubr.bf16.gmra.mrb[204].mxu1 %v13370_v3  ;;  %v13387_v62 = vld [vmem:[#allocation66_spill] sm:$0xff] }
 0x549   : > { %5096 = vmatprep.mubr.bf16.mxu1 %v13372_v44  ;;  %7826 = vmatpush3.bf16.msra.mxu1 %v8900_v52  ;;  %v13381_v52 = vpack.c.bf16 %v11791_v8, %v11788_v32  ;;  %v8908_v32 = vld [vmem:[%s12969_s2 + $0x208] sm:$0xff]  }
 0x54a   : > { %7827 = vmatprep.subr.bf16.mxu1 %v8901_v36  ;;  %v13388_v36 = vld [vmem:[#allocation72_spill] sm:$0xff] }
 0x54d   : > { %7828 = vmatpush3.bf16.msra.mxu1 %v8902_v40 }
 0x54e   : > { %7829 = vmatprep.subr.bf16.mxu1 %v8903_v23  ;;  %v8912_v23 = vld [vmem:[%s12969_s2 + $0x228] sm:$0xff]  }
 0x550   : > { %5097 = vmatmul.mubr.bf16.gmra.mrb[208].mxu1 %v13375_v29  ;;  %v8914_v29 = vld [vmem:[%s12969_s2 + $0x238] sm:$0xff]  }
 0x551   : > { %5104 = vmatprep.mubr.bf16.mxu1 %v13376_v21  ;;  %7830 = vmatpush3.bf16.msra.mxu1 %v8904_v13  ;;  %v13391_v21 = vld [vmem:[#allocation75_spill] sm:$0xff] }
 0x552   : > { %7831 = vmatprep.subr.bf16.mxu1 %v8905_v33  ;;  %v13389_v33 = vld [vmem:[#allocation76_spill] sm:$0xff] }
 0x555   : > { %7832 = vmatpush3.bf16.msra.mxu1 %v8906_v59  ;;  %v13392_v59 = vpack.c.bf16 %v11907_v0, %v11904_v42 }
 0x556   : > { %8205 = vmatprep.subr.bf16.mxu1 %v8907_v1 }
 0x558   : > { %5105 = vmatmul.mubr.bf16.gmra.mrb[212].mxu1 %v13377_v30  ;;  %v13393_v30 = vld [vmem:[#allocation42_spill] sm:$0xff] }
 0x559   : > { %5112 = vmatprep.mubr.bf16.mxu1 %v13378_v14  ;;  %v12125_v14 = vsub.s32 1, %v13393_v30 }
 0x560   : > { %5113 = vmatmul.mubr.bf16.gmra.mrb[216].mxu1 %v13379_v39 }
 0x561   : > { %5120 = vmatprep.mubr.bf16.mxu1 %v13380_v58 }
 0x568   : > { %5121 = vmatmul.mubr.bf16.gmra.mrb[220].mxu1 %v13381_v52  ;;  %v13395_v52 = vld [vmem:[#allocation81_spill] sm:$0xff] }
 0x569   : > { %5128 = vmatprep.mubr.bf16.mxu1 %v13382_v48 }
 0x570   : > { %5129 = vmatmul.mubr.bf16.gmra.mrb[224].mxu1 %v13383_v24 }
 0x571   : > { %5169 = vmatprep.mubr.bf16.mxu1 %v13384_v6 }
 0x573   : > { %v7665_v10 = vpop.f32.mrb[148].mxu1 }
 0x574   : > { %v7666_v20 = vpop.f32.mrb[149].mxu1 }
 0x575   : > { %v12062_v54 = vadd.f32 %v7666_v20, %v7665_v10  ;;  %v7668_v45 = vpop.f32.mrb[150].mxu1 }
 0x576   : > { %v7669_v61 = vpop.f32.mrb[151].mxu1 }
 0x577   : > { %v12067_v8 = vadd.f32 %v7669_v61, %v7668_v45 }
 0x578   : > { %5170 = vmatmul.mubr.bf16.vlgmr.msra.gmra.mrb[228].mxu1 %v13385_v34  ;;  %v13397_v34 = vld [vmem:[#allocation82_spill] sm:$0xff] }
 0x579   : > { %5177 = vmatprep.mubr.bf16.mxu1 %v13386_v60  ;;  %8206 = vmatpush3.bf16.msra.mxu1 %v8907_v1  ;;  %v4257_v1 = vpack.c.bf16 %v11916_v25, %v13127_v22 }
 0x57a   : > { %8207 = vmatprep.subr.bf16.mxu1 %v8908_v32 }
 0x57d   : > { %8208 = vmatpush3.bf16.msra.mxu1 %v8908_v32 }
 0x57e   : > { %8209 = vmatprep.subr.bf16.mxu1 %v8909_v43 }
 0x580   : > { %5178 = vmatmul.mubr.bf16.gmra.mrb[232].mxu1 %v13387_v62 }
 0x581   : > { %5185 = vmatprep.mubr.bf16.mxu1 %v13388_v36  ;;  %8210 = vmatpush3.bf16.msra.mxu1 %v8909_v43 }
 0x582   : > { %8211 = vmatprep.subr.bf16.mxu1 %v8910_v9 }
 0x583   : > { %v7671_v37 = vpop.f32.mrb[152].mxu1 }
 0x584   : > { %v7672_v3 = vpop.f32.mrb[153].mxu1 }
 0x585   : > { %v12082_v50 = vadd.f32 %v7672_v3, %v7671_v37  ;;  %v7674_v44 = vpop.f32.mrb[154].mxu1  ;;  %8212 = vmatpush3.bf16.msra.mxu1 %v8910_v9 }
 0x586   : > { %v7675_v40 = vpop.f32.mrb[155].mxu1  ;;  %8213 = vmatprep.subr.bf16.mxu1 %v8911_v28 }
 0x587   : > { %v12087_v13 = vadd.f32 %v7675_v40, %v7674_v44 }
 0x588   : > { %5186 = vmatmul.mubr.bf16.gmra.mrb[236].mxu1 %v13389_v33 }
 0x589   : > { %5193 = vmatprep.mubr.bf16.mxu1 %v13390_v4  ;;  %8214 = vmatpush3.bf16.msra.mxu1 %v8911_v28 }
 0x58a   : > { %8215 = vmatprep.subr.bf16.mxu1 %v8912_v23 }
 0x58d   : > { %8216 = vmatpush3.bf16.msra.mxu1 %v8912_v23 }
 0x58e   : > { %8217 = vmatprep.subr.bf16.mxu1 %v8913_v31 }
 0x590   : > { %5194 = vmatmul.mubr.bf16.gmra.mrb[240].mxu1 %v13391_v21 }
 0x591   : > { %5201 = vmatprep.mubr.bf16.mxu1 %v11716_v16  ;;  %8218 = vmatpush3.bf16.msra.mxu1 %v8913_v31 }
 0x592   : > { %8219 = vmatprep.subr.bf16.mxu1 %v8914_v29 }
 0x595   : > { %8220 = vmatpush3.bf16.msra.mxu1 %v8914_v29 }
 0x598   : > { %5202 = vmatmul.mubr.bf16.gmra.mrb[244].mxu1 %v11721_v11 }
 0x599   : > { %5209 = vmatprep.mubr.bf16.mxu1 %v11747_v7 }
 0x5a0   : > { %5210 = vmatmul.mubr.bf16.gmra.mrb[248].mxu1 %v11736_v17 }
 0x5a1   : > { %5217 = vmatprep.mubr.bf16.mxu1 %v13392_v59 }
 0x5a8   : > { %5218 = vmatmul.mubr.bf16.gmra.mrb[252].mxu1 %v4257_v1 }
 0x5a9   : > { %5225 = vmatprep.mubr.bf16.mxu1 %v4264_v18 }
 0x5b0   : > { %5226 = vmatmul.mubr.bf16.gmra.mrb[0].mxu1 %v4263_v19 }
 0x5b1   : > { %8221 = vmatprep.mubr.bf16.mxu1 %v11433_v46 }
 0x5b3   : > { %v7677_v16 = vpop.f32.mrb[156].mxu1 }
 0x5b4   : > { %v7678_v11 = vpop.f32.mrb[157].mxu1 }
 0x5b5   : > { %v12114_v17 = vadd.f32 %v7678_v11, %v7677_v16  ;;  %v7680_v7 = vpop.f32.mrb[158].mxu1 }
 0x5b6   : > { %v7681_v42 = vpop.f32.mrb[159].mxu1 }
 0x5b7   : > { %v12116_v0 = vadd.f32 %v7681_v42, %v7680_v7 }
 0x5b8   : > { %8222 = vmatmul.mubr.bf16.vlgmr.msra.gmra.mrb[4].mxu1 %v11477_v27  ;;  %v13394_v27 = vpack.c.bf16 %v11911_v5, %v11916_v25 }
 0x5b9   : > { %8225 = vmatprep.mubr.bf16.mxu1 %v11593_v55  ;;  %v9075_v55 = vld [vmem:[%s12972_s5] sm:$0xf] }
 0x5c0   : > { %8226 = vmatmul.mubr.bf16.gmra.mrb[8].mxu1 %v11621_v12  ;;  %v12137_v12 = vrot.slane %v9075_v55, %v12125_v14 }
 0x5c1   : > { %8229 = vmatprep.mubr.bf16.mxu1 %v11724_v35 }
 0x5c2   : > { %v4881_v48 = vadd.f32 %v13395_v52, %v12137_v12  ;;  %v4889_v60 = vadd.f32 %v13397_v34, %v12137_v12  ;;  %v4892_v36 = vadd.f32 %v11635_v26, %v12137_v12  ;;  %v4897_v3 = vadd.f32 %v11960_v2, %v12137_v12  ;;  %v8915_v2 = vld [vmem:[%s12970_s3 + $0x40] sm:$0xff]   ;;  %v8919_v52 = vld [vmem:[%s12970_s3 + $0x50] sm:$0xff]  }
 0x5c3   : > { %v7683_v53 = vpop.f32.mrb[160].mxu1  ;;  %v4900_v33 = vadd.f32 %v11968_v15, %v12137_v12  ;;  %v4905_v59 = vadd.f32 %v12000_v47, %v12137_v12  ;;  %v4908_v15 = vadd.f32 %v12008_v38, %v12137_v12  ;;  %7897 = vmatprep.subr.bf16.mxu1 %v8915_v2  ;;  %v8917_v47 = vld [vmem:[%s12970_s3 + $0x48] sm:$0xff]  }
 0x5c4   : > { %v7684_v19 = vpop.f32.mrb[161].mxu1  ;;  %v8918_v38 = vld [vmem:[%s12970_s3 + $0x8] sm:$0xff]  }
 0x5c5   : > { %v12122_v57 = vadd.f32 %v7684_v19, %v7683_v53  ;;  %v7686_v46 = vpop.f32.mrb[162].mxu1  ;;  %v8916_v53 = vld [vmem:[%s12970_s3] sm:$0xff]  }
 0x5c6   : > { %v7687_v18 = vpop.f32.mrb[163].mxu1  ;;  %7898 = vmatpush3.bf16.msra.mxu1 %v8916_v53 }
 0x5c7   : > { %v12127_v39 = vadd.f32 %v7687_v18, %v7686_v46  ;;  %7899 = vmatprep.subr.bf16.mxu1 %v8917_v47 }
 0x5c8   : > { %8230 = vmatmul.mubr.bf16.gmra.mrb[12].mxu1 %v11754_v63  ;;  %v13396_v63 = vld [vmem:[#allocation80_spill] sm:$0xff] }
 0x5c9   : > { %8233 = vmatprep.mubr.bf16.mxu1 %v13394_v27  ;;  %v4884_v20 = vadd.f32 %v13396_v63, %v12137_v12  ;;  %v4913_v27 = vadd.f32 %v12062_v54, %v12137_v12  ;;  %v8921_v63 = vld [vmem:[%s12970_s3 + $0x58] sm:$0xff]  }
 0x5ca   : > { %7900 = vmatpush3.bf16.msra.mxu1 %v8918_v38 }
 0x5cb   : > { %v7705_v35 = vpop.f32.mrb[164].mxu1  ;;  %7901 = vmatprep.subr.bf16.mxu1 %v8919_v52 }
 0x5cc   : > { %v7706_v58 = vpop.f32.mrb[165].mxu1 }
 0x5cd   : > { %v7707_v24 = vadd.f32 %v7706_v58, %v7705_v35  ;;  %v7708_v6 = vpop.f32.mrb[166].mxu1 }
 0x5ce   : > { %v7709_v10 = vpop.f32.mrb[167].mxu1 }
 0x5cf   : > { %v12143_v5 = vadd.f32 %v7707_v24, %v4881_v48  ;;  %v7710_v25 = vadd.f32 %v7709_v10, %v7708_v6  ;;  %v4916_v48 = vadd.f32 %v12067_v8, %v12137_v12  ;;  %v8920_v10 = vld [vmem:[%s12970_s3 + $0x10] sm:$0xff]   ;;  %v8922_v8 = vld [vmem:[%s12970_s3 + $0x18] sm:$0xff]  }
 0x5d0   : > { %8234 = vmatmul.mubr.bf16.gmra.mrb[16].mxu1 %v4265_v49 }
 0x5d1   : > { %v12148_v45 = vadd.f32 %v7710_v25, %v4884_v20  ;;  %6043 = vmatprep.mubr.bf16.mxu1 %v13341_v51  ;;  %7902 = vmatpush3.bf16.msra.mxu1 %v8920_v10 }
 0x5d2   : > { %7903 = vmatprep.subr.bf16.mxu1 %v8921_v63 }
 0x5d3   : > { %v7711_v61 = vpop.f32.mrb[168].mxu1 }
 0x5d4   : > { %v7712_v32 = vpop.f32.mrb[169].mxu1 }
 0x5d5   : > { %v7713_v43 = vadd.f32 %v7712_v32, %v7711_v61  ;;  %v7714_v9 = vpop.f32.mrb[170].mxu1  ;;  %v4921_v61 = vadd.f32 %v12082_v50, %v12137_v12  ;;  %7904 = vmatpush3.bf16.msra.mxu1 %v8922_v8 }
 0x5d6   : > { %v7715_v62 = vpop.f32.mrb[171].mxu1 }
 0x5d7   : > { %v12155_v28 = vadd.f32 %v7713_v43, %v4889_v60  ;;  %v7716_v37 = vadd.f32 %v7715_v62, %v7714_v9  ;;  %v8923_v43 = vld [vmem:[%s12970_s3 + $0x60] sm:$0xff]   ;;  %v4924_v9 = vadd.f32 %v12087_v13, %v12137_v12  ;;  %v8926_v13 = vld [vmem:[%s12970_s3 + $0x28] sm:$0xff]  }
 0x5d8   : > { %7905 = vmatprep.subr.bf16.mxu1 %v8923_v43  ;;  %v8938_v43 = vld [vmem:[%s12970_s3 + $0x98] sm:$0xff]  }
 0x5d9   : > { %v12157_v56 = vadd.f32 %v7716_v37, %v4892_v36  ;;  %v8924_v37 = vld [vmem:[%s12970_s3 + $0x20] sm:$0xff]  }
 0x5da   : > { %7906 = vmatpush3.bf16.msra.mxu1 %v8924_v37  ;;  %v8939_v37 = vld [vmem:[%s12970_s3 + $0xe0] sm:$0xff]  }
 0x5db   : > { %v7717_v41 = vpop.f32.mrb[172].mxu1 }
 0x5dc   : > { %v7718_v49 = vpop.f32.mrb[173].mxu1 }
 0x5dd   : > { %v7719_v44 = vadd.f32 %v7718_v49, %v7717_v41  ;;  %v7720_v40 = vpop.f32.mrb[174].mxu1  ;;  %v8925_v41 = vld [vmem:[%s12970_s3 + $0x68] sm:$0xff]  }
 0x5de   : > { %v7721_v23 = vpop.f32.mrb[175].mxu1  ;;  %7907 = vmatprep.subr.bf16.mxu1 %v8925_v41 }
 0x5df   : > { %v12163_v4 = vadd.f32 %v7719_v44, %v4897_v3  ;;  %v7722_v31 = vadd.f32 %v7721_v23, %v7720_v40  ;;  %v4929_v44 = vadd.f32 %v12114_v17, %v12137_v12  ;;  %7908 = vmatpush3.bf16.msra.mxu1 %v8926_v13 }
 0x5e1   : > { %v12165_v26 = vadd.f32 %v7722_v31, %v4900_v33  ;;  %v8927_v31 = vld [vmem:[%s12970_s3 + $0x70] sm:$0xff]  }
 0x5e2   : > { %7909 = vmatprep.subr.bf16.mxu1 %v8927_v31 }
 0x5e3   : > { %v7723_v29 = vpop.f32.mrb[176].mxu1 }
 0x5e4   : > { %v7724_v21 = vpop.f32.mrb[177].mxu1 }
 0x5e5   : > { %v7725_v1 = vadd.f32 %v7724_v21, %v7723_v29  ;;  %v7726_v16 = vpop.f32.mrb[178].mxu1  ;;  %v4932_v29 = vadd.f32 %v12116_v0, %v12137_v12  ;;  %v8930_v0 = vld [vmem:[%s12970_s3 + $0x38] sm:$0xff]  }
 0x5e6   : > { %v7727_v11 = vpop.f32.mrb[179].mxu1 }
 0x5e7   : > { %v12174_v7 = vadd.f32 %v7725_v1, %v4905_v59  ;;  %v7728_v42 = vadd.f32 %v7727_v11, %v7726_v16  ;;  %v8928_v1 = vld [vmem:[%s12970_s3 + $0x30] sm:$0xff]   ;;  %v8929_v16 = vld [vmem:[%s12970_s3 + $0x78] sm:$0xff]  }
 0x5e8   : > { %7910 = vmatpush3.bf16.msra.mxu1 %v8928_v1  ;;  %v8944_v1 = vld [vmem:[%s12970_s3 + $0xb0] sm:$0xff]  }
 0x5e9   : > { %v12179_v19 = vadd.f32 %v7728_v42, %v4908_v15  ;;  %7911 = vmatprep.subr.bf16.mxu1 %v8929_v16  ;;  %v4937_v15 = vadd.f32 %v12122_v57, %v12137_v12 }
 0x5eb   : > { %v7729_v46 = vpop.f32.mrb[180].mxu1 }
 0x5ec   : > { %v7730_v18 = vpop.f32.mrb[181].mxu1  ;;  %7912 = vmatpush3.bf16.msra.mxu1 %v8930_v0 }
 0x5ed   : > { %v7731_v55 = vadd.f32 %v7730_v18, %v7729_v46  ;;  %v7732_v35 = vpop.f32.mrb[182].mxu1  ;;  %v4940_v46 = vadd.f32 %v12127_v39, %v12137_v12  ;;  %v8933_v39 = vld [vmem:[%s12970_s3 + $0xc8] sm:$0xff]  }
 0x5ee   : > { %v7733_v58 = vpop.f32.mrb[183].mxu1 }
 0x5ef   : > { %v12194_v24 = vadd.f32 %v7731_v55, %v4913_v27  ;;  %v7734_v6 = vadd.f32 %v7733_v58, %v7732_v35  ;;  %v8931_v27 = vld [vmem:[%s12970_s3 + $0xc0] sm:$0xff]   ;;  %6044 = vmatmul.mubr.bf16.vlgmr.msra.gmra.mrb[20].mxu1 %v13341_v51 }
 0x5f0   : > { %v8932_v55 = vld [vmem:[%s12970_s3 + $0x80] sm:$0xff]   ;;  %7925 = vmatprep.subr.bf16.mxu1 %v8931_v27 }
 0x5f1   : > { %v12199_v54 = vadd.f32 %v7734_v6, %v4916_v48  ;;  %7926 = vmatpush3.bf16.msra.mxu1 %v8932_v55  ;;  %v8934_v48 = vld [vmem:[%s12970_s3 + $0x88] sm:$0xff]  }
 0x5f2   : > { %7927 = vmatprep.subr.bf16.mxu1 %v8933_v39 }
 0x5f3   : > { %v7735_v20 = vpop.f32.mrb[184].mxu1 }
 0x5f4   : > { %v7736_v25 = vpop.f32.mrb[185].mxu1 }
 0x5f5   : > { %v7737_v32 = vadd.f32 %v7736_v25, %v7735_v20  ;;  %v7738_v34 = vpop.f32.mrb[186].mxu1  ;;  %7928 = vmatpush3.bf16.msra.mxu1 %v8934_v48  ;;  %v8935_v20 = vld [vmem:[%s12970_s3 + $0xd0] sm:$0xff]  }
 0x5f6   : > { %v7739_v60 = vpop.f32.mrb[187].mxu1  ;;  %v8936_v25 = vld [vmem:[%s12970_s3 + $0x90] sm:$0xff]   ;;  %7929 = vmatprep.subr.bf16.mxu1 %v8935_v20 }
 0x5f7   : > { %v12214_v62 = vadd.f32 %v7737_v32, %v4921_v61  ;;  %v7740_v36 = vadd.f32 %v7739_v60, %v7738_v34 }
 0x5f9   : > { %v12219_v50 = vadd.f32 %v7740_v36, %v4924_v9  ;;  %7930 = vmatpush3.bf16.msra.mxu1 %v8936_v25 }
 0x5fb   : > { %v7741_v49 = vpop.f32.mrb[188].mxu1 }
 0x5fc   : > { %v7742_v3 = vpop.f32.mrb[189].mxu1 }
 0x5fd   : > { %v7743_v40 = vadd.f32 %v7742_v3, %v7741_v49  ;;  %v7744_v23 = vpop.f32.mrb[190].mxu1  ;;  %v8940_v49 = vld [vmem:[%s12970_s3 + $0xa0] sm:$0xff]  }
 0x5fe   : > { %v7745_v33 = vpop.f32.mrb[191].mxu1 }
 0x5ff   : > { %v12234_v21 = vadd.f32 %v7743_v40, %v4929_v44  ;;  %v7746_v59 = vadd.f32 %v7745_v33, %v7744_v23  ;;  %v8942_v23 = vld [vmem:[%s12970_s3 + $0xa8] sm:$0xff]  }
 0x601   : > { %v12239_v17 = vadd.f32 %v7746_v59, %v4932_v29  ;;  %v8943_v29 = vld [vmem:[%s12970_s3 + $0xf0] sm:$0xff]  }
 0x603   : > { %v7747_v11 = vpop.f32.mrb[192].mxu1 }
 0x604   : > { %v7748_v2 = vpop.f32.mrb[193].mxu1 }
 0x605   : > { %v7749_v42 = vadd.f32 %v7748_v2, %v7747_v11  ;;  %v7750_v53 = vpop.f32.mrb[194].mxu1  ;;  %v8945_v2 = vld [vmem:[%s12970_s3 + $0xf8] sm:$0xff]  }
 0x606   : > { %v7751_v47 = vpop.f32.mrb[195].mxu1 }
 0x607   : > { %v12251_v38 = vadd.f32 %v7749_v42, %v4937_v15  ;;  %v7752_v18 = vadd.f32 %v7751_v47, %v7750_v53 }
 0x609   : > { %v12260_v57 = vadd.f32 %v7752_v18, %v4940_v46  ;;  %v8947_v46 = vld [vmem:[%s12970_s3 + $0x140] sm:$0xff]  }
 0x60b   : > { %v7769_v35 = vpop.f32.mrb[196].mxu1 }
 0x60c   : > { %v7770_v58 = vpop.f32.mrb[197].mxu1 }
 0x60d   : > { %v7771_v12 = vadd.f32 %v7770_v58, %v7769_v35  ;;  %v7772_v52 = vpop.f32.mrb[198].mxu1 }
 0x60e   : > { %v7773_v6 = vpop.f32.mrb[199].mxu1 }
 0x60f   : > { %v12269_v10 = vadd.f32 %v7771_v12, %v12143_v5  ;;  %v7774_v63 = vadd.f32 %v7773_v6, %v7772_v52  ;;  %v8937_v5 = vld [vmem:[%s12970_s3 + $0xd8] sm:$0xff]  }
 0x610   : > { %7931 = vmatprep.subr.bf16.mxu1 %v8937_v5 }
 0x611   : > { %v12275_v8 = vadd.f32 %v7774_v63, %v12148_v45  ;;  %7932 = vmatpush3.bf16.msra.mxu1 %v8938_v43 }
 0x612   : > { %7933 = vmatprep.subr.bf16.mxu1 %v8939_v37 }
 0x613   : > { %v7775_v61 = vpop.f32.mrb[200].mxu1 }
 0x614   : > { %v7776_v32 = vpop.f32.mrb[201].mxu1 }
 0x615   : > { %v7777_v34 = vadd.f32 %v7776_v32, %v7775_v61  ;;  %v7778_v60 = vpop.f32.mrb[202].mxu1  ;;  %7934 = vmatpush3.bf16.msra.mxu1 %v8940_v49 }
 0x616   : > { %v7779_v45 = vpop.f32.mrb[203].mxu1 }
 0x617   : > { %v12287_v9 = vadd.f32 %v7777_v34, %v12155_v28  ;;  %v7780_v36 = vadd.f32 %v7779_v45, %v7778_v60  ;;  %v8941_v28 = vld [vmem:[%s12970_s3 + $0xe8] sm:$0xff]  }
 0x618   : > { %7935 = vmatprep.subr.bf16.mxu1 %v8941_v28 }
 0x619   : > { %v12293_v41 = vadd.f32 %v7780_v36, %v12157_v56  ;;  %7936 = vmatpush3.bf16.msra.mxu1 %v8942_v23 }
 0x61a   : > { %7937 = vmatprep.subr.bf16.mxu1 %v8943_v29 }
 0x61b   : > { %v7781_v13 = vpop.f32.mrb[204].mxu1 }
 0x61c   : > { %v7782_v3 = vpop.f32.mrb[205].mxu1 }
 0x61d   : > { %v7783_v44 = vadd.f32 %v7782_v3, %v7781_v13  ;;  %v7784_v40 = vpop.f32.mrb[206].mxu1  ;;  %7938 = vmatpush3.bf16.msra.mxu1 %v8944_v1 }
 0x61e   : > { %v7785_v56 = vpop.f32.mrb[207].mxu1  ;;  %7939 = vmatprep.subr.bf16.mxu1 %v8945_v2 }
 0x61f   : > { %v12305_v33 = vadd.f32 %v7783_v44, %v12163_v4  ;;  %v7786_v31 = vadd.f32 %v7785_v56, %v7784_v40 }
 0x621   : > { %v12311_v59 = vadd.f32 %v7786_v31, %v12165_v26  ;;  %v8946_v26 = vld [vmem:[%s12970_s3 + $0xb8] sm:$0xff]  }
 0x622   : > { %7940 = vmatpush3.bf16.msra.mxu1 %v8946_v26 }
 0x623   : > { %v7787_v16 = vpop.f32.mrb[208].mxu1  ;;  %7953 = vmatprep.subr.bf16.mxu1 %v8947_v46 }
 0x624   : > { %v7788_v11 = vpop.f32.mrb[209].mxu1 }
 0x625   : > { %v7789_v0 = vadd.f32 %v7788_v11, %v7787_v16  ;;  %v7790_v4 = vpop.f32.mrb[210].mxu1 }
 0x626   : > { %v7791_v15 = vpop.f32.mrb[211].mxu1 }
 0x627   : > { %v12323_v42 = vadd.f32 %v7789_v0, %v12174_v7  ;;  %v7792_v53 = vadd.f32 %v7791_v15, %v7790_v4 }
 0x629   : > { %v12326_v47 = vadd.f32 %v7792_v53, %v12179_v19 }
 0x62b   : > { %v7793_v18 = vpop.f32.mrb[212].mxu1 }
 0x62c   : > { %v7794_v27 = vpop.f32.mrb[213].mxu1 }
 0x62d   : > { %v7795_v55 = vadd.f32 %v7794_v27, %v7793_v18  ;;  %v7796_v35 = vpop.f32.mrb[214].mxu1 }
 0x62e   : > { %v7797_v58 = vpop.f32.mrb[215].mxu1 }
 0x62f   : > { %v12332_v39 = vadd.f32 %v7795_v55, %v12194_v24  ;;  %v7798_v7 = vadd.f32 %v7797_v58, %v7796_v35 }
 0x631   : > { %v12335_v12 = vadd.f32 %v7798_v7, %v12199_v54 }
 0x633   : > { %v7799_v52 = vpop.f32.mrb[216].mxu1 }
 0x634   : > { %v7800_v19 = vpop.f32.mrb[217].mxu1 }
 0x635   : > { %v7801_v48 = vadd.f32 %v7800_v19, %v7799_v52  ;;  %v7802_v6 = vpop.f32.mrb[218].mxu1 }
 0x636   : > { %v7803_v63 = vpop.f32.mrb[219].mxu1 }
 0x637   : > { %v12338_v20 = vadd.f32 %v7801_v48, %v12214_v62  ;;  %v7804_v25 = vadd.f32 %v7803_v63, %v7802_v6 }
 0x639   : > { %v12341_v61 = vadd.f32 %v7804_v25, %v12219_v50 }
 0x63b   : > { %v7805_v32 = vpop.f32.mrb[220].mxu1 }
 0x63c   : > { %v7806_v5 = vpop.f32.mrb[221].mxu1 }
 0x63d   : > { %v7807_v24 = vadd.f32 %v7806_v5, %v7805_v32  ;;  %v7808_v34 = vpop.f32.mrb[222].mxu1 }
 0x63e   : > { %v7809_v60 = vpop.f32.mrb[223].mxu1 }
 0x63f   : > { %v12344_v54 = vadd.f32 %v7807_v24, %v12234_v21  ;;  %v7810_v43 = vadd.f32 %v7809_v60, %v7808_v34 }
 0x641   : > { %v12347_v45 = vadd.f32 %v7810_v43, %v12239_v17 }
 0x643   : > { %v7811_v36 = vpop.f32.mrb[224].mxu1 }
 0x644   : > { %v7812_v37 = vpop.f32.mrb[225].mxu1 }
 0x645   : > { %v7813_v62 = vadd.f32 %v7812_v37, %v7811_v36  ;;  %v7814_v49 = vpop.f32.mrb[226].mxu1 }
 0x646   : > { %v7815_v13 = vpop.f32.mrb[227].mxu1 }
 0x647   : > { %v12350_v50 = vadd.f32 %v7813_v62, %v12251_v38  ;;  %v7816_v3 = vadd.f32 %v7815_v13, %v7814_v49 }
 0x649   : > { %v12353_v28 = vadd.f32 %v7816_v3, %v12260_v57 }
 0x64b   : > { %v7833_v44 = vpop.f32.mrb[228].mxu1 }
 0x64c   : > { %v7834_v40 = vpop.f32.mrb[229].mxu1 }
 0x64d   : > { %v7835_v21 = vadd.f32 %v7834_v40, %v7833_v44  ;;  %v7836_v23 = vpop.f32.mrb[230].mxu1 }
 0x64e   : > { %v7837_v56 = vpop.f32.mrb[231].mxu1 }
 0x64f   : > { %v7838_v31 = vadd.f32 %v7837_v56, %v7836_v23  ;;  %v12356_v17 = vadd.f32 %v7835_v21, %v12269_v10 }
 0x651   : > { %v12359_v29 = vadd.f32 %v7838_v31, %v12275_v8 }
 0x653   : > { %v7839_v1 = vpop.f32.mrb[232].mxu1 }
 0x654   : > { %v7840_v16 = vpop.f32.mrb[233].mxu1 }
 0x655   : > { %v7841_v38 = vadd.f32 %v7840_v16, %v7839_v1  ;;  %v7842_v11 = vpop.f32.mrb[234].mxu1 }
 0x656   : > { %v7843_v0 = vpop.f32.mrb[235].mxu1 }
 0x657   : > { %v7844_v4 = vadd.f32 %v7843_v0, %v7842_v11  ;;  %v5180_v57 = vadd.f32 %v7841_v38, %v12287_v9 }
 0x659   : > { %v5183_v2 = vadd.f32 %v7844_v4, %v12293_v41 }
 0x65b   : > { %v7845_v15 = vpop.f32.mrb[236].mxu1 }
 0x65c   : > { %v7846_v26 = vpop.f32.mrb[237].mxu1 }
 0x65d   : > { %v7847_v53 = vadd.f32 %v7846_v26, %v7845_v15  ;;  %v7848_v46 = vpop.f32.mrb[238].mxu1 }
 0x65e   : > { %v7849_v18 = vpop.f32.mrb[239].mxu1 }
 0x65f   : > { %v7850_v10 = vadd.f32 %v7849_v18, %v7848_v46  ;;  %v12364_v27 = vadd.f32 %v7847_v53, %v12305_v33 }
 0x661   : > { %v12367_v8 = vadd.f32 %v7850_v10, %v12311_v59 }
 0x663   : > { %v7851_v55 = vpop.f32.mrb[240].mxu1 }
 0x664   : > { %v7852_v35 = vpop.f32.mrb[241].mxu1 }
 0x665   : > { %v7853_v58 = vadd.f32 %v7852_v35, %v7851_v55  ;;  %v7854_v7 = vpop.f32.mrb[242].mxu1 }
 0x666   : > { %v7855_v52 = vpop.f32.mrb[243].mxu1 }
 0x667   : > { %v7856_v9 = vadd.f32 %v7855_v52, %v7854_v7  ;;  %v12370_v41 = vadd.f32 %v7853_v58, %v12323_v42 }
 0x669   : > { %v12373_v19 = vadd.f32 %v7856_v9, %v12326_v47 }
 0x66b   : > { %v7857_v48 = vpop.f32.mrb[244].mxu1 }
 0x66c   : > { %v7858_v6 = vpop.f32.mrb[245].mxu1 }
 0x66d   : > { %v7859_v63 = vadd.f32 %v7858_v6, %v7857_v48  ;;  %v7860_v33 = vpop.f32.mrb[246].mxu1 }
 0x66e   : > { %v7861_v25 = vpop.f32.mrb[247].mxu1 }
 0x66f   : > { %v7862_v32 = vadd.f32 %v7861_v25, %v7860_v33  ;;  %v12376_v59 = vadd.f32 %v7859_v63, %v12332_v39 }
 0x671   : > { %v12379_v5 = vadd.f32 %v7862_v32, %v12335_v12 }
 0x673   : > { %v7863_v24 = vpop.f32.mrb[248].mxu1 }
 0x674   : > { %v7864_v34 = vpop.f32.mrb[249].mxu1 }
 0x675   : > { %v7865_v60 = vadd.f32 %v7864_v34, %v7863_v24  ;;  %v7866_v42 = vpop.f32.mrb[250].mxu1 }
 0x676   : > { %v7867_v43 = vpop.f32.mrb[251].mxu1 }
 0x677   : > { %v7868_v36 = vadd.f32 %v7867_v43, %v7866_v42  ;;  %v12382_v47 = vadd.f32 %v7865_v60, %v12338_v20 }
 0x679   : > { %v12385_v37 = vadd.f32 %v7868_v36, %v12341_v61 }
 0x67b   : > { %v7869_v62 = vpop.f32.mrb[252].mxu1 }
 0x67c   : > { %v7870_v49 = vpop.f32.mrb[253].mxu1 }
 0x67d   : > { %v7871_v13 = vadd.f32 %v7870_v49, %v7869_v62  ;;  %v7872_v39 = vpop.f32.mrb[254].mxu1 }
 0x67e   : > { %v7873_v3 = vpop.f32.mrb[255].mxu1 }
 0x67f   : > { %v7874_v44 = vadd.f32 %v7873_v3, %v7872_v39  ;;  %v12388_v12 = vadd.f32 %v7871_v13, %v12344_v54  ;;  %v12402_v54 = vld [vmem:[%s12973_s6] sm:$0xf] }
 0x681   : > { %v12391_v40 = vadd.f32 %v7874_v44, %v12347_v45  ;;  %v12406_v45 = vrot.slane %v12402_v54, %v12125_v14 }
 0x683   : > { %v7875_v21 = vpop.f32.mrb[0].mxu1 }
 0x684   : > { %v7876_v23 = vpop.f32.mrb[1].mxu1 }
 0x685   : > { %v7877_v56 = vadd.f32 %v7876_v23, %v7875_v21  ;;  %v7878_v20 = vpop.f32.mrb[2].mxu1 }
 0x686   : > { %v7879_v31 = vpop.f32.mrb[3].mxu1 }
 0x687   : > { %v7880_v1 = vadd.f32 %v7879_v31, %v7878_v20  ;;  %v12394_v61 = vadd.f32 %v7877_v56, %v12350_v50 }
 0x689   : > { %v12397_v16 = vadd.f32 %v7880_v1, %v12353_v28 }
 0x68b   : > { %v8223_v38 = vpop.f32.mrb[4].mxu1 }
 0x68c   : > { %v5277_v11 = vadd.f32 %v8223_v38, %v5180_v57  ;;  %v5268_v0 = vpop.f32.mrb[5].mxu1  ;;  %v12412_v57 = vld [vmem:[%s12974_s7] sm:$0xf] }
 0x68d   : > { %v5269_v4 = vadd.f32 %v5268_v0, %v12356_v17  ;;  %v8224_v15 = vpop.f32.mrb[6].mxu1  ;;  %v12416_v53 = vrot.slane %v12412_v57, %v12125_v14 }
 0x68e   : > { %vm5333_vm0 = vcmp.gt.f32.partialorder %v5277_v11, 0.0  ;;  %v5349_v50 = vmul.f32 0.2, %v5277_v11  ;;  %v5280_v26 = vadd.f32 %v8224_v15, %v5183_v2  ;;  %v5271_v28 = vpop.f32.mrb[7].mxu1 }
 0x68f   : > { %vm5331_vm1 = vcmp.gt.f32.partialorder %v5269_v4, 0.0  ;;  %v5347_v46 = vmul.f32 0.2, %v5269_v4  ;;  %v5272_v18 = vadd.f32 %v5271_v28, %v12359_v29 }
 0x690   : > { %v5365_v10 = vsel %vm5333_vm0, %v5277_v11, %v5349_v50  ;;  %vm5334_vm2 = vcmp.gt.f32.partialorder %v5280_v26, 0.0  ;;  %v5350_v17 = vmul.f32 0.2, %v5280_v26 }
 0x691   : > { %v5385_v55 = vmul.f32 %v12406_v45, %v5365_v10  ;;  %v5363_v2 = vsel %vm5331_vm1, %v5269_v4, %v5347_v46  ;;  %vm5332_vm3 = vcmp.gt.f32.partialorder %v5272_v18, 0.0  ;;  %v5348_v35 = vmul.f32 0.2, %v5272_v18 }
 0x692   : > { %v5383_v58 = vmul.f32 %v12406_v45, %v5363_v2  ;;  %v5366_v7 = vsel %vm5334_vm2, %v5280_v26, %v5350_v17 }
 0x693   : > { %v12422_v52 = vadd.f32 %v12416_v53, %v5385_v55  ;;  %v5386_v14 = vmul.f32 %v12406_v45, %v5366_v7  ;;  %v5364_v9 = vsel %vm5332_vm3, %v5272_v18, %v5348_v35  ;;  %v8227_v48 = vpop.f32.mrb[8].mxu1 }
 0x694   : > { %v12426_v29 = vadd.f32 %v12416_v53, %v5383_v58  ;;  %v5384_v6 = vmul.f32 %v12406_v45, %v5364_v9  ;;  %v5293_v63 = vadd.f32 %v8227_v48, %v12370_v41  ;;  %v5284_v33 = vpop.f32.mrb[9].mxu1 }
 0x695   : > { %v5285_v25 = vadd.f32 %v5284_v33, %v12364_v27  ;;  %v8228_v32 = vpop.f32.mrb[10].mxu1  ;;  %v12432_v24 = vadd.f32 %v12416_v53, %v5386_v14 }
 0x696   : > { %v5420_v34 = vpack.c.bf16 %v12422_v52, %v12426_v29  ;;  %vm5337_vm4 = vcmp.gt.f32.partialorder %v5293_v63, 0.0  ;;  %v5353_v60 = vmul.f32 0.2, %v5293_v63  ;;  %v5296_v42 = vadd.f32 %v8228_v32, %v12373_v19  ;;  %v5287_v43 = vpop.f32.mrb[11].mxu1  ;;  %v8969_v52 = vld [vmem:[%s12970_s3 + $0x1d8] sm:$0xff]  }
 0x697   : > { %vm5335_vm5 = vcmp.gt.f32.partialorder %v5285_v25, 0.0  ;;  %v5351_v36 = vmul.f32 0.2, %v5285_v25  ;;  %v5288_v62 = vadd.f32 %v5287_v43, %v12367_v8  ;;  %v12439_v41 = vadd.f32 %v12416_v53, %v5384_v6  ;;  %v8970_v29 = vld [vmem:[%s12970_s3 + $0x198] sm:$0xff]  }
 0x698   : > { %v5369_v27 = vsel %vm5337_vm4, %v5293_v63, %v5353_v60  ;;  %vm5338_vm6 = vcmp.gt.f32.partialorder %v5296_v42, 0.0  ;;  %v5354_v49 = vmul.f32 0.2, %v5296_v42  ;;  %vm9108_vm4 = vmmov 0  }
 0x699   : > { %v5389_v13 = vmul.f32 %v12406_v45, %v5369_v27  ;;  %v5367_v39 = vsel %vm5335_vm5, %v5285_v25, %v5351_v36  ;;  %vm5336_vm7 = vcmp.gt.f32.partialorder %v5288_v62, 0.0  ;;  %v5352_v3 = vmul.f32 0.2, %v5288_v62 }
 0x69a   : > { %v5387_v44 = vmul.f32 %v12406_v45, %v5367_v39  ;;  %v5370_v21 = vsel %vm5338_vm6, %v5296_v42, %v5354_v49  ;;  %v5421_v19 = vpack.c.bf16 %v12432_v24, %v12439_v41  ;;  %v5419_v50 = vpack.c.bf16 %v12439_v41, %v13127_v22  ;;  %v8957_v24 = vld [vmem:[%s12970_s3 + $0x168] sm:$0xff]  }
 0x69b   : > { %v5390_v23 = vmul.f32 %v12406_v45, %v5370_v21  ;;  %v5368_v8 = vsel %vm5336_vm7, %v5288_v62, %v5352_v3  ;;  %v8231_v56 = vpop.f32.mrb[12].mxu1  ;;  %v5409_v20 = vadd.f32 %v12416_v53, %v5389_v13  ;;  %v8949_v21 = vld [vmem:[%s12970_s3 + $0x148] sm:$0xff]  }
 0x69c   : > { %v5388_v31 = vmul.f32 %v12406_v45, %v5368_v8  ;;  %v5309_v1 = vadd.f32 %v8231_v56, %v12382_v47  ;;  %v5300_v38 = vpop.f32.mrb[13].mxu1  ;;  %v5407_v11 = vadd.f32 %v12416_v53, %v5387_v44  ;;  %v8958_v41 = vld [vmem:[%s12970_s3 + $0x128] sm:$0xff]  }
 0x69d   : > { %v5410_v0 = vadd.f32 %v12416_v53, %v5390_v23  ;;  %v5301_v4 = vadd.f32 %v5300_v38, %v12376_v59  ;;  %v8232_v15 = vpop.f32.mrb[14].mxu1 }
 0x69e   : > { %v5408_v26 = vadd.f32 %v12416_v53, %v5388_v31  ;;  %vm5341_vm8 = vcmp.gt.f32.partialorder %v5309_v1, 0.0  ;;  %v5357_v28 = vmul.f32 0.2, %v5309_v1  ;;  %v5312_v46 = vadd.f32 %v8232_v15, %v12385_v37  ;;  %v5303_v18 = vpop.f32.mrb[15].mxu1 }
 0x69f   : > { %vm5339_vm9 = vcmp.gt.f32.partialorder %v5301_v4, 0.0  ;;  %v5355_v47 = vmul.f32 0.2, %v5301_v4  ;;  %v5304_v10 = vadd.f32 %v5303_v18, %v12379_v5  ;;  %v12457_v17 = vpack.c.bf16 %v5409_v20, %v5407_v11 }
 0x6a0   : > { %v12460_v55 = vpack.c.bf16 %v5408_v26, %v13127_v22  ;;  %v12462_v59 = vpack.c.bf16 %v5410_v0, %v5408_v26  ;;  %v5373_v2 = vsel %vm5341_vm8, %v5309_v1, %v5357_v28  ;;  %vm5342_vm10 = vcmp.gt.f32.partialorder %v5312_v46, 0.0  ;;  %v8950_v0 = vld [vmem:[%s12970_s3 + $0x108] sm:$0xff]  }
 0x6a1   : > { %v5393_v35 = vmul.f32 %v12406_v45, %v5373_v2  ;;  %v5371_v58 = vsel %vm5339_vm9, %v5301_v4, %v5355_v47  ;;  %v5358_v7 = vmul.f32 0.2, %v5312_v46  ;;  %vm5340_vm11 = vcmp.gt.f32.partialorder %v5304_v10, 0.0  ;;  %6051 = vmatprep.mubr.bf16.mxu1 %v12457_v17  ;;  %v8955_v2 = vld [vmem:[%s12970_s3 + $0x160] sm:$0xff]  }
 0x6a2   : > { %v5391_v37 = vmul.f32 %v12406_v45, %v5371_v58  ;;  %v5356_v14 = vmul.f32 0.2, %v5304_v10  ;;  %6052 = vmatmul.mubr.bf16.gmra.mrb[24].mxu1 %v12460_v55  ;;  %v8960_v58 = vld [vmem:[%s12970_s3 + $0x130] sm:$0xff]  }
 0x6a3   : > { %v12469_v5 = vadd.f32 %v12416_v53, %v5393_v35  ;;  %v5374_v9 = vsel %vm5342_vm10, %v5312_v46, %v5358_v7  ;;  %v8235_v48 = vpop.f32.mrb[16].mxu1  ;;  %6092 = vmatprep.mubr.bf16.mxu1 %v5419_v50  ;;  %v8951_v50 = vld [vmem:[%s12970_s3 + $0x150] sm:$0xff]   ;;  %v8956_v35 = vld [vmem:[%s12970_s3 + $0x120] sm:$0xff]   ;;  %v8961_v7 = vld [vmem:[%s12970_s3 + $0x178] sm:$0xff]  }
 0x6a4   : > { %v12472_v6 = vadd.f32 %v12416_v53, %v5391_v37  ;;  %v5394_v63 = vmul.f32 %v12406_v45, %v5374_v9  ;;  %v5372_v33 = vsel %vm5340_vm11, %v5304_v10, %v5356_v14  ;;  %v5325_v25 = vadd.f32 %v8235_v48, %v12394_v61  ;;  %v5316_v32 = vpop.f32.mrb[17].mxu1  ;;  %v8948_v61 = vld [vmem:[%s12970_s3 + $0x100] sm:$0xff]   ;;  %v8953_v10 = vld [vmem:[%s12970_s3 + $0x158] sm:$0xff]   ;;  %v8965_v48 = vld [vmem:[%s12970_s3 + $0x1c8] sm:$0xff]  }
 0x6a5   : > { %v5392_v60 = vmul.f32 %v12406_v45, %v5372_v33  ;;  %v5317_v42 = vadd.f32 %v5316_v32, %v12388_v12  ;;  %v8236_v43 = vpop.f32.mrb[18].mxu1  ;;  %v8962_v37 = vld [vmem:[%s12970_s3 + $0x138] sm:$0xff]   ;;  %v8963_v14 = vld [vmem:[%s12970_s3 + $0x1c0] sm:$0xff]   ;;  %v8967_v33 = vld [vmem:[%s12970_s3 + $0x1d0] sm:$0xff]  }
 0x6a6   : > { %v5426_v36 = vpack.c.bf16 %v12469_v5, %v12472_v6  ;;  %vm5345_vm12 = vcmp.gt.f32.partialorder %v5325_v25, 0.0  ;;  %v5361_v62 = vmul.f32 0.2, %v5325_v25  ;;  %v5328_v27 = vadd.f32 %v8236_v43, %v12397_v16  ;;  %v5319_v49 = vpop.f32.mrb[19].mxu1  ;;  %v8964_v9 = vld [vmem:[%s12970_s3 + $0x180] sm:$0xff]   ;;  %v8973_v5 = vld [vmem:[%s12970_s3 + $0x1e8] sm:$0xff]  }
 0x6a7   : > { %vm5343_vm13 = vcmp.gt.f32.partialorder %v5317_v42, 0.0  ;;  %v5359_v13 = vmul.f32 0.2, %v5317_v42  ;;  %v5320_v39 = vadd.f32 %v5319_v49, %v12391_v40  ;;  %v5412_v3 = vadd.f32 %v12416_v53, %v5392_v60  ;;  %v8972_v32 = vld [vmem:[%s12970_s3 + $0x1a0] sm:$0xff]   ;;  %v8975_v60 = vld [vmem:[%s12970_s3 + $0x1f0] sm:$0xff]  }
 0x6a8   : > { %v5377_v12 = vsel %vm5345_vm12, %v5325_v25, %v5361_v62  ;;  %vm5346_vm14 = vcmp.gt.f32.partialorder %v5328_v27, 0.0  ;;  %v5362_v44 = vmul.f32 0.2, %v5328_v27  ;;  %v5414_v16 = vadd.f32 %v12416_v53, %v5394_v63  ;;  %v8966_v63 = vld [vmem:[%s12970_s3 + $0x188] sm:$0xff]   ;;  %v8968_v25 = vld [vmem:[%s12970_s3 + $0x190] sm:$0xff]  }
 0x6a9   : > { %v5397_v23 = vmul.f32 %v12406_v45, %v5377_v12  ;;  %v5375_v8 = vsel %vm5343_vm13, %v5317_v42, %v5359_v13  ;;  %vm5344_vm15 = vcmp.gt.f32.partialorder %v5320_v39, 0.0  ;;  %v5360_v40 = vmul.f32 0.2, %v5320_v39  ;;  %v8977_v13 = vld [vmem:[%s12970_s3 + $0x1f8] sm:$0xff]   ;;  %v8981_v12 = vld [vmem:[%s12970_s3 + $0x210] sm:$0xff]  }
 0x6aa   : > { %v5395_v56 = vmul.f32 %v12406_v45, %v5375_v8  ;;  %v5378_v20 = vsel %vm5346_vm14, %v5328_v27, %v5362_v44  ;;  %6093 = vmatmul.mubr.bf16.vlgmr.msra.gmra.mrb[28].mxu1 %v13341_v51  ;;  %v5425_v31 = vpack.c.bf16 %v5412_v3, %v13127_v22  ;;  %v5427_v1 = vpack.c.bf16 %v5414_v16, %v5412_v3  ;;  %v8976_v27 = vld [vmem:[%s12970_s3 + $0x1b0] sm:$0xff]   ;;  %v8980_v3 = vld [vmem:[%s12970_s3 + $0x208] sm:$0xff]   ;;  %v8987_v8 = vld [vmem:[%s12971_s4 + $0x40] sm:$0xff]  }
 0x6ab   : > { %v5398_v38 = vmul.f32 %v12406_v45, %v5378_v20  ;;  %v5376_v11 = vsel %vm5344_vm15, %v5320_v39, %v5360_v40  ;;  %7954 = vmatpush3.bf16.msra.mxu1 %v8948_v61  ;;  %v12499_v4 = vadd.f32 %v12416_v53, %v5397_v23  ;;  %v8978_v39 = vld [vmem:[%s12970_s3 + $0x1b8] sm:$0xff]   ;;  %v8979_v61 = vld [vmem:[%s12970_s3 + $0x200] sm:$0xff]   ;;  %v8984_v16 = vld [vmem:[%s12970_s3 + $0x228] sm:$0xff]  }
 0x6ac   : > { %v5396_v15 = vmul.f32 %v12406_v45, %v5376_v11  ;;  %6100 = vmatprep.mubr.bf16.mxu1 %v5425_v31  ;;  %7955 = vmatprep.subr.bf16.mxu1 %v8949_v21  ;;  %v12506_v26 = vadd.f32 %v12416_v53, %v5395_v56  ;;  %v8952_v45 = vld [vmem:[%s12970_s3 + $0x110] sm:$0xff]   ;;  %v8982_v21 = vld [vmem:[%s12970_s3 + $0x218] sm:$0xff]   ;;  %v8988_v40 = vld [vmem:[%s12971_s4] sm:$0xff]  }
 0x6ad   : > { %v12509_v28 = vadd.f32 %v12416_v53, %v5398_v38  ;;  %v8985_v23 = vld [vmem:[%s12970_s3 + $0x230] sm:$0xff]   ;;  %v8989_v56 = vld [vmem:[%s12971_s4 + $0x48] sm:$0xff]   ;;  %v8993_v38 = vld [vmem:[%s12971_s4 + $0x58] sm:$0xff]  }
 0x6ae   : > { %v12512_v46 = vadd.f32 %v12416_v53, %v5396_v15  ;;  %v5429_v18 = vpack.c.bf16 %v12499_v4, %v12506_v26  ;;  %v8954_v53 = vld [vmem:[%s12970_s3 + $0x118] sm:$0xff]   ;;  %v8990_v20 = vld [vmem:[%s12971_s4 + $0x8] sm:$0xff]   ;;  %v8991_v31 = vld [vmem:[%s12971_s4 + $0x50] sm:$0xff]  }
 0x6af   : > { %7956 = vmatpush3.bf16.msra.mxu1 %v8950_v0  ;;  %v8994_v11 = vld [vmem:[%s12971_s4 + $0x18] sm:$0xff]   ;;  %v8995_v0 = vld [vmem:[%s12971_s4 + $0x60] sm:$0xff]   ;;  %v8997_v15 = vld [vmem:[%s12971_s4 + $0x68] sm:$0xff]  }
 0x6b0   : > { %v5430_v47 = vpack.c.bf16 %v12509_v28, %v12512_v46  ;;  %7957 = vmatprep.subr.bf16.mxu1 %v8951_v50  ;;  %v5428_v44 = vpack.c.bf16 %v12512_v46, %v13127_v22  ;;  %v8996_v4 = vld [vmem:[%s12971_s4 + $0x20] sm:$0xff]   ;;  %v8998_v50 = vld [vmem:[%s12971_s4 + $0x28] sm:$0xff]   ;;  %v8999_v26 = vld [vmem:[%s12971_s4 + $0x70] sm:$0xff]  }
 0x6b1   : > { %v9000_v28 = vld [vmem:[%s12971_s4 + $0x30] sm:$0xff]   ;;  %v9001_v46 = vld [vmem:[%s12971_s4 + $0x78] sm:$0xff]  }
 0x6b2   : > { %6101 = vmatmul.mubr.bf16.gmra.mrb[32].mxu1 %v12462_v59 }
 0x6b3   : > { %7958 = vmatpush3.bf16.msra.mxu1 %v8952_v45  ;;  %6141 = vmatprep.mubr.bf16.mxu1 %v5421_v19  ;;  %v8959_v19 = vld [vmem:[%s12970_s3 + $0x170] sm:$0xff]   ;;  %v9003_v45 = vld [vmem:[%s12971_s4 + $0xc0] sm:$0xff]  }
 0x6b4   : > { %7959 = vmatprep.subr.bf16.mxu1 %v8953_v10  ;;  %v9005_v10 = vld [vmem:[%s12971_s4 + $0xc8] sm:$0xff]  }
 0x6b7   : > { %7960 = vmatpush3.bf16.msra.mxu1 %v8954_v53  ;;  %v9006_v53 = vld [vmem:[%s12971_s4 + $0x88] sm:$0xff]  }
 0x6b8   : > { %7961 = vmatprep.subr.bf16.mxu1 %v8955_v2  ;;  %v9007_v2 = vld [vmem:[%s12971_s4 + $0xd0] sm:$0xff]  }
 0x6bb   : > { %7962 = vmatpush3.bf16.msra.mxu1 %v8956_v35  ;;  %v9008_v35 = vld [vmem:[%s12971_s4 + $0x90] sm:$0xff]  }
 0x6bc   : > { %7963 = vmatprep.subr.bf16.mxu1 %v8957_v24  ;;  %v9009_v24 = vld [vmem:[%s12971_s4 + $0xd8] sm:$0xff]  }
 0x6bf   : > { %7964 = vmatpush3.bf16.msra.mxu1 %v8958_v41  ;;  %v9010_v41 = vld [vmem:[%s12971_s4 + $0x98] sm:$0xff]  }
 0x6c0   : > { %7965 = vmatprep.subr.bf16.mxu1 %v8959_v19  ;;  %v9011_v19 = vld [vmem:[%s12971_s4 + $0xe0] sm:$0xff]  }
 0x6c2   : > { %v7913_v6 = vpop.f32.mrb[20].mxu1 }
 0x6c3   : > { %7966 = vmatpush3.bf16.msra.mxu1 %v8960_v58  ;;  %v7914_v42 = vpop.f32.mrb[21].mxu1  ;;  %v9012_v58 = vld [vmem:[%s12971_s4 + $0xa0] sm:$0xff]  }
 0x6c4   : > { %7967 = vmatprep.subr.bf16.mxu1 %v8961_v7  ;;  %v12601_v43 = vadd.f32 %v7914_v42, %v7913_v6  ;;  %v9013_v7 = vld [vmem:[%s12971_s4 + $0xe8] sm:$0xff]   ;;  %v9027_v6 = vld [vmem:[%s12971_s4 + $0x160] sm:$0xff]  }
 0x6c5   : > { %v9029_v42 = vld [vmem:[%s12971_s4 + $0x168] sm:$0xff]  }
 0x6c7   : > { %7968 = vmatpush3.bf16.msra.mxu1 %v8962_v37  ;;  %v9014_v37 = vld [vmem:[%s12971_s4 + $0xa8] sm:$0xff]  }
 0x6c8   : > { %7981 = vmatprep.subr.bf16.mxu1 %v8963_v14  ;;  %v9015_v14 = vld [vmem:[%s12971_s4 + $0xf0] sm:$0xff]  }
 0x6ca   : > { %6142 = vmatmul.mubr.bf16.vlgmr.msra.gmra.mrb[36].mxu1 %v5420_v34  ;;  %v8971_v34 = vld [vmem:[%s12970_s3 + $0x1e0] sm:$0xff]  }
 0x6cb   : > { %6149 = vmatprep.mubr.bf16.mxu1 %v5427_v1  ;;  %7982 = vmatpush3.bf16.msra.mxu1 %v8964_v9  ;;  %v8992_v1 = vld [vmem:[%s12971_s4 + $0x10] sm:$0xff]  }
 0x6cc   : > { %7983 = vmatprep.subr.bf16.mxu1 %v8965_v48  ;;  %v9016_v9 = vld [vmem:[%s12971_s4 + $0xb0] sm:$0xff]   ;;  %v9017_v48 = vld [vmem:[%s12971_s4 + $0xf8] sm:$0xff]  }
 0x6cf   : > { %7984 = vmatpush3.bf16.msra.mxu1 %v8966_v63  ;;  %v9018_v63 = vld [vmem:[%s12971_s4 + $0xb8] sm:$0xff]  }
 0x6d0   : > { %7985 = vmatprep.subr.bf16.mxu1 %v8967_v33  ;;  %v9019_v33 = vld [vmem:[%s12971_s4 + $0x140] sm:$0xff]  }
 0x6d2   : > { %6150 = vmatmul.mubr.bf16.gmra.mrb[40].mxu1 %v5426_v36  ;;  %v7916_v36 = vpop.f32.mrb[22].mxu1 }
 0x6d3   : > { %7986 = vmatpush3.bf16.msra.mxu1 %v8968_v25  ;;  %6190 = vmatprep.mubr.bf16.mxu1 %v12457_v17  ;;  %v8974_v17 = vld [vmem:[%s12970_s3 + $0x1a8] sm:$0xff]   ;;  %v7917_v62 = vpop.f32.mrb[23].mxu1  ;;  %v9020_v25 = vld [vmem:[%s12971_s4 + $0x100] sm:$0xff]  }
 0x6d4   : > { %7987 = vmatprep.subr.bf16.mxu1 %v8969_v52  ;;  %v12606_v49 = vadd.f32 %v7917_v62, %v7916_v36  ;;  %v9021_v52 = vld [vmem:[%s12971_s4 + $0x148] sm:$0xff]   ;;  %v9031_v62 = vld [vmem:[%s12971_s4 + $0x170] sm:$0xff]  }
 0x6d5   : > { %v9030_v36 = vld [vmem:[%s12971_s4 + $0x128] sm:$0xff]  }
 0x6d7   : > { %7988 = vmatpush3.bf16.msra.mxu1 %v8970_v29  ;;  %v9022_v29 = vld [vmem:[%s12971_s4 + $0x108] sm:$0xff]  }
 0x6d8   : > { %7989 = vmatprep.subr.bf16.mxu1 %v8971_v34  ;;  %v9023_v34 = vld [vmem:[%s12971_s4 + $0x150] sm:$0xff]  }
 0x6db   : > { %7990 = vmatpush3.bf16.msra.mxu1 %v8972_v32  ;;  %v9024_v32 = vld [vmem:[%s12971_s4 + $0x110] sm:$0xff]  }
 0x6dc   : > { %7991 = vmatprep.subr.bf16.mxu1 %v8973_v5  ;;  %v9025_v5 = vld [vmem:[%s12971_s4 + $0x158] sm:$0xff]  }
 0x6df   : > { %7992 = vmatpush3.bf16.msra.mxu1 %v8974_v17  ;;  %v9026_v17 = vld [vmem:[%s12971_s4 + $0x118] sm:$0xff]  }
 0x6e0   : > { %7993 = vmatprep.subr.bf16.mxu1 %v8975_v60  ;;  %v9028_v60 = vld [vmem:[%s12971_s4 + $0x120] sm:$0xff]  }
 0x6e3   : > { %7994 = vmatpush3.bf16.msra.mxu1 %v8976_v27  ;;  %v9032_v27 = vld [vmem:[%s12971_s4 + $0x130] sm:$0xff]  }
 0x6e4   : > { %7995 = vmatprep.subr.bf16.mxu1 %v8977_v13  ;;  %v9033_v13 = vld [vmem:[%s12971_s4 + $0x178] sm:$0xff]  }
 0x6e7   : > { %7996 = vmatpush3.bf16.msra.mxu1 %v8978_v39  ;;  %v9034_v39 = vld [vmem:[%s12971_s4 + $0x138] sm:$0xff]  }
 0x6e8   : > { %8237 = vmatprep.subr.bf16.mxu1 %v8979_v61 }
 0x6ea   : > { %6191 = vmatmul.mubr.bf16.vlgmr.msra.gmra.mrb[44].mxu1 %v12460_v55  ;;  %v8983_v55 = vld [vmem:[%s12970_s3 + $0x220] sm:$0xff]  }
 0x6eb   : > { %6198 = vmatprep.mubr.bf16.mxu1 %v5429_v18  ;;  %8238 = vmatpush3.bf16.msra.mxu1 %v8979_v61  ;;  %v9002_v18 = vld [vmem:[%s12971_s4 + $0x38] sm:$0xff]   ;;  %v9035_v61 = vld [vmem:[%s12971_s4 + $0x1c0] sm:$0xff]  }
 0x6ec   : > { %8239 = vmatprep.subr.bf16.mxu1 %v8980_v3 }
 0x6ef   : > { %8240 = vmatpush3.bf16.msra.mxu1 %v8980_v3 }
 0x6f0   : > { %8241 = vmatprep.subr.bf16.mxu1 %v8981_v12 }
 0x6f2   : > { %6199 = vmatmul.mubr.bf16.gmra.mrb[48].mxu1 %v5428_v44  ;;  %v12800_v44 = vsub.s32 2, %v13393_v30 }
 0x6f3   : > { %8242 = vmatpush3.bf16.msra.mxu1 %v8981_v12  ;;  %8253 = vmatprep.mubr.bf16.mxu1 %v12462_v59  ;;  %v8986_v59 = vld [vmem:[%s12970_s3 + $0x238] sm:$0xff]  }
 0x6f4   : > { %8243 = vmatprep.subr.bf16.mxu1 %v8982_v21 }
 0x6f7   : > { %8244 = vmatpush3.bf16.msra.mxu1 %v8982_v21 }
 0x6f8   : > { %8245 = vmatprep.subr.bf16.mxu1 %v8983_v55 }
 0x6fb   : > { %8246 = vmatpush3.bf16.msra.mxu1 %v8983_v55 }
 0x6fc   : > { %8247 = vmatprep.subr.bf16.mxu1 %v8984_v16 }
 0x6ff   : > { %8248 = vmatpush3.bf16.msra.mxu1 %v8984_v16 }
 0x700   : > { %8249 = vmatprep.subr.bf16.mxu1 %v8985_v23 }
 0x703   : > { %8250 = vmatpush3.bf16.msra.mxu1 %v8985_v23 }
 0x704   : > { %8251 = vmatprep.subr.bf16.mxu1 %v8986_v59 }
 0x707   : > { %8252 = vmatpush3.bf16.msra.mxu1 %v8986_v59  ;;  %v12805_v59 = vld [vmem:[%s12972_s5] sm:$0xf] }
 0x708   : > { %8019 = vmatprep.subr.bf16.mxu1 %v8987_v8  ;;  %v5578_v8 = vrot.slane %v12805_v59, %v12800_v44 }
 0x70a   : > { %8254 = vmatmul.mubr.bf16.vlgmr.msra.gmra.mrb[52].mxu1 %v5430_v47  ;;  %v9004_v47 = vld [vmem:[%s12971_s4 + $0x80] sm:$0xff]  }
 0x70b   : > { %8020 = vmatpush3.bf16.msra.mxu1 %v8988_v40  ;;  %6900 = vmatprep.mubr.bf16.mxu1 %v13341_v51 }
 0x70c   : > { %8021 = vmatprep.subr.bf16.mxu1 %v8989_v56 }
 0x70f   : > { %8022 = vmatpush3.bf16.msra.mxu1 %v8990_v20  ;;  %v6046_v20 = vadd.f32 %v12601_v43, %v5578_v8 }
 0x710   : > { %8023 = vmatprep.subr.bf16.mxu1 %v8991_v31 }
 0x713   : > { %8024 = vmatpush3.bf16.msra.mxu1 %v8992_v1 }
 0x714   : > { %8025 = vmatprep.subr.bf16.mxu1 %v8993_v38 }
 0x717   : > { %8026 = vmatpush3.bf16.msra.mxu1 %v8994_v11  ;;  %v6049_v11 = vadd.f32 %v12606_v49, %v5578_v8 }
 0x718   : > { %8027 = vmatprep.subr.bf16.mxu1 %v8995_v0 }
 0x71b   : > { %8028 = vmatpush3.bf16.msra.mxu1 %v8996_v4 }
 0x71c   : > { %8029 = vmatprep.subr.bf16.mxu1 %v8997_v15 }
 0x71f   : > { %8030 = vmatpush3.bf16.msra.mxu1 %v8998_v50 }
 0x720   : > { %8031 = vmatprep.subr.bf16.mxu1 %v8999_v26 }
 0x723   : > { %8032 = vmatpush3.bf16.msra.mxu1 %v9000_v28 }
 0x724   : > { %8033 = vmatprep.subr.bf16.mxu1 %v9001_v46 }
 0x727   : > { %8034 = vmatpush3.bf16.msra.mxu1 %v9002_v18 }
 0x728   : > { %8041 = vmatprep.subr.bf16.mxu1 %v9003_v45 }
 0x72a   : > { %6901 = vmatmul.mubr.bf16.vlgmr.msra.gmra.mrb[56].mxu1 %v13341_v51 }
 0x72b   : > { %8042 = vmatpush3.bf16.msra.mxu1 %v9004_v47  ;;  %6940 = vmatprep.mubr.bf16.mxu1 %v13341_v51 }
 0x72c   : > { %8043 = vmatprep.subr.bf16.mxu1 %v9005_v10 }
 0x72f   : > { %8044 = vmatpush3.bf16.msra.mxu1 %v9006_v53 }
 0x730   : > { %8045 = vmatprep.subr.bf16.mxu1 %v9007_v2 }
 0x733   : > { %8046 = vmatpush3.bf16.msra.mxu1 %v9008_v35 }
 0x734   : > { %8047 = vmatprep.subr.bf16.mxu1 %v9009_v24 }
 0x737   : > { %8048 = vmatpush3.bf16.msra.mxu1 %v9010_v41 }
 0x738   : > { %8049 = vmatprep.subr.bf16.mxu1 %v9011_v19 }
 0x73b   : > { %8050 = vmatpush3.bf16.msra.mxu1 %v9012_v58 }
 0x73c   : > { %8051 = vmatprep.subr.bf16.mxu1 %v9013_v7 }
 0x73f   : > { %8052 = vmatpush3.bf16.msra.mxu1 %v9014_v37 }
 0x740   : > { %8053 = vmatprep.subr.bf16.mxu1 %v9015_v14 }
 0x743   : > { %8054 = vmatpush3.bf16.msra.mxu1 %v9016_v9 }
 0x744   : > { %8055 = vmatprep.subr.bf16.mxu1 %v9017_v48 }
 0x747   : > { %8056 = vmatpush3.bf16.msra.mxu1 %v9018_v63 }
 0x748   : > { %8063 = vmatprep.subr.bf16.mxu1 %v9019_v33 }
 0x74a   : > { %6941 = vmatmul.mubr.bf16.vlgmr.msra.gmra.mrb[60].mxu1 %v13341_v51 }
 0x74b   : > { %8064 = vmatpush3.bf16.msra.mxu1 %v9020_v25 }
 0x74c   : > { %8065 = vmatprep.subr.bf16.mxu1 %v9021_v52 }
 0x74f   : > { %8066 = vmatpush3.bf16.msra.mxu1 %v9022_v29 }
 0x750   : > { %8067 = vmatprep.subr.bf16.mxu1 %v9023_v34 }
 0x753   : > { %8068 = vmatpush3.bf16.msra.mxu1 %v9024_v32 }
 0x754   : > { %8069 = vmatprep.subr.bf16.mxu1 %v9025_v5 }
 0x757   : > { %8070 = vmatpush3.bf16.msra.mxu1 %v9026_v17 }
 0x758   : > { %8071 = vmatprep.subr.bf16.mxu1 %v9027_v6 }
 0x75b   : > { %8072 = vmatpush3.bf16.msra.mxu1 %v9028_v60 }
 0x75c   : > { %8073 = vmatprep.subr.bf16.mxu1 %v9029_v42 }
 0x75f   : > { %8074 = vmatpush3.bf16.msra.mxu1 %v9030_v36 }
 0x760   : > { %8075 = vmatprep.subr.bf16.mxu1 %v9031_v62 }
 0x763   : > { %8076 = vmatpush3.bf16.msra.mxu1 %v9032_v27 }
 0x764   : > { %8077 = vmatprep.subr.bf16.mxu1 %v9033_v13 }
 0x767   : > { %8078 = vmatpush3.bf16.msra.mxu1 %v9034_v39 }
 0x768   : > { %8085 = vmatprep.subr.bf16.mxu1 %v9035_v61 }
 0x775   : > { %v7919_v3 = vpop.f32.mrb[24].mxu1 }
 0x776   : > { %v7920_v12 = vpop.f32.mrb[25].mxu1 }
 0x777   : > { %v7921_v21 = vadd.f32 %v7920_v12, %v7919_v3  ;;  %v7922_v55 = vpop.f32.mrb[26].mxu1 }
 0x778   : > { %v7923_v16 = vpop.f32.mrb[27].mxu1 }
 0x779   : > { %v7924_v23 = vadd.f32 %v7923_v16, %v7922_v55  ;;  %v6054_v28 = vadd.f32 %v7921_v21, %v5578_v8 }
 0x77b   : > { %v6057_v47 = vadd.f32 %v7924_v23, %v5578_v8 }
 0x77d   : > { %v7941_v40 = vpop.f32.mrb[28].mxu1 }
 0x77e   : > { %v7942_v56 = vpop.f32.mrb[29].mxu1 }
 0x77f   : > { %v7943_v31 = vadd.f32 %v7942_v56, %v7941_v40  ;;  %v7944_v1 = vpop.f32.mrb[30].mxu1  ;;  %v6271_v56 = vrot.slane %v12402_v54, %v12800_v44 }
 0x780   : > { %v7945_v38 = vpop.f32.mrb[31].mxu1 }
 0x781   : > { %v6095_v0 = vadd.f32 %v7943_v31, %v6046_v20  ;;  %v7946_v4 = vadd.f32 %v7945_v38, %v7944_v1 }
 0x783   : > { %v6098_v15 = vadd.f32 %v7946_v4, %v6049_v11 }
 0x785   : > { %v7947_v50 = vpop.f32.mrb[32].mxu1 }
 0x786   : > { %v7948_v26 = vpop.f32.mrb[33].mxu1 }
 0x787   : > { %v7949_v46 = vadd.f32 %v7948_v26, %v7947_v50  ;;  %v7950_v18 = vpop.f32.mrb[34].mxu1 }
 0x788   : > { %v7951_v45 = vpop.f32.mrb[35].mxu1 }
 0x789   : > { %v6103_v10 = vadd.f32 %v7949_v46, %v6054_v28  ;;  %v7952_v53 = vadd.f32 %v7951_v45, %v7950_v18 }
 0x78b   : > { %v6106_v2 = vadd.f32 %v7952_v53, %v6057_v47 }
 0x79d   : > { %v7969_v35 = vpop.f32.mrb[36].mxu1 }
 0x79e   : > { %v7970_v43 = vpop.f32.mrb[37].mxu1 }
 0x79f   : > { %v7971_v24 = vadd.f32 %v7970_v43, %v7969_v35  ;;  %v7972_v41 = vpop.f32.mrb[38].mxu1  ;;  %v9036_v43 = vld [vmem:[%s12971_s4 + $0x180] sm:$0xff]  }
 0x7a0   : > { %v7973_v19 = vpop.f32.mrb[39].mxu1 }
 0x7a1   : > { %v6144_v58 = vadd.f32 %v7971_v24, %v6095_v0  ;;  %v7974_v49 = vadd.f32 %v7973_v19, %v7972_v41  ;;  %v9038_v41 = vld [vmem:[%s12971_s4 + $0x188] sm:$0xff]   ;;  %v9039_v19 = vld [vmem:[%s12971_s4 + $0x1d0] sm:$0xff]  }
 0x7a3   : > { %v6147_v7 = vadd.f32 %v7974_v49, %v6098_v15  ;;  %v6279_v15 = vrot.slane %v12412_v57, %v12800_v44  ;;  %v9037_v57 = vld [vmem:[%s12971_s4 + $0x1c8] sm:$0xff]   ;;  %v9041_v49 = vld [vmem:[%s12971_s4 + $0x1d8] sm:$0xff]  }
 0x7a5   : > { %v7975_v37 = vpop.f32.mrb[40].mxu1 }
 0x7a6   : > { %v7976_v14 = vpop.f32.mrb[41].mxu1 }
 0x7a7   : > { %v7977_v9 = vadd.f32 %v7976_v14, %v7975_v37  ;;  %v7978_v48 = vpop.f32.mrb[42].mxu1  ;;  %v9043_v37 = vld [vmem:[%s12971_s4 + $0x1e0] sm:$0xff]  }
 0x7a8   : > { %v7979_v63 = vpop.f32.mrb[43].mxu1  ;;  %v9044_v14 = vld [vmem:[%s12971_s4 + $0x1a0] sm:$0xff]  }
 0x7a9   : > { %v6152_v33 = vadd.f32 %v7977_v9, %v6103_v10  ;;  %v7980_v25 = vadd.f32 %v7979_v63, %v7978_v48  ;;  %v9045_v9 = vld [vmem:[%s12971_s4 + $0x1e8] sm:$0xff]  }
 0x7aa   : > { %v9046_v63 = vld [vmem:[%s12971_s4 + $0x1a8] sm:$0xff]  }
 0x7ab   : > { %v6155_v52 = vadd.f32 %v7980_v25, %v6106_v2  ;;  %v9047_v25 = vld [vmem:[%s12971_s4 + $0x1f0] sm:$0xff]  }
 0x7bd   : > { %v7997_v29 = vpop.f32.mrb[44].mxu1 }
 0x7be   : > { %v7998_v34 = vpop.f32.mrb[45].mxu1 }
 0x7bf   : > { %v7999_v32 = vadd.f32 %v7998_v34, %v7997_v29  ;;  %v8000_v5 = vpop.f32.mrb[46].mxu1 }
 0x7c0   : > { %v8001_v17 = vpop.f32.mrb[47].mxu1 }
 0x7c1   : > { %v8002_v6 = vadd.f32 %v8001_v17, %v8000_v5  ;;  %v6193_v60 = vadd.f32 %v7999_v32, %v6144_v58  ;;  %v9040_v58 = vld [vmem:[%s12971_s4 + $0x190] sm:$0xff]   ;;  %v9049_v5 = vld [vmem:[%s12971_s4 + $0x1f8] sm:$0xff]  }
 0x7c2   : > { %v9048_v32 = vld [vmem:[%s12971_s4 + $0x1b0] sm:$0xff]   ;;  %v9050_v17 = vld [vmem:[%s12971_s4 + $0x1b8] sm:$0xff]  }
 0x7c3   : > { %v6196_v42 = vadd.f32 %v8002_v6, %v6147_v7  ;;  %v9042_v7 = vld [vmem:[%s12971_s4 + $0x198] sm:$0xff]   ;;  %v9051_v6 = vld [vmem:[%s12971_s4 + $0x200] sm:$0xff]  }
 0x7c5   : > { %v8003_v36 = vpop.f32.mrb[48].mxu1 }
 0x7c6   : > { %v8004_v62 = vpop.f32.mrb[49].mxu1 }
 0x7c7   : > { %v8005_v27 = vadd.f32 %v8004_v62, %v8003_v36  ;;  %v8006_v13 = vpop.f32.mrb[50].mxu1  ;;  %v9054_v36 = vld [vmem:[%s12971_s4 + $0x218] sm:$0xff]  }
 0x7c8   : > { %v8007_v39 = vpop.f32.mrb[51].mxu1 }
 0x7c9   : > { %v8008_v61 = vadd.f32 %v8007_v39, %v8006_v13  ;;  %v6201_v3 = vadd.f32 %v8005_v27, %v6152_v33  ;;  %v9055_v27 = vld [vmem:[%s12971_s4 + $0x220] sm:$0xff]   ;;  %v9056_v39 = vld [vmem:[%s12971_s4 + $0x228] sm:$0xff]  }
 0x7cb   : > { %v6204_v12 = vadd.f32 %v8008_v61, %v6155_v52 }
 0x7dd   : > { %v8255_v21 = vpop.f32.mrb[52].mxu1 }
 0x7de   : > { %v6250_v55 = vadd.f32 %v8255_v21, %v6201_v3  ;;  %v6241_v16 = vpop.f32.mrb[53].mxu1 }
 0x7df   : > { %v6242_v23 = vadd.f32 %v6241_v16, %v6193_v60  ;;  %v8256_v8 = vpop.f32.mrb[54].mxu1  ;;  %v9052_v60 = vld [vmem:[%s12971_s4 + $0x208] sm:$0xff]   ;;  %v9058_v16 = vld [vmem:[%s12971_s4 + $0x238] sm:$0xff]  }
 0x7e0   : > { %vm6258_vm0 = vcmp.gt.f32.partialorder %v6250_v55, 0.0  ;;  %v6262_v40 = vmul.f32 0.2, %v6250_v55  ;;  %v6253_v20 = vadd.f32 %v8256_v8, %v6204_v12  ;;  %v6244_v31 = vpop.f32.mrb[55].mxu1  ;;  %v9059_v8 = vld [vmem:[%s12975_s8] sm:$0xff]  }
 0x7e1   : > { %vm6256_vm1 = vcmp.gt.f32.partialorder %v6242_v23, 0.0  ;;  %v6260_v1 = vmul.f32 0.2, %v6242_v23  ;;  %v6245_v38 = vadd.f32 %v6244_v31, %v6196_v42  ;;  %v9053_v42 = vld [vmem:[%s12971_s4 + $0x210] sm:$0xff]   ;;  %v9063_v31 = vld [vmem:[%s12975_s8 + $0x20] sm:$0xff]  }
 0x7e2   : > { %v6266_v11 = vsel %vm6258_vm0, %v6250_v55, %v6262_v40  ;;  %vm6259_vm2 = vcmp.gt.f32.partialorder %v6253_v20, 0.0  ;;  %v6263_v0 = vmul.f32 0.2, %v6253_v20  ;;  %v9057_v55 = vld [vmem:[%s12971_s4 + $0x230] sm:$0xff]   ;;  %v9060_v40 = vld [vmem:[%s12975_s8 + $0x8] sm:$0xff]  }
 0x7e3   : > { %v6264_v4 = vsel %vm6256_vm1, %v6242_v23, %v6260_v1  ;;  %vm6257_vm3 = vcmp.gt.f32.partialorder %v6245_v38, 0.0  ;;  %v6261_v50 = vmul.f32 0.2, %v6245_v38  ;;  %v6274_v26 = vmul.f32 %v6271_v56, %v6266_v11  ;;  %v9064_v1 = vld [vmem:[%s12975_s8 + $0x28] sm:$0xff]   ;;  %v9066_v11 = vld [vmem:[%s12975_s8 + $0x38] sm:$0xff]  }
 0x7e4   : > { %v6272_v28 = vmul.f32 %v6271_v56, %v6264_v4  ;;  %v6267_v46 = vsel %vm6259_vm2, %v6253_v20, %v6263_v0  ;;  %v9062_v20 = vld [vmem:[%s12975_s8 + $0x18] sm:$0xff]  }
 0x7e5   : > { %v6275_v18 = vmul.f32 %v6271_v56, %v6267_v46  ;;  %v6265_v45 = vsel %vm6257_vm3, %v6245_v38, %v6261_v50  ;;  %v6282_v2 = vadd.f32 %v6279_v15, %v6274_v26  ;;  %v9065_v38 = vld [vmem:[%s12975_s8 + $0x30] sm:$0xff]  }
 0x7e6   : > { %v6273_v54 = vmul.f32 %v6271_v56, %v6265_v45  ;;  %v6280_v47 = vadd.f32 %v6279_v15, %v6272_v28  ;;  %v9061_v56 = vld [vmem:[%s12975_s8 + $0x10] sm:$0xff]  }
 0x7e7   : > { %v12815_v10 = vadd.f32 %v6279_v15, %v6275_v18  ;;  %v6286_v44 = vpack.c.bf16 %v6282_v2, %v6282_v2 }
 0x7e8   : > { %v6281_v53 = vadd.f32 %v6279_v15, %v6273_v54  ;;  %v6284_v24 = vpack.c.bf16 %v6280_v47, %v6280_v47 }
 0x7e9   : > { %v6287_v23 = vpack.c.bf16 %v12815_v10, %v12815_v10 }
 0x7ea   : > { %v6285_v35 = vpack.c.bf16 %v6281_v53, %v6281_v53 }
 0x7ec   : > { %6980 = vmatprep.mubr.bf16.mxu1 %v6285_v35  ;;  %v9079_v35 = vld [vmem:[%s12973_s6] sm:$0xf] }
 0x7ed   : > { %6981 = vmatmul.mubr.bf16.vlgmr.msra.gmra.mrb[64].mxu1 %v6284_v24 }
 0x7ee   : > { %8086 = vmatpush3.bf16.msra.mxu1 %v9036_v43  ;;  %7020 = vmatprep.mubr.bf16.mxu1 %v6286_v44 }
 0x7ef   : > { %8087 = vmatprep.subr.bf16.mxu1 %v9037_v57 }
 0x7f2   : > { %8088 = vmatpush3.bf16.msra.mxu1 %v9038_v41  ;;  %v9080_v41 = vld [vmem:[%s12974_s7] sm:$0xf] }
 0x7f3   : > { %8089 = vmatprep.subr.bf16.mxu1 %v9039_v19 }
 0x7f6   : > { %8090 = vmatpush3.bf16.msra.mxu1 %v9040_v58 }
 0x7f7   : > { %8091 = vmatprep.subr.bf16.mxu1 %v9041_v49 }
 0x7fa   : > { %8092 = vmatpush3.bf16.msra.mxu1 %v9042_v7 }
 0x7fb   : > { %8093 = vmatprep.subr.bf16.mxu1 %v9043_v37 }
 0x7fd   : > { %v8035_v48 = vpop.f32.mrb[56].mxu1 }
 0x7fe   : > { %8094 = vmatpush3.bf16.msra.mxu1 %v9044_v14  ;;  %v8036_v33 = vpop.f32.mrb[57].mxu1  ;;  %v13398_v14 = vlaneseq }
 0x7ff   : > { %8095 = vmatprep.subr.bf16.mxu1 %v9045_v9  ;;  %v8037_v52 = vadd.f32 %v8036_v33, %v8035_v48  ;;  %v8038_v29 = vpop.f32.mrb[58].mxu1  ;;  %v7574_v48 = vld [vmem:[%s12976_s9] ss:$0 sm:$0xff] }
 0x800   : > { %v8039_v34 = vpop.f32.mrb[59].mxu1  ;;  %v7194_v9 = vand.u32 127, %v13398_v14 }
 0x802   : > { %8096 = vmatpush3.bf16.msra.mxu1 %v9046_v63  ;;  %vm7201_vm6 = vcmp.ge.s32.totalorder %v7194_v9, 1  ;;  %vm7202_vm7 = vcmp.lt.s32.totalorder %v7194_v9, 6  ;;  %vm7215_vm9 = vcmp.eq.s32.totalorder %v7194_v9, 0 }
 0x803   : > { %8097 = vmatprep.subr.bf16.mxu1 %v9047_v25  ;;  %vm7203_vm8 = vmand %vm7201_vm6, %vm7202_vm7 }
 0x806   : > { %8098 = vmatpush3.bf16.msra.mxu1 %v9048_v32 }
 0x807   : > { %8099 = vmatprep.subr.bf16.mxu1 %v9049_v5 }
 0x80a   : > { %8100 = vmatpush3.bf16.msra.mxu1 %v9050_v17 }
 0x80b   : > { %8257 = vmatprep.subr.bf16.mxu1 %v13127_v22 }
 0x80d   : > { %7021 = vmatmul.mubr.bf16.vlgmr.msra.gmra.mrb[68].mxu1 %v13341_v51  ;;  %v12878_v51 = vsub.s32 3, %v13393_v30 }
 0x80e   : > { %8258 = vmatpush3.bf16.msra.mxu1 %v9051_v6  ;;  %8273 = vmatprep.mubr.msk.bf16.mxu1 %vm9108_vm4, %v13127_v22 }
 0x80f   : > { %8259 = vmatprep.subr.bf16.mxu1 %v13127_v22  ;;  %v6435_v62 = vrot.slane %v12805_v59, %v12878_v51  ;;  %v7074_v43 = vrot.slane %v9079_v35, %v12878_v51  ;;  %v7079_v19 = vrot.slane %v9080_v41, %v12878_v51 }
 0x811   : > { %v6903_v13 = vadd.f32 %v8037_v52, %v6435_v62 }
 0x812   : > { %8260 = vmatpush3.bf16.msra.mxu1 %v9052_v60 }
 0x813   : > { %8261 = vmatprep.subr.bf16.mxu1 %v13127_v22 }
 0x816   : > { %8262 = vmatpush3.bf16.msra.mxu1 %v9053_v42 }
 0x817   : > { %8263 = vmatprep.subr.bf16.mxu1 %v13127_v22 }
 0x81a   : > { %8264 = vmatpush3.bf16.msra.mxu1 %v9054_v36 }
 0x81b   : > { %8265 = vmatprep.subr.bf16.mxu1 %v13127_v22 }
 0x81d   : > { %v8057_v30 = vpop.f32.mrb[60].mxu1 }
 0x81e   : > { %8266 = vmatpush3.bf16.msra.mxu1 %v9055_v27  ;;  %v8058_v61 = vpop.f32.mrb[61].mxu1 }
 0x81f   : > { %8267 = vmatprep.subr.bf16.mxu1 %v13127_v22  ;;  %v8059_v3 = vadd.f32 %v8058_v61, %v8057_v30  ;;  %v8060_v12 = vpop.f32.mrb[62].mxu1 }
 0x820   : > { %v8061_v59 = vpop.f32.mrb[63].mxu1 }
 0x821   : > { %v6943_v21 = vadd.f32 %v8059_v3, %v6903_v13 }
 0x822   : > { %8268 = vmatpush3.bf16.msra.mxu1 %v9056_v39 }
 0x823   : > { %8269 = vmatprep.subr.bf16.mxu1 %v13127_v22 }
 0x826   : > { %8270 = vmatpush3.bf16.msra.mxu1 %v9057_v55 }
 0x827   : > { %8271 = vmatprep.subr.bf16.mxu1 %v13127_v22 }
 0x82a   : > { %8272 = vmatpush3.bf16.msra.mxu1 %v9058_v16 }
 0x82b   : > { %8277 = vmatprep.subr.bf16.mxu1 %v13127_v22 }
 0x82d   : > { %8274 = vmatmul.mubr.bf16.vlgmr.msra.gmra.mrb[72].mxu1 %v6287_v23 }
 0x82e   : > { %8293 = vmatprep.mubr.msk.bf16.mxu1 %vm9108_vm4, %v13127_v22  ;;  %8278 = vmatpush3.bf16.msra.mxu1 %v9059_v8 }
 0x82f   : > { %8279 = vmatprep.subr.bf16.mxu1 %v13127_v22 }
 0x832   : > { %8280 = vmatpush3.bf16.msra.mxu1 %v9060_v40 }
 0x833   : > { %8281 = vmatprep.subr.bf16.mxu1 %v13127_v22 }
 0x836   : > { %8282 = vmatpush3.bf16.msra.mxu1 %v9061_v56 }
 0x837   : > { %8283 = vmatprep.subr.bf16.mxu1 %v13127_v22 }
 0x83a   : > { %8284 = vmatpush3.bf16.msra.mxu1 %v9062_v20 }
 0x83b   : > { %8285 = vmatprep.subr.bf16.mxu1 %v13127_v22 }
 0x83e   : > { %8286 = vmatpush3.bf16.msra.mxu1 %v9063_v31 }
 0x83f   : > { %8287 = vmatprep.subr.bf16.mxu1 %v13127_v22 }
 0x842   : > { %8288 = vmatpush3.bf16.msra.mxu1 %v9064_v1 }
 0x843   : > { %8289 = vmatprep.subr.bf16.mxu1 %v13127_v22 }
 0x846   : > { %8290 = vmatpush3.bf16.msra.mxu1 %v9065_v38 }
 0x847   : > { %8291 = vmatprep.subr.bf16.mxu1 %v13127_v22 }
 0x84a   : > { %8292 = vmatpush3.bf16.msra.mxu1 %v9066_v11 }
 0x8c0   : > { %v8079_v0 = vpop.f32.mrb[64].mxu1 }
 0x8c1   : > { %v8080_v4 = vpop.f32.mrb[65].mxu1 }
 0x8c2   : > { %v8081_v15 = vadd.f32 %v8080_v4, %v8079_v0  ;;  %v8082_v50 = vpop.f32.mrb[66].mxu1 }
 0x8c3   : > { %v8083_v26 = vpop.f32.mrb[67].mxu1 }
 0x8c4   : > { %v6983_v28 = vadd.f32 %v8081_v15, %v6943_v21 }
 0x8e0   : > { %v8101_v46 = vpop.f32.mrb[68].mxu1 }
 0x8e1   : > { %v8102_v18 = vpop.f32.mrb[69].mxu1 }
 0x8e2   : > { %v8103_v45 = vadd.f32 %v8102_v18, %v8101_v46  ;;  %v8104_v54 = vpop.f32.mrb[70].mxu1 }
 0x8e3   : > { %v8105_v47 = vpop.f32.mrb[71].mxu1 }
 0x8e4   : > { %v7023_v10 = vadd.f32 %v8103_v45, %v6983_v28 }
 0x900   : > { %v7062_v53 = vpop.f32.mrb[72].mxu1 }
 0x901   : > { %v7063_v2 = vadd.f32 %v7062_v53, %v7023_v10  ;;  %v8275_v22 = vpop.f32.mrb[73].mxu1 }
 0x902   : > { %v7065_v24 = vpop.f32.mrb[74].mxu1 }
 0x903   : > { %vm7068_vm5 = vcmp.gt.f32.partialorder %v7063_v2, 0.0  ;;  %v7069_v57 = vmul.f32 0.2, %v7063_v2  ;;  %v8276_v44 = vpop.f32.mrb[75].mxu1 }
 0x905   : > { %v7070_v58 = vsel %vm7068_vm5, %v7063_v2, %v7069_v57 }
 0x906   : > { %v7075_v49 = vmul.f32 %v7074_v43, %v7070_v58 }
 0x908   : > { %v7080_v7 = vadd.f32 %v7079_v19, %v7075_v49 }
 0x90a   : > { %v7081_v37 = vpack.c.bf16 %v7080_v7, %v7080_v7 }
 0x90c   : > { %8294 = vmatmul.mubr.bf16.vlgmr.msra.gmra.mrb[76].mxu1 %v7081_v37 }
 0x9df   : > { %v7187_v63 = vpop.f32.mrb[76].mxu1 }
 0x9e0   : > { %v7188_v33 = vadd.f32 %v7574_v48, %v7187_v63  ;;  %v8295_v25 = vpop.f32.mrb[77].mxu1 }
 0x9e1   : > { %v7190_v52 = vpop.f32.mrb[78].mxu1 }
 0x9e2   : > { %v8296_v29 = vpop.f32.mrb[79].mxu1  ;;  %v7204_v34 = vsel %vm7203_vm8, %v7188_v33, -1e+30  ;;  %v7195_v42 = vsub.f32 0.0, %v7188_v33 }
 0x9e3   : > { %7205 = vmax.xlane.f32.xlu0 %v7204_v34 }
 0x9e4   : > { %v7196_v51 = vmul.f32 1.442695, %v7195_v42 }
 0xa70   : > { %v7206_v32 = vpop.xlane.xlu0 %7205 }
 0xa71   : > { %v7207_v5 = vsub.f32 %v7204_v34, %v7206_v32 }
 0xa73   : > { %v7208_v17 = vmul.f32 1.442695, %v7207_v5 }
 0xa75   : > { %9067 = vpow2.f32 %v7208_v17 }
 0xa76   : > { %9069 = vpow2.f32 %v7196_v51 }
 0xa7f   : > { %v9068_v6 = vpop.eup %9067 }
 0xa80   : > { %v7210_v60 = vsel %vm7203_vm8, %v9068_v6, 0.0  ;;  %v9070_v36 = vpop.eup %9069 }
 0xa81   : > { %7211 = vadd.xlane.f32.xlu0 %v7210_v60  ;;  %v7198_v62 = vadd.f32 1.0, %v9070_v36 }
 0xb0e   : > { %v7212_v27 = vpop.xlane.xlu0 %7211 }
 0xb0f   : > { %9071 = vrcp.f32 %v7212_v27 }
 0xb10   : > { %9073 = vrcp.f32 %v7198_v62 }
 0xb19   : > { %v9072_v13 = vpop.eup %9071 }
 0xb1a   : > { %v7214_v30 = vmul.f32 %v9072_v13, %v7210_v60  ;;  %v9074_v39 = vpop.eup %9073 }
 0xb1c   : > { %v7216_v61 = vsel %vm7215_vm9, %v9074_v39, %v7214_v30 }
 0xb1d   : > { %7217 = vst [vmem:[%s1411_s27] sm:$0xff] %v7216_v61 }
 0xb1e PF: > { %p17_p9 = scmp.ge.s32.totalorder %s9181_s17, 4   ;;  %s13399_s13 = smov %s9099_s14 }
 0xb1f   : > { %s13400_s14 = smov %s9190_s20  ;;  %s13401_s15 = smov %s9181_s17 }
 0xb20   :  { %19 = sbr.rel (!%p17_p9) target bundleno = 2 (0x2), region = 133 }

</bundles_post_ra>
